<compile_context>
chip_gen: v6e
topology: v6e:2x2x1
jax: 0.10.0
libtpu: 0.0.40
codegen_flags: <defaults>
</compile_context>

<pallas_src>
import functools

import jax
import jax.numpy as jnp
from jax import lax
from jax.experimental import pallas as pl
from jax.experimental.pallas import tpu as pltpu

_VMEM_LIMIT = 32 * 1024 * 1024


def _round_up(x, m):
    return ((x + m - 1) // m) * m


def _apply_act(y, act):
    if act == "relu":
        return jnp.maximum(y, 0.0)
    if act == "sigmoid":
        return jax.nn.sigmoid(y)
    if act == "lrelu":                      # nn.LeakyReLU() default slope 0.01
        return jnp.where(y >= 0.0, y, 0.01 * y)
    return y


# ----------------------------------------------------------------------------
# Pallas kernel 1: matmul + bias + activation (bf16 operands, f32 accumulation)
# ----------------------------------------------------------------------------
def _mm_bias_act_kernel(a_ref, b_ref, bias_ref, o_ref, *, act):
    y = jnp.dot(a_ref[...], b_ref[...], preferred_element_type=jnp.float32)
    y = y + bias_ref[...]
    y = _apply_act(y, act)
    o_ref[...] = y.astype(o_ref.dtype)


def matmul_bias_act(a, b, bias, act="none", out_dtype=jnp.bfloat16, tm=512, tn_max=512):
    """(M,K) @ (K,N) + bias[N] -> act.  Full-K blocks (no K padding), large M tiles."""
    M, K = a.shape
    K2, N = b.shape
    assert K == K2
    a = a.astype(jnp.bfloat16)
    b = b.astype(jnp.bfloat16)
    bias = bias.astype(jnp.float32).reshape(1, N)

    tm_eff = min(tm, _round_up(M, 128))
    Mp = _round_up(M, tm_eff)
    if Mp != M:
        a = jnp.pad(a, ((0, Mp - M), (0, 0)))

    if N <= tn_max:
        tn, Np = N, N
    else:
        tn = tn_max if N % tn_max == 0 else (256 if N % 256 == 0 else 128)
        Np = _round_up(N, tn)
        if Np != N:
            b = jnp.pad(b, ((0, 0), (0, Np - N)))
            bias = jnp.pad(bias, ((0, 0), (0, Np - N)))

    out = pl.pallas_call(
        functools.partial(_mm_bias_act_kernel, act=act),
        out_shape=jax.ShapeDtypeStruct((Mp, Np), out_dtype),
        grid_spec=pltpu.PrefetchScalarGridSpec(
            num_scalar_prefetch=0,
            grid=(Mp // tm_eff, Np // tn),
            in_specs=[
                pl.BlockSpec((tm_eff, K), lambda i, j: (i, 0)),
                pl.BlockSpec((K, tn), lambda i, j: (0, j)),
                pl.BlockSpec((1, tn), lambda i, j: (0, j)),
            ],
            out_specs=pl.BlockSpec((tm_eff, tn), lambda i, j: (i, j)),
        ),
        compiler_params=pltpu.CompilerParams(
            dimension_semantics=("parallel", "parallel"),
            vmem_limit_bytes=_VMEM_LIMIT,
        ),
    )(a, b, bias)
    if Mp != M or Np != N:
        out = out[:M, :N]
    return out


# ----------------------------------------------------------------------------
# Pallas kernel 2: fused stride-1 3x3 conv (row taps accumulated in-kernel)
# ----------------------------------------------------------------------------
def _conv3x3_kernel(x_ref, w_ref, b_ref, o_ref, *, W, tr, act):
    L = tr * W
    cout = o_ref.shape[-1]
    acc = jnp.zeros((L, cout), jnp.float32)
    for di in range(3):                                   # 3 row taps, static slices
        a = x_ref[0, 0, di * W: di * W + L, :]            # (tr*W, 3*Cin) bf16
        acc = acc + jnp.dot(a, w_ref[di], preferred_element_type=jnp.float32)
    y = _apply_act(acc + b_ref[...], act)
    o_ref[0] = y.astype(o_ref.dtype)


def conv3x3_same_nhwc(x, w, b, act="none", out_dtype=jnp.bfloat16):
    """nn.Conv2d(k=3, s=1, p=1) on NHWC.  Column taps materialized (3x), row taps fused."""
    N, H, W, Cin = x.shape
    Cout = w.shape[0]
    xb = x.astype(jnp.bfloat16)
    xp = jnp.pad(xb, ((0, 0), (0, 0), (1, 1), (0, 0)))                       # pad W
    x3 = jnp.concatenate([xp[:, :, 0:W, :], xp[:, :, 1:W + 1, :], xp[:, :, 2:W + 2, :]],
                         axis=-1)                                            # (N, H, W, 3*Cin)
    x3 = jnp.pad(x3, ((0, 0), (1, 1), (0, 0), (0, 0)))                       # pad H

    if H * W <= 4096:
        tr = H
    else:
        tr = max(1, 4096 // W)
        while H % tr:
            tr -= 1
    R = H // tr
    # row-groups with their 2 halo rows baked in -> non-overlapping BlockSpec tiles
    groups = [x3[:, r * tr: r * tr + tr + 2] for r in range(R)]
    xg = jnp.stack(groups, axis=1).reshape(N, R, (tr + 2) * W, 3 * Cin)

    wmat = jnp.transpose(w, (2, 3, 1, 0)).reshape(3, 3 * Cin, Cout).astype(jnp.bfloat16)
    bias = b.astype(jnp.float32).reshape(1, Cout)

    out = pl.pallas_call(
        functools.partial(_conv3x3_kernel, W=W, tr=tr, act=act),
        out_shape=jax.ShapeDtypeStruct((N, R * tr * W, Cout), out_dtype),
        grid_spec=pltpu.PrefetchScalarGridSpec(
            num_scalar_prefetch=0,
            grid=(N, R),
            in_specs=[
                pl.BlockSpec((1, 1, (tr + 2) * W, 3 * Cin), lambda n, r: (n, r, 0, 0)),
                pl.BlockSpec((3, 3 * Cin, Cout), lambda n, r: (0, 0, 0)),
                pl.BlockSpec((1, Cout), lambda n, r: (0, 0)),
            ],
            out_specs=pl.BlockSpec((1, tr * W, Cout), lambda n, r: (n, r, 0)),
        ),
        compiler_params=pltpu.CompilerParams(
            dimension_semantics=("parallel", "parallel"),
            vmem_limit_bytes=_VMEM_LIMIT,
        ),
    )(xg, wmat, bias)
    return out.reshape(N, H, W, Cout)


# ----------------------------------------------------------------------------
# Pallas kernel 3: GroupNorm over NHWC (per-sample, streams x once)
# ----------------------------------------------------------------------------
def _groupnorm_kernel(x_ref, g_ref, b_ref, p_ref, o_ref, *, eps):
    x = x_ref[0].astype(jnp.float32)                       # (HW, C)
    pm = p_ref[...]                                        # (C, C) group-averaging projector
    mean_c = jnp.dot(jnp.sum(x, axis=0, keepdims=True), pm,
                     preferred_element_type=jnp.float32)   # (1, C)
    d = x - mean_c
    var_c = jnp.dot(jnp.sum(d * d, axis=0, keepdims=True), pm,
                    preferred_element_type=jnp.float32)
    y = d * lax.rsqrt(var_c + eps) * g_ref[...] + b_ref[...]
    o_ref[0] = y.astype(o_ref.dtype)


def group_norm_nhwc(x, gamma, beta, num_groups, eps=1e-5, out_dtype=jnp.bfloat16):
    N, H, W, C = x.shape
    G = num_groups
    Cg = C // G
    HW = H * W
    xr = x.reshape(N, HW, C)
    same_group = (jnp.arange(C)[:, None] // Cg) == (jnp.arange(C)[None, :] // Cg)
    proj = same_group.astype(jnp.float32) / float(HW * Cg)
    out = pl.pallas_call(
        functools.partial(_groupnorm_kernel, eps=eps),
        out_shape=jax.ShapeDtypeStruct((N, HW, C), out_dtype),
        grid_spec=pltpu.PrefetchScalarGridSpec(
            num_scalar_prefetch=0,
            grid=(N,),
            in_specs=[
                pl.BlockSpec((1, HW, C), lambda n: (n, 0, 0)),
                pl.BlockSpec((1, C), lambda n: (0, 0)),
                pl.BlockSpec((1, C), lambda n: (0, 0)),
                pl.BlockSpec((C, C), lambda n: (0, 0)),
            ],
            out_specs=pl.BlockSpec((1, HW, C), lambda n: (n, 0, 0)),
        ),
        compiler_params=pltpu.CompilerParams(
            dimension_semantics=("parallel",),
            vmem_limit_bytes=_VMEM_LIMIT,
        ),
    )(xr, gamma.reshape(1, C).astype(jnp.float32),
      beta.reshape(1, C).astype(jnp.float32), proj)
    return out.reshape(N, H, W, C)


# ----------------------------------------------------------------------------
# Conv wrappers (NHWC glue in JAX, matmuls in Pallas)
# ----------------------------------------------------------------------------
def conv2d_im2col_nhwc(x, w, b, stride, padding, act="none", out_dtype=jnp.bfloat16):
    """Used for the stride-4 7x7 convs and the 1x1 convs (1x1 im2col is a free reshape)."""
    N, H, W, Cin = x.shape
    Cout, _, kh, kw = w.shape
    s, p = stride, padding
    OH = (H + 2 * p - kh) // s + 1
    OW = (W + 2 * p - kw) // s + 1
    xb = x.astype(jnp.bfloat16)
    if kh == 1 and kw == 1 and s == 1 and p == 0:
        patches = xb.reshape(N * H * W, Cin)
    else:
        xp = jnp.pad(xb, ((0, 0), (p, p), (p, p), (0, 0)))
        cols = [xp[:, di:di + s * OH:s, dj:dj + s * OW:s, :]
                for di in range(kh) for dj in range(kw)]
        patches = jnp.stack(cols, axis=3).reshape(N * OH * OW, kh * kw * Cin)
    wmat = jnp.transpose(w, (2, 3, 1, 0)).reshape(kh * kw * Cin, Cout)
    y = matmul_bias_act(patches, wmat, b, act=act, out_dtype=out_dtype)
    return y.reshape(N, OH, OW, Cout)


def conv_transpose_s4_nhwc(x, w, b, act="none", out_dtype=jnp.bfloat16):
    """nn.ConvTranspose2d(k=4, stride=4, pad=0) == per-pixel Cin -> Cout*16 matmul (NHWC)."""
    N, H, W, Cin = x.shape
    _, Cout, kh, kw = w.shape
    assert kh == 4 and kw == 4
    xm = x.astype(jnp.bfloat16).reshape(N * H * W, Cin)
    wm = w.reshape(Cin, Cout * 16)
    bias = jnp.repeat(b, 16)
    y = matmul_bias_act(xm, wm, bias, act=act, out_dtype=out_dtype)   # (N*H*W, Cout*16)
    y = y.reshape(N, H, W, Cout, 4, 4).transpose(0, 1, 4, 2, 5, 3)    # (N, H, 4, W, 4, Cout)
    return y.reshape(N, 4 * H, 4 * W, Cout)


# ----------------------------------------------------------------------------
# grid generation + sampling
# ----------------------------------------------------------------------------
def grid_sample(img, grid):
    """F.grid_sample(mode='bilinear', padding_mode='zeros', align_corners=False)."""
    # TODO(synk): data-dependent bilinear gather kept in plain JAX (no clean Pallas TPU gather here).
    N, C, H, W = img.shape
    Hg, Wg = grid.shape[1], grid.shape[2]
    gx = grid[..., 0]
    gy = grid[..., 1]
    ix = ((gx + 1.0) * W - 1.0) / 2.0
    iy = ((gy + 1.0) * H - 1.0) / 2.0
    ix0 = jnp.floor(ix)
    iy0 = jnp.floor(iy)
    ix1 = ix0 + 1.0
    iy1 = iy0 + 1.0
    wx1 = ix - ix0
    wx0 = 1.0 - wx1
    wy1 = iy - iy0
    wy0 = 1.0 - wy1
    flat = img.reshape(N, C, H * W)

    def corner(iy_, ix_, wgt):
        valid = (ix_ >= 0) & (ix_ <= W - 1) & (iy_ >= 0) & (iy_ <= H - 1)
        ixc = jnp.clip(ix_, 0, W - 1).astype(jnp.int32)
        iyc = jnp.clip(iy_, 0, H - 1).astype(jnp.int32)
        idx = (iyc * W + ixc).reshape(N, Hg * Wg)
        vals = jax.vmap(lambda im, id_: jnp.take(im, id_, axis=1))(flat, idx)  # (N, C, Hg*Wg)
        w_ = (wgt * valid.astype(img.dtype)).reshape(N, 1, Hg * Wg)
        return vals * w_

    out = (corner(iy0, ix0, wy0 * wx0) + corner(iy0, ix1, wy0 * wx1)
           + corner(iy1, ix0, wy1 * wx0) + corner(iy1, ix1, wy1 * wx1))
    return out.reshape(N, C, Hg, Wg)


def uniform_grid(shape):
    """pytorch_tps.uniform_grid: control points on [0,1]^2, (H, W, 2) with [...,0]=x."""
    H, W = shape
    X, Y = jnp.meshgrid(jnp.linspace(0.0, 1.0, W), jnp.linspace(0.0, 1.0, H), indexing="xy")
    return jnp.stack([X, Y], axis=-1).astype(jnp.float32)


def tps_grid_coords(theta, ctrl, size):
    """pytorch_tps.tps_grid (cheind-style thin-plate spline, reduced theta: T+2 params)."""
    _, _, H, W = size
    X, Y = jnp.meshgrid(jnp.linspace(0.0, 1.0, W), jnp.linspace(0.0, 1.0, H), indexing="xy")
    loc = jnp.stack([X, Y], axis=-1)                            # (H, W, 2)
    T = ctrl.shape[0]
    diff = loc[:, :, None, :] - ctrl[None, None, :, :]          # (H, W, T, 2)
    D = jnp.sqrt(jnp.sum(diff * diff, axis=-1))
    U = (D * D) * jnp.log(D + 1e-6)                             # (H, W, T)
    w_ = theta[0, :-3, :]                                       # (T-1, 2)  (reduced)
    a_ = theta[0, -3:, :]                                       # (3, 2)
    w_full = jnp.concatenate([-jnp.sum(w_, axis=0, keepdims=True), w_], axis=0)   # (T, 2)
    feats = jnp.concatenate(
        [U.reshape(H * W, T), jnp.ones((H * W, 1), jnp.float32),
         X.reshape(H * W, 1), Y.reshape(H * W, 1)], axis=1)     # (HW, T+3)
    params = jnp.concatenate([w_full, a_], axis=0)              # (T+3, 2)
    z = matmul_bias_act(feats, params, jnp.zeros((2,), jnp.float32),
                        act="none", out_dtype=jnp.float32)
    z = z.reshape(H, W, 2)
    return ((loc + z) * 2.0 - 1.0)[None]                        # (1, H, W, 2) in [-1,1]


def affine_grid(theta_mat, size):
    """F.affine_grid(align_corners=False)."""
    N, C, H, W = size
    xs = (2.0 * jnp.arange(W, dtype=jnp.float32) + 1.0) / W - 1.0
    ys = (2.0 * jnp.arange(H, dtype=jnp.float32) + 1.0) / H - 1.0
    X, Y = jnp.meshgrid(xs, ys, indexing="xy")
    base = jnp.stack([X, Y, jnp.ones_like(X)], axis=-1)         # (H, W, 3)
    return jnp.einsum("hwk,njk->nhwj", base, theta_mat)         # (N, H, W, 2)


# ----------------------------------------------------------------------------
# GridRefine / GDNet / CmpTrans512 forward (NHWC residency inside GridRefine)
# ----------------------------------------------------------------------------
def grid_refine_forward(x, p):
    """x: (N, oH, oW, 2) f32 NHWC grid."""
    x1 = conv2d_im2col_nhwc(x, p["c1_w"], p["c1_b"], 4, 3, "relu", out_dtype=jnp.float32)
    x1 = group_norm_nhwc(x1, p["gn_w"], p["gn_b"], num_groups=16)
    x2 = conv3x3_same_nhwc(x1, p["c2_w"], p["c2_b"], "relu")
    x31 = conv2d_im2col_nhwc(x2, p["c31_w"], p["c31_b"], 4, 3, "relu")
    x32 = conv3x3_same_nhwc(x31, p["c32_w"], p["c32_b"], "relu")
    x3_f = conv2d_im2col_nhwc(x31, p["c3f_w"], p["c3f_b"], 1, 0, "sigmoid")
    x33 = conv3x3_same_nhwc(x32, p["c33_w"], p["c33_b"], "relu")
    x3_out = conv_transpose_s4_nhwc(x33 * x3_f, p["t2_w"], p["t2_b"], "lrelu")
    x3 = conv3x3_same_nhwc(x3_out, p["c3_w"], p["c3_b"], "relu")
    x2_f = conv2d_im2col_nhwc(x1, p["c2f_w"], p["c2f_b"], 1, 0, "sigmoid")
    out = conv_transpose_s4_nhwc(x3 * x2_f, p["t1_w"], p["t1_b"], "lrelu",
                                 out_dtype=jnp.float32)
    return x + out


def gdnet_forward(x, p, out_size):
    N, C, H, W = x.shape
    coarse_affine = affine_grid(p["affine_mat"], (1, C, H, W))                 # (1, H, W, 2)
    affine_img = jnp.transpose(coarse_affine, (0, 3, 1, 2))                    # (1, 2, H, W)
    coarse_tps = tps_grid_coords(p["theta"], p["ctrl_pts"], (1, C) + out_size)  # (1,oH,oW,2)
    tps_sampled = grid_sample(affine_img, coarse_tps)                          # (1, 2, oH, oW)
    tps_nhwc = jnp.transpose(tps_sampled, (0, 2, 3, 1))                        # (1, oH, oW, 2)
    tps_batched = jnp.tile(tps_nhwc, (N, 1, 1, 1))
    fine_grid = jnp.clip(grid_refine_forward(tps_batched, p), -1.0, 1.0)       # (N, oH, oW, 2)
    return grid_sample(x, fine_grid)


def cmptrans512_forward(x, s, p, out_size):
    x = gdnet_forward(x, p, out_size)
    s = gdnet_forward(s, p, out_size)
    # TODO(synk): pu_net (CompenTransNet512) source is not provided in the reference module;
    # it is applied here as identity on x (s is still computed through gd_net per forward()).
    return x


# ----------------------------------------------------------------------------
# deterministic parameter init (shapes from GridRefine / GDNet __init__)
# ----------------------------------------------------------------------------
def init_params(key, grid_shape=(5, 5)):
    keys = iter(jax.random.split(key, 32))

    def conv_w(shape):                       # nn.init.normal_(w, 0, 0.0001)
        return (1e-4 * jax.random.normal(next(keys), shape)).astype(jnp.float32)

    def unif(shape, fan_in):                 # deterministic stand-in for default bias/tconv init
        bound = float(fan_in) ** -0.5
        return jax.random.uniform(next(keys), shape, minval=-bound, maxval=bound).astype(jnp.float32)

    p = {}
    p["c1_w"], p["c1_b"] = conv_w((32, 2, 7, 7)), unif((32,), 2 * 49)
    p["c2_w"], p["c2_b"] = conv_w((64, 32, 3, 3)), unif((64,), 32 * 9)
    p["c3_w"], p["c3_b"] = conv_w((32, 64, 3, 3)), unif((32,), 64 * 9)
    p["c2f_w"], p["c2f_b"] = conv_w((32, 32, 1, 1)), unif((32,), 32)
    p["c31_w"], p["c31_b"] = conv_w((64, 64, 7, 7)), unif((64,), 64 * 49)
    p["c32_w"], p["c32_b"] = conv_w((128, 64, 3, 3)), unif((128,), 64 * 9)
    p["c33_w"], p["c33_b"] = conv_w((64, 128, 3, 3)), unif((64,), 128 * 9)
    p["c3f_w"], p["c3f_b"] = conv_w((64, 64, 1, 1)), unif((64,), 64)
    p["t1_w"], p["t1_b"] = unif((32, 2, 4, 4), 2 * 16), unif((2,), 2 * 16)
    p["t2_w"], p["t2_b"] = unif((64, 64, 4, 4), 64 * 16), unif((64,), 64 * 16)
    p["gn_w"], p["gn_b"] = jnp.ones((32,), jnp.float32), jnp.zeros((32,), jnp.float32)
    p["affine_mat"] = jnp.array([[[1.0, 0.0, 0.0], [0.0, 1.0, 0.0]]], jnp.float32)
    p["ctrl_pts"] = uniform_grid(grid_shape).reshape(-1, 2)
    nparam = grid_shape[0] * grid_shape[1] + 2
    p["theta"] = 0.001 * jnp.ones((1, nparam, 2), jnp.float32)
    return p


if __name__ == "__main__":
    key = jax.random.PRNGKey(0)
    kp, kx, ks = jax.random.split(key, 3)
    out_size = (64, 64)   # small stand-in for the (512, 512) default; must be divisible by 16
    params = init_params(kp)
    x = jax.random.uniform(kx, (2, 3, 64, 64), jnp.float32)
    s = jax.random.uniform(ks, (2, 3, 64, 64), jnp.float32)
    fwd = jax.jit(functools.partial(cmptrans512_forward, out_size=out_size))
    out = fwd(x, s, params)
    jax.block_until_ready(out)
    assert out.shape == (2, 3, 64, 64)
    print("KERNEL_OK")
</pallas_src>

<mosaic_0001>
module attributes {stable_mosaic.version = 11 : i64} {
  func.func @_mm_bias_act_kernel(%arg0: i32, %arg1: i32, %arg2: memref<512x28xbf16, #tpu.memory_space<vmem>>, %arg3: memref<28x2xbf16, #tpu.memory_space<vmem>>, %arg4: memref<1x2xf32, #tpu.memory_space<vmem>>, %arg5: memref<512x2xf32, #tpu.memory_space<vmem>>) attributes {dimension_semantics = [#tpu.dimension_semantics<parallel>, #tpu.dimension_semantics<parallel>], iteration_bounds = array<i64: 8, 1>, scalar_prefetch = 0 : i64, scratch_operands = 0 : i64, tpu.core_type = #tpu.core_type<tc>, window_params = [{transform_indices = @transform_0, window_bounds = array<i64: 512, 28>}, {transform_indices = @transform_1, window_bounds = array<i64: 28, 2>}, {transform_indices = @transform_2, window_bounds = array<i64: 1, 2>}, {transform_indices = @transform_3, window_bounds = array<i64: 512, 2>}]} {
    %c0 = arith.constant 0 : index
    %c0_0 = arith.constant 0 : index
    %0 = vector.load %arg2[%c0, %c0_0] : memref<512x28xbf16, #tpu.memory_space<vmem>>, vector<512x28xbf16>
    %c0_1 = arith.constant 0 : index
    %c0_2 = arith.constant 0 : index
    %1 = vector.load %arg3[%c0_1, %c0_2] : memref<28x2xbf16, #tpu.memory_space<vmem>>, vector<28x2xbf16>
    %cst = arith.constant dense<0.000000e+00> : vector<512x2xf32>
    %2 = tpu.matmul %0, %1, %cst {dimension_numbers = #tpu.dot_dimension_numbers<[1], [0], [0], [1], [0, 0, 1, 1], [], []>} : vector<512x28xbf16>, vector<28x2xbf16>, vector<512x2xf32> -> vector<512x2xf32>
    %c0_3 = arith.constant 0 : index
    %c0_4 = arith.constant 0 : index
    %3 = vector.load %arg4[%c0_3, %c0_4] : memref<1x2xf32, #tpu.memory_space<vmem>>, vector<1x2xf32>
    %4 = vector.broadcast %3 : vector<1x2xf32> to vector<512x2xf32>
    %5 = arith.addf %2, %4 : vector<512x2xf32>
    %c0_5 = arith.constant 0 : index
    %c0_6 = arith.constant 0 : index
    %6 = vector.load %arg5[%c0_5, %c0_6] : memref<512x2xf32, #tpu.memory_space<vmem>>, vector<512x2xf32>
    tpu.vector_store %arg5[%c0_5, %c0_6], %5 {strides = array<i32>} : memref<512x2xf32, #tpu.memory_space<vmem>>, vector<512x2xf32>,
    return
  }
  func.func @transform_0(%arg0: i32, %arg1: i32) -> (i32, i32) {
    %c0_i32 = arith.constant 0 : i32
    %c0_i32_0 = arith.constant 0 : i32
    return %arg0, %c0_i32 : i32, i32
  }
  func.func @transform_1(%arg0: i32, %arg1: i32) -> (i32, i32) {
    %c0_i32 = arith.constant 0 : i32
    %c0_i32_0 = arith.constant 0 : i32
    return %c0_i32, %arg1 : i32, i32
  }
  func.func @transform_2(%arg0: i32, %arg1: i32) -> (i32, i32) {
    %c0_i32 = arith.constant 0 : i32
    %c0_i32_0 = arith.constant 0 : i32
    return %c0_i32, %arg1 : i32, i32
  }
  func.func @transform_3(%arg0: i32, %arg1: i32) -> (i32, i32) {
    %c0_i32 = arith.constant 0 : i32
    return %arg0, %arg1 : i32, i32
  }
}

module attributes {stable_mosaic.version = 11 : i64} {
  func.func @_mm_bias_act_kernel(%arg0: i32, %arg1: i32, %arg2: memref<512x98xbf16, #tpu.memory_space<vmem>>, %arg3: memref<98x32xbf16, #tpu.memory_space<vmem>>, %arg4: memref<1x32xf32, #tpu.memory_space<vmem>>, %arg5: memref<512x32xf32, #tpu.memory_space<vmem>>) attributes {dimension_semantics = [#tpu.dimension_semantics<parallel>, #tpu.dimension_semantics<parallel>], iteration_bounds = array<i64: 1, 1>, scalar_prefetch = 0 : i64, scratch_operands = 0 : i64, tpu.core_type = #tpu.core_type<tc>, window_params = [{transform_indices = @transform_0, window_bounds = array<i64: 512, 98>}, {transform_indices = @transform_1, window_bounds = array<i64: 98, 32>}, {transform_indices = @transform_2, window_bounds = array<i64: 1, 32>}, {transform_indices = @transform_3, window_bounds = array<i64: 512, 32>}]} {
    %c0 = arith.constant 0 : index
    %c0_0 = arith.constant 0 : index
    %0 = vector.load %arg2[%c0, %c0_0] : memref<512x98xbf16, #tpu.memory_space<vmem>>, vector<512x98xbf16>
    %c0_1 = arith.constant 0 : index
    %c0_2 = arith.constant 0 : index
    %1 = vector.load %arg3[%c0_1, %c0_2] : memref<98x32xbf16, #tpu.memory_space<vmem>>, vector<98x32xbf16>
    %cst = arith.constant dense<0.000000e+00> : vector<512x32xf32>
    %2 = tpu.matmul %0, %1, %cst {dimension_numbers = #tpu.dot_dimension_numbers<[1], [0], [0], [1], [0, 0, 1, 1], [], []>} : vector<512x98xbf16>, vector<98x32xbf16>, vector<512x32xf32> -> vector<512x32xf32>
    %c0_3 = arith.constant 0 : index
    %c0_4 = arith.constant 0 : index
    %3 = vector.load %arg4[%c0_3, %c0_4] : memref<1x32xf32, #tpu.memory_space<vmem>>, vector<1x32xf32>
    %4 = vector.broadcast %3 : vector<1x32xf32> to vector<512x32xf32>
    %5 = arith.addf %2, %4 : vector<512x32xf32>
    %cst_5 = arith.constant 0.000000e+00 : f32
    %6 = vector.broadcast %cst_5 : f32 to vector<512x32xf32>
    %7 = arith.maximumf %5, %6 : vector<512x32xf32>
    %c0_6 = arith.constant 0 : index
    %c0_7 = arith.constant 0 : index
    %8 = vector.load %arg5[%c0_6, %c0_7] : memref<512x32xf32, #tpu.memory_space<vmem>>, vector<512x32xf32>
    tpu.vector_store %arg5[%c0_6, %c0_7], %7 {strides = array<i32>} : memref<512x32xf32, #tpu.memory_space<vmem>>, vector<512x32xf32>,
    return
  }
  func.func @transform_0(%arg0: i32, %arg1: i32) -> (i32, i32) {
    %c0_i32 = arith.constant 0 : i32
    %c0_i32_0 = arith.constant 0 : i32
    return %arg0, %c0_i32 : i32, i32
  }
  func.func @transform_1(%arg0: i32, %arg1: i32) -> (i32, i32) {
    %c0_i32 = arith.constant 0 : i32
    %c0_i32_0 = arith.constant 0 : i32
    return %c0_i32, %arg1 : i32, i32
  }
  func.func @transform_2(%arg0: i32, %arg1: i32) -> (i32, i32) {
    %c0_i32 = arith.constant 0 : i32
    %c0_i32_0 = arith.constant 0 : i32
    return %c0_i32, %arg1 : i32, i32
  }
  func.func @transform_3(%arg0: i32, %arg1: i32) -> (i32, i32) {
    %c0_i32 = arith.constant 0 : i32
    return %arg0, %arg1 : i32, i32
  }
}

module attributes {stable_mosaic.version = 11 : i64} {
  func.func @_groupnorm_kernel(%arg0: i32, %arg1: memref<1x256x32xf32, #tpu.memory_space<vmem>>, %arg2: memref<1x32xf32, #tpu.memory_space<vmem>>, %arg3: memref<1x32xf32, #tpu.memory_space<vmem>>, %arg4: memref<32x32xf32, #tpu.memory_space<vmem>>, %arg5: memref<1x256x32xbf16, #tpu.memory_space<vmem>>) attributes {dimension_semantics = [#tpu.dimension_semantics<parallel>], iteration_bounds = array<i64: 2>, scalar_prefetch = 0 : i64, scratch_operands = 0 : i64, tpu.core_type = #tpu.core_type<tc>, window_params = [{transform_indices = @transform_0, window_bounds = array<i64: 1, 256, 32>}, {pipeline_mode = #tpu.pipeline_mode<synchronous>, transform_indices = @transform_1, window_bounds = array<i64: 1, 32>}, {pipeline_mode = #tpu.pipeline_mode<synchronous>, transform_indices = @transform_2, window_bounds = array<i64: 1, 32>}, {pipeline_mode = #tpu.pipeline_mode<synchronous>, transform_indices = @transform_3, window_bounds = array<i64: 32, 32>}, {transform_indices = @transform_4, window_bounds = array<i64: 1, 256, 32>}]} {
    %c0 = arith.constant 0 : index
    %c0_0 = arith.constant 0 : index
    %c0_1 = arith.constant 0 : index
    %0 = vector.load %arg1[%c0, %c0_0, %c0_1] : memref<1x256x32xf32, #tpu.memory_space<vmem>>, vector<1x256x32xf32>
    %1 = vector.shape_cast %0 : vector<1x256x32xf32> to vector<256x32xf32>
    %c0_2 = arith.constant 0 : index
    %c0_3 = arith.constant 0 : index
    %2 = vector.load %arg4[%c0_2, %c0_3] : memref<32x32xf32, #tpu.memory_space<vmem>>, vector<32x32xf32>
    %cst = arith.constant dense<0.000000e+00> : vector<32xf32>
    %3 = vector.multi_reduction <add>, %1, %cst [0] : vector<256x32xf32> to vector<32xf32>
    %4 = vector.shape_cast %3 : vector<32xf32> to vector<1x32xf32>
    %cst_4 = arith.constant dense<0.000000e+00> : vector<1x32xf32>
    %5 = tpu.matmul %4, %2, %cst_4 {dimension_numbers = #tpu.dot_dimension_numbers<[1], [0], [0], [1], [0, 0, 1, 1], [], []>} : vector<1x32xf32>, vector<32x32xf32>, vector<1x32xf32> -> vector<1x32xf32>
    %6 = vector.broadcast %5 : vector<1x32xf32> to vector<256x32xf32>
    %7 = arith.subf %1, %6 : vector<256x32xf32>
    %8 = arith.mulf %7, %7 : vector<256x32xf32>
    %cst_5 = arith.constant dense<0.000000e+00> : vector<32xf32>
    %9 = vector.multi_reduction <add>, %8, %cst_5 [0] : vector<256x32xf32> to vector<32xf32>
    %10 = vector.shape_cast %9 : vector<32xf32> to vector<1x32xf32>
    %cst_6 = arith.constant dense<0.000000e+00> : vector<1x32xf32>
    %11 = tpu.matmul %10, %2, %cst_6 {dimension_numbers = #tpu.dot_dimension_numbers<[1], [0], [0], [1], [0, 0, 1, 1], [], []>} : vector<1x32xf32>, vector<32x32xf32>, vector<1x32xf32> -> vector<1x32xf32>
    %cst_7 = arith.constant 9.99999974E-6 : f32
    %12 = vector.broadcast %cst_7 : f32 to vector<1x32xf32>
    %13 = arith.addf %11, %12 : vector<1x32xf32>
    %14 = math.rsqrt %13 : vector<1x32xf32>
    %15 = vector.broadcast %14 : vector<1x32xf32> to vector<256x32xf32>
    %16 = arith.mulf %7, %15 : vector<256x32xf32>
    %c0_8 = arith.constant 0 : index
    %c0_9 = arith.constant 0 : index
    %17 = vector.load %arg2[%c0_8, %c0_9] : memref<1x32xf32, #tpu.memory_space<vmem>>, vector<1x32xf32>
    %18 = vector.broadcast %17 : vector<1x32xf32> to vector<256x32xf32>
    %19 = arith.mulf %16, %18 : vector<256x32xf32>
    %c0_10 = arith.constant 0 : index
    %c0_11 = arith.constant 0 : index
    %20 = vector.load %arg3[%c0_10, %c0_11] : memref<1x32xf32, #tpu.memory_space<vmem>>, vector<1x32xf32>
    %21 = vector.broadcast %20 : vector<1x32xf32> to vector<256x32xf32>
    %22 = arith.addf %19, %21 : vector<256x32xf32>
    %23 = arith.truncf %22 : vector<256x32xf32> to vector<256x32xbf16>
    %c0_12 = arith.constant 0 : index
    %c0_13 = arith.constant 0 : index
    %c0_14 = arith.constant 0 : index
    %24 = vector.load %arg5[%c0_12, %c0_13, %c0_14] : memref<1x256x32xbf16, #tpu.memory_space<vmem>>, vector<1x256x32xbf16>
    %25 = vector.shape_cast %24 : vector<1x256x32xbf16> to vector<256x32xbf16>
    %26 = vector.shape_cast %23 : vector<256x32xbf16> to vector<1x256x32xbf16>
    tpu.vector_store %arg5[%c0_12, %c0_13, %c0_14], %26 {strides = array<i32>} : memref<1x256x32xbf16, #tpu.memory_space<vmem>>, vector<1x256x32xbf16>,
    return
  }
  func.func @transform_0(%arg0: i32) -> (i32, i32, i32) {
    %c0_i32 = arith.constant 0 : i32
    %c0_i32_0 = arith.constant 0 : i32
    %c0_i32_1 = arith.constant 0 : i32
    return %arg0, %c0_i32, %c0_i32_0 : i32, i32, i32
  }
  func.func @transform_1(%arg0: i32) -> (i32, i32) {
    %c0_i32 = arith.constant 0 : i32
    %c0_i32_0 = arith.constant 0 : i32
    %c0_i32_1 = arith.constant 0 : i32
    return %c0_i32, %c0_i32_0 : i32, i32
  }
  func.func @transform_2(%arg0: i32) -> (i32, i32) {
    %c0_i32 = arith.constant 0 : i32
    %c0_i32_0 = arith.constant 0 : i32
    %c0_i32_1 = arith.constant 0 : i32
    return %c0_i32, %c0_i32_0 : i32, i32
  }
  func.func @transform_3(%arg0: i32) -> (i32, i32) {
    %c0_i32 = arith.constant 0 : i32
    %c0_i32_0 = arith.constant 0 : i32
    %c0_i32_1 = arith.constant 0 : i32
    return %c0_i32, %c0_i32_0 : i32, i32
  }
  func.func @transform_4(%arg0: i32) -> (i32, i32, i32) {
    %c0_i32 = arith.constant 0 : i32
    %c0_i32_0 = arith.constant 0 : i32
    %c0_i32_1 = arith.constant 0 : i32
    return %arg0, %c0_i32, %c0_i32_0 : i32, i32, i32
  }
}

module attributes {stable_mosaic.version = 11 : i64} {
  func.func @_conv3x3_kernel(%arg0: i32, %arg1: i32, %arg2: memref<1x1x288x96xbf16, #tpu.memory_space<vmem>>, %arg3: memref<3x96x64xbf16, #tpu.memory_space<vmem>>, %arg4: memref<1x64xf32, #tpu.memory_space<vmem>>, %arg5: memref<1x256x64xbf16, #tpu.memory_space<vmem>>) attributes {dimension_semantics = [#tpu.dimension_semantics<parallel>, #tpu.dimension_semantics<parallel>], iteration_bounds = array<i64: 2, 1>, scalar_prefetch = 0 : i64, scratch_operands = 0 : i64, tpu.core_type = #tpu.core_type<tc>, window_params = [{transform_indices = @transform_0, window_bounds = array<i64: 1, 1, 288, 96>}, {pipeline_mode = #tpu.pipeline_mode<synchronous>, transform_indices = @transform_1, window_bounds = array<i64: 3, 96, 64>}, {pipeline_mode = #tpu.pipeline_mode<synchronous>, transform_indices = @transform_2, window_bounds = array<i64: 1, 64>}, {transform_indices = @transform_3, window_bounds = array<i64: 1, 256, 64>}]} {
    %cst = arith.constant 0.000000e+00 : f32
    %0 = vector.broadcast %cst : f32 to vector<256x64xf32>
    %c0 = arith.constant 0 : index
    %c0_0 = arith.constant 0 : index
    %c0_1 = arith.constant 0 : index
    %c0_2 = arith.constant 0 : index
    %1 = vector.load %arg2[%c0, %c0_0, %c0_1, %c0_2] : memref<1x1x288x96xbf16, #tpu.memory_space<vmem>>, vector<1x1x256x96xbf16>
    %2 = vector.shape_cast %1 : vector<1x1x256x96xbf16> to vector<256x96xbf16>
    %c0_3 = arith.constant 0 : index
    %c0_4 = arith.constant 0 : index
    %c0_5 = arith.constant 0 : index
    %3 = vector.load %arg3[%c0_3, %c0_4, %c0_5] : memref<3x96x64xbf16, #tpu.memory_space<vmem>>, vector<1x96x64xbf16>
    %4 = vector.shape_cast %3 : vector<1x96x64xbf16> to vector<96x64xbf16>
    %cst_6 = arith.constant dense<0.000000e+00> : vector<256x64xf32>
    %5 = tpu.matmul %2, %4, %cst_6 {dimension_numbers = #tpu.dot_dimension_numbers<[1], [0], [0], [1], [0, 0, 1, 1], [], []>} : vector<256x96xbf16>, vector<96x64xbf16>, vector<256x64xf32> -> vector<256x64xf32>
    %6 = arith.addf %0, %5 : vector<256x64xf32>
    %c0_7 = arith.constant 0 : index
    %c0_8 = arith.constant 0 : index
    %c16 = arith.constant 16 : index
    %c0_9 = arith.constant 0 : index
    %7 = vector.load %arg2[%c0_7, %c0_8, %c16, %c0_9] : memref<1x1x288x96xbf16, #tpu.memory_space<vmem>>, vector<1x1x256x96xbf16>
    %8 = vector.shape_cast %7 : vector<1x1x256x96xbf16> to vector<256x96xbf16>
    %c1 = arith.constant 1 : index
    %c0_10 = arith.constant 0 : index
    %c0_11 = arith.constant 0 : index
    %9 = vector.load %arg3[%c1, %c0_10, %c0_11] : memref<3x96x64xbf16, #tpu.memory_space<vmem>>, vector<1x96x64xbf16>
    %10 = vector.shape_cast %9 : vector<1x96x64xbf16> to vector<96x64xbf16>
    %cst_12 = arith.constant dense<0.000000e+00> : vector<256x64xf32>
    %11 = tpu.matmul %8, %10, %cst_12 {dimension_numbers = #tpu.dot_dimension_numbers<[1], [0], [0], [1], [0, 0, 1, 1], [], []>} : vector<256x96xbf16>, vector<96x64xbf16>, vector<256x64xf32> -> vector<256x64xf32>
    %12 = arith.addf %6, %11 : vector<256x64xf32>
    %c0_13 = arith.constant 0 : index
    %c0_14 = arith.constant 0 : index
    %c32 = arith.constant 32 : index
    %c0_15 = arith.constant 0 : index
    %13 = vector.load %arg2[%c0_13, %c0_14, %c32, %c0_15] : memref<1x1x288x96xbf16, #tpu.memory_space<vmem>>, vector<1x1x256x96xbf16>
    %14 = vector.shape_cast %13 : vector<1x1x256x96xbf16> to vector<256x96xbf16>
    %c2 = arith.constant 2 : index
    %c0_16 = arith.constant 0 : index
    %c0_17 = arith.constant 0 : index
    %15 = vector.load %arg3[%c2, %c0_16, %c0_17] : memref<3x96x64xbf16, #tpu.memory_space<vmem>>, vector<1x96x64xbf16>
    %16 = vector.shape_cast %15 : vector<1x96x64xbf16> to vector<96x64xbf16>
    %cst_18 = arith.constant dense<0.000000e+00> : vector<256x64xf32>
    %17 = tpu.matmul %14, %16, %cst_18 {dimension_numbers = #tpu.dot_dimension_numbers<[1], [0], [0], [1], [0, 0, 1, 1], [], []>} : vector<256x96xbf16>, vector<96x64xbf16>, vector<256x64xf32> -> vector<256x64xf32>
    %18 = arith.addf %12, %17 : vector<256x64xf32>
    %c0_19 = arith.constant 0 : index
    %c0_20 = arith.constant 0 : index
    %19 = vector.load %arg4[%c0_19, %c0_20] : memref<1x64xf32, #tpu.memory_space<vmem>>, vector<1x64xf32>
    %20 = vector.broadcast %19 : vector<1x64xf32> to vector<256x64xf32>
    %21 = arith.addf %18, %20 : vector<256x64xf32>
    %cst_21 = arith.constant 0.000000e+00 : f32
    %22 = vector.broadcast %cst_21 : f32 to vector<256x64xf32>
    %23 = arith.maximumf %21, %22 : vector<256x64xf32>
    %24 = arith.truncf %23 : vector<256x64xf32> to vector<256x64xbf16>
    %c0_22 = arith.constant 0 : index
    %c0_23 = arith.constant 0 : index
    %c0_24 = arith.constant 0 : index
    %25 = vector.load %arg5[%c0_22, %c0_23, %c0_24] : memref<1x256x64xbf16, #tpu.memory_space<vmem>>, vector<1x256x64xbf16>
    %26 = vector.shape_cast %25 : vector<1x256x64xbf16> to vector<256x64xbf16>
    %27 = vector.shape_cast %24 : vector<256x64xbf16> to vector<1x256x64xbf16>
    tpu.vector_store %arg5[%c0_22, %c0_23, %c0_24], %27 {strides = array<i32>} : memref<1x256x64xbf16, #tpu.memory_space<vmem>>, vector<1x256x64xbf16>,
    return
  }
  func.func @transform_0(%arg0: i32, %arg1: i32) -> (i32, i32, i32, i32) {
    %c0_i32 = arith.constant 0 : i32
    %c0_i32_0 = arith.constant 0 : i32
    %c0_i32_1 = arith.constant 0 : i32
    return %arg0, %arg1, %c0_i32, %c0_i32_0 : i32, i32, i32, i32
  }
  func.func @transform_1(%arg0: i32, %arg1: i32) -> (i32, i32, i32) {
    %c0_i32 = arith.constant 0 : i32
    %c0_i32_0 = arith.constant 0 : i32
    %c0_i32_1 = arith.constant 0 : i32
    %c0_i32_2 = arith.constant 0 : i32
    return %c0_i32, %c0_i32_0, %c0_i32_1 : i32, i32, i32
  }
  func.func @transform_2(%arg0: i32, %arg1: i32) -> (i32, i32) {
    %c0_i32 = arith.constant 0 : i32
    %c0_i32_0 = arith.constant 0 : i32
    %c0_i32_1 = arith.constant 0 : i32
    return %c0_i32, %c0_i32_0 : i32, i32
  }
  func.func @transform_3(%arg0: i32, %arg1: i32) -> (i32, i32, i32) {
    %c0_i32 = arith.constant 0 : i32
    %c0_i32_0 = arith.constant 0 : i32
    return %arg0, %arg1, %c0_i32 : i32, i32, i32
  }
}

module attributes {stable_mosaic.version = 11 : i64} {
  func.func @_mm_bias_act_kernel(%arg0: i32, %arg1: i32, %arg2: memref<128x3136xbf16, #tpu.memory_space<vmem>>, %arg3: memref<3136x64xbf16, #tpu.memory_space<vmem>>, %arg4: memref<1x64xf32, #tpu.memory_space<vmem>>, %arg5: memref<128x64xbf16, #tpu.memory_space<vmem>>) attributes {dimension_semantics = [#tpu.dimension_semantics<parallel>, #tpu.dimension_semantics<parallel>], iteration_bounds = array<i64: 1, 1>, scalar_prefetch = 0 : i64, scratch_operands = 0 : i64, tpu.core_type = #tpu.core_type<tc>, window_params = [{transform_indices = @transform_0, window_bounds = array<i64: 128, 3136>}, {transform_indices = @transform_1, window_bounds = array<i64: 3136, 64>}, {transform_indices = @transform_2, window_bounds = array<i64: 1, 64>}, {transform_indices = @transform_3, window_bounds = array<i64: 128, 64>}]} {
    %c0 = arith.constant 0 : index
    %c0_0 = arith.constant 0 : index
    %0 = vector.load %arg2[%c0, %c0_0] : memref<128x3136xbf16, #tpu.memory_space<vmem>>, vector<128x3136xbf16>
    %c0_1 = arith.constant 0 : index
    %c0_2 = arith.constant 0 : index
    %1 = vector.load %arg3[%c0_1, %c0_2] : memref<3136x64xbf16, #tpu.memory_space<vmem>>, vector<3136x64xbf16>
    %cst = arith.constant dense<0.000000e+00> : vector<128x64xf32>
    %2 = tpu.matmul %0, %1, %cst {dimension_numbers = #tpu.dot_dimension_numbers<[1], [0], [0], [1], [0, 0, 1, 1], [], []>} : vector<128x3136xbf16>, vector<3136x64xbf16>, vector<128x64xf32> -> vector<128x64xf32>
    %c0_3 = arith.constant 0 : index
    %c0_4 = arith.constant 0 : index
    %3 = vector.load %arg4[%c0_3, %c0_4] : memref<1x64xf32, #tpu.memory_space<vmem>>, vector<1x64xf32>
    %4 = vector.broadcast %3 : vector<1x64xf32> to vector<128x64xf32>
    %5 = arith.addf %2, %4 : vector<128x64xf32>
    %cst_5 = arith.constant 0.000000e+00 : f32
    %6 = vector.broadcast %cst_5 : f32 to vector<128x64xf32>
    %7 = arith.maximumf %5, %6 : vector<128x64xf32>
    %8 = arith.truncf %7 : vector<128x64xf32> to vector<128x64xbf16>
    %c0_6 = arith.constant 0 : index
    %c0_7 = arith.constant 0 : index
    %9 = vector.load %arg5[%c0_6, %c0_7] : memref<128x64xbf16, #tpu.memory_space<vmem>>, vector<128x64xbf16>
    tpu.vector_store %arg5[%c0_6, %c0_7], %8 {strides = array<i32>} : memref<128x64xbf16, #tpu.memory_space<vmem>>, vector<128x64xbf16>,
    return
  }
  func.func @transform_0(%arg0: i32, %arg1: i32) -> (i32, i32) {
    %c0_i32 = arith.constant 0 : i32
    %c0_i32_0 = arith.constant 0 : i32
    return %arg0, %c0_i32 : i32, i32
  }
  func.func @transform_1(%arg0: i32, %arg1: i32) -> (i32, i32) {
    %c0_i32 = arith.constant 0 : i32
    %c0_i32_0 = arith.constant 0 : i32
    return %c0_i32, %arg1 : i32, i32
  }
  func.func @transform_2(%arg0: i32, %arg1: i32) -> (i32, i32) {
    %c0_i32 = arith.constant 0 : i32
    %c0_i32_0 = arith.constant 0 : i32
    return %c0_i32, %arg1 : i32, i32
  }
  func.func @transform_3(%arg0: i32, %arg1: i32) -> (i32, i32) {
    %c0_i32 = arith.constant 0 : i32
    return %arg0, %arg1 : i32, i32
  }
}

module attributes {stable_mosaic.version = 11 : i64} {
  func.func @_conv3x3_kernel(%arg0: i32, %arg1: i32, %arg2: memref<1x1x24x192xbf16, #tpu.memory_space<vmem>>, %arg3: memref<3x192x128xbf16, #tpu.memory_space<vmem>>, %arg4: memref<1x128xf32, #tpu.memory_space<vmem>>, %arg5: memref<1x16x128xbf16, #tpu.memory_space<vmem>>) attributes {dimension_semantics = [#tpu.dimension_semantics<parallel>, #tpu.dimension_semantics<parallel>], iteration_bounds = array<i64: 2, 1>, scalar_prefetch = 0 : i64, scratch_operands = 0 : i64, tpu.core_type = #tpu.core_type<tc>, window_params = [{transform_indices = @transform_0, window_bounds = array<i64: 1, 1, 24, 192>}, {pipeline_mode = #tpu.pipeline_mode<synchronous>, transform_indices = @transform_1, window_bounds = array<i64: 3, 192, 128>}, {pipeline_mode = #tpu.pipeline_mode<synchronous>, transform_indices = @transform_2, window_bounds = array<i64: 1, 128>}, {transform_indices = @transform_3, window_bounds = array<i64: 1, 16, 128>}]} {
    %cst = arith.constant 0.000000e+00 : f32
    %0 = vector.broadcast %cst : f32 to vector<16x128xf32>
    %c0 = arith.constant 0 : index
    %c0_0 = arith.constant 0 : index
    %c0_1 = arith.constant 0 : index
    %c0_2 = arith.constant 0 : index
    %1 = vector.load %arg2[%c0, %c0_0, %c0_1, %c0_2] : memref<1x1x24x192xbf16, #tpu.memory_space<vmem>>, vector<1x1x16x192xbf16>
    %2 = vector.shape_cast %1 : vector<1x1x16x192xbf16> to vector<16x192xbf16>
    %c0_3 = arith.constant 0 : index
    %c0_4 = arith.constant 0 : index
    %c0_5 = arith.constant 0 : index
    %3 = vector.load %arg3[%c0_3, %c0_4, %c0_5] : memref<3x192x128xbf16, #tpu.memory_space<vmem>>, vector<1x192x128xbf16>
    %4 = vector.shape_cast %3 : vector<1x192x128xbf16> to vector<192x128xbf16>
    %cst_6 = arith.constant dense<0.000000e+00> : vector<16x128xf32>
    %5 = tpu.matmul %2, %4, %cst_6 {dimension_numbers = #tpu.dot_dimension_numbers<[1], [0], [0], [1], [0, 0, 1, 1], [], []>} : vector<16x192xbf16>, vector<192x128xbf16>, vector<16x128xf32> -> vector<16x128xf32>
    %6 = arith.addf %0, %5 : vector<16x128xf32>
    %c0_7 = arith.constant 0 : index
    %c0_8 = arith.constant 0 : index
    %c4 = arith.constant 4 : index
    %c0_9 = arith.constant 0 : index
    %7 = vector.load %arg2[%c0_7, %c0_8, %c4, %c0_9] : memref<1x1x24x192xbf16, #tpu.memory_space<vmem>>, vector<1x1x16x192xbf16>
    %8 = vector.shape_cast %7 : vector<1x1x16x192xbf16> to vector<16x192xbf16>
    %c1 = arith.constant 1 : index
    %c0_10 = arith.constant 0 : index
    %c0_11 = arith.constant 0 : index
    %9 = vector.load %arg3[%c1, %c0_10, %c0_11] : memref<3x192x128xbf16, #tpu.memory_space<vmem>>, vector<1x192x128xbf16>
    %10 = vector.shape_cast %9 : vector<1x192x128xbf16> to vector<192x128xbf16>
    %cst_12 = arith.constant dense<0.000000e+00> : vector<16x128xf32>
    %11 = tpu.matmul %8, %10, %cst_12 {dimension_numbers = #tpu.dot_dimension_numbers<[1], [0], [0], [1], [0, 0, 1, 1], [], []>} : vector<16x192xbf16>, vector<192x128xbf16>, vector<16x128xf32> -> vector<16x128xf32>
    %12 = arith.addf %6, %11 : vector<16x128xf32>
    %c0_13 = arith.constant 0 : index
    %c0_14 = arith.constant 0 : index
    %c8 = arith.constant 8 : index
    %c0_15 = arith.constant 0 : index
    %13 = vector.load %arg2[%c0_13, %c0_14, %c8, %c0_15] : memref<1x1x24x192xbf16, #tpu.memory_space<vmem>>, vector<1x1x16x192xbf16>
    %14 = vector.shape_cast %13 : vector<1x1x16x192xbf16> to vector<16x192xbf16>
    %c2 = arith.constant 2 : index
    %c0_16 = arith.constant 0 : index
    %c0_17 = arith.constant 0 : index
    %15 = vector.load %arg3[%c2, %c0_16, %c0_17] : memref<3x192x128xbf16, #tpu.memory_space<vmem>>, vector<1x192x128xbf16>
    %16 = vector.shape_cast %15 : vector<1x192x128xbf16> to vector<192x128xbf16>
    %cst_18 = arith.constant dense<0.000000e+00> : vector<16x128xf32>
    %17 = tpu.matmul %14, %16, %cst_18 {dimension_numbers = #tpu.dot_dimension_numbers<[1], [0], [0], [1], [0, 0, 1, 1], [], []>} : vector<16x192xbf16>, vector<192x128xbf16>, vector<16x128xf32> -> vector<16x128xf32>
    %18 = arith.addf %12, %17 : vector<16x128xf32>
    %c0_19 = arith.constant 0 : index
    %c0_20 = arith.constant 0 : index
    %19 = vector.load %arg4[%c0_19, %c0_20] : memref<1x128xf32, #tpu.memory_space<vmem>>, vector<1x128xf32>
    %20 = vector.broadcast %19 : vector<1x128xf32> to vector<16x128xf32>
    %21 = arith.addf %18, %20 : vector<16x128xf32>
    %cst_21 = arith.constant 0.000000e+00 : f32
    %22 = vector.broadcast %cst_21 : f32 to vector<16x128xf32>
    %23 = arith.maximumf %21, %22 : vector<16x128xf32>
    %24 = arith.truncf %23 : vector<16x128xf32> to vector<16x128xbf16>
    %c0_22 = arith.constant 0 : index
    %c0_23 = arith.constant 0 : index
    %c0_24 = arith.constant 0 : index
    %25 = vector.load %arg5[%c0_22, %c0_23, %c0_24] : memref<1x16x128xbf16, #tpu.memory_space<vmem>>, vector<1x16x128xbf16>
    %26 = vector.shape_cast %25 : vector<1x16x128xbf16> to vector<16x128xbf16>
    %27 = vector.shape_cast %24 : vector<16x128xbf16> to vector<1x16x128xbf16>
    tpu.vector_store %arg5[%c0_22, %c0_23, %c0_24], %27 {strides = array<i32>} : memref<1x16x128xbf16, #tpu.memory_space<vmem>>, vector<1x16x128xbf16>,
    return
  }
  func.func @transform_0(%arg0: i32, %arg1: i32) -> (i32, i32, i32, i32) {
    %c0_i32 = arith.constant 0 : i32
    %c0_i32_0 = arith.constant 0 : i32
    %c0_i32_1 = arith.constant 0 : i32
    return %arg0, %arg1, %c0_i32, %c0_i32_0 : i32, i32, i32, i32
  }
  func.func @transform_1(%arg0: i32, %arg1: i32) -> (i32, i32, i32) {
    %c0_i32 = arith.constant 0 : i32
    %c0_i32_0 = arith.constant 0 : i32
    %c0_i32_1 = arith.constant 0 : i32
    %c0_i32_2 = arith.constant 0 : i32
    return %c0_i32, %c0_i32_0, %c0_i32_1 : i32, i32, i32
  }
  func.func @transform_2(%arg0: i32, %arg1: i32) -> (i32, i32) {
    %c0_i32 = arith.constant 0 : i32
    %c0_i32_0 = arith.constant 0 : i32
    %c0_i32_1 = arith.constant 0 : i32
    return %c0_i32, %c0_i32_0 : i32, i32
  }
  func.func @transform_3(%arg0: i32, %arg1: i32) -> (i32, i32, i32) {
    %c0_i32 = arith.constant 0 : i32
    %c0_i32_0 = arith.constant 0 : i32
    return %arg0, %arg1, %c0_i32 : i32, i32, i32
  }
}

module attributes {stable_mosaic.version = 11 : i64} {
  func.func @_conv3x3_kernel(%arg0: i32, %arg1: i32, %arg2: memref<1x1x24x384xbf16, #tpu.memory_space<vmem>>, %arg3: memref<3x384x64xbf16, #tpu.memory_space<vmem>>, %arg4: memref<1x64xf32, #tpu.memory_space<vmem>>, %arg5: memref<1x16x64xbf16, #tpu.memory_space<vmem>>) attributes {dimension_semantics = [#tpu.dimension_semantics<parallel>, #tpu.dimension_semantics<parallel>], iteration_bounds = array<i64: 2, 1>, scalar_prefetch = 0 : i64, scratch_operands = 0 : i64, tpu.core_type = #tpu.core_type<tc>, window_params = [{transform_indices = @transform_0, window_bounds = array<i64: 1, 1, 24, 384>}, {pipeline_mode = #tpu.pipeline_mode<synchronous>, transform_indices = @transform_1, window_bounds = array<i64: 3, 384, 64>}, {pipeline_mode = #tpu.pipeline_mode<synchronous>, transform_indices = @transform_2, window_bounds = array<i64: 1, 64>}, {transform_indices = @transform_3, window_bounds = array<i64: 1, 16, 64>}]} {
    %cst = arith.constant 0.000000e+00 : f32
    %0 = vector.broadcast %cst : f32 to vector<16x64xf32>
    %c0 = arith.constant 0 : index
    %c0_0 = arith.constant 0 : index
    %c0_1 = arith.constant 0 : index
    %c0_2 = arith.constant 0 : index
    %1 = vector.load %arg2[%c0, %c0_0, %c0_1, %c0_2] : memref<1x1x24x384xbf16, #tpu.memory_space<vmem>>, vector<1x1x16x384xbf16>
    %2 = vector.shape_cast %1 : vector<1x1x16x384xbf16> to vector<16x384xbf16>
    %c0_3 = arith.constant 0 : index
    %c0_4 = arith.constant 0 : index
    %c0_5 = arith.constant 0 : index
    %3 = vector.load %arg3[%c0_3, %c0_4, %c0_5] : memref<3x384x64xbf16, #tpu.memory_space<vmem>>, vector<1x384x64xbf16>
    %4 = vector.shape_cast %3 : vector<1x384x64xbf16> to vector<384x64xbf16>
    %cst_6 = arith.constant dense<0.000000e+00> : vector<16x64xf32>
    %5 = tpu.matmul %2, %4, %cst_6 {dimension_numbers = #tpu.dot_dimension_numbers<[1], [0], [0], [1], [0, 0, 1, 1], [], []>} : vector<16x384xbf16>, vector<384x64xbf16>, vector<16x64xf32> -> vector<16x64xf32>
    %6 = arith.addf %0, %5 : vector<16x64xf32>
    %c0_7 = arith.constant 0 : index
    %c0_8 = arith.constant 0 : index
    %c4 = arith.constant 4 : index
    %c0_9 = arith.constant 0 : index
    %7 = vector.load %arg2[%c0_7, %c0_8, %c4, %c0_9] : memref<1x1x24x384xbf16, #tpu.memory_space<vmem>>, vector<1x1x16x384xbf16>
    %8 = vector.shape_cast %7 : vector<1x1x16x384xbf16> to vector<16x384xbf16>
    %c1 = arith.constant 1 : index
    %c0_10 = arith.constant 0 : index
    %c0_11 = arith.constant 0 : index
    %9 = vector.load %arg3[%c1, %c0_10, %c0_11] : memref<3x384x64xbf16, #tpu.memory_space<vmem>>, vector<1x384x64xbf16>
    %10 = vector.shape_cast %9 : vector<1x384x64xbf16> to vector<384x64xbf16>
    %cst_12 = arith.constant dense<0.000000e+00> : vector<16x64xf32>
    %11 = tpu.matmul %8, %10, %cst_12 {dimension_numbers = #tpu.dot_dimension_numbers<[1], [0], [0], [1], [0, 0, 1, 1], [], []>} : vector<16x384xbf16>, vector<384x64xbf16>, vector<16x64xf32> -> vector<16x64xf32>
    %12 = arith.addf %6, %11 : vector<16x64xf32>
    %c0_13 = arith.constant 0 : index
    %c0_14 = arith.constant 0 : index
    %c8 = arith.constant 8 : index
    %c0_15 = arith.constant 0 : index
    %13 = vector.load %arg2[%c0_13, %c0_14, %c8, %c0_15] : memref<1x1x24x384xbf16, #tpu.memory_space<vmem>>, vector<1x1x16x384xbf16>
    %14 = vector.shape_cast %13 : vector<1x1x16x384xbf16> to vector<16x384xbf16>
    %c2 = arith.constant 2 : index
    %c0_16 = arith.constant 0 : index
    %c0_17 = arith.constant 0 : index
    %15 = vector.load %arg3[%c2, %c0_16, %c0_17] : memref<3x384x64xbf16, #tpu.memory_space<vmem>>, vector<1x384x64xbf16>
    %16 = vector.shape_cast %15 : vector<1x384x64xbf16> to vector<384x64xbf16>
    %cst_18 = arith.constant dense<0.000000e+00> : vector<16x64xf32>
    %17 = tpu.matmul %14, %16, %cst_18 {dimension_numbers = #tpu.dot_dimension_numbers<[1], [0], [0], [1], [0, 0, 1, 1], [], []>} : vector<16x384xbf16>, vector<384x64xbf16>, vector<16x64xf32> -> vector<16x64xf32>
    %18 = arith.addf %12, %17 : vector<16x64xf32>
    %c0_19 = arith.constant 0 : index
    %c0_20 = arith.constant 0 : index
    %19 = vector.load %arg4[%c0_19, %c0_20] : memref<1x64xf32, #tpu.memory_space<vmem>>, vector<1x64xf32>
    %20 = vector.broadcast %19 : vector<1x64xf32> to vector<16x64xf32>
    %21 = arith.addf %18, %20 : vector<16x64xf32>
    %cst_21 = arith.constant 0.000000e+00 : f32
    %22 = vector.broadcast %cst_21 : f32 to vector<16x64xf32>
    %23 = arith.maximumf %21, %22 : vector<16x64xf32>
    %24 = arith.truncf %23 : vector<16x64xf32> to vector<16x64xbf16>
    %c0_22 = arith.constant 0 : index
    %c0_23 = arith.constant 0 : index
    %c0_24 = arith.constant 0 : index
    %25 = vector.load %arg5[%c0_22, %c0_23, %c0_24] : memref<1x16x64xbf16, #tpu.memory_space<vmem>>, vector<1x16x64xbf16>
    %26 = vector.shape_cast %25 : vector<1x16x64xbf16> to vector<16x64xbf16>
    %27 = vector.shape_cast %24 : vector<16x64xbf16> to vector<1x16x64xbf16>
    tpu.vector_store %arg5[%c0_22, %c0_23, %c0_24], %27 {strides = array<i32>} : memref<1x16x64xbf16, #tpu.memory_space<vmem>>, vector<1x16x64xbf16>,
    return
  }
  func.func @transform_0(%arg0: i32, %arg1: i32) -> (i32, i32, i32, i32) {
    %c0_i32 = arith.constant 0 : i32
    %c0_i32_0 = arith.constant 0 : i32
    %c0_i32_1 = arith.constant 0 : i32
    return %arg0, %arg1, %c0_i32, %c0_i32_0 : i32, i32, i32, i32
  }
  func.func @transform_1(%arg0: i32, %arg1: i32) -> (i32, i32, i32) {
    %c0_i32 = arith.constant 0 : i32
    %c0_i32_0 = arith.constant 0 : i32
    %c0_i32_1 = arith.constant 0 : i32
    %c0_i32_2 = arith.constant 0 : i32
    return %c0_i32, %c0_i32_0, %c0_i32_1 : i32, i32, i32
  }
  func.func @transform_2(%arg0: i32, %arg1: i32) -> (i32, i32) {
    %c0_i32 = arith.constant 0 : i32
    %c0_i32_0 = arith.constant 0 : i32
    %c0_i32_1 = arith.constant 0 : i32
    return %c0_i32, %c0_i32_0 : i32, i32
  }
  func.func @transform_3(%arg0: i32, %arg1: i32) -> (i32, i32, i32) {
    %c0_i32 = arith.constant 0 : i32
    %c0_i32_0 = arith.constant 0 : i32
    return %arg0, %arg1, %c0_i32 : i32, i32, i32
  }
}

module attributes {stable_mosaic.version = 11 : i64} {
  func.func @_mm_bias_act_kernel(%arg0: i32, %arg1: i32, %arg2: memref<128x64xbf16, #tpu.memory_space<vmem>>, %arg3: memref<64x64xbf16, #tpu.memory_space<vmem>>, %arg4: memref<1x64xf32, #tpu.memory_space<vmem>>, %arg5: memref<128x64xbf16, #tpu.memory_space<vmem>>) attributes {dimension_semantics = [#tpu.dimension_semantics<parallel>, #tpu.dimension_semantics<parallel>], iteration_bounds = array<i64: 1, 1>, scalar_prefetch = 0 : i64, scratch_operands = 0 : i64, tpu.core_type = #tpu.core_type<tc>, window_params = [{transform_indices = @transform_0, window_bounds = array<i64: 128, 64>}, {transform_indices = @transform_1, window_bounds = array<i64: 64, 64>}, {transform_indices = @transform_2, window_bounds = array<i64: 1, 64>}, {transform_indices = @transform_3, window_bounds = array<i64: 128, 64>}]} {
    %c0 = arith.constant 0 : index
    %c0_0 = arith.constant 0 : index
    %0 = vector.load %arg2[%c0, %c0_0] : memref<128x64xbf16, #tpu.memory_space<vmem>>, vector<128x64xbf16>
    %c0_1 = arith.constant 0 : index
    %c0_2 = arith.constant 0 : index
    %1 = vector.load %arg3[%c0_1, %c0_2] : memref<64x64xbf16, #tpu.memory_space<vmem>>, vector<64x64xbf16>
    %cst = arith.constant dense<0.000000e+00> : vector<128x64xf32>
    %2 = tpu.matmul %0, %1, %cst {dimension_numbers = #tpu.dot_dimension_numbers<[1], [0], [0], [1], [0, 0, 1, 1], [], []>} : vector<128x64xbf16>, vector<64x64xbf16>, vector<128x64xf32> -> vector<128x64xf32>
    %c0_3 = arith.constant 0 : index
    %c0_4 = arith.constant 0 : index
    %3 = vector.load %arg4[%c0_3, %c0_4] : memref<1x64xf32, #tpu.memory_space<vmem>>, vector<1x64xf32>
    %4 = vector.broadcast %3 : vector<1x64xf32> to vector<128x64xf32>
    %5 = arith.addf %2, %4 : vector<128x64xf32>
    %6 = arith.negf %5 : vector<128x64xf32>
    %7 = math.exp %6 : vector<128x64xf32>
    %cst_5 = arith.constant 1.000000e+00 : f32
    %8 = vector.broadcast %cst_5 : f32 to vector<128x64xf32>
    %9 = arith.addf %8, %7 : vector<128x64xf32>
    %10 = arith.divf %8, %9 : vector<128x64xf32>
    %11 = arith.truncf %10 : vector<128x64xf32> to vector<128x64xbf16>
    %c0_6 = arith.constant 0 : index
    %c0_7 = arith.constant 0 : index
    %12 = vector.load %arg5[%c0_6, %c0_7] : memref<128x64xbf16, #tpu.memory_space<vmem>>, vector<128x64xbf16>
    tpu.vector_store %arg5[%c0_6, %c0_7], %11 {strides = array<i32>} : memref<128x64xbf16, #tpu.memory_space<vmem>>, vector<128x64xbf16>,
    return
  }
  func.func @transform_0(%arg0: i32, %arg1: i32) -> (i32, i32) {
    %c0_i32 = arith.constant 0 : i32
    %c0_i32_0 = arith.constant 0 : i32
    return %arg0, %c0_i32 : i32, i32
  }
  func.func @transform_1(%arg0: i32, %arg1: i32) -> (i32, i32) {
    %c0_i32 = arith.constant 0 : i32
    %c0_i32_0 = arith.constant 0 : i32
    return %c0_i32, %arg1 : i32, i32
  }
  func.func @transform_2(%arg0: i32, %arg1: i32) -> (i32, i32) {
    %c0_i32 = arith.constant 0 : i32
    %c0_i32_0 = arith.constant 0 : i32
    return %c0_i32, %arg1 : i32, i32
  }
  func.func @transform_3(%arg0: i32, %arg1: i32) -> (i32, i32) {
    %c0_i32 = arith.constant 0 : i32
    return %arg0, %arg1 : i32, i32
  }
}

module attributes {stable_mosaic.version = 11 : i64} {
  func.func @_mm_bias_act_kernel(%arg0: i32, %arg1: i32, %arg2: memref<128x64xbf16, #tpu.memory_space<vmem>>, %arg3: memref<64x512xbf16, #tpu.memory_space<vmem>>, %arg4: memref<1x512xf32, #tpu.memory_space<vmem>>, %arg5: memref<128x512xbf16, #tpu.memory_space<vmem>>) attributes {dimension_semantics = [#tpu.dimension_semantics<parallel>, #tpu.dimension_semantics<parallel>], iteration_bounds = array<i64: 1, 2>, scalar_prefetch = 0 : i64, scratch_operands = 0 : i64, tpu.core_type = #tpu.core_type<tc>, window_params = [{transform_indices = @transform_0, window_bounds = array<i64: 128, 64>}, {transform_indices = @transform_1, window_bounds = array<i64: 64, 512>}, {transform_indices = @transform_2, window_bounds = array<i64: 1, 512>}, {transform_indices = @transform_3, window_bounds = array<i64: 128, 512>}]} {
    %c0 = arith.constant 0 : index
    %c0_0 = arith.constant 0 : index
    %0 = vector.load %arg2[%c0, %c0_0] : memref<128x64xbf16, #tpu.memory_space<vmem>>, vector<128x64xbf16>
    %c0_1 = arith.constant 0 : index
    %c0_2 = arith.constant 0 : index
    %1 = vector.load %arg3[%c0_1, %c0_2] : memref<64x512xbf16, #tpu.memory_space<vmem>>, vector<64x512xbf16>
    %cst = arith.constant dense<0.000000e+00> : vector<128x512xf32>
    %2 = tpu.matmul %0, %1, %cst {dimension_numbers = #tpu.dot_dimension_numbers<[1], [0], [0], [1], [0, 0, 1, 1], [], []>} : vector<128x64xbf16>, vector<64x512xbf16>, vector<128x512xf32> -> vector<128x512xf32>
    %c0_3 = arith.constant 0 : index
    %c0_4 = arith.constant 0 : index
    %3 = vector.load %arg4[%c0_3, %c0_4] : memref<1x512xf32, #tpu.memory_space<vmem>>, vector<1x512xf32>
    %4 = vector.broadcast %3 : vector<1x512xf32> to vector<128x512xf32>
    %5 = arith.addf %2, %4 : vector<128x512xf32>
    %cst_5 = arith.constant 0.000000e+00 : f32
    %6 = vector.broadcast %cst_5 : f32 to vector<128x512xf32>
    %7 = arith.cmpf oge, %5, %6 : vector<128x512xf32>
    %cst_6 = arith.constant 0.00999999977 : f32
    %8 = vector.broadcast %cst_6 : f32 to vector<128x512xf32>
    %9 = arith.mulf %8, %5 : vector<128x512xf32>
    %10 = arith.select %7, %5, %9 : vector<128x512xi1>, vector<128x512xf32>
    %11 = arith.truncf %10 : vector<128x512xf32> to vector<128x512xbf16>
    %c0_7 = arith.constant 0 : index
    %c0_8 = arith.constant 0 : index
    %12 = vector.load %arg5[%c0_7, %c0_8] : memref<128x512xbf16, #tpu.memory_space<vmem>>, vector<128x512xbf16>
    tpu.vector_store %arg5[%c0_7, %c0_8], %11 {strides = array<i32>} : memref<128x512xbf16, #tpu.memory_space<vmem>>, vector<128x512xbf16>,
    return
  }
  func.func @transform_0(%arg0: i32, %arg1: i32) -> (i32, i32) {
    %c0_i32 = arith.constant 0 : i32
    %c0_i32_0 = arith.constant 0 : i32
    return %arg0, %c0_i32 : i32, i32
  }
  func.func @transform_1(%arg0: i32, %arg1: i32) -> (i32, i32) {
    %c0_i32 = arith.constant 0 : i32
    %c0_i32_0 = arith.constant 0 : i32
    return %c0_i32, %arg1 : i32, i32
  }
  func.func @transform_2(%arg0: i32, %arg1: i32) -> (i32, i32) {
    %c0_i32 = arith.constant 0 : i32
    %c0_i32_0 = arith.constant 0 : i32
    return %c0_i32, %arg1 : i32, i32
  }
  func.func @transform_3(%arg0: i32, %arg1: i32) -> (i32, i32) {
    %c0_i32 = arith.constant 0 : i32
    return %arg0, %arg1 : i32, i32
  }
}

module attributes {stable_mosaic.version = 11 : i64} {
  func.func @_conv3x3_kernel(%arg0: i32, %arg1: i32, %arg2: memref<1x1x288x192xbf16, #tpu.memory_space<vmem>>, %arg3: memref<3x192x32xbf16, #tpu.memory_space<vmem>>, %arg4: memref<1x32xf32, #tpu.memory_space<vmem>>, %arg5: memref<1x256x32xbf16, #tpu.memory_space<vmem>>) attributes {dimension_semantics = [#tpu.dimension_semantics<parallel>, #tpu.dimension_semantics<parallel>], iteration_bounds = array<i64: 2, 1>, scalar_prefetch = 0 : i64, scratch_operands = 0 : i64, tpu.core_type = #tpu.core_type<tc>, window_params = [{transform_indices = @transform_0, window_bounds = array<i64: 1, 1, 288, 192>}, {pipeline_mode = #tpu.pipeline_mode<synchronous>, transform_indices = @transform_1, window_bounds = array<i64: 3, 192, 32>}, {pipeline_mode = #tpu.pipeline_mode<synchronous>, transform_indices = @transform_2, window_bounds = array<i64: 1, 32>}, {transform_indices = @transform_3, window_bounds = array<i64: 1, 256, 32>}]} {
    %cst = arith.constant 0.000000e+00 : f32
    %0 = vector.broadcast %cst : f32 to vector<256x32xf32>
    %c0 = arith.constant 0 : index
    %c0_0 = arith.constant 0 : index
    %c0_1 = arith.constant 0 : index
    %c0_2 = arith.constant 0 : index
    %1 = vector.load %arg2[%c0, %c0_0, %c0_1, %c0_2] : memref<1x1x288x192xbf16, #tpu.memory_space<vmem>>, vector<1x1x256x192xbf16>
    %2 = vector.shape_cast %1 : vector<1x1x256x192xbf16> to vector<256x192xbf16>
    %c0_3 = arith.constant 0 : index
    %c0_4 = arith.constant 0 : index
    %c0_5 = arith.constant 0 : index
    %3 = vector.load %arg3[%c0_3, %c0_4, %c0_5] : memref<3x192x32xbf16, #tpu.memory_space<vmem>>, vector<1x192x32xbf16>
    %4 = vector.shape_cast %3 : vector<1x192x32xbf16> to vector<192x32xbf16>
    %cst_6 = arith.constant dense<0.000000e+00> : vector<256x32xf32>
    %5 = tpu.matmul %2, %4, %cst_6 {dimension_numbers = #tpu.dot_dimension_numbers<[1], [0], [0], [1], [0, 0, 1, 1], [], []>} : vector<256x192xbf16>, vector<192x32xbf16>, vector<256x32xf32> -> vector<256x32xf32>
    %6 = arith.addf %0, %5 : vector<256x32xf32>
    %c0_7 = arith.constant 0 : index
    %c0_8 = arith.constant 0 : index
    %c16 = arith.constant 16 : index
    %c0_9 = arith.constant 0 : index
    %7 = vector.load %arg2[%c0_7, %c0_8, %c16, %c0_9] : memref<1x1x288x192xbf16, #tpu.memory_space<vmem>>, vector<1x1x256x192xbf16>
    %8 = vector.shape_cast %7 : vector<1x1x256x192xbf16> to vector<256x192xbf16>
    %c1 = arith.constant 1 : index
    %c0_10 = arith.constant 0 : index
    %c0_11 = arith.constant 0 : index
    %9 = vector.load %arg3[%c1, %c0_10, %c0_11] : memref<3x192x32xbf16, #tpu.memory_space<vmem>>, vector<1x192x32xbf16>
    %10 = vector.shape_cast %9 : vector<1x192x32xbf16> to vector<192x32xbf16>
    %cst_12 = arith.constant dense<0.000000e+00> : vector<256x32xf32>
    %11 = tpu.matmul %8, %10, %cst_12 {dimension_numbers = #tpu.dot_dimension_numbers<[1], [0], [0], [1], [0, 0, 1, 1], [], []>} : vector<256x192xbf16>, vector<192x32xbf16>, vector<256x32xf32> -> vector<256x32xf32>
    %12 = arith.addf %6, %11 : vector<256x32xf32>
    %c0_13 = arith.constant 0 : index
    %c0_14 = arith.constant 0 : index
    %c32 = arith.constant 32 : index
    %c0_15 = arith.constant 0 : index
    %13 = vector.load %arg2[%c0_13, %c0_14, %c32, %c0_15] : memref<1x1x288x192xbf16, #tpu.memory_space<vmem>>, vector<1x1x256x192xbf16>
    %14 = vector.shape_cast %13 : vector<1x1x256x192xbf16> to vector<256x192xbf16>
    %c2 = arith.constant 2 : index
    %c0_16 = arith.constant 0 : index
    %c0_17 = arith.constant 0 : index
    %15 = vector.load %arg3[%c2, %c0_16, %c0_17] : memref<3x192x32xbf16, #tpu.memory_space<vmem>>, vector<1x192x32xbf16>
    %16 = vector.shape_cast %15 : vector<1x192x32xbf16> to vector<192x32xbf16>
    %cst_18 = arith.constant dense<0.000000e+00> : vector<256x32xf32>
    %17 = tpu.matmul %14, %16, %cst_18 {dimension_numbers = #tpu.dot_dimension_numbers<[1], [0], [0], [1], [0, 0, 1, 1], [], []>} : vector<256x192xbf16>, vector<192x32xbf16>, vector<256x32xf32> -> vector<256x32xf32>
    %18 = arith.addf %12, %17 : vector<256x32xf32>
    %c0_19 = arith.constant 0 : index
    %c0_20 = arith.constant 0 : index
    %19 = vector.load %arg4[%c0_19, %c0_20] : memref<1x32xf32, #tpu.memory_space<vmem>>, vector<1x32xf32>
    %20 = vector.broadcast %19 : vector<1x32xf32> to vector<256x32xf32>
    %21 = arith.addf %18, %20 : vector<256x32xf32>
    %cst_21 = arith.constant 0.000000e+00 : f32
    %22 = vector.broadcast %cst_21 : f32 to vector<256x32xf32>
    %23 = arith.maximumf %21, %22 : vector<256x32xf32>
    %24 = arith.truncf %23 : vector<256x32xf32> to vector<256x32xbf16>
    %c0_22 = arith.constant 0 : index
    %c0_23 = arith.constant 0 : index
    %c0_24 = arith.constant 0 : index
    %25 = vector.load %arg5[%c0_22, %c0_23, %c0_24] : memref<1x256x32xbf16, #tpu.memory_space<vmem>>, vector<1x256x32xbf16>
    %26 = vector.shape_cast %25 : vector<1x256x32xbf16> to vector<256x32xbf16>
    %27 = vector.shape_cast %24 : vector<256x32xbf16> to vector<1x256x32xbf16>
    tpu.vector_store %arg5[%c0_22, %c0_23, %c0_24], %27 {strides = array<i32>} : memref<1x256x32xbf16, #tpu.memory_space<vmem>>, vector<1x256x32xbf16>,
    return
  }
  func.func @transform_0(%arg0: i32, %arg1: i32) -> (i32, i32, i32, i32) {
    %c0_i32 = arith.constant 0 : i32
    %c0_i32_0 = arith.constant 0 : i32
    %c0_i32_1 = arith.constant 0 : i32
    return %arg0, %arg1, %c0_i32, %c0_i32_0 : i32, i32, i32, i32
  }
  func.func @transform_1(%arg0: i32, %arg1: i32) -> (i32, i32, i32) {
    %c0_i32 = arith.constant 0 : i32
    %c0_i32_0 = arith.constant 0 : i32
    %c0_i32_1 = arith.constant 0 : i32
    %c0_i32_2 = arith.constant 0 : i32
    return %c0_i32, %c0_i32_0, %c0_i32_1 : i32, i32, i32
  }
  func.func @transform_2(%arg0: i32, %arg1: i32) -> (i32, i32) {
    %c0_i32 = arith.constant 0 : i32
    %c0_i32_0 = arith.constant 0 : i32
    %c0_i32_1 = arith.constant 0 : i32
    return %c0_i32, %c0_i32_0 : i32, i32
  }
  func.func @transform_3(%arg0: i32, %arg1: i32) -> (i32, i32, i32) {
    %c0_i32 = arith.constant 0 : i32
    %c0_i32_0 = arith.constant 0 : i32
    return %arg0, %arg1, %c0_i32 : i32, i32, i32
  }
}

module attributes {stable_mosaic.version = 11 : i64} {
  func.func @_mm_bias_act_kernel(%arg0: i32, %arg1: i32, %arg2: memref<512x32xbf16, #tpu.memory_space<vmem>>, %arg3: memref<32x32xbf16, #tpu.memory_space<vmem>>, %arg4: memref<1x32xf32, #tpu.memory_space<vmem>>, %arg5: memref<512x32xbf16, #tpu.memory_space<vmem>>) attributes {dimension_semantics = [#tpu.dimension_semantics<parallel>, #tpu.dimension_semantics<parallel>], iteration_bounds = array<i64: 1, 1>, scalar_prefetch = 0 : i64, scratch_operands = 0 : i64, tpu.core_type = #tpu.core_type<tc>, window_params = [{transform_indices = @transform_0, window_bounds = array<i64: 512, 32>}, {transform_indices = @transform_1, window_bounds = array<i64: 32, 32>}, {transform_indices = @transform_2, window_bounds = array<i64: 1, 32>}, {transform_indices = @transform_3, window_bounds = array<i64: 512, 32>}]} {
    %c0 = arith.constant 0 : index
    %c0_0 = arith.constant 0 : index
    %0 = vector.load %arg2[%c0, %c0_0] : memref<512x32xbf16, #tpu.memory_space<vmem>>, vector<512x32xbf16>
    %c0_1 = arith.constant 0 : index
    %c0_2 = arith.constant 0 : index
    %1 = vector.load %arg3[%c0_1, %c0_2] : memref<32x32xbf16, #tpu.memory_space<vmem>>, vector<32x32xbf16>
    %cst = arith.constant dense<0.000000e+00> : vector<512x32xf32>
    %2 = tpu.matmul %0, %1, %cst {dimension_numbers = #tpu.dot_dimension_numbers<[1], [0], [0], [1], [0, 0, 1, 1], [], []>} : vector<512x32xbf16>, vector<32x32xbf16>, vector<512x32xf32> -> vector<512x32xf32>
    %c0_3 = arith.constant 0 : index
    %c0_4 = arith.constant 0 : index
    %3 = vector.load %arg4[%c0_3, %c0_4] : memref<1x32xf32, #tpu.memory_space<vmem>>, vector<1x32xf32>
    %4 = vector.broadcast %3 : vector<1x32xf32> to vector<512x32xf32>
    %5 = arith.addf %2, %4 : vector<512x32xf32>
    %6 = arith.negf %5 : vector<512x32xf32>
    %7 = math.exp %6 : vector<512x32xf32>
    %cst_5 = arith.constant 1.000000e+00 : f32
    %8 = vector.broadcast %cst_5 : f32 to vector<512x32xf32>
    %9 = arith.addf %8, %7 : vector<512x32xf32>
    %10 = arith.divf %8, %9 : vector<512x32xf32>
    %11 = arith.truncf %10 : vector<512x32xf32> to vector<512x32xbf16>
    %c0_6 = arith.constant 0 : index
    %c0_7 = arith.constant 0 : index
    %12 = vector.load %arg5[%c0_6, %c0_7] : memref<512x32xbf16, #tpu.memory_space<vmem>>, vector<512x32xbf16>
    tpu.vector_store %arg5[%c0_6, %c0_7], %11 {strides = array<i32>} : memref<512x32xbf16, #tpu.memory_space<vmem>>, vector<512x32xbf16>,
    return
  }
  func.func @transform_0(%arg0: i32, %arg1: i32) -> (i32, i32) {
    %c0_i32 = arith.constant 0 : i32
    %c0_i32_0 = arith.constant 0 : i32
    return %arg0, %c0_i32 : i32, i32
  }
  func.func @transform_1(%arg0: i32, %arg1: i32) -> (i32, i32) {
    %c0_i32 = arith.constant 0 : i32
    %c0_i32_0 = arith.constant 0 : i32
    return %c0_i32, %arg1 : i32, i32
  }
  func.func @transform_2(%arg0: i32, %arg1: i32) -> (i32, i32) {
    %c0_i32 = arith.constant 0 : i32
    %c0_i32_0 = arith.constant 0 : i32
    return %c0_i32, %arg1 : i32, i32
  }
  func.func @transform_3(%arg0: i32, %arg1: i32) -> (i32, i32) {
    %c0_i32 = arith.constant 0 : i32
    return %arg0, %arg1 : i32, i32
  }
}

module attributes {stable_mosaic.version = 11 : i64} {
  func.func @_mm_bias_act_kernel(%arg0: i32, %arg1: i32, %arg2: memref<512x32xbf16, #tpu.memory_space<vmem>>, %arg3: memref<32x32xbf16, #tpu.memory_space<vmem>>, %arg4: memref<1x32xf32, #tpu.memory_space<vmem>>, %arg5: memref<512x32xf32, #tpu.memory_space<vmem>>) attributes {dimension_semantics = [#tpu.dimension_semantics<parallel>, #tpu.dimension_semantics<parallel>], iteration_bounds = array<i64: 1, 1>, scalar_prefetch = 0 : i64, scratch_operands = 0 : i64, tpu.core_type = #tpu.core_type<tc>, window_params = [{transform_indices = @transform_0, window_bounds = array<i64: 512, 32>}, {transform_indices = @transform_1, window_bounds = array<i64: 32, 32>}, {transform_indices = @transform_2, window_bounds = array<i64: 1, 32>}, {transform_indices = @transform_3, window_bounds = array<i64: 512, 32>}]} {
    %c0 = arith.constant 0 : index
    %c0_0 = arith.constant 0 : index
    %0 = vector.load %arg2[%c0, %c0_0] : memref<512x32xbf16, #tpu.memory_space<vmem>>, vector<512x32xbf16>
    %c0_1 = arith.constant 0 : index
    %c0_2 = arith.constant 0 : index
    %1 = vector.load %arg3[%c0_1, %c0_2] : memref<32x32xbf16, #tpu.memory_space<vmem>>, vector<32x32xbf16>
    %cst = arith.constant dense<0.000000e+00> : vector<512x32xf32>
    %2 = tpu.matmul %0, %1, %cst {dimension_numbers = #tpu.dot_dimension_numbers<[1], [0], [0], [1], [0, 0, 1, 1], [], []>} : vector<512x32xbf16>, vector<32x32xbf16>, vector<512x32xf32> -> vector<512x32xf32>
    %c0_3 = arith.constant 0 : index
    %c0_4 = arith.constant 0 : index
    %3 = vector.load %arg4[%c0_3, %c0_4] : memref<1x32xf32, #tpu.memory_space<vmem>>, vector<1x32xf32>
    %4 = vector.broadcast %3 : vector<1x32xf32> to vector<512x32xf32>
    %5 = arith.addf %2, %4 : vector<512x32xf32>
    %cst_5 = arith.constant 0.000000e+00 : f32
    %6 = vector.broadcast %cst_5 : f32 to vector<512x32xf32>
    %7 = arith.cmpf oge, %5, %6 : vector<512x32xf32>
    %cst_6 = arith.constant 0.00999999977 : f32
    %8 = vector.broadcast %cst_6 : f32 to vector<512x32xf32>
    %9 = arith.mulf %8, %5 : vector<512x32xf32>
    %10 = arith.select %7, %5, %9 : vector<512x32xi1>, vector<512x32xf32>
    %c0_7 = arith.constant 0 : index
    %c0_8 = arith.constant 0 : index
    %11 = vector.load %arg5[%c0_7, %c0_8] : memref<512x32xf32, #tpu.memory_space<vmem>>, vector<512x32xf32>
    tpu.vector_store %arg5[%c0_7, %c0_8], %10 {strides = array<i32>} : memref<512x32xf32, #tpu.memory_space<vmem>>, vector<512x32xf32>,
    return
  }
  func.func @transform_0(%arg0: i32, %arg1: i32) -> (i32, i32) {
    %c0_i32 = arith.constant 0 : i32
    %c0_i32_0 = arith.constant 0 : i32
    return %arg0, %c0_i32 : i32, i32
  }
  func.func @transform_1(%arg0: i32, %arg1: i32) -> (i32, i32) {
    %c0_i32 = arith.constant 0 : i32
    %c0_i32_0 = arith.constant 0 : i32
    return %c0_i32, %arg1 : i32, i32
  }
  func.func @transform_2(%arg0: i32, %arg1: i32) -> (i32, i32) {
    %c0_i32 = arith.constant 0 : i32
    %c0_i32_0 = arith.constant 0 : i32
    return %c0_i32, %arg1 : i32, i32
  }
  func.func @transform_3(%arg0: i32, %arg1: i32) -> (i32, i32) {
    %c0_i32 = arith.constant 0 : i32
    return %arg0, %arg1 : i32, i32
  }
}

</mosaic_0001>

<bundles_post_ra>
// kernel: cmptrans512_forward.12
= control target key start
LH: loop header
LB: loop body
LE: loop exit
PB: predicated region body
PF: predicated region fallthrough
CT: control target
= control target key end

     0   :  { %s1319_s12 = smov 0   ;;  %s1321_s13 = smov 0   ;;  %s1627_s0 = inlined_call_operand.vmem [shape: bf16[4096,28], index: 0, kind: input, shape index: {}]   ;;  %s1628_s1 = inlined_call_operand.vmem [shape: bf16[28,2], index: 1, kind: input, shape index: {}]   ;;  %s1629_s2 = inlined_call_operand.vmem [shape: f32[1,2], index: 2, kind: input, shape index: {}]   ;;  %s1630_s3 = inlined_call_operand.vmem [shape: f32[4096,2], index: 3, kind: output, shape index: {}]  }
   0x1   :  { %s1323_s14 = smov 0  }
   0x2 LB: > { %s25_s15 = sadd.s32 1, %s1293_s13  ;;  %p1035_p0 = scmp.ge.s32.totalorder %s1297_s14, 1  ;;  %s1297_s14 = sphi %s1323_s14, %s13_s14   ;;  %s1293_s13 = sphi %s1321_s13, %s1632_s13   ;;  %s1289_s12 = sphi %s1319_s12, %s1631_s12  }
   0x3   : > { %p27_p1 = scmp.ge.s32.totalorder %s25_s15, 8  ;;  %p169_p2 = scmp.lt.s32.totalorder %s1297_s14, 9 }
   0x5   : > { %s1634_s15 = smov (%p27_p1, %s25_s15), 0  ;;  %p170_p3 = pnand %p1035_p0, %p169_p2 }
   0x6   : > { %s1036_s20 = sshll.u32 (!%p170_p3), %s1289_s12, 6 }
   0x7   : > { %173 = sbr.rel (%p170_p3) target bundleno = 279 (0x117), region = 32  ;;  %p204_p4 = scmp.lt.s32.totalorder (!%p170_p3), %s1036_s20, 511 }
   0xc   : > { %v1241_v0 = vld [vmem:[%s1628_s1 + $0x8] sm:$0x3f]   ;;  %vm569_vm0 = vcmask 1045504   ;;  %v1242_v1 = vld [vmem:[%s1628_s1] sm:$0xff]   ;;  %s1636_s20 = smov (!%p204_p4, %s1036_s20), 511  ;;  %vm472_vm1 = vcmask 228352  }
   0xd   : > { %1215 = vmatprep.subr.msk.bf16.mxu0 %vm569_vm0, %v1241_v0  ;;  %1216 = vmatprep.subr.msk.bf16.mxu1 %vm569_vm0, %v1241_v0  ;;  %v571_v2 = vsel %vm569_vm0, %v1241_v0, 0  ;;  %s1037_s21 = sshll.u32 %s1636_s20, 2  ;;  %s1039_s25 = sshll.u32 %s1636_s20, 3  ;;  %v1419_v35 = vld [vmem:[%s1629_s2] ss:$0 sm:$0xff]  ;;  %vm862_vm2 = vcmask 15360  }
   0xe   : > { %1144 = vmatpush3.bf16.msra.mxu0 %v571_v2  ;;  %1213 = vmatpush3.bf16.msra.mxu1 %v571_v2  ;;  %s1349_s24 = scalar_lea.vmem %s1627_s0, %s1037_s21  ;;  %s1424_s30 = scalar_lea.vmem %s1630_s3, %s1039_s25 }
   0xf   : > { %1145 = vmatprep.subr.bf16.mxu0 %v1242_v1  ;;  %1212 = vmatprep.subr.bf16.mxu1 %v1242_v1  ;;  %v1243_v3 = vld [vmem:[%s1349_s24] sm:$0xff]   ;;  %v1245_v5 = vld [vmem:[%s1349_s24 + $0x8] sm:$0xff]   ;;  %v1247_v7 = vld [vmem:[%s1349_s24 + $0x10] sm:$0xff]  }
  0x10   : > { %v1244_v4 = vld [vmem:[%s1349_s24 + $0x80] sm:$0xff]   ;;  %1147 = vmatprep.mubr.msk.bf16.mxu0 %vm472_vm1, %v1243_v3  ;;  %v1246_v6 = vld [vmem:[%s1349_s24 + $0x88] sm:$0xff]   ;;  %v1248_v8 = vld [vmem:[%s1349_s24 + $0x90] sm:$0xff]  }
  0x11   : > { %1179 = vmatprep.mubr.msk.bf16.mxu1 %vm472_vm1, %v1244_v4  ;;  %v1249_v9 = vld [vmem:[%s1349_s24 + $0x18] sm:$0xff]   ;;  %v1251_v11 = vld [vmem:[%s1349_s24 + $0x20] sm:$0xff]   ;;  %v1253_v13 = vld [vmem:[%s1349_s24 + $0x28] sm:$0xff]  }
  0x12   : > { %1146 = vmatpush3.bf16.msra.mxu0 %v1242_v1  ;;  %1214 = vmatpush3.bf16.msra.mxu1 %v1242_v1  ;;  %v1250_v10 = vld [vmem:[%s1349_s24 + $0x98] sm:$0xff]   ;;  %v1252_v12 = vld [vmem:[%s1349_s24 + $0xa0] sm:$0xff]   ;;  %v1254_v14 = vld [vmem:[%s1349_s24 + $0xa8] sm:$0xff]  }
  0x13   : > { %v1255_v15 = vld [vmem:[%s1349_s24 + $0x30] sm:$0xff]   ;;  %v1257_v17 = vld [vmem:[%s1349_s24 + $0x38] sm:$0xff]   ;;  %v1259_v19 = vld [vmem:[%s1349_s24 + $0x40] sm:$0xff]  }
  0x14   : > { %v1256_v16 = vld [vmem:[%s1349_s24 + $0xb0] sm:$0xff]   ;;  %v1258_v18 = vld [vmem:[%s1349_s24 + $0xb8] sm:$0xff]   ;;  %v1260_v20 = vld [vmem:[%s1349_s24 + $0xc0] sm:$0xff]  }
  0x15   : > { %1148 = vmatmul.mubr.msk.bf16.vlgmr.msra.gmra.mxu0 %vm472_vm1, %v1245_v5  ;;  %1180 = vmatmul.mubr.msk.bf16.vlgmr.msra.gmra.mxu1 %vm472_vm1, %v1246_v6  ;;  %v1261_v21 = vld [vmem:[%s1349_s24 + $0x48] sm:$0xff]   ;;  %v1263_v23 = vld [vmem:[%s1349_s24 + $0x50] sm:$0xff]   ;;  %v1265_v25 = vld [vmem:[%s1349_s24 + $0x58] sm:$0xff]  }
  0x16   : > { %1151 = vmatprep.mubr.msk.bf16.mxu0 %vm472_vm1, %v1247_v7  ;;  %1183 = vmatprep.mubr.msk.bf16.mxu1 %vm472_vm1, %v1248_v8  ;;  %v1262_v22 = vld [vmem:[%s1349_s24 + $0xc8] sm:$0xff]   ;;  %v1264_v24 = vld [vmem:[%s1349_s24 + $0xd0] sm:$0xff]   ;;  %v1266_v26 = vld [vmem:[%s1349_s24 + $0xd8] sm:$0xff]  }
  0x17   : > { %v1267_v27 = vld [vmem:[%s1349_s24 + $0x60] sm:$0xff]   ;;  %v1269_v29 = vld [vmem:[%s1349_s24 + $0x68] sm:$0xff]   ;;  %v1271_v31 = vld [vmem:[%s1349_s24 + $0x70] sm:$0xff]  }
  0x18   : > { %v1268_v28 = vld [vmem:[%s1349_s24 + $0xe0] sm:$0xff]   ;;  %v1270_v30 = vld [vmem:[%s1349_s24 + $0xe8] sm:$0xff]   ;;  %v1272_v32 = vld [vmem:[%s1349_s24 + $0xf0] sm:$0xff]  }
  0x19   : > { %v1273_v33 = vld [vmem:[%s1349_s24 + $0x78] sm:$0xff]  }
  0x1a   : > { %v1274_v34 = vld [vmem:[%s1349_s24 + $0xf8] sm:$0xff]  }
  0x1d   : > { %1152 = vmatmul.mubr.msk.bf16.gmra.mxu0 %vm472_vm1, %v1249_v9  ;;  %1184 = vmatmul.mubr.msk.bf16.gmra.mxu1 %vm472_vm1, %v1250_v10 }
  0x1e   : > { %1155 = vmatprep.mubr.msk.bf16.mxu0 %vm472_vm1, %v1251_v11  ;;  %1187 = vmatprep.mubr.msk.bf16.mxu1 %vm472_vm1, %v1252_v12 }
  0x25   : > { %1156 = vmatmul.mubr.msk.bf16.gmra.mxu0 %vm472_vm1, %v1253_v13  ;;  %1188 = vmatmul.mubr.msk.bf16.gmra.mxu1 %vm472_vm1, %v1254_v14 }
  0x26   : > { %1159 = vmatprep.mubr.msk.bf16.mxu0 %vm472_vm1, %v1255_v15  ;;  %1191 = vmatprep.mubr.msk.bf16.mxu1 %vm472_vm1, %v1256_v16 }
  0x2d   : > { %1160 = vmatmul.mubr.msk.bf16.gmra.mxu0 %vm472_vm1, %v1257_v17  ;;  %1192 = vmatmul.mubr.msk.bf16.gmra.mxu1 %vm472_vm1, %v1258_v18 }
  0x2e   : > { %1163 = vmatprep.mubr.msk.bf16.mxu0 %vm472_vm1, %v1259_v19  ;;  %1195 = vmatprep.mubr.msk.bf16.mxu1 %vm472_vm1, %v1260_v20 }
  0x35   : > { %1164 = vmatmul.mubr.msk.bf16.gmra.mxu0 %vm472_vm1, %v1261_v21  ;;  %1196 = vmatmul.mubr.msk.bf16.gmra.mxu1 %vm472_vm1, %v1262_v22 }
  0x36   : > { %1167 = vmatprep.mubr.msk.bf16.mxu0 %vm472_vm1, %v1263_v23  ;;  %1199 = vmatprep.mubr.msk.bf16.mxu1 %vm472_vm1, %v1264_v24 }
  0x3d   : > { %1168 = vmatmul.mubr.msk.bf16.gmra.mxu0 %vm472_vm1, %v1265_v25  ;;  %1200 = vmatmul.mubr.msk.bf16.gmra.mxu1 %vm472_vm1, %v1266_v26 }
  0x3e   : > { %1171 = vmatprep.mubr.msk.bf16.mxu0 %vm472_vm1, %v1267_v27  ;;  %1203 = vmatprep.mubr.msk.bf16.mxu1 %vm472_vm1, %v1268_v28 }
  0x45   : > { %1172 = vmatmul.mubr.msk.bf16.gmra.mxu0 %vm472_vm1, %v1269_v29  ;;  %1204 = vmatmul.mubr.msk.bf16.gmra.mxu1 %vm472_vm1, %v1270_v30 }
  0x46   : > { %1175 = vmatprep.mubr.msk.bf16.mxu0 %vm472_vm1, %v1271_v31  ;;  %1207 = vmatprep.mubr.msk.bf16.mxu1 %vm472_vm1, %v1272_v32 }
  0x4d   : > { %1176 = vmatmul.mubr.msk.bf16.gmra.mxu0 %vm472_vm1, %v1273_v33  ;;  %1208 = vmatmul.mubr.msk.bf16.gmra.mxu1 %vm472_vm1, %v1274_v34 }
  0xd5   : > { %v1149_v36 = vpop.f32.mrf.mxu0  ;;  %v1181_v38 = vpop.f32.mrf.mxu1 }
  0xd6   : > { %v616_v37 = vadd.f32 %v1149_v36, %v1419_v35  ;;  %v744_v39 = vadd.f32 %v1181_v38, %v1419_v35 }
  0xd7   : > { %v607_v40 = vpop.f32.mrf.mxu0  ;;  %v735_v42 = vpop.f32.mrf.mxu1 }
  0xd8   : > { %865 = vst.msk [vmem:[%s1424_s30 + $0x10] sm:$0xff] %vm862_vm2, %v616_v37  ;;  %v608_v41 = vadd.f32 %v1419_v35, %v607_v40  ;;  %897 = vst.msk [vmem:[%s1424_s30 + $0x110] sm:$0xff] %vm862_vm2, %v744_v39  ;;  %v736_v43 = vadd.f32 %v1419_v35, %v735_v42 }
  0xd9   : > { %v1150_v44 = vpop.f32.mrf.mxu0  ;;  %v1182_v46 = vpop.f32.mrf.mxu1 }
  0xda   : > { %863 = vst.msk [vmem:[%s1424_s30] sm:$0xff] %vm862_vm2, %v608_v41  ;;  %v619_v45 = vadd.f32 %v1150_v44, %v1419_v35  ;;  %895 = vst.msk [vmem:[%s1424_s30 + $0x100] sm:$0xff] %vm862_vm2, %v736_v43  ;;  %v747_v47 = vadd.f32 %v1182_v46, %v1419_v35 }
  0xdb   : > { %v610_v48 = vpop.f32.mrf.mxu0  ;;  %v738_v50 = vpop.f32.mrf.mxu1 }
  0xdc   : > { %866 = vst.msk [vmem:[%s1424_s30 + $0x18] sm:$0xff] %vm862_vm2, %v619_v45  ;;  %v611_v49 = vadd.f32 %v1419_v35, %v610_v48  ;;  %898 = vst.msk [vmem:[%s1424_s30 + $0x118] sm:$0xff] %vm862_vm2, %v747_v47  ;;  %v739_v51 = vadd.f32 %v1419_v35, %v738_v50 }
  0xdd   : > { %v1153_v52 = vpop.f32.mrf.mxu0  ;;  %v1185_v54 = vpop.f32.mrf.mxu1 }
  0xde   : > { %864 = vst.msk [vmem:[%s1424_s30 + $0x8] sm:$0xff] %vm862_vm2, %v611_v49  ;;  %v632_v53 = vadd.f32 %v1153_v52, %v1419_v35  ;;  %896 = vst.msk [vmem:[%s1424_s30 + $0x108] sm:$0xff] %vm862_vm2, %v739_v51  ;;  %v760_v55 = vadd.f32 %v1185_v54, %v1419_v35 }
  0xdf   : > { %v623_v56 = vpop.f32.mrf.mxu0  ;;  %v751_v58 = vpop.f32.mrf.mxu1 }
  0xe0   : > { %869 = vst.msk [vmem:[%s1424_s30 + $0x30] sm:$0xff] %vm862_vm2, %v632_v53  ;;  %v624_v57 = vadd.f32 %v1419_v35, %v623_v56  ;;  %901 = vst.msk [vmem:[%s1424_s30 + $0x130] sm:$0xff] %vm862_vm2, %v760_v55  ;;  %v752_v59 = vadd.f32 %v1419_v35, %v751_v58 }
  0xe1   : > { %v1154_v60 = vpop.f32.mrf.mxu0  ;;  %v1186_v62 = vpop.f32.mrf.mxu1 }
  0xe2   : > { %867 = vst.msk [vmem:[%s1424_s30 + $0x20] sm:$0xff] %vm862_vm2, %v624_v57  ;;  %v635_v61 = vadd.f32 %v1154_v60, %v1419_v35  ;;  %899 = vst.msk [vmem:[%s1424_s30 + $0x120] sm:$0xff] %vm862_vm2, %v752_v59  ;;  %v763_v63 = vadd.f32 %v1186_v62, %v1419_v35 }
  0xe3   : > { %v626_v0 = vpop.f32.mrf.mxu0  ;;  %v754_v2 = vpop.f32.mrf.mxu1 }
  0xe4   : > { %870 = vst.msk [vmem:[%s1424_s30 + $0x38] sm:$0xff] %vm862_vm2, %v635_v61  ;;  %v627_v1 = vadd.f32 %v1419_v35, %v626_v0  ;;  %902 = vst.msk [vmem:[%s1424_s30 + $0x138] sm:$0xff] %vm862_vm2, %v763_v63  ;;  %v755_v3 = vadd.f32 %v1419_v35, %v754_v2 }
  0xe5   : > { %v1157_v4 = vpop.f32.mrf.mxu0  ;;  %v1189_v6 = vpop.f32.mrf.mxu1 }
  0xe6   : > { %868 = vst.msk [vmem:[%s1424_s30 + $0x28] sm:$0xff] %vm862_vm2, %v627_v1  ;;  %v648_v5 = vadd.f32 %v1157_v4, %v1419_v35  ;;  %900 = vst.msk [vmem:[%s1424_s30 + $0x128] sm:$0xff] %vm862_vm2, %v755_v3  ;;  %v776_v7 = vadd.f32 %v1189_v6, %v1419_v35 }
  0xe7   : > { %v639_v8 = vpop.f32.mrf.mxu0  ;;  %v767_v10 = vpop.f32.mrf.mxu1 }
  0xe8   : > { %873 = vst.msk [vmem:[%s1424_s30 + $0x50] sm:$0xff] %vm862_vm2, %v648_v5  ;;  %v640_v9 = vadd.f32 %v1419_v35, %v639_v8  ;;  %905 = vst.msk [vmem:[%s1424_s30 + $0x150] sm:$0xff] %vm862_vm2, %v776_v7  ;;  %v768_v11 = vadd.f32 %v1419_v35, %v767_v10 }
  0xe9   : > { %v1158_v12 = vpop.f32.mrf.mxu0  ;;  %v1190_v14 = vpop.f32.mrf.mxu1 }
  0xea   : > { %871 = vst.msk [vmem:[%s1424_s30 + $0x40] sm:$0xff] %vm862_vm2, %v640_v9  ;;  %v651_v13 = vadd.f32 %v1158_v12, %v1419_v35  ;;  %903 = vst.msk [vmem:[%s1424_s30 + $0x140] sm:$0xff] %vm862_vm2, %v768_v11  ;;  %v779_v15 = vadd.f32 %v1190_v14, %v1419_v35 }
  0xeb   : > { %v642_v16 = vpop.f32.mrf.mxu0  ;;  %v770_v18 = vpop.f32.mrf.mxu1 }
  0xec   : > { %874 = vst.msk [vmem:[%s1424_s30 + $0x58] sm:$0xff] %vm862_vm2, %v651_v13  ;;  %v643_v17 = vadd.f32 %v1419_v35, %v642_v16  ;;  %906 = vst.msk [vmem:[%s1424_s30 + $0x158] sm:$0xff] %vm862_vm2, %v779_v15  ;;  %v771_v19 = vadd.f32 %v1419_v35, %v770_v18 }
  0xed   : > { %v1161_v20 = vpop.f32.mrf.mxu0  ;;  %v1193_v22 = vpop.f32.mrf.mxu1 }
  0xee   : > { %872 = vst.msk [vmem:[%s1424_s30 + $0x48] sm:$0xff] %vm862_vm2, %v643_v17  ;;  %v664_v21 = vadd.f32 %v1161_v20, %v1419_v35  ;;  %904 = vst.msk [vmem:[%s1424_s30 + $0x148] sm:$0xff] %vm862_vm2, %v771_v19  ;;  %v792_v23 = vadd.f32 %v1193_v22, %v1419_v35 }
  0xef   : > { %v655_v24 = vpop.f32.mrf.mxu0  ;;  %v783_v26 = vpop.f32.mrf.mxu1 }
  0xf0   : > { %877 = vst.msk [vmem:[%s1424_s30 + $0x70] sm:$0xff] %vm862_vm2, %v664_v21  ;;  %v656_v25 = vadd.f32 %v1419_v35, %v655_v24  ;;  %909 = vst.msk [vmem:[%s1424_s30 + $0x170] sm:$0xff] %vm862_vm2, %v792_v23  ;;  %v784_v27 = vadd.f32 %v1419_v35, %v783_v26 }
  0xf1   : > { %v1162_v28 = vpop.f32.mrf.mxu0  ;;  %v1194_v30 = vpop.f32.mrf.mxu1 }
  0xf2   : > { %875 = vst.msk [vmem:[%s1424_s30 + $0x60] sm:$0xff] %vm862_vm2, %v656_v25  ;;  %v667_v29 = vadd.f32 %v1162_v28, %v1419_v35  ;;  %907 = vst.msk [vmem:[%s1424_s30 + $0x160] sm:$0xff] %vm862_vm2, %v784_v27  ;;  %v795_v31 = vadd.f32 %v1194_v30, %v1419_v35 }
  0xf3   : > { %v658_v32 = vpop.f32.mrf.mxu0  ;;  %v786_v34 = vpop.f32.mrf.mxu1 }
  0xf4   : > { %878 = vst.msk [vmem:[%s1424_s30 + $0x78] sm:$0xff] %vm862_vm2, %v667_v29  ;;  %v659_v33 = vadd.f32 %v1419_v35, %v658_v32  ;;  %910 = vst.msk [vmem:[%s1424_s30 + $0x178] sm:$0xff] %vm862_vm2, %v795_v31  ;;  %v787_v36 = vadd.f32 %v1419_v35, %v786_v34 }
  0xf5   : > { %v1165_v37 = vpop.f32.mrf.mxu0  ;;  %v1197_v39 = vpop.f32.mrf.mxu1 }
  0xf6   : > { %876 = vst.msk [vmem:[%s1424_s30 + $0x68] sm:$0xff] %vm862_vm2, %v659_v33  ;;  %v680_v38 = vadd.f32 %v1165_v37, %v1419_v35  ;;  %908 = vst.msk [vmem:[%s1424_s30 + $0x168] sm:$0xff] %vm862_vm2, %v787_v36  ;;  %v808_v40 = vadd.f32 %v1197_v39, %v1419_v35 }
  0xf7   : > { %v671_v41 = vpop.f32.mrf.mxu0  ;;  %v799_v43 = vpop.f32.mrf.mxu1 }
  0xf8   : > { %881 = vst.msk [vmem:[%s1424_s30 + $0x90] sm:$0xff] %vm862_vm2, %v680_v38  ;;  %v672_v42 = vadd.f32 %v1419_v35, %v671_v41  ;;  %913 = vst.msk [vmem:[%s1424_s30 + $0x190] sm:$0xff] %vm862_vm2, %v808_v40  ;;  %v800_v44 = vadd.f32 %v1419_v35, %v799_v43 }
  0xf9   : > { %v1166_v45 = vpop.f32.mrf.mxu0  ;;  %v1198_v47 = vpop.f32.mrf.mxu1 }
  0xfa   : > { %879 = vst.msk [vmem:[%s1424_s30 + $0x80] sm:$0xff] %vm862_vm2, %v672_v42  ;;  %v683_v46 = vadd.f32 %v1166_v45, %v1419_v35  ;;  %911 = vst.msk [vmem:[%s1424_s30 + $0x180] sm:$0xff] %vm862_vm2, %v800_v44  ;;  %v811_v48 = vadd.f32 %v1198_v47, %v1419_v35 }
  0xfb   : > { %v674_v49 = vpop.f32.mrf.mxu0  ;;  %v802_v51 = vpop.f32.mrf.mxu1 }
  0xfc   : > { %882 = vst.msk [vmem:[%s1424_s30 + $0x98] sm:$0xff] %vm862_vm2, %v683_v46  ;;  %v675_v50 = vadd.f32 %v1419_v35, %v674_v49  ;;  %914 = vst.msk [vmem:[%s1424_s30 + $0x198] sm:$0xff] %vm862_vm2, %v811_v48  ;;  %v803_v52 = vadd.f32 %v1419_v35, %v802_v51 }
  0xfd   : > { %v1169_v53 = vpop.f32.mrf.mxu0  ;;  %v1201_v55 = vpop.f32.mrf.mxu1 }
  0xfe   : > { %880 = vst.msk [vmem:[%s1424_s30 + $0x88] sm:$0xff] %vm862_vm2, %v675_v50  ;;  %v696_v54 = vadd.f32 %v1169_v53, %v1419_v35  ;;  %912 = vst.msk [vmem:[%s1424_s30 + $0x188] sm:$0xff] %vm862_vm2, %v803_v52  ;;  %v824_v56 = vadd.f32 %v1201_v55, %v1419_v35 }
  0xff   : > { %v687_v57 = vpop.f32.mrf.mxu0  ;;  %v815_v59 = vpop.f32.mrf.mxu1 }
 0x100   : > { %885 = vst.msk [vmem:[%s1424_s30 + $0xb0] sm:$0xff] %vm862_vm2, %v696_v54  ;;  %v688_v58 = vadd.f32 %v1419_v35, %v687_v57  ;;  %917 = vst.msk [vmem:[%s1424_s30 + $0x1b0] sm:$0xff] %vm862_vm2, %v824_v56  ;;  %v816_v60 = vadd.f32 %v1419_v35, %v815_v59 }
 0x101   : > { %v1170_v61 = vpop.f32.mrf.mxu0  ;;  %v1202_v63 = vpop.f32.mrf.mxu1 }
 0x102   : > { %883 = vst.msk [vmem:[%s1424_s30 + $0xa0] sm:$0xff] %vm862_vm2, %v688_v58  ;;  %v699_v62 = vadd.f32 %v1170_v61, %v1419_v35  ;;  %915 = vst.msk [vmem:[%s1424_s30 + $0x1a0] sm:$0xff] %vm862_vm2, %v816_v60  ;;  %v827_v0 = vadd.f32 %v1202_v63, %v1419_v35 }
 0x103   : > { %v690_v1 = vpop.f32.mrf.mxu0  ;;  %v818_v3 = vpop.f32.mrf.mxu1 }
 0x104   : > { %886 = vst.msk [vmem:[%s1424_s30 + $0xb8] sm:$0xff] %vm862_vm2, %v699_v62  ;;  %v691_v2 = vadd.f32 %v1419_v35, %v690_v1  ;;  %918 = vst.msk [vmem:[%s1424_s30 + $0x1b8] sm:$0xff] %vm862_vm2, %v827_v0  ;;  %v819_v4 = vadd.f32 %v1419_v35, %v818_v3 }
 0x105   : > { %v1173_v5 = vpop.f32.mrf.mxu0  ;;  %v1205_v7 = vpop.f32.mrf.mxu1 }
 0x106   : > { %884 = vst.msk [vmem:[%s1424_s30 + $0xa8] sm:$0xff] %vm862_vm2, %v691_v2  ;;  %v712_v6 = vadd.f32 %v1173_v5, %v1419_v35  ;;  %916 = vst.msk [vmem:[%s1424_s30 + $0x1a8] sm:$0xff] %vm862_vm2, %v819_v4  ;;  %v840_v8 = vadd.f32 %v1205_v7, %v1419_v35 }
 0x107   : > { %v703_v9 = vpop.f32.mrf.mxu0  ;;  %v831_v11 = vpop.f32.mrf.mxu1 }
 0x108   : > { %889 = vst.msk [vmem:[%s1424_s30 + $0xd0] sm:$0xff] %vm862_vm2, %v712_v6  ;;  %v704_v10 = vadd.f32 %v1419_v35, %v703_v9  ;;  %921 = vst.msk [vmem:[%s1424_s30 + $0x1d0] sm:$0xff] %vm862_vm2, %v840_v8  ;;  %v832_v12 = vadd.f32 %v1419_v35, %v831_v11 }
 0x109   : > { %v1174_v13 = vpop.f32.mrf.mxu0  ;;  %v1206_v15 = vpop.f32.mrf.mxu1 }
 0x10a   : > { %887 = vst.msk [vmem:[%s1424_s30 + $0xc0] sm:$0xff] %vm862_vm2, %v704_v10  ;;  %v715_v14 = vadd.f32 %v1174_v13, %v1419_v35  ;;  %919 = vst.msk [vmem:[%s1424_s30 + $0x1c0] sm:$0xff] %vm862_vm2, %v832_v12  ;;  %v843_v16 = vadd.f32 %v1206_v15, %v1419_v35 }
 0x10b   : > { %v706_v17 = vpop.f32.mrf.mxu0  ;;  %v834_v19 = vpop.f32.mrf.mxu1 }
 0x10c   : > { %890 = vst.msk [vmem:[%s1424_s30 + $0xd8] sm:$0xff] %vm862_vm2, %v715_v14  ;;  %v707_v18 = vadd.f32 %v1419_v35, %v706_v17  ;;  %922 = vst.msk [vmem:[%s1424_s30 + $0x1d8] sm:$0xff] %vm862_vm2, %v843_v16  ;;  %v835_v20 = vadd.f32 %v1419_v35, %v834_v19 }
 0x10d   : > { %v1177_v21 = vpop.f32.mrf.mxu0  ;;  %v1209_v23 = vpop.f32.mrf.mxu1 }
 0x10e   : > { %888 = vst.msk [vmem:[%s1424_s30 + $0xc8] sm:$0xff] %vm862_vm2, %v707_v18  ;;  %v728_v22 = vadd.f32 %v1177_v21, %v1419_v35  ;;  %920 = vst.msk [vmem:[%s1424_s30 + $0x1c8] sm:$0xff] %vm862_vm2, %v835_v20  ;;  %v856_v24 = vadd.f32 %v1209_v23, %v1419_v35 }
 0x10f   : > { %v719_v25 = vpop.f32.mrf.mxu0  ;;  %v847_v27 = vpop.f32.mrf.mxu1 }
 0x110   : > { %893 = vst.msk [vmem:[%s1424_s30 + $0xf0] sm:$0xff] %vm862_vm2, %v728_v22  ;;  %v720_v26 = vadd.f32 %v1419_v35, %v719_v25  ;;  %925 = vst.msk [vmem:[%s1424_s30 + $0x1f0] sm:$0xff] %vm862_vm2, %v856_v24  ;;  %v848_v28 = vadd.f32 %v1419_v35, %v847_v27 }
 0x111   : > { %v1178_v29 = vpop.f32.mrf.mxu0  ;;  %v1210_v31 = vpop.f32.mrf.mxu1 }
 0x112   : > { %891 = vst.msk [vmem:[%s1424_s30 + $0xe0] sm:$0xff] %vm862_vm2, %v720_v26  ;;  %v731_v30 = vadd.f32 %v1178_v29, %v1419_v35  ;;  %923 = vst.msk [vmem:[%s1424_s30 + $0x1e0] sm:$0xff] %vm862_vm2, %v848_v28  ;;  %v859_v32 = vadd.f32 %v1210_v31, %v1419_v35 }
 0x113   : > { %v722_v33 = vpop.f32.mrf.mxu0  ;;  %v850_v36 = vpop.f32.mrf.mxu1 }
 0x114   : > { %894 = vst.msk [vmem:[%s1424_s30 + $0xf8] sm:$0xff] %vm862_vm2, %v731_v30  ;;  %v723_v34 = vadd.f32 %v1419_v35, %v722_v33  ;;  %926 = vst.msk [vmem:[%s1424_s30 + $0x1f8] sm:$0xff] %vm862_vm2, %v859_v32  ;;  %v851_v37 = vadd.f32 %v1419_v35, %v850_v36 }
 0x116   : > { %892 = vst.msk [vmem:[%s1424_s30 + $0xe8] sm:$0xff] %vm862_vm2, %v723_v34  ;;  %924 = vst.msk [vmem:[%s1424_s30 + $0x1e8] sm:$0xff] %vm862_vm2, %v851_v37 }
 0x117 PF: > { %s13_s14 = sadd.s32 1, %s1297_s14   ;;  %s1631_s12 = smov %s1293_s13 }
 0x118   : > { %p10_p5 = scmp.ge.s32.totalorder %s13_s14, 10   ;;  %s1632_s13 = smov %s1634_s15 }
 0x11a   :  { %12 = sbr.rel (!%p10_p5) target bundleno = 2 (0x2), region = 68 }

// kernel: cmptrans512_forward.13
= control target key start
LH: loop header
LB: loop body
LE: loop exit
PB: predicated region body
PF: predicated region fallthrough
CT: control target
= control target key end

     0   :  { %vm395_vm0 = vcmask 1040384   ;;  %vm298_vm1 = vcmask 801792   ;;  %vm752_vm2 = vcmask 261120   ;;  %s1559_s1 = inlined_call_operand.vmem [shape: bf16[98,32], index: 1, kind: input, shape index: {}]   ;;  %s1560_s0 = inlined_call_operand.vmem [shape: bf16[512,98], index: 0, kind: input, shape index: {}]   ;;  %s1561_s2 = inlined_call_operand.vmem [shape: f32[1,32], index: 2, kind: input, shape index: {}]   ;;  %s1562_s3 = inlined_call_operand.vmem [shape: f32[512,32], index: 3, kind: output, shape index: {}]  }
   0x1   :  { %v1026_v0 = vld [vmem:[%s1559_s1 + $0x30] ss:$0 sps:$4 sm:$0x11]   ;;  %v1027_v1 = vld [vmem:[%s1559_s1 + $0x28] sm:$0xff]   ;;  %v1028_v3 = vld [vmem:[%s1559_s1 + $0x20] sm:$0xff]  }
   0x2   :  { %1024 = vmatprep.subr.msk.bf16.mxu0 %vm395_vm0, %v1026_v0  ;;  %1025 = vmatprep.subr.msk.bf16.mxu1 %vm395_vm0, %v1026_v0  ;;  %v397_v2 = vsel %vm395_vm0, %v1026_v0, 0  ;;  %v1029_v4 = vld [vmem:[%s1559_s1 + $0x18] sm:$0xff]   ;;  %v1033_v5 = vld [vmem:[%s1560_s0] sm:$0xff]   ;;  %v1030_v7 = vld [vmem:[%s1559_s1 + $0x10] sm:$0xff]  }
   0x3   :  { %933 = vmatpush3.bf16.msra.mxu0 %v397_v2  ;;  %1017 = vmatpush3.bf16.msra.mxu1 %v397_v2  ;;  %v1034_v6 = vld [vmem:[%s1560_s0 + $0x80] sm:$0xff]   ;;  %v1031_v8 = vld [vmem:[%s1559_s1 + $0x8] sm:$0xff]   ;;  %v1037_v12 = vld [vmem:[%s1560_s0 + $0x10] sm:$0xff]  }
   0x4   :  { %934 = vmatprep.subr.bf16.mxu0 %v1027_v1  ;;  %1011 = vmatprep.subr.bf16.mxu1 %v1027_v1  ;;  %v1032_v9 = vld [vmem:[%s1559_s1] sm:$0xff]   ;;  %v1035_v10 = vld [vmem:[%s1560_s0 + $0x8] sm:$0xff]   ;;  %v1038_v13 = vld [vmem:[%s1560_s0 + $0x90] sm:$0xff]  }
   0x5   :  { %946 = vmatprep.mubr.msk.bf16.mxu0 %vm298_vm1, %v1033_v5  ;;  %978 = vmatprep.mubr.msk.bf16.mxu1 %vm298_vm1, %v1034_v6  ;;  %v1036_v11 = vld [vmem:[%s1560_s0 + $0x88] sm:$0xff]   ;;  %v1039_v14 = vld [vmem:[%s1560_s0 + $0x18] sm:$0xff]   ;;  %v1041_v16 = vld [vmem:[%s1560_s0 + $0x20] sm:$0xff]  }
   0x6   :  { %v1040_v15 = vld [vmem:[%s1560_s0 + $0x98] sm:$0xff]   ;;  %v1042_v17 = vld [vmem:[%s1560_s0 + $0xa0] sm:$0xff]   ;;  %v1043_v18 = vld [vmem:[%s1560_s0 + $0x28] sm:$0xff]  }
   0x7   :  { %935 = vmatpush3.bf16.msra.mxu0 %v1027_v1  ;;  %1018 = vmatpush3.bf16.msra.mxu1 %v1027_v1  ;;  %v1044_v19 = vld [vmem:[%s1560_s0 + $0xa8] sm:$0xff]   ;;  %v1045_v20 = vld [vmem:[%s1560_s0 + $0x30] sm:$0xff]   ;;  %v1047_v22 = vld [vmem:[%s1560_s0 + $0x38] sm:$0xff]  }
   0x8   :  { %936 = vmatprep.subr.bf16.mxu0 %v1028_v3  ;;  %1012 = vmatprep.subr.bf16.mxu1 %v1028_v3  ;;  %v1046_v21 = vld [vmem:[%s1560_s0 + $0xb0] sm:$0xff]   ;;  %v1048_v23 = vld [vmem:[%s1560_s0 + $0xb8] sm:$0xff]   ;;  %v1049_v24 = vld [vmem:[%s1560_s0 + $0x40] sm:$0xff]  }
   0x9   :  { %v1050_v25 = vld [vmem:[%s1560_s0 + $0xc0] sm:$0xff]   ;;  %v1051_v26 = vld [vmem:[%s1560_s0 + $0x48] sm:$0xff]   ;;  %v1053_v28 = vld [vmem:[%s1560_s0 + $0x50] sm:$0xff]  }
   0xa   :  { %v1052_v27 = vld [vmem:[%s1560_s0 + $0xc8] sm:$0xff]   ;;  %v1054_v29 = vld [vmem:[%s1560_s0 + $0xd0] sm:$0xff]   ;;  %v1055_v30 = vld [vmem:[%s1560_s0 + $0x58] sm:$0xff]  }
   0xb   :  { %937 = vmatpush3.bf16.msra.mxu0 %v1028_v3  ;;  %1019 = vmatpush3.bf16.msra.mxu1 %v1028_v3  ;;  %v1056_v31 = vld [vmem:[%s1560_s0 + $0xd8] sm:$0xff]   ;;  %v1057_v32 = vld [vmem:[%s1560_s0 + $0x60] sm:$0xff]   ;;  %v1059_v34 = vld [vmem:[%s1560_s0 + $0x68] sm:$0xff]  }
   0xc   :  { %938 = vmatprep.subr.bf16.mxu0 %v1029_v4  ;;  %1013 = vmatprep.subr.bf16.mxu1 %v1029_v4  ;;  %v1058_v33 = vld [vmem:[%s1560_s0 + $0xe0] sm:$0xff]   ;;  %v1060_v35 = vld [vmem:[%s1560_s0 + $0xe8] sm:$0xff]   ;;  %v1061_v36 = vld [vmem:[%s1560_s0 + $0x70] sm:$0xff]  }
   0xd   :  { %v1062_v37 = vld [vmem:[%s1560_s0 + $0xf0] sm:$0xff]   ;;  %v1063_v38 = vld [vmem:[%s1560_s0 + $0x78] sm:$0xff]   ;;  %v1237_v40 = vld [vmem:[%s1561_s2] ss:$0 sm:$0xff] }
   0xe   :  { %v1064_v39 = vld [vmem:[%s1560_s0 + $0xf8] sm:$0xff]  }
   0xf   :  { %939 = vmatpush3.bf16.msra.mxu0 %v1029_v4  ;;  %1020 = vmatpush3.bf16.msra.mxu1 %v1029_v4 }
  0x10   :  { %940 = vmatprep.subr.bf16.mxu0 %v1030_v7  ;;  %1014 = vmatprep.subr.bf16.mxu1 %v1030_v7 }
  0x13   :  { %941 = vmatpush3.bf16.msra.mxu0 %v1030_v7  ;;  %1021 = vmatpush3.bf16.msra.mxu1 %v1030_v7 }
  0x14   :  { %942 = vmatprep.subr.bf16.mxu0 %v1031_v8  ;;  %1015 = vmatprep.subr.bf16.mxu1 %v1031_v8 }
  0x17   :  { %943 = vmatpush3.bf16.msra.mxu0 %v1031_v8  ;;  %1022 = vmatpush3.bf16.msra.mxu1 %v1031_v8 }
  0x18   :  { %944 = vmatprep.subr.bf16.mxu0 %v1032_v9  ;;  %1016 = vmatprep.subr.bf16.mxu1 %v1032_v9 }
  0x1b   :  { %945 = vmatpush3.bf16.msra.mxu0 %v1032_v9  ;;  %1023 = vmatpush3.bf16.msra.mxu1 %v1032_v9 }
  0x1e   :  { %947 = vmatmul.mubr.msk.bf16.vlgmr.msra.gmra.mxu0 %vm298_vm1, %v1035_v10  ;;  %979 = vmatmul.mubr.msk.bf16.vlgmr.msra.gmra.mxu1 %vm298_vm1, %v1036_v11 }
  0x1f   :  { %950 = vmatprep.mubr.msk.bf16.mxu0 %vm298_vm1, %v1037_v12  ;;  %982 = vmatprep.mubr.msk.bf16.mxu1 %vm298_vm1, %v1038_v13 }
  0x26   :  { %951 = vmatmul.mubr.msk.bf16.gmra.mxu0 %vm298_vm1, %v1039_v14  ;;  %983 = vmatmul.mubr.msk.bf16.gmra.mxu1 %vm298_vm1, %v1040_v15 }
  0x27   :  { %954 = vmatprep.mubr.msk.bf16.mxu0 %vm298_vm1, %v1041_v16  ;;  %986 = vmatprep.mubr.msk.bf16.mxu1 %vm298_vm1, %v1042_v17 }
  0x2e   :  { %955 = vmatmul.mubr.msk.bf16.gmra.mxu0 %vm298_vm1, %v1043_v18  ;;  %987 = vmatmul.mubr.msk.bf16.gmra.mxu1 %vm298_vm1, %v1044_v19 }
  0x2f   :  { %958 = vmatprep.mubr.msk.bf16.mxu0 %vm298_vm1, %v1045_v20  ;;  %990 = vmatprep.mubr.msk.bf16.mxu1 %vm298_vm1, %v1046_v21 }
  0x36   :  { %959 = vmatmul.mubr.msk.bf16.gmra.mxu0 %vm298_vm1, %v1047_v22  ;;  %991 = vmatmul.mubr.msk.bf16.gmra.mxu1 %vm298_vm1, %v1048_v23 }
  0x37   :  { %962 = vmatprep.mubr.msk.bf16.mxu0 %vm298_vm1, %v1049_v24  ;;  %994 = vmatprep.mubr.msk.bf16.mxu1 %vm298_vm1, %v1050_v25 }
  0x3e   :  { %963 = vmatmul.mubr.msk.bf16.gmra.mxu0 %vm298_vm1, %v1051_v26  ;;  %995 = vmatmul.mubr.msk.bf16.gmra.mxu1 %vm298_vm1, %v1052_v27 }
  0x3f   :  { %966 = vmatprep.mubr.msk.bf16.mxu0 %vm298_vm1, %v1053_v28  ;;  %998 = vmatprep.mubr.msk.bf16.mxu1 %vm298_vm1, %v1054_v29 }
  0x46   :  { %967 = vmatmul.mubr.msk.bf16.gmra.mxu0 %vm298_vm1, %v1055_v30  ;;  %999 = vmatmul.mubr.msk.bf16.gmra.mxu1 %vm298_vm1, %v1056_v31 }
  0x47   :  { %970 = vmatprep.mubr.msk.bf16.mxu0 %vm298_vm1, %v1057_v32  ;;  %1002 = vmatprep.mubr.msk.bf16.mxu1 %vm298_vm1, %v1058_v33 }
  0x4e   :  { %971 = vmatmul.mubr.msk.bf16.gmra.mxu0 %vm298_vm1, %v1059_v34  ;;  %1003 = vmatmul.mubr.msk.bf16.gmra.mxu1 %vm298_vm1, %v1060_v35 }
  0x4f   :  { %974 = vmatprep.mubr.msk.bf16.mxu0 %vm298_vm1, %v1061_v36  ;;  %1006 = vmatprep.mubr.msk.bf16.mxu1 %vm298_vm1, %v1062_v37 }
  0x56   :  { %975 = vmatmul.mubr.msk.bf16.gmra.mxu0 %vm298_vm1, %v1063_v38  ;;  %1007 = vmatmul.mubr.msk.bf16.gmra.mxu1 %vm298_vm1, %v1064_v39 }
  0xde   :  { %v948_v41 = vpop.f32.mrf.mxu0  ;;  %v980_v42 = vpop.f32.mrf.mxu1 }
  0xdf   :  { %v442_v43 = vadd.f32 %v948_v41, %v1237_v40  ;;  %v570_v44 = vadd.f32 %v980_v42, %v1237_v40 }
  0xe0   :  { %v433_v45 = vpop.f32.mrf.mxu0  ;;  %v561_v46 = vpop.f32.mrf.mxu1 }
  0xe1   :  { %v690_v47 = vmax.f32 %v442_v43, 0.0  ;;  %v722_v48 = vmax.f32 %v570_v44, 0.0  ;;  %v434_v49 = vadd.f32 %v1237_v40, %v433_v45  ;;  %v562_v50 = vadd.f32 %v1237_v40, %v561_v46 }
  0xe2   :  { %v949_v51 = vpop.f32.mrf.mxu0  ;;  %v981_v52 = vpop.f32.mrf.mxu1 }
  0xe3   :  { %755 = vst.msk [vmem:[%s1562_s3 + $0x10] sm:$0xff] %vm752_vm2, %v690_v47  ;;  %787 = vst.msk [vmem:[%s1562_s3 + $0x110] sm:$0xff] %vm752_vm2, %v722_v48  ;;  %v688_v53 = vmax.f32 %v434_v49, 0.0  ;;  %v720_v54 = vmax.f32 %v562_v50, 0.0  ;;  %v445_v55 = vadd.f32 %v949_v51, %v1237_v40  ;;  %v573_v56 = vadd.f32 %v981_v52, %v1237_v40 }
  0xe4   :  { %v436_v57 = vpop.f32.mrf.mxu0  ;;  %v564_v58 = vpop.f32.mrf.mxu1 }
  0xe5   :  { %753 = vst.msk [vmem:[%s1562_s3] sm:$0xff] %vm752_vm2, %v688_v53  ;;  %785 = vst.msk [vmem:[%s1562_s3 + $0x100] sm:$0xff] %vm752_vm2, %v720_v54  ;;  %v691_v59 = vmax.f32 %v445_v55, 0.0  ;;  %v723_v60 = vmax.f32 %v573_v56, 0.0  ;;  %v437_v61 = vadd.f32 %v1237_v40, %v436_v57  ;;  %v565_v62 = vadd.f32 %v1237_v40, %v564_v58 }
  0xe6   :  { %v952_v63 = vpop.f32.mrf.mxu0  ;;  %v984_v0 = vpop.f32.mrf.mxu1 }
  0xe7   :  { %756 = vst.msk [vmem:[%s1562_s3 + $0x18] sm:$0xff] %vm752_vm2, %v691_v59  ;;  %788 = vst.msk [vmem:[%s1562_s3 + $0x118] sm:$0xff] %vm752_vm2, %v723_v60  ;;  %v689_v1 = vmax.f32 %v437_v61, 0.0  ;;  %v721_v2 = vmax.f32 %v565_v62, 0.0  ;;  %v458_v3 = vadd.f32 %v952_v63, %v1237_v40  ;;  %v586_v4 = vadd.f32 %v984_v0, %v1237_v40 }
  0xe8   :  { %v449_v5 = vpop.f32.mrf.mxu0  ;;  %v577_v6 = vpop.f32.mrf.mxu1 }
  0xe9   :  { %754 = vst.msk [vmem:[%s1562_s3 + $0x8] sm:$0xff] %vm752_vm2, %v689_v1  ;;  %786 = vst.msk [vmem:[%s1562_s3 + $0x108] sm:$0xff] %vm752_vm2, %v721_v2  ;;  %v694_v7 = vmax.f32 %v458_v3, 0.0  ;;  %v726_v8 = vmax.f32 %v586_v4, 0.0  ;;  %v450_v9 = vadd.f32 %v1237_v40, %v449_v5  ;;  %v578_v10 = vadd.f32 %v1237_v40, %v577_v6 }
  0xea   :  { %v953_v11 = vpop.f32.mrf.mxu0  ;;  %v985_v12 = vpop.f32.mrf.mxu1 }
  0xeb   :  { %759 = vst.msk [vmem:[%s1562_s3 + $0x30] sm:$0xff] %vm752_vm2, %v694_v7  ;;  %791 = vst.msk [vmem:[%s1562_s3 + $0x130] sm:$0xff] %vm752_vm2, %v726_v8  ;;  %v692_v13 = vmax.f32 %v450_v9, 0.0  ;;  %v724_v14 = vmax.f32 %v578_v10, 0.0  ;;  %v461_v15 = vadd.f32 %v953_v11, %v1237_v40  ;;  %v589_v16 = vadd.f32 %v985_v12, %v1237_v40 }
  0xec   :  { %v452_v17 = vpop.f32.mrf.mxu0  ;;  %v580_v18 = vpop.f32.mrf.mxu1 }
  0xed   :  { %757 = vst.msk [vmem:[%s1562_s3 + $0x20] sm:$0xff] %vm752_vm2, %v692_v13  ;;  %789 = vst.msk [vmem:[%s1562_s3 + $0x120] sm:$0xff] %vm752_vm2, %v724_v14  ;;  %v695_v19 = vmax.f32 %v461_v15, 0.0  ;;  %v727_v20 = vmax.f32 %v589_v16, 0.0  ;;  %v453_v21 = vadd.f32 %v1237_v40, %v452_v17  ;;  %v581_v22 = vadd.f32 %v1237_v40, %v580_v18 }
  0xee   :  { %v956_v23 = vpop.f32.mrf.mxu0  ;;  %v988_v24 = vpop.f32.mrf.mxu1 }
  0xef   :  { %760 = vst.msk [vmem:[%s1562_s3 + $0x38] sm:$0xff] %vm752_vm2, %v695_v19  ;;  %792 = vst.msk [vmem:[%s1562_s3 + $0x138] sm:$0xff] %vm752_vm2, %v727_v20  ;;  %v693_v25 = vmax.f32 %v453_v21, 0.0  ;;  %v725_v26 = vmax.f32 %v581_v22, 0.0  ;;  %v474_v27 = vadd.f32 %v956_v23, %v1237_v40  ;;  %v602_v28 = vadd.f32 %v988_v24, %v1237_v40 }
  0xf0   :  { %v465_v29 = vpop.f32.mrf.mxu0  ;;  %v593_v30 = vpop.f32.mrf.mxu1 }
  0xf1   :  { %758 = vst.msk [vmem:[%s1562_s3 + $0x28] sm:$0xff] %vm752_vm2, %v693_v25  ;;  %790 = vst.msk [vmem:[%s1562_s3 + $0x128] sm:$0xff] %vm752_vm2, %v725_v26  ;;  %v698_v31 = vmax.f32 %v474_v27, 0.0  ;;  %v730_v32 = vmax.f32 %v602_v28, 0.0  ;;  %v466_v33 = vadd.f32 %v1237_v40, %v465_v29  ;;  %v594_v34 = vadd.f32 %v1237_v40, %v593_v30 }
  0xf2   :  { %v957_v35 = vpop.f32.mrf.mxu0  ;;  %v989_v36 = vpop.f32.mrf.mxu1 }
  0xf3   :  { %763 = vst.msk [vmem:[%s1562_s3 + $0x50] sm:$0xff] %vm752_vm2, %v698_v31  ;;  %795 = vst.msk [vmem:[%s1562_s3 + $0x150] sm:$0xff] %vm752_vm2, %v730_v32  ;;  %v696_v37 = vmax.f32 %v466_v33, 0.0  ;;  %v728_v38 = vmax.f32 %v594_v34, 0.0  ;;  %v477_v39 = vadd.f32 %v957_v35, %v1237_v40  ;;  %v605_v41 = vadd.f32 %v989_v36, %v1237_v40 }
  0xf4   :  { %v468_v42 = vpop.f32.mrf.mxu0  ;;  %v596_v43 = vpop.f32.mrf.mxu1 }
  0xf5   :  { %761 = vst.msk [vmem:[%s1562_s3 + $0x40] sm:$0xff] %vm752_vm2, %v696_v37  ;;  %793 = vst.msk [vmem:[%s1562_s3 + $0x140] sm:$0xff] %vm752_vm2, %v728_v38  ;;  %v699_v44 = vmax.f32 %v477_v39, 0.0  ;;  %v731_v45 = vmax.f32 %v605_v41, 0.0  ;;  %v469_v46 = vadd.f32 %v1237_v40, %v468_v42  ;;  %v597_v47 = vadd.f32 %v1237_v40, %v596_v43 }
  0xf6   :  { %v960_v48 = vpop.f32.mrf.mxu0  ;;  %v992_v49 = vpop.f32.mrf.mxu1 }
  0xf7   :  { %764 = vst.msk [vmem:[%s1562_s3 + $0x58] sm:$0xff] %vm752_vm2, %v699_v44  ;;  %796 = vst.msk [vmem:[%s1562_s3 + $0x158] sm:$0xff] %vm752_vm2, %v731_v45  ;;  %v697_v50 = vmax.f32 %v469_v46, 0.0  ;;  %v729_v51 = vmax.f32 %v597_v47, 0.0  ;;  %v490_v52 = vadd.f32 %v960_v48, %v1237_v40  ;;  %v618_v53 = vadd.f32 %v992_v49, %v1237_v40 }
  0xf8   :  { %v481_v54 = vpop.f32.mrf.mxu0  ;;  %v609_v55 = vpop.f32.mrf.mxu1 }
  0xf9   :  { %762 = vst.msk [vmem:[%s1562_s3 + $0x48] sm:$0xff] %vm752_vm2, %v697_v50  ;;  %794 = vst.msk [vmem:[%s1562_s3 + $0x148] sm:$0xff] %vm752_vm2, %v729_v51  ;;  %v702_v56 = vmax.f32 %v490_v52, 0.0  ;;  %v734_v57 = vmax.f32 %v618_v53, 0.0  ;;  %v482_v58 = vadd.f32 %v1237_v40, %v481_v54  ;;  %v610_v59 = vadd.f32 %v1237_v40, %v609_v55 }
  0xfa   :  { %v961_v60 = vpop.f32.mrf.mxu0  ;;  %v993_v61 = vpop.f32.mrf.mxu1 }
  0xfb   :  { %767 = vst.msk [vmem:[%s1562_s3 + $0x70] sm:$0xff] %vm752_vm2, %v702_v56  ;;  %799 = vst.msk [vmem:[%s1562_s3 + $0x170] sm:$0xff] %vm752_vm2, %v734_v57  ;;  %v700_v62 = vmax.f32 %v482_v58, 0.0  ;;  %v732_v63 = vmax.f32 %v610_v59, 0.0  ;;  %v493_v0 = vadd.f32 %v961_v60, %v1237_v40  ;;  %v621_v1 = vadd.f32 %v993_v61, %v1237_v40 }
  0xfc   :  { %v484_v2 = vpop.f32.mrf.mxu0  ;;  %v612_v3 = vpop.f32.mrf.mxu1 }
  0xfd   :  { %765 = vst.msk [vmem:[%s1562_s3 + $0x60] sm:$0xff] %vm752_vm2, %v700_v62  ;;  %797 = vst.msk [vmem:[%s1562_s3 + $0x160] sm:$0xff] %vm752_vm2, %v732_v63  ;;  %v703_v4 = vmax.f32 %v493_v0, 0.0  ;;  %v735_v5 = vmax.f32 %v621_v1, 0.0  ;;  %v485_v6 = vadd.f32 %v1237_v40, %v484_v2  ;;  %v613_v7 = vadd.f32 %v1237_v40, %v612_v3 }
  0xfe   :  { %v964_v8 = vpop.f32.mrf.mxu0  ;;  %v996_v9 = vpop.f32.mrf.mxu1 }
  0xff   :  { %768 = vst.msk [vmem:[%s1562_s3 + $0x78] sm:$0xff] %vm752_vm2, %v703_v4  ;;  %800 = vst.msk [vmem:[%s1562_s3 + $0x178] sm:$0xff] %vm752_vm2, %v735_v5  ;;  %v701_v10 = vmax.f32 %v485_v6, 0.0  ;;  %v733_v11 = vmax.f32 %v613_v7, 0.0  ;;  %v506_v12 = vadd.f32 %v964_v8, %v1237_v40  ;;  %v634_v13 = vadd.f32 %v996_v9, %v1237_v40 }
 0x100   :  { %v497_v14 = vpop.f32.mrf.mxu0  ;;  %v625_v15 = vpop.f32.mrf.mxu1 }
 0x101   :  { %766 = vst.msk [vmem:[%s1562_s3 + $0x68] sm:$0xff] %vm752_vm2, %v701_v10  ;;  %798 = vst.msk [vmem:[%s1562_s3 + $0x168] sm:$0xff] %vm752_vm2, %v733_v11  ;;  %v706_v16 = vmax.f32 %v506_v12, 0.0  ;;  %v738_v17 = vmax.f32 %v634_v13, 0.0  ;;  %v498_v18 = vadd.f32 %v1237_v40, %v497_v14  ;;  %v626_v19 = vadd.f32 %v1237_v40, %v625_v15 }
 0x102   :  { %v965_v20 = vpop.f32.mrf.mxu0  ;;  %v997_v21 = vpop.f32.mrf.mxu1 }
 0x103   :  { %771 = vst.msk [vmem:[%s1562_s3 + $0x90] sm:$0xff] %vm752_vm2, %v706_v16  ;;  %803 = vst.msk [vmem:[%s1562_s3 + $0x190] sm:$0xff] %vm752_vm2, %v738_v17  ;;  %v704_v22 = vmax.f32 %v498_v18, 0.0  ;;  %v736_v23 = vmax.f32 %v626_v19, 0.0  ;;  %v509_v24 = vadd.f32 %v965_v20, %v1237_v40  ;;  %v637_v25 = vadd.f32 %v997_v21, %v1237_v40 }
 0x104   :  { %v500_v26 = vpop.f32.mrf.mxu0  ;;  %v628_v27 = vpop.f32.mrf.mxu1 }
 0x105   :  { %769 = vst.msk [vmem:[%s1562_s3 + $0x80] sm:$0xff] %vm752_vm2, %v704_v22  ;;  %801 = vst.msk [vmem:[%s1562_s3 + $0x180] sm:$0xff] %vm752_vm2, %v736_v23  ;;  %v707_v28 = vmax.f32 %v509_v24, 0.0  ;;  %v739_v29 = vmax.f32 %v637_v25, 0.0  ;;  %v501_v30 = vadd.f32 %v1237_v40, %v500_v26  ;;  %v629_v31 = vadd.f32 %v1237_v40, %v628_v27 }
 0x106   :  { %v968_v32 = vpop.f32.mrf.mxu0  ;;  %v1000_v33 = vpop.f32.mrf.mxu1 }
 0x107   :  { %772 = vst.msk [vmem:[%s1562_s3 + $0x98] sm:$0xff] %vm752_vm2, %v707_v28  ;;  %804 = vst.msk [vmem:[%s1562_s3 + $0x198] sm:$0xff] %vm752_vm2, %v739_v29  ;;  %v705_v34 = vmax.f32 %v501_v30, 0.0  ;;  %v737_v35 = vmax.f32 %v629_v31, 0.0  ;;  %v522_v36 = vadd.f32 %v968_v32, %v1237_v40  ;;  %v650_v37 = vadd.f32 %v1000_v33, %v1237_v40 }
 0x108   :  { %v513_v38 = vpop.f32.mrf.mxu0  ;;  %v641_v39 = vpop.f32.mrf.mxu1 }
 0x109   :  { %770 = vst.msk [vmem:[%s1562_s3 + $0x88] sm:$0xff] %vm752_vm2, %v705_v34  ;;  %802 = vst.msk [vmem:[%s1562_s3 + $0x188] sm:$0xff] %vm752_vm2, %v737_v35  ;;  %v710_v41 = vmax.f32 %v522_v36, 0.0  ;;  %v742_v42 = vmax.f32 %v650_v37, 0.0  ;;  %v514_v43 = vadd.f32 %v1237_v40, %v513_v38  ;;  %v642_v44 = vadd.f32 %v1237_v40, %v641_v39 }
 0x10a   :  { %v969_v45 = vpop.f32.mrf.mxu0  ;;  %v1001_v46 = vpop.f32.mrf.mxu1 }
 0x10b   :  { %775 = vst.msk [vmem:[%s1562_s3 + $0xb0] sm:$0xff] %vm752_vm2, %v710_v41  ;;  %807 = vst.msk [vmem:[%s1562_s3 + $0x1b0] sm:$0xff] %vm752_vm2, %v742_v42  ;;  %v708_v47 = vmax.f32 %v514_v43, 0.0  ;;  %v740_v48 = vmax.f32 %v642_v44, 0.0  ;;  %v525_v49 = vadd.f32 %v969_v45, %v1237_v40  ;;  %v653_v50 = vadd.f32 %v1001_v46, %v1237_v40 }
 0x10c   :  { %v516_v51 = vpop.f32.mrf.mxu0  ;;  %v644_v52 = vpop.f32.mrf.mxu1 }
 0x10d   :  { %773 = vst.msk [vmem:[%s1562_s3 + $0xa0] sm:$0xff] %vm752_vm2, %v708_v47  ;;  %805 = vst.msk [vmem:[%s1562_s3 + $0x1a0] sm:$0xff] %vm752_vm2, %v740_v48  ;;  %v711_v53 = vmax.f32 %v525_v49, 0.0  ;;  %v743_v54 = vmax.f32 %v653_v50, 0.0  ;;  %v517_v55 = vadd.f32 %v1237_v40, %v516_v51  ;;  %v645_v56 = vadd.f32 %v1237_v40, %v644_v52 }
 0x10e   :  { %v972_v57 = vpop.f32.mrf.mxu0  ;;  %v1004_v58 = vpop.f32.mrf.mxu1 }
 0x10f   :  { %776 = vst.msk [vmem:[%s1562_s3 + $0xb8] sm:$0xff] %vm752_vm2, %v711_v53  ;;  %808 = vst.msk [vmem:[%s1562_s3 + $0x1b8] sm:$0xff] %vm752_vm2, %v743_v54  ;;  %v709_v59 = vmax.f32 %v517_v55, 0.0  ;;  %v741_v60 = vmax.f32 %v645_v56, 0.0  ;;  %v538_v61 = vadd.f32 %v972_v57, %v1237_v40  ;;  %v666_v62 = vadd.f32 %v1004_v58, %v1237_v40 }
 0x110   :  { %v529_v63 = vpop.f32.mrf.mxu0  ;;  %v657_v0 = vpop.f32.mrf.mxu1 }
 0x111   :  { %774 = vst.msk [vmem:[%s1562_s3 + $0xa8] sm:$0xff] %vm752_vm2, %v709_v59  ;;  %806 = vst.msk [vmem:[%s1562_s3 + $0x1a8] sm:$0xff] %vm752_vm2, %v741_v60  ;;  %v714_v1 = vmax.f32 %v538_v61, 0.0  ;;  %v746_v2 = vmax.f32 %v666_v62, 0.0  ;;  %v530_v3 = vadd.f32 %v1237_v40, %v529_v63  ;;  %v658_v4 = vadd.f32 %v1237_v40, %v657_v0 }
 0x112   :  { %v973_v5 = vpop.f32.mrf.mxu0  ;;  %v1005_v6 = vpop.f32.mrf.mxu1 }
 0x113   :  { %779 = vst.msk [vmem:[%s1562_s3 + $0xd0] sm:$0xff] %vm752_vm2, %v714_v1  ;;  %811 = vst.msk [vmem:[%s1562_s3 + $0x1d0] sm:$0xff] %vm752_vm2, %v746_v2  ;;  %v712_v7 = vmax.f32 %v530_v3, 0.0  ;;  %v744_v8 = vmax.f32 %v658_v4, 0.0  ;;  %v541_v9 = vadd.f32 %v973_v5, %v1237_v40  ;;  %v669_v10 = vadd.f32 %v1005_v6, %v1237_v40 }
 0x114   :  { %v532_v11 = vpop.f32.mrf.mxu0  ;;  %v660_v12 = vpop.f32.mrf.mxu1 }
 0x115   :  { %777 = vst.msk [vmem:[%s1562_s3 + $0xc0] sm:$0xff] %vm752_vm2, %v712_v7  ;;  %809 = vst.msk [vmem:[%s1562_s3 + $0x1c0] sm:$0xff] %vm752_vm2, %v744_v8  ;;  %v715_v13 = vmax.f32 %v541_v9, 0.0  ;;  %v747_v14 = vmax.f32 %v669_v10, 0.0  ;;  %v533_v15 = vadd.f32 %v1237_v40, %v532_v11  ;;  %v661_v16 = vadd.f32 %v1237_v40, %v660_v12 }
 0x116   :  { %v976_v17 = vpop.f32.mrf.mxu0  ;;  %v1008_v18 = vpop.f32.mrf.mxu1 }
 0x117   :  { %780 = vst.msk [vmem:[%s1562_s3 + $0xd8] sm:$0xff] %vm752_vm2, %v715_v13  ;;  %812 = vst.msk [vmem:[%s1562_s3 + $0x1d8] sm:$0xff] %vm752_vm2, %v747_v14  ;;  %v713_v19 = vmax.f32 %v533_v15, 0.0  ;;  %v745_v20 = vmax.f32 %v661_v16, 0.0  ;;  %v554_v21 = vadd.f32 %v976_v17, %v1237_v40  ;;  %v682_v22 = vadd.f32 %v1008_v18, %v1237_v40 }
 0x118   :  { %v545_v23 = vpop.f32.mrf.mxu0  ;;  %v673_v24 = vpop.f32.mrf.mxu1 }
 0x119   :  { %778 = vst.msk [vmem:[%s1562_s3 + $0xc8] sm:$0xff] %vm752_vm2, %v713_v19  ;;  %810 = vst.msk [vmem:[%s1562_s3 + $0x1c8] sm:$0xff] %vm752_vm2, %v745_v20  ;;  %v718_v25 = vmax.f32 %v554_v21, 0.0  ;;  %v750_v26 = vmax.f32 %v682_v22, 0.0  ;;  %v546_v27 = vadd.f32 %v1237_v40, %v545_v23  ;;  %v674_v28 = vadd.f32 %v1237_v40, %v673_v24 }
 0x11a   :  { %v977_v29 = vpop.f32.mrf.mxu0  ;;  %v1009_v30 = vpop.f32.mrf.mxu1 }
 0x11b   :  { %783 = vst.msk [vmem:[%s1562_s3 + $0xf0] sm:$0xff] %vm752_vm2, %v718_v25  ;;  %815 = vst.msk [vmem:[%s1562_s3 + $0x1f0] sm:$0xff] %vm752_vm2, %v750_v26  ;;  %v716_v31 = vmax.f32 %v546_v27, 0.0  ;;  %v748_v32 = vmax.f32 %v674_v28, 0.0  ;;  %v557_v33 = vadd.f32 %v977_v29, %v1237_v40  ;;  %v685_v34 = vadd.f32 %v1009_v30, %v1237_v40 }
 0x11c   :  { %v548_v35 = vpop.f32.mrf.mxu0  ;;  %v676_v36 = vpop.f32.mrf.mxu1 }
 0x11d   :  { %781 = vst.msk [vmem:[%s1562_s3 + $0xe0] sm:$0xff] %vm752_vm2, %v716_v31  ;;  %813 = vst.msk [vmem:[%s1562_s3 + $0x1e0] sm:$0xff] %vm752_vm2, %v748_v32  ;;  %v719_v37 = vmax.f32 %v557_v33, 0.0  ;;  %v751_v38 = vmax.f32 %v685_v34, 0.0  ;;  %v549_v39 = vadd.f32 %v1237_v40, %v548_v35  ;;  %v677_v41 = vadd.f32 %v1237_v40, %v676_v36 }
 0x11f   :  { %784 = vst.msk [vmem:[%s1562_s3 + $0xf8] sm:$0xff] %vm752_vm2, %v719_v37  ;;  %816 = vst.msk [vmem:[%s1562_s3 + $0x1f8] sm:$0xff] %vm752_vm2, %v751_v38  ;;  %v717_v42 = vmax.f32 %v549_v39, 0.0  ;;  %v749_v43 = vmax.f32 %v677_v41, 0.0 }
 0x121   :  { %782 = vst.msk [vmem:[%s1562_s3 + $0xe8] sm:$0xff] %vm752_vm2, %v717_v42  ;;  %814 = vst.msk [vmem:[%s1562_s3 + $0x1e8] sm:$0xff] %vm752_vm2, %v749_v43 }

// kernel: cmptrans512_forward.14
= control target key start
LH: loop header
LB: loop body
LE: loop exit
PB: predicated region body
PF: predicated region fallthrough
CT: control target
= control target key end

     0   :  { %s1078_s15 = smov 0   ;;  %s1652_s0 = inlined_call_operand.vmem [shape: f32[2,256,32], index: 0, kind: input, shape index: {}]   ;;  %s1653_s1 = inlined_call_operand.vmem [shape: f32[1,32], index: 1, kind: input, shape index: {}]   ;;  %s1654_s2 = inlined_call_operand.vmem [shape: f32[1,32], index: 2, kind: input, shape index: {}]   ;;  %s1655_s3 = inlined_call_operand.vmem [shape: f32[32,32], index: 3, kind: input, shape index: {}]   ;;  %s1656_s4 = inlined_call_operand.vmem [shape: bf16[2,256,32], index: 4, kind: output, shape index: {}]  }
   0x1 LB: > { %s918_s16 = sadd.s32 4294967295, %s1049_s15   ;;  %p922_p0 = scmp.ge.s32.totalorder %s1049_s15, 1  ;;  %s1049_s15 = sphi %s1078_s15, %s14_s15  }
   0x2   : > { %p162_p1 = scmp.lt.s32.totalorder %s1049_s15, 3 }
   0x4   : > { %p163_p2 = pnand %p922_p0, %p162_p1 }
   0x5   : > { %p188_p3 = scmp.lt.s32.totalorder (!%p163_p2), %s918_s16, 1 }
   0x6   : > { %166 = sbr.rel (%p163_p2) target bundleno = 618 (0x26a), region = 36 }
   0xb   : > { %v233_v0 = vld [vmem:[%s1655_s3 + $0x18] sm:$0xff]  ;;  %v1051_v1 = vmov 0.0   ;;  %v232_v2 = vld [vmem:[%s1655_s3 + $0x10] sm:$0xff]  ;;  %vm1052_vm0 = vmmov 0   ;;  %s1658_s16 = smov (!%p188_p3, %s918_s16), 1  ;;  %v231_v3 = vld [vmem:[%s1655_s3 + $0x8] sm:$0xff] }
   0xc   : > { %1009 = vmatprep.subr.mxu0 %v1051_v1  ;;  %1017 = vmatprep.mubr.msk.f32.mxu0 %vm1052_vm0, %v1051_v1  ;;  %s965_s23 = sshll.u32 %s1658_s16, 8  ;;  %vm234_vm1 = vcmask 261120   ;;  %v230_v4 = vld [vmem:[%s1655_s3] sm:$0xff]  ;;  %vm830_vm2 = vcmask 257024   ;;  %s966_s7 = sshll.u32 %s1658_s16, 7 }
   0xd   : > { %1010 = vmatpush3.msra.mxu0 %v233_v0  ;;  %1020 = vmatprep.subr.mxu1 %v1051_v1  ;;  %s1105_s28 = scalar_lea.vmem %s1652_s0, %s965_s23  ;;  %s1551_s10 = scalar_lea.vmem %s1656_s4, %s966_s7 }
   0xe   : > { %1011 = vmatprep.subr.mxu0 %v1051_v1  ;;  %1021 = vmatpush3.msra.mxu1 %v233_v0  ;;  %v1108_v5 = vld [vmem:[%s1105_s28] sm:$0xff]  ;;  %v1111_v6 = vld [vmem:[%s1105_s28 + $0x8] sm:$0xff]  ;;  %v1114_v7 = vld [vmem:[%s1105_s28 + $0x10] sm:$0xff] }
   0xf   : > { %1012 = vmatpush3.msra.mxu0 %v232_v2  ;;  %1022 = vmatprep.subr.mxu1 %v1051_v1  ;;  %v1117_v8 = vld [vmem:[%s1105_s28 + $0x18] sm:$0xff]  ;;  %v235_v9 = vsel %vm234_vm1, %v1108_v5, 0.0  ;;  %v236_v10 = vsel %vm234_vm1, %v1111_v6, 0.0  ;;  %v238_v11 = vsel %vm234_vm1, %v1114_v7, 0.0  ;;  %v1126_v12 = vld [vmem:[%s1105_s28 + $0x20] sm:$0xff]  ;;  %v1132_v15 = vld [vmem:[%s1105_s28 + $0x28] sm:$0xff] }
  0x10   : > { %1013 = vmatprep.subr.mxu0 %v1051_v1  ;;  %1023 = vmatpush3.msra.mxu1 %v232_v2  ;;  %v237_v13 = vadd.f32 %v236_v10, %v235_v9  ;;  %v240_v14 = vsel %vm234_vm1, %v1117_v8, 0.0  ;;  %v242_v17 = vsel %vm234_vm1, %v1126_v12, 0.0  ;;  %v1137_v18 = vld [vmem:[%s1105_s28 + $0x30] sm:$0xff]  ;;  %v244_v20 = vsel %vm234_vm1, %v1132_v15, 0.0  ;;  %v1142_v21 = vld [vmem:[%s1105_s28 + $0x38] sm:$0xff]  ;;  %v1147_v24 = vld [vmem:[%s1105_s28 + $0x40] sm:$0xff] }
  0x11   : > { %1014 = vmatpush3.msra.mxu0 %v231_v3  ;;  %1024 = vmatprep.subr.mxu1 %v1051_v1  ;;  %v246_v23 = vsel %vm234_vm1, %v1137_v18, 0.0  ;;  %v248_v26 = vsel %vm234_vm1, %v1142_v21, 0.0  ;;  %v1152_v27 = vld [vmem:[%s1105_s28 + $0x48] sm:$0xff]  ;;  %v250_v29 = vsel %vm234_vm1, %v1147_v24, 0.0  ;;  %v1157_v30 = vld [vmem:[%s1105_s28 + $0x50] sm:$0xff]  ;;  %v1162_v33 = vld [vmem:[%s1105_s28 + $0x58] sm:$0xff] }
  0x12   : > { %1015 = vmatprep.subr.mxu0 %v1051_v1  ;;  %1025 = vmatpush3.msra.mxu1 %v231_v3  ;;  %v239_v16 = vadd.f32 %v238_v11, %v237_v13  ;;  %v252_v32 = vsel %vm234_vm1, %v1152_v27, 0.0  ;;  %v254_v35 = vsel %vm234_vm1, %v1157_v30, 0.0  ;;  %v1167_v36 = vld [vmem:[%s1105_s28 + $0x60] sm:$0xff]  ;;  %v256_v38 = vsel %vm234_vm1, %v1162_v33, 0.0  ;;  %v1172_v39 = vld [vmem:[%s1105_s28 + $0x68] sm:$0xff]  ;;  %v1177_v42 = vld [vmem:[%s1105_s28 + $0x70] sm:$0xff] }
  0x13   : > { %1016 = vmatpush3.msra.mxu0 %v230_v4  ;;  %1026 = vmatprep.subr.mxu1 %v1051_v1  ;;  %v258_v41 = vsel %vm234_vm1, %v1167_v36, 0.0  ;;  %v260_v44 = vsel %vm234_vm1, %v1172_v39, 0.0  ;;  %v1182_v45 = vld [vmem:[%s1105_s28 + $0x78] sm:$0xff]  ;;  %v262_v47 = vsel %vm234_vm1, %v1177_v42, 0.0  ;;  %v1187_v48 = vld [vmem:[%s1105_s28 + $0x80] sm:$0xff]  ;;  %v1192_v51 = vld [vmem:[%s1105_s28 + $0x88] sm:$0xff] }
  0x14   : > { %1027 = vmatpush3.msra.mxu1 %v230_v4  ;;  %1028 = vmatprep.mubr.msk.f32.mxu1 %vm1052_vm0, %v1051_v1  ;;  %v241_v19 = vadd.f32 %v240_v14, %v239_v16  ;;  %v264_v50 = vsel %vm234_vm1, %v1182_v45, 0.0  ;;  %v266_v53 = vsel %vm234_vm1, %v1187_v48, 0.0  ;;  %v1197_v54 = vld [vmem:[%s1105_s28 + $0x90] sm:$0xff]  ;;  %v268_v56 = vsel %vm234_vm1, %v1192_v51, 0.0  ;;  %v1202_v57 = vld [vmem:[%s1105_s28 + $0x98] sm:$0xff]  ;;  %v1207_v60 = vld [vmem:[%s1105_s28 + $0xa0] sm:$0xff] }
  0x15   : > { %v270_v59 = vsel %vm234_vm1, %v1197_v54, 0.0  ;;  %v272_v62 = vsel %vm234_vm1, %v1202_v57, 0.0  ;;  %v1212_v63 = vld [vmem:[%s1105_s28 + $0xa8] sm:$0xff]  ;;  %v274_v1 = vsel %vm234_vm1, %v1207_v60, 0.0  ;;  %v1217_v2 = vld [vmem:[%s1105_s28 + $0xb0] sm:$0xff]  ;;  %v1222_v9 = vld [vmem:[%s1105_s28 + $0xb8] sm:$0xff] }
  0x16   : > { %v243_v22 = vadd.f32 %v242_v17, %v241_v19  ;;  %v276_v4 = vsel %vm234_vm1, %v1212_v63, 0.0  ;;  %v278_v11 = vsel %vm234_vm1, %v1217_v2, 0.0  ;;  %v1227_v13 = vld [vmem:[%s1105_s28 + $0xc0] sm:$0xff]  ;;  %v280_v16 = vsel %vm234_vm1, %v1222_v9, 0.0  ;;  %v1232_v17 = vld [vmem:[%s1105_s28 + $0xc8] sm:$0xff] }
  0x18   : > { %v245_v25 = vadd.f32 %v244_v20, %v243_v22  ;;  %v282_v20 = vsel %vm234_vm1, %v1227_v13, 0.0  ;;  %v1237_v22 = vld [vmem:[%s1105_s28 + $0xd0] sm:$0xff] }
  0x1a   : > { %v247_v28 = vadd.f32 %v246_v23, %v245_v25  ;;  %v284_v25 = vsel %vm234_vm1, %v1232_v17, 0.0 }
  0x1c   : > { %v249_v31 = vadd.f32 %v248_v26, %v247_v28  ;;  %v1242_v26 = vld [vmem:[%s1105_s28 + $0xd8] sm:$0xff] }
  0x1e   : > { %v251_v34 = vadd.f32 %v250_v29, %v249_v31  ;;  %v286_v29 = vsel %vm234_vm1, %v1237_v22, 0.0  ;;  %v1247_v31 = vld [vmem:[%s1105_s28 + $0xe0] sm:$0xff] }
  0x20   : > { %v253_v37 = vadd.f32 %v252_v32, %v251_v34  ;;  %v288_v34 = vsel %vm234_vm1, %v1242_v26, 0.0 }
  0x22   : > { %v255_v40 = vadd.f32 %v254_v35, %v253_v37  ;;  %v1252_v35 = vld [vmem:[%s1105_s28 + $0xe8] sm:$0xff] }
  0x24   : > { %v257_v43 = vadd.f32 %v256_v38, %v255_v40  ;;  %v290_v38 = vsel %vm234_vm1, %v1247_v31, 0.0  ;;  %v1257_v40 = vld [vmem:[%s1105_s28 + $0xf0] sm:$0xff] }
  0x26   : > { %v259_v46 = vadd.f32 %v258_v41, %v257_v43  ;;  %v292_v43 = vsel %vm234_vm1, %v1252_v35, 0.0 }
  0x28   : > { %v261_v49 = vadd.f32 %v260_v44, %v259_v46  ;;  %v1262_v44 = vld [vmem:[%s1105_s28 + $0xf8] sm:$0xff] }
  0x2a   : > { %v263_v52 = vadd.f32 %v262_v47, %v261_v49  ;;  %v294_v47 = vsel %vm234_vm1, %v1257_v40, 0.0 }
  0x2c   : > { %v265_v55 = vadd.f32 %v264_v50, %v263_v52  ;;  %v296_v50 = vsel %vm234_vm1, %v1262_v44, 0.0 }
  0x2e   : > { %v267_v58 = vadd.f32 %v266_v53, %v265_v55 }
  0x30   : > { %v269_v61 = vadd.f32 %v268_v56, %v267_v58 }
  0x32   : > { %v271_v0 = vadd.f32 %v270_v59, %v269_v61 }
  0x34   : > { %v273_v3 = vadd.f32 %v272_v62, %v271_v0  ;;  %v377_v0 = vlaneseq }
  0x36   : > { %v275_v10 = vadd.f32 %v274_v1, %v273_v3  ;;  %v1269_v1 = vshrl.u32 %v377_v0, 7 }
  0x38   : > { %v277_v14 = vadd.f32 %v276_v4, %v275_v10  ;;  %v379_v10 = vsub.s32 0, %v1269_v1 }
  0x3a   : > { %v279_v19 = vadd.f32 %v278_v11, %v277_v14 }
  0x3c   : > { %v281_v23 = vadd.f32 %v280_v16, %v279_v19 }
  0x3e   : > { %v283_v28 = vadd.f32 %v282_v20, %v281_v23 }
  0x40   : > { %v285_v32 = vadd.f32 %v284_v25, %v283_v28 }
  0x42   : > { %v287_v37 = vadd.f32 %v286_v29, %v285_v32 }
  0x44   : > { %v289_v41 = vadd.f32 %v288_v34, %v287_v37 }
  0x46   : > { %v291_v46 = vadd.f32 %v290_v38, %v289_v41 }
  0x48   : > { %v293_v49 = vadd.f32 %v292_v43, %v291_v46 }
  0x4a   : > { %v295_v52 = vadd.f32 %v294_v47, %v293_v49 }
  0x4c   : > { %v297_v53 = vadd.f32 %v296_v50, %v295_v52 }
  0x4e   : > { %v298_v55 = vrot.slane %v297_v53, 4 }
  0x50   : > { %v299_v56 = vadd.f32 %v298_v55, %v297_v53 }
  0x52   : > { %v300_v58 = vrot.slane %v299_v56, 2 }
  0x54   : > { %v301_v59 = vadd.f32 %v300_v58, %v299_v56 }
  0x56   : > { %v302_v61 = vrot.slane %v301_v59, 1 }
  0x58   : > { %v303_v62 = vadd.f32 %v302_v61, %v301_v59 }
  0x5a   : > { %1018 = vmatmul.mubr.msk.f32.vlgmr.msra.gmra.mxu0 %vm234_vm1, %v303_v62 }
 0x11a   : > { %v373_v3 = vpop.f32.mrf.mxu0 }
 0x11b   : > { %v1274_v11 = vrot.slane %v373_v3, %v379_v10 }
 0x11c   : > { %v1019_v4 = vpop.f32.mrf.mxu0 }
 0x11d   : > { %v1278_v14 = vsub.f32 %v1108_v5, %v1274_v11  ;;  %v1282_v16 = vsub.f32 %v1111_v6, %v1274_v11  ;;  %v1286_v19 = vsub.f32 %v1114_v7, %v1274_v11  ;;  %v1290_v20 = vsub.f32 %v1117_v8, %v1274_v11 }
 0x11e   : > { %v1298_v5 = vsub.f32 %v1126_v12, %v1274_v11  ;;  %v1304_v7 = vsub.f32 %v1132_v15, %v1274_v11  ;;  %v1312_v34 = vsub.f32 %v1137_v18, %v1274_v11  ;;  %v1319_v15 = vsub.f32 %v1142_v21, %v1274_v11 }
 0x11f   : > { %v413_v23 = vmul.f32 %v1278_v14, %v1278_v14  ;;  %v414_v25 = vmul.f32 %v1282_v16, %v1282_v16  ;;  %v415_v6 = vmul.f32 %v1286_v19, %v1286_v19  ;;  %v416_v8 = vmul.f32 %v1290_v20, %v1290_v20 }
 0x120   : > { %v417_v12 = vmul.f32 %v1298_v5, %v1298_v5  ;;  %v418_v41 = vmul.f32 %v1304_v7, %v1304_v7  ;;  %v1326_v18 = vsub.f32 %v1147_v24, %v1274_v11  ;;  %v419_v47 = vmul.f32 %v1312_v34, %v1312_v34 }
 0x121   : > { %v445_v28 = vsel %vm234_vm1, %v413_v23, 0.0  ;;  %v446_v29 = vsel %vm234_vm1, %v414_v25, 0.0  ;;  %v448_v37 = vsel %vm234_vm1, %v415_v6, 0.0  ;;  %v450_v43 = vsel %vm234_vm1, %v416_v8, 0.0 }
 0x122   : > { %v447_v32 = vadd.f32 %v446_v29, %v445_v28  ;;  %v452_v49 = vsel %vm234_vm1, %v417_v12, 0.0  ;;  %v1333_v21 = vsub.f32 %v1152_v27, %v1274_v11  ;;  %v420_v52 = vmul.f32 %v1319_v15, %v1319_v15 }
 0x123   : > { %v454_v53 = vsel %vm234_vm1, %v418_v41, 0.0  ;;  %v1340_v24 = vsub.f32 %v1157_v30, %v1274_v11  ;;  %v421_v56 = vmul.f32 %v1326_v18, %v1326_v18  ;;  %v456_v58 = vsel %vm234_vm1, %v419_v47, 0.0 }
 0x124   : > { %v449_v38 = vadd.f32 %v448_v37, %v447_v32  ;;  %v1347_v27 = vsub.f32 %v1162_v33, %v1274_v11  ;;  %v422_v61 = vmul.f32 %v1333_v21, %v1333_v21  ;;  %v458_v62 = vsel %vm234_vm1, %v420_v52, 0.0 }
 0x125   : > { %v1354_v30 = vsub.f32 %v1167_v36, %v1274_v11  ;;  %v423_v3 = vmul.f32 %v1340_v24, %v1340_v24  ;;  %v460_v4 = vsel %vm234_vm1, %v421_v56, 0.0  ;;  %v1361_v33 = vsub.f32 %v1172_v39, %v1274_v11 }
 0x126   : > { %v451_v46 = vadd.f32 %v450_v43, %v449_v38  ;;  %v424_v25 = vmul.f32 %v1347_v27, %v1347_v27  ;;  %v462_v6 = vsel %vm234_vm1, %v422_v61, 0.0  ;;  %v1368_v36 = vsub.f32 %v1177_v42, %v1274_v11 }
 0x127   : > { %v425_v28 = vmul.f32 %v1354_v30, %v1354_v30  ;;  %v464_v29 = vsel %vm234_vm1, %v423_v3, 0.0  ;;  %v1375_v39 = vsub.f32 %v1182_v45, %v1274_v11  ;;  %v426_v12 = vmul.f32 %v1361_v33, %v1361_v33 }
 0x128   : > { %v453_v50 = vadd.f32 %v452_v49, %v451_v46  ;;  %v466_v37 = vsel %vm234_vm1, %v424_v25, 0.0  ;;  %v1382_v42 = vsub.f32 %v1187_v48, %v1274_v11  ;;  %v427_v41 = vmul.f32 %v1368_v36, %v1368_v36 }
 0x129   : > { %v468_v43 = vsel %vm234_vm1, %v425_v28, 0.0  ;;  %v1389_v45 = vsub.f32 %v1192_v51, %v1274_v11  ;;  %v428_v47 = vmul.f32 %v1375_v39, %v1375_v39  ;;  %v470_v49 = vsel %vm234_vm1, %v426_v12, 0.0 }
 0x12a   : > { %v455_v55 = vadd.f32 %v454_v53, %v453_v50  ;;  %v1396_v48 = vsub.f32 %v1197_v54, %v1274_v11  ;;  %v429_v52 = vmul.f32 %v1382_v42, %v1382_v42  ;;  %v472_v53 = vsel %vm234_vm1, %v427_v41, 0.0 }
 0x12b   : > { %v1403_v51 = vsub.f32 %v1202_v57, %v1274_v11  ;;  %v430_v56 = vmul.f32 %v1389_v45, %v1389_v45  ;;  %v1410_v54 = vsub.f32 %v1207_v60, %v1274_v11  ;;  %v1417_v57 = vsub.f32 %v1212_v63, %v1274_v11 }
 0x12c   : > { %v457_v59 = vadd.f32 %v456_v58, %v455_v55  ;;  %v474_v58 = vsel %vm234_vm1, %v428_v47, 0.0  ;;  %v431_v61 = vmul.f32 %v1396_v48, %v1396_v48  ;;  %v1424_v60 = vsub.f32 %v1217_v2, %v1274_v11 }
 0x12d   : > { %v432_v3 = vmul.f32 %v1403_v51, %v1403_v51  ;;  %v433_v25 = vmul.f32 %v1410_v54, %v1410_v54  ;;  %v1431_v63 = vsub.f32 %v1222_v9, %v1274_v11  ;;  %v434_v28 = vmul.f32 %v1417_v57, %v1417_v57 }
 0x12e   : > { %v459_v0 = vadd.f32 %v458_v62, %v457_v59  ;;  %v476_v62 = vsel %vm234_vm1, %v429_v52, 0.0  ;;  %v1438_v2 = vsub.f32 %v1227_v13, %v1274_v11  ;;  %v435_v12 = vmul.f32 %v1424_v60, %v1424_v60 }
 0x12f   : > { %v1445_v9 = vsub.f32 %v1232_v17, %v1274_v11  ;;  %v436_v41 = vmul.f32 %v1431_v63, %v1431_v63  ;;  %v1452_v13 = vsub.f32 %v1237_v22, %v1274_v11  ;;  %v1459_v17 = vsub.f32 %v1242_v26, %v1274_v11 }
 0x130   : > { %v461_v23 = vadd.f32 %v460_v4, %v459_v0  ;;  %v478_v4 = vsel %vm234_vm1, %v430_v56, 0.0  ;;  %v437_v47 = vmul.f32 %v1438_v2, %v1438_v2  ;;  %v1466_v22 = vsub.f32 %v1247_v31, %v1274_v11 }
 0x131   : > { %v438_v52 = vmul.f32 %v1445_v9, %v1445_v9  ;;  %v439_v56 = vmul.f32 %v1452_v13, %v1452_v13  ;;  %v1473_v26 = vsub.f32 %v1252_v35, %v1274_v11  ;;  %v411_v31 = vsub.f32 %v1257_v40, %v1274_v11 }
 0x132   : > { %v463_v8 = vadd.f32 %v462_v6, %v461_v23  ;;  %v480_v6 = vsel %vm234_vm1, %v431_v61, 0.0  ;;  %v440_v61 = vmul.f32 %v1459_v17, %v1459_v17 }
 0x133   : > { %v442_v35 = vmul.f32 %v1473_v26, %v1473_v26 }
 0x134   : > { %v465_v32 = vadd.f32 %v464_v29, %v463_v8  ;;  %v482_v29 = vsel %vm234_vm1, %v432_v3, 0.0  ;;  %v441_v3 = vmul.f32 %v1466_v22, %v1466_v22 }
 0x136   : > { %v467_v38 = vadd.f32 %v466_v37, %v465_v32  ;;  %v484_v37 = vsel %vm234_vm1, %v433_v25, 0.0  ;;  %v412_v25 = vsub.f32 %v1262_v44, %v1274_v11 }
 0x138   : > { %v469_v46 = vadd.f32 %v468_v43, %v467_v38  ;;  %v486_v43 = vsel %vm234_vm1, %v434_v28, 0.0  ;;  %v443_v28 = vmul.f32 %v411_v31, %v411_v31  ;;  %v444_v40 = vmul.f32 %v412_v25, %v412_v25 }
 0x13a   : > { %v471_v50 = vadd.f32 %v470_v49, %v469_v46  ;;  %v488_v49 = vsel %vm234_vm1, %v435_v12, 0.0  ;;  %v502_v12 = vsel %vm234_vm1, %v442_v35, 0.0 }
 0x13c   : > { %v473_v55 = vadd.f32 %v472_v53, %v471_v50  ;;  %v490_v53 = vsel %vm234_vm1, %v436_v41, 0.0 }
 0x13e   : > { %v475_v59 = vadd.f32 %v474_v58, %v473_v55  ;;  %v492_v58 = vsel %vm234_vm1, %v437_v47, 0.0 }
 0x140   : > { %v477_v0 = vadd.f32 %v476_v62, %v475_v59  ;;  %v494_v62 = vsel %vm234_vm1, %v438_v52, 0.0 }
 0x142   : > { %v479_v23 = vadd.f32 %v478_v4, %v477_v0  ;;  %v496_v4 = vsel %vm234_vm1, %v439_v56, 0.0 }
 0x144   : > { %v481_v8 = vadd.f32 %v480_v6, %v479_v23  ;;  %v498_v6 = vsel %vm234_vm1, %v440_v61, 0.0 }
 0x146   : > { %v483_v32 = vadd.f32 %v482_v29, %v481_v8  ;;  %v500_v29 = vsel %vm234_vm1, %v441_v3, 0.0 }
 0x148   : > { %v485_v38 = vadd.f32 %v484_v37, %v483_v32 }
 0x14a   : > { %v487_v46 = vadd.f32 %v486_v43, %v485_v38  ;;  %v504_v38 = vsel %vm234_vm1, %v443_v28, 0.0  ;;  %v506_v43 = vsel %vm234_vm1, %v444_v40, 0.0 }
 0x14c   : > { %v489_v50 = vadd.f32 %v488_v49, %v487_v46 }
 0x14e   : > { %v491_v55 = vadd.f32 %v490_v53, %v489_v50 }
 0x150   : > { %v493_v59 = vadd.f32 %v492_v58, %v491_v55 }
 0x152   : > { %v495_v0 = vadd.f32 %v494_v62, %v493_v59 }
 0x154   : > { %v497_v23 = vadd.f32 %v496_v4, %v495_v0 }
 0x156   : > { %v499_v8 = vadd.f32 %v498_v6, %v497_v23 }
 0x158   : > { %v501_v32 = vadd.f32 %v500_v29, %v499_v8 }
 0x15a   : > { %v503_v37 = vadd.f32 %v502_v12, %v501_v32 }
 0x15c   : > { %v505_v41 = vadd.f32 %v504_v38, %v503_v37 }
 0x15e   : > { %v507_v44 = vadd.f32 %v506_v43, %v505_v41 }
 0x160   : > { %v508_v11 = vrot.slane %v507_v44, 4 }
 0x162   : > { %v509_v46 = vadd.f32 %v508_v11, %v507_v44 }
 0x164   : > { %v510_v47 = vrot.slane %v509_v46, 2 }
 0x166   : > { %v511_v49 = vadd.f32 %v510_v47, %v509_v46 }
 0x168   : > { %v512_v50 = vrot.slane %v511_v49, 1 }
 0x16a   : > { %v513_v52 = vadd.f32 %v512_v50, %v511_v49  ;;  %v930_v50 = vld [vmem:[%s1654_s2] ss:$0 sm:$0xff] }
 0x16c   : > { %1029 = vmatmul.mubr.msk.f32.vlgmr.msra.gmra.mxu1 %vm234_vm1, %v513_v52 }
 0x22c   : > { %v583_v53 = vpop.f32.mrf.mxu1 }
 0x22d   : > { %v584_v55 = vadd.f32 1e-05, %v583_v53 }
 0x22e   : > { %v1030_v56 = vpop.f32.mrf.mxu1 }
 0x22f   : > { %1041 = vrsqrt.f32 %v584_v55 }
 0x23c   : > { %v1042_v58 = vpop.eup %1041 }
 0x23d   : > { %v591_v59 = vrot.slane %v1042_v58, %v379_v10 }
 0x23f   : > { %v592_v61 = vmul.f32 %v591_v59, %v1278_v14  ;;  %v593_v62 = vmul.f32 %v591_v59, %v1282_v16  ;;  %v594_v0 = vmul.f32 %v591_v59, %v1286_v19  ;;  %v595_v3 = vmul.f32 %v591_v59, %v1290_v20 }
 0x240   : > { %v596_v4 = vmul.f32 %v591_v59, %v1298_v5  ;;  %v597_v23 = vmul.f32 %v591_v59, %v1304_v7  ;;  %v598_v35 = vmul.f32 %v591_v59, %v1312_v34  ;;  %v599_v6 = vmul.f32 %v591_v59, %v1319_v15 }
 0x241   : > { %v600_v8 = vmul.f32 %v591_v59, %v1326_v18  ;;  %v601_v1 = vmul.f32 %v591_v59, %v1333_v21  ;;  %v602_v10 = vmul.f32 %v591_v59, %v1340_v24  ;;  %v603_v14 = vmul.f32 %v591_v59, %v1347_v27 }
 0x242   : > { %v604_v16 = vmul.f32 %v591_v59, %v1354_v30  ;;  %v605_v19 = vmul.f32 %v591_v59, %v1361_v33  ;;  %v606_v20 = vmul.f32 %v591_v59, %v1368_v36  ;;  %v607_v5 = vmul.f32 %v591_v59, %v1375_v39  ;;  %v929_v33 = vld [vmem:[%s1653_s1] ss:$0 sm:$0xff] }
 0x243   : > { %v608_v7 = vmul.f32 %v591_v59, %v1382_v42  ;;  %v609_v34 = vmul.f32 %v591_v59, %v1389_v45  ;;  %v610_v15 = vmul.f32 %v591_v59, %v1396_v48  ;;  %v611_v18 = vmul.f32 %v591_v59, %v1403_v51 }
 0x244   : > { %v612_v21 = vmul.f32 %v591_v59, %v1410_v54  ;;  %v613_v24 = vmul.f32 %v591_v59, %v1417_v57  ;;  %v614_v27 = vmul.f32 %v591_v59, %v1424_v60  ;;  %v615_v30 = vmul.f32 %v591_v59, %v1431_v63 }
 0x245   : > { %v616_v36 = vmul.f32 %v591_v59, %v1438_v2  ;;  %v617_v39 = vmul.f32 %v591_v59, %v1445_v9  ;;  %v618_v42 = vmul.f32 %v591_v59, %v1452_v13  ;;  %v619_v45 = vmul.f32 %v591_v59, %v1459_v17 }
 0x246   : > { %v620_v48 = vmul.f32 %v591_v59, %v1466_v22  ;;  %v621_v51 = vmul.f32 %v591_v59, %v1473_v26  ;;  %v622_v54 = vmul.f32 %v591_v59, %v411_v31  ;;  %v623_v57 = vmul.f32 %v591_v59, %v412_v25 }
 0x247   : > { %v631_v60 = vmul.f32 %v929_v33, %v592_v61  ;;  %v632_v63 = vmul.f32 %v929_v33, %v593_v62  ;;  %v633_v28 = vmul.f32 %v929_v33, %v594_v0  ;;  %v634_v29 = vmul.f32 %v929_v33, %v595_v3 }
 0x248   : > { %v635_v32 = vmul.f32 %v929_v33, %v596_v4  ;;  %v636_v40 = vmul.f32 %v929_v33, %v597_v23  ;;  %v637_v12 = vmul.f32 %v929_v33, %v598_v35  ;;  %v638_v2 = vmul.f32 %v929_v33, %v599_v6 }
 0x249   : > { %v639_v37 = vmul.f32 %v929_v33, %v600_v8  ;;  %v640_v9 = vmul.f32 %v929_v33, %v601_v1  ;;  %v641_v38 = vmul.f32 %v929_v33, %v602_v10  ;;  %v642_v13 = vmul.f32 %v929_v33, %v603_v14 }
 0x24a   : > { %v643_v41 = vmul.f32 %v929_v33, %v604_v16  ;;  %v644_v17 = vmul.f32 %v929_v33, %v605_v19  ;;  %v645_v43 = vmul.f32 %v929_v33, %v606_v20  ;;  %v646_v22 = vmul.f32 %v929_v33, %v607_v5 }
 0x24b   : > { %v647_v44 = vmul.f32 %v929_v33, %v608_v7  ;;  %v648_v26 = vmul.f32 %v929_v33, %v609_v34  ;;  %v649_v31 = vmul.f32 %v929_v33, %v610_v15  ;;  %v650_v25 = vmul.f32 %v929_v33, %v611_v18 }
 0x24c   : > { %v651_v11 = vmul.f32 %v929_v33, %v612_v21  ;;  %v652_v46 = vmul.f32 %v929_v33, %v613_v24  ;;  %v653_v47 = vmul.f32 %v929_v33, %v614_v27  ;;  %v654_v49 = vmul.f32 %v929_v33, %v615_v30 }
 0x24d   : > { %v655_v52 = vmul.f32 %v929_v33, %v616_v36  ;;  %v656_v53 = vmul.f32 %v929_v33, %v617_v39  ;;  %v657_v55 = vmul.f32 %v929_v33, %v618_v42  ;;  %v658_v56 = vmul.f32 %v929_v33, %v619_v45 }
 0x24e   : > { %v659_v58 = vmul.f32 %v929_v33, %v620_v48  ;;  %v660_v59 = vmul.f32 %v929_v33, %v621_v51  ;;  %v661_v61 = vmul.f32 %v929_v33, %v622_v54  ;;  %v662_v62 = vmul.f32 %v929_v33, %v623_v57 }
 0x24f   : > { %v670_v0 = vadd.f32 %v930_v50, %v631_v60  ;;  %v671_v3 = vadd.f32 %v930_v50, %v632_v63  ;;  %v672_v4 = vadd.f32 %v930_v50, %v633_v28  ;;  %v673_v23 = vadd.f32 %v930_v50, %v634_v29 }
 0x250   : > { %v674_v35 = vadd.f32 %v930_v50, %v635_v32  ;;  %v675_v6 = vadd.f32 %v930_v50, %v636_v40  ;;  %v676_v8 = vadd.f32 %v930_v50, %v637_v12  ;;  %v677_v1 = vadd.f32 %v930_v50, %v638_v2 }
 0x251   : > { %v678_v10 = vadd.f32 %v930_v50, %v639_v37  ;;  %v679_v14 = vadd.f32 %v930_v50, %v640_v9  ;;  %v680_v16 = vadd.f32 %v930_v50, %v641_v38  ;;  %v681_v19 = vadd.f32 %v930_v50, %v642_v13 }
 0x252   : > { %v682_v20 = vadd.f32 %v930_v50, %v643_v41  ;;  %v683_v5 = vadd.f32 %v930_v50, %v644_v17  ;;  %v684_v7 = vadd.f32 %v930_v50, %v645_v43  ;;  %v685_v34 = vadd.f32 %v930_v50, %v646_v22 }
 0x253   : > { %v686_v15 = vadd.f32 %v930_v50, %v647_v44  ;;  %v687_v18 = vadd.f32 %v930_v50, %v648_v26  ;;  %v688_v21 = vadd.f32 %v930_v50, %v649_v31  ;;  %v689_v24 = vadd.f32 %v930_v50, %v650_v25 }
 0x254   : > { %v1532_v27 = vadd.f32 %v930_v50, %v651_v11  ;;  %v1534_v30 = vadd.f32 %v930_v50, %v652_v46  ;;  %v1536_v33 = vadd.f32 %v930_v50, %v653_v47  ;;  %v1538_v36 = vadd.f32 %v930_v50, %v654_v49 }
 0x255   : > { %v1540_v39 = vadd.f32 %v930_v50, %v655_v52  ;;  %v1542_v42 = vadd.f32 %v930_v50, %v656_v53  ;;  %v1544_v45 = vadd.f32 %v930_v50, %v657_v55  ;;  %v1546_v48 = vadd.f32 %v930_v50, %v658_v56 }
 0x256   : > { %v1553_v51 = vadd.f32 %v930_v50, %v659_v58  ;;  %v1555_v54 = vadd.f32 %v930_v50, %v660_v59  ;;  %v1557_v57 = vadd.f32 %v930_v50, %v661_v61  ;;  %v1559_v60 = vadd.f32 %v930_v50, %v662_v62 }
 0x257   : > { %v967_v63 = vpack.c.bf16 %v670_v0, %v670_v0  ;;  %v968_v28 = vpack.c.bf16 %v671_v3, %v671_v3  ;;  %v969_v29 = vpack.c.bf16 %v672_v4, %v672_v4  ;;  %v970_v32 = vpack.c.bf16 %v673_v23, %v673_v23 }
 0x258   : > { %v971_v40 = vpack.c.bf16 %v674_v35, %v674_v35  ;;  %v972_v12 = vpack.c.bf16 %v675_v6, %v675_v6  ;;  %v973_v2 = vpack.c.bf16 %v676_v8, %v676_v8  ;;  %v974_v37 = vpack.c.bf16 %v677_v1, %v677_v1 }
 0x259   : > { %v975_v9 = vpack.c.bf16 %v678_v10, %v678_v10  ;;  %v976_v38 = vpack.c.bf16 %v679_v14, %v679_v14  ;;  %v977_v13 = vpack.c.bf16 %v680_v16, %v680_v16  ;;  %v978_v41 = vpack.c.bf16 %v681_v19, %v681_v19  ;;  %831 = vst.msk [vmem:[%s1551_s10] sm:$0xf] %vm830_vm2, %v967_v63 }
 0x25a   : > { %832 = vst.msk [vmem:[%s1551_s10 + $0x4] sm:$0xf] %vm830_vm2, %v968_v28  ;;  %833 = vst.msk [vmem:[%s1551_s10 + $0x8] sm:$0xf] %vm830_vm2, %v969_v29  ;;  %v979_v17 = vpack.c.bf16 %v682_v20, %v682_v20  ;;  %v980_v43 = vpack.c.bf16 %v683_v5, %v683_v5  ;;  %v981_v22 = vpack.c.bf16 %v684_v7, %v684_v7 }
 0x25b   : > { %834 = vst.msk [vmem:[%s1551_s10 + $0xc] sm:$0xf] %vm830_vm2, %v970_v32  ;;  %v982_v44 = vpack.c.bf16 %v685_v34, %v685_v34  ;;  %835 = vst.msk [vmem:[%s1551_s10 + $0x10] sm:$0xf] %vm830_vm2, %v971_v40  ;;  %v983_v26 = vpack.c.bf16 %v686_v15, %v686_v15  ;;  %v984_v31 = vpack.c.bf16 %v687_v18, %v687_v18 }
 0x25c   : > { %836 = vst.msk [vmem:[%s1551_s10 + $0x14] sm:$0xf] %vm830_vm2, %v972_v12  ;;  %837 = vst.msk [vmem:[%s1551_s10 + $0x18] sm:$0xf] %vm830_vm2, %v973_v2  ;;  %v985_v25 = vpack.c.bf16 %v688_v21, %v688_v21  ;;  %v986_v11 = vpack.c.bf16 %v689_v24, %v689_v24  ;;  %v987_v46 = vpack.c.bf16 %v1532_v27, %v1532_v27 }
 0x25d   : > { %838 = vst.msk [vmem:[%s1551_s10 + $0x1c] sm:$0xf] %vm830_vm2, %v974_v37  ;;  %839 = vst.msk [vmem:[%s1551_s10 + $0x20] sm:$0xf] %vm830_vm2, %v975_v9  ;;  %v988_v47 = vpack.c.bf16 %v1534_v30, %v1534_v30  ;;  %v989_v49 = vpack.c.bf16 %v1536_v33, %v1536_v33  ;;  %v990_v50 = vpack.c.bf16 %v1538_v36, %v1538_v36 }
 0x25e   : > { %840 = vst.msk [vmem:[%s1551_s10 + $0x24] sm:$0xf] %vm830_vm2, %v976_v38  ;;  %841 = vst.msk [vmem:[%s1551_s10 + $0x28] sm:$0xf] %vm830_vm2, %v977_v13  ;;  %v991_v52 = vpack.c.bf16 %v1540_v39, %v1540_v39  ;;  %v992_v53 = vpack.c.bf16 %v1542_v42, %v1542_v42  ;;  %v993_v55 = vpack.c.bf16 %v1544_v45, %v1544_v45 }
 0x25f   : > { %842 = vst.msk [vmem:[%s1551_s10 + $0x2c] sm:$0xf] %vm830_vm2, %v978_v41  ;;  %843 = vst.msk [vmem:[%s1551_s10 + $0x30] sm:$0xf] %vm830_vm2, %v979_v17  ;;  %v994_v56 = vpack.c.bf16 %v1546_v48, %v1546_v48  ;;  %v995_v58 = vpack.c.bf16 %v1553_v51, %v1553_v51  ;;  %v996_v59 = vpack.c.bf16 %v1555_v54, %v1555_v54 }
 0x260   : > { %844 = vst.msk [vmem:[%s1551_s10 + $0x34] sm:$0xf] %vm830_vm2, %v980_v43  ;;  %845 = vst.msk [vmem:[%s1551_s10 + $0x38] sm:$0xf] %vm830_vm2, %v981_v22  ;;  %v997_v61 = vpack.c.bf16 %v1557_v57, %v1557_v57  ;;  %v998_v62 = vpack.c.bf16 %v1559_v60, %v1559_v60 }
 0x261   : > { %846 = vst.msk [vmem:[%s1551_s10 + $0x3c] sm:$0xf] %vm830_vm2, %v982_v44  ;;  %847 = vst.msk [vmem:[%s1551_s10 + $0x40] sm:$0xf] %vm830_vm2, %v983_v26 }
 0x262   : > { %848 = vst.msk [vmem:[%s1551_s10 + $0x44] sm:$0xf] %vm830_vm2, %v984_v31  ;;  %849 = vst.msk [vmem:[%s1551_s10 + $0x48] sm:$0xf] %vm830_vm2, %v985_v25 }
 0x263   : > { %850 = vst.msk [vmem:[%s1551_s10 + $0x4c] sm:$0xf] %vm830_vm2, %v986_v11  ;;  %851 = vst.msk [vmem:[%s1551_s10 + $0x50] sm:$0xf] %vm830_vm2, %v987_v46 }
 0x264   : > { %852 = vst.msk [vmem:[%s1551_s10 + $0x54] sm:$0xf] %vm830_vm2, %v988_v47  ;;  %853 = vst.msk [vmem:[%s1551_s10 + $0x58] sm:$0xf] %vm830_vm2, %v989_v49 }
 0x265   : > { %854 = vst.msk [vmem:[%s1551_s10 + $0x5c] sm:$0xf] %vm830_vm2, %v990_v50  ;;  %855 = vst.msk [vmem:[%s1551_s10 + $0x60] sm:$0xf] %vm830_vm2, %v991_v52 }
 0x266   : > { %856 = vst.msk [vmem:[%s1551_s10 + $0x64] sm:$0xf] %vm830_vm2, %v992_v53  ;;  %857 = vst.msk [vmem:[%s1551_s10 + $0x68] sm:$0xf] %vm830_vm2, %v993_v55 }
 0x267   : > { %858 = vst.msk [vmem:[%s1551_s10 + $0x6c] sm:$0xf] %vm830_vm2, %v994_v56  ;;  %859 = vst.msk [vmem:[%s1551_s10 + $0x70] sm:$0xf] %vm830_vm2, %v995_v58 }
 0x268   : > { %860 = vst.msk [vmem:[%s1551_s10 + $0x74] sm:$0xf] %vm830_vm2, %v996_v59  ;;  %861 = vst.msk [vmem:[%s1551_s10 + $0x78] sm:$0xf] %vm830_vm2, %v997_v61 }
 0x269   : > { %862 = vst.msk [vmem:[%s1551_s10 + $0x7c] sm:$0xf] %vm830_vm2, %v998_v62 }
 0x26a PF: > { %s14_s15 = sadd.s32 1, %s1049_s15  }
 0x26b   : > { %p11_p4 = scmp.ge.s32.totalorder %s14_s15, 4  }
 0x26d   :  { %13 = sbr.rel (!%p11_p4) target bundleno = 1 (0x1), region = 66 }

// kernel: cmptrans512_forward.15
= control target key start
LH: loop header
LB: loop body
LE: loop exit
PB: predicated region body
PF: predicated region fallthrough
CT: control target
= control target key end

     0   :  { %s2052_s12 = smov 0   ;;  %s2054_s13 = smov 0   ;;  %s2447_s0 = inlined_call_operand.vmem [shape: bf16[2,1,288,96], index: 0, kind: input, shape index: {}]   ;;  %s2448_s1 = inlined_call_operand.vmem [shape: bf16[3,96,64], index: 1, kind: input, shape index: {}]   ;;  %s2449_s2 = inlined_call_operand.vmem [shape: f32[1,64], index: 2, kind: input, shape index: {}]   ;;  %s2450_s3 = inlined_call_operand.vmem [shape: bf16[2,256,64], index: 3, kind: output, shape index: {}]  }
   0x1   :  { %s2056_s14 = smov 0  }
   0x2 LB: > { %s25_s15 = sadd.s32 1, %s2026_s13  ;;  %p1527_p0 = scmp.ge.s32.totalorder %s2030_s14, 1  ;;  %s2030_s14 = sphi %s2056_s14, %s13_s14   ;;  %s2026_s13 = sphi %s2054_s13, %s2452_s13   ;;  %s2022_s12 = sphi %s2052_s12, %s2451_s12  }
   0x3   : > { %p27_p1 = scmp.ge.s32.totalorder %s25_s15, 2  ;;  %p157_p2 = scmp.lt.s32.totalorder %s2030_s14, 3 }
   0x5   : > { %s2454_s15 = smov (%p27_p1, %s25_s15), 0  ;;  %p158_p3 = pnand %p1527_p0, %p157_p2 }
   0x6   : > { %p189_p4 = scmp.lt.s32.totalorder (!%p158_p3), %s2022_s12, 1 }
   0x7   : > { %161 = sbr.rel (%p158_p3) target bundleno = 335 (0x14f), region = 32 }
   0xc   : > { %v1957_v0 = vld [vmem:[%s2448_s1 + $0x58] sm:$0xff]   ;;  %v1958_v1 = vld [vmem:[%s2448_s1 + $0x50] sm:$0xff]   ;;  %s2456_s12 = smov (!%p189_p4, %s2022_s12), 1  ;;  %v1959_v2 = vld [vmem:[%s2448_s1 + $0x48] sm:$0xff]   ;;  %vm384_vm0 = vcmask 785408   ;;  %vm1400_vm1 = vcmask 519168  }
   0xd   : > { %1788 = vmatprep.subr.bf16.mxu0 %v1957_v0  ;;  %1920 = vmatprep.subr.bf16.mxu1 %v1957_v0  ;;  %s1932_s22 = smul.u32 144, %s2456_s12  ;;  %v1960_v3 = vld [vmem:[%s2448_s1 + $0x40] sm:$0xff]   ;;  %v1961_v6 = vld [vmem:[%s2448_s1 + $0x38] sm:$0xff]   ;;  %v1962_v7 = vld [vmem:[%s2448_s1 + $0x30] sm:$0xff]   ;;  %s1689_s8 = sshll.u32 %s2456_s12, 7 }
   0xe   : > { %1789 = vmatpush3.bf16.msra.mxu0 %v1957_v0  ;;  %1926 = vmatpush3.bf16.msra.mxu1 %v1957_v0  ;;  %v1967_v8 = vld [vmem:[%s2448_s1 + $0x28] sm:$0xff]   ;;  %v1969_v12 = vld [vmem:[%s2448_s1 + $0x20] sm:$0xff]   ;;  %v1975_v16 = vld [vmem:[%s2448_s1 + $0x18] sm:$0xff]   ;;  %s2316_s11 = scalar_lea.vmem %s2450_s3, %s1689_s8 }
   0xf   : > { %1790 = vmatprep.subr.bf16.mxu0 %v1958_v1  ;;  %1921 = vmatprep.subr.bf16.mxu1 %v1958_v1  ;;  %s2088_s27 = scalar_lea.vmem %s2447_s0, %s1932_s22  ;;  %v1968_v10 = vld [vmem:[%s2448_s1 + $0x88] sm:$0xff]   ;;  %v1974_v15 = vld [vmem:[%s2448_s1 + $0x80] sm:$0xff]   ;;  %v1976_v18 = vld [vmem:[%s2448_s1 + $0x78] sm:$0xff]  }
  0x10   : > { %v2091_v4 = vld [vmem:[%s2088_s27 + $0x8] sm:$0xff]   ;;  %v2110_v9 = vld [vmem:[%s2088_s27 + $0x10] sm:$0xff]   ;;  %v2122_v13 = vld [vmem:[%s2088_s27 + $0x18] sm:$0xff]  }
  0x11   : > { %v2094_v5 = vld [vmem:[%s2088_s27 + $0x48] sm:$0xff]   ;;  %1800 = vmatprep.mubr.msk.bf16.mxu0 %vm384_vm0, %v2091_v4  ;;  %v2116_v11 = vld [vmem:[%s2088_s27 + $0x50] sm:$0xff]   ;;  %v2125_v14 = vld [vmem:[%s2088_s27 + $0x58] sm:$0xff]  }
  0x12   : > { %1791 = vmatpush3.bf16.msra.mxu0 %v1958_v1  ;;  %1927 = vmatpush3.bf16.msra.mxu1 %v1958_v1  ;;  %v1972_v17 = vld [vmem:[%s2088_s27 + $0x20] sm:$0xff]   ;;  %v1977_v20 = vld [vmem:[%s2088_s27 + $0x28] sm:$0xff]   ;;  %v1981_v22 = vld [vmem:[%s2448_s1 + $0x10] sm:$0xff]  }
  0x13   : > { %1792 = vmatprep.subr.bf16.mxu0 %v1959_v2  ;;  %1922 = vmatprep.subr.bf16.mxu1 %v1959_v2  ;;  %v2146_v19 = vld [vmem:[%s2088_s27 + $0x60] sm:$0xff]   ;;  %v2150_v21 = vld [vmem:[%s2088_s27 + $0x68] sm:$0xff]   ;;  %v1982_v23 = vld [vmem:[%s2448_s1 + $0x70] sm:$0xff]  }
  0x14   : > { %1816 = vmatprep.mubr.msk.bf16.mxu1 %vm384_vm0, %v2094_v5  ;;  %v1983_v24 = vld [vmem:[%s2448_s1 + $0x8] sm:$0xff]   ;;  %v1979_v25 = vld [vmem:[%s2088_s27 + $0x30] sm:$0xff]   ;;  %v1984_v28 = vld [vmem:[%s2088_s27 + $0x38] sm:$0xff]  }
  0x15   : > { %v1988_v26 = vld [vmem:[%s2448_s1 + $0x68] sm:$0xff]   ;;  %v2172_v27 = vld [vmem:[%s2088_s27 + $0x70] sm:$0xff]   ;;  %v2176_v29 = vld [vmem:[%s2088_s27 + $0x78] sm:$0xff]  }
  0x16   : > { %1793 = vmatpush3.bf16.msra.mxu0 %v1959_v2  ;;  %1928 = vmatpush3.bf16.msra.mxu1 %v1959_v2  ;;  %v1989_v30 = vld [vmem:[%s2448_s1] sm:$0xff]   ;;  %v1992_v35 = vld [vmem:[%s2088_s27 + $0x10] sm:$0xff]   ;;  %v1993_v36 = vld [vmem:[%s2088_s27 + $0x18] sm:$0xff]  }
  0x17   : > { %1794 = vmatprep.subr.bf16.mxu0 %v1960_v3  ;;  %1923 = vmatprep.subr.bf16.mxu1 %v1960_v3  ;;  %v1990_v31 = vld [vmem:[%s2448_s1 + $0x60] sm:$0xff]   ;;  %v1995_v38 = vld [vmem:[%s2088_s27 + $0x28] sm:$0xff]   ;;  %v1996_v39 = vld [vmem:[%s2088_s27 + $0x30] sm:$0xff]  }
  0x18   : > { %v1986_v32 = vld [vmem:[%s2088_s27 + $0x40] sm:$0xff]   ;;  %v1997_v40 = vld [vmem:[%s2088_s27 + $0x38] sm:$0xff]   ;;  %v1999_v42 = vld [vmem:[%s2088_s27 + $0x48] sm:$0xff]  }
  0x19   : > { %v1987_v33 = vld [vmem:[%s2088_s27 + $0x80] sm:$0xff]   ;;  %v2000_v43 = vld [vmem:[%s2088_s27 + $0x50] sm:$0xff]   ;;  %v2001_v44 = vld [vmem:[%s2088_s27 + $0x58] sm:$0xff]  }
  0x1a   : > { %1795 = vmatpush3.bf16.msra.mxu0 %v1960_v3  ;;  %1929 = vmatpush3.bf16.msra.mxu1 %v1960_v3  ;;  %v1991_v34 = vld [vmem:[%s2088_s27] sm:$0xff]   ;;  %v2003_v46 = vld [vmem:[%s2088_s27 + $0x68] sm:$0xff]   ;;  %v2004_v47 = vld [vmem:[%s2088_s27 + $0x70] sm:$0xff]  }
  0x1b   : > { %1796 = vmatprep.subr.bf16.mxu0 %v1961_v6  ;;  %1924 = vmatprep.subr.bf16.mxu1 %v1961_v6  ;;  %v1994_v37 = vld [vmem:[%s2088_s27 + $0x20] sm:$0xff]   ;;  %v2005_v48 = vld [vmem:[%s2088_s27 + $0x78] sm:$0xff]   ;;  %v2007_v50 = vld [vmem:[%s2088_s27 + $0x88] sm:$0xff]  }
  0x1c   : > { %v1998_v41 = vld [vmem:[%s2088_s27 + $0x40] sm:$0xff]  }
  0x1d   : > { %v2002_v45 = vld [vmem:[%s2088_s27 + $0x60] sm:$0xff]  }
  0x1e   : > { %1797 = vmatpush3.bf16.msra.mxu0 %v1961_v6  ;;  %1930 = vmatpush3.bf16.msra.mxu1 %v1961_v6  ;;  %v2006_v49 = vld [vmem:[%s2088_s27 + $0x80] sm:$0xff]  }
  0x1f   : > { %1798 = vmatprep.subr.bf16.mxu0 %v1962_v7  ;;  %1925 = vmatprep.subr.bf16.mxu1 %v1962_v7 }
  0x22   : > { %1799 = vmatpush3.bf16.msra.mxu0 %v1962_v7  ;;  %1931 = vmatpush3.bf16.msra.mxu1 %v1962_v7 }
  0x23   : > { %1832 = vmatprep.subr.bf16.mxu1 %v1967_v8  ;;  %1876 = vmatprep.subr.bf16.mxu0 %v1968_v10 }
  0x25   : > { %1801 = vmatmul.mubr.msk.bf16.vlgmr.msra.gmra.mxu0 %vm384_vm0, %v2110_v9  ;;  %1817 = vmatmul.mubr.msk.bf16.vlgmr.msra.gmra.mxu1 %vm384_vm0, %v2116_v11 }
  0x26   : > { %1833 = vmatpush3.bf16.msra.mxu1 %v1967_v8  ;;  %1877 = vmatpush3.bf16.msra.mxu0 %v1968_v10 }
  0x27   : > { %1834 = vmatprep.subr.bf16.mxu1 %v1969_v12  ;;  %1804 = vmatprep.mubr.msk.bf16.mxu0 %vm384_vm0, %v2122_v13 }
  0x28   : > { %1820 = vmatprep.mubr.msk.bf16.mxu1 %vm384_vm0, %v2125_v14  ;;  %1878 = vmatprep.subr.bf16.mxu0 %v1974_v15 }
  0x2a   : > { %1835 = vmatpush3.bf16.msra.mxu1 %v1969_v12  ;;  %1879 = vmatpush3.bf16.msra.mxu0 %v1974_v15 }
  0x2b   : > { %1836 = vmatprep.subr.bf16.mxu1 %v1975_v16  ;;  %1880 = vmatprep.subr.bf16.mxu0 %v1976_v18 }
  0x2d   : > { %1805 = vmatmul.mubr.msk.bf16.gmra.mxu0 %vm384_vm0, %v1972_v17  ;;  %1821 = vmatmul.mubr.msk.bf16.gmra.mxu1 %vm384_vm0, %v2146_v19 }
  0x2e   : > { %1837 = vmatpush3.bf16.msra.mxu1 %v1975_v16  ;;  %1881 = vmatpush3.bf16.msra.mxu0 %v1976_v18 }
  0x2f   : > { %1808 = vmatprep.mubr.msk.bf16.mxu0 %vm384_vm0, %v1977_v20  ;;  %1824 = vmatprep.mubr.msk.bf16.mxu1 %vm384_vm0, %v2150_v21 }
  0x30   : > { %1838 = vmatprep.subr.bf16.mxu1 %v1981_v22  ;;  %1882 = vmatprep.subr.bf16.mxu0 %v1982_v23 }
  0x32   : > { %1839 = vmatpush3.bf16.msra.mxu1 %v1981_v22  ;;  %1883 = vmatpush3.bf16.msra.mxu0 %v1982_v23  ;;  %v2308_v22 = vld [vmem:[%s2449_s2] ss:$0 sm:$0xff] }
  0x33   : > { %1840 = vmatprep.subr.bf16.mxu1 %v1983_v24  ;;  %1884 = vmatprep.subr.bf16.mxu0 %v1988_v26 }
  0x35   : > { %1809 = vmatmul.mubr.msk.bf16.gmra.mxu0 %vm384_vm0, %v1979_v25  ;;  %1825 = vmatmul.mubr.msk.bf16.gmra.mxu1 %vm384_vm0, %v2172_v27 }
  0x36   : > { %1812 = vmatprep.mubr.msk.bf16.mxu0 %vm384_vm0, %v1984_v28  ;;  %1828 = vmatprep.mubr.msk.bf16.mxu1 %vm384_vm0, %v2176_v29 }
  0x37   : > { %1841 = vmatpush3.bf16.msra.mxu1 %v1983_v24  ;;  %1885 = vmatpush3.bf16.msra.mxu0 %v1988_v26 }
  0x38   : > { %1842 = vmatprep.subr.bf16.mxu1 %v1989_v30  ;;  %1886 = vmatprep.subr.bf16.mxu0 %v1990_v31 }
  0x3b   : > { %1843 = vmatpush3.bf16.msra.mxu1 %v1989_v30  ;;  %1887 = vmatpush3.bf16.msra.mxu0 %v1990_v31 }
  0x3d   : > { %1813 = vmatmul.mubr.msk.bf16.gmra.mxu0 %vm384_vm0, %v1986_v32  ;;  %1829 = vmatmul.mubr.msk.bf16.gmra.mxu1 %vm384_vm0, %v1987_v33 }
  0x3e   : > { %1844 = vmatprep.mubr.msk.bf16.mxu1 %vm384_vm0, %v1991_v34  ;;  %1888 = vmatprep.mubr.msk.bf16.mxu0 %vm384_vm0, %v1992_v35 }
  0x45   : > { %1845 = vmatmul.mubr.msk.bf16.vlgmr.msra.gmra.mxu1 %vm384_vm0, %v2091_v4  ;;  %1889 = vmatmul.mubr.msk.bf16.vlgmr.msra.gmra.mxu0 %vm384_vm0, %v1993_v36 }
  0x46   : > { %1848 = vmatprep.mubr.msk.bf16.mxu1 %vm384_vm0, %v2110_v9  ;;  %1892 = vmatprep.mubr.msk.bf16.mxu0 %vm384_vm0, %v1994_v37 }
  0x4d   : > { %1849 = vmatmul.mubr.msk.bf16.gmra.mxu1 %vm384_vm0, %v2122_v13  ;;  %1893 = vmatmul.mubr.msk.bf16.gmra.mxu0 %vm384_vm0, %v1995_v38 }
  0x4e   : > { %1852 = vmatprep.mubr.msk.bf16.mxu1 %vm384_vm0, %v1972_v17  ;;  %1896 = vmatprep.mubr.msk.bf16.mxu0 %vm384_vm0, %v1996_v39 }
  0x55   : > { %1853 = vmatmul.mubr.msk.bf16.gmra.mxu1 %vm384_vm0, %v1977_v20  ;;  %1897 = vmatmul.mubr.msk.bf16.gmra.mxu0 %vm384_vm0, %v1997_v40 }
  0x56   : > { %1856 = vmatprep.mubr.msk.bf16.mxu1 %vm384_vm0, %v1979_v25  ;;  %1900 = vmatprep.mubr.msk.bf16.mxu0 %vm384_vm0, %v1998_v41 }
  0x5d   : > { %1857 = vmatmul.mubr.msk.bf16.gmra.mxu1 %vm384_vm0, %v1984_v28  ;;  %1901 = vmatmul.mubr.msk.bf16.gmra.mxu0 %vm384_vm0, %v1999_v42 }
  0x5e   : > { %1860 = vmatprep.mubr.msk.bf16.mxu1 %vm384_vm0, %v1986_v32  ;;  %1904 = vmatprep.mubr.msk.bf16.mxu0 %vm384_vm0, %v2000_v43 }
  0x65   : > { %1861 = vmatmul.mubr.msk.bf16.gmra.mxu1 %vm384_vm0, %v2094_v5  ;;  %1905 = vmatmul.mubr.msk.bf16.gmra.mxu0 %vm384_vm0, %v2001_v44 }
  0x66   : > { %1864 = vmatprep.mubr.msk.bf16.mxu1 %vm384_vm0, %v2116_v11  ;;  %1908 = vmatprep.mubr.msk.bf16.mxu0 %vm384_vm0, %v2002_v45 }
  0x6d   : > { %1865 = vmatmul.mubr.msk.bf16.gmra.mxu1 %vm384_vm0, %v2125_v14  ;;  %1909 = vmatmul.mubr.msk.bf16.gmra.mxu0 %vm384_vm0, %v2003_v46 }
  0x6e   : > { %1868 = vmatprep.mubr.msk.bf16.mxu1 %vm384_vm0, %v2146_v19  ;;  %1912 = vmatprep.mubr.msk.bf16.mxu0 %vm384_vm0, %v2004_v47 }
  0x75   : > { %1869 = vmatmul.mubr.msk.bf16.gmra.mxu1 %vm384_vm0, %v2150_v21  ;;  %1913 = vmatmul.mubr.msk.bf16.gmra.mxu0 %vm384_vm0, %v2005_v48 }
  0x76   : > { %1872 = vmatprep.mubr.msk.bf16.mxu1 %vm384_vm0, %v2172_v27  ;;  %1916 = vmatprep.mubr.msk.bf16.mxu0 %vm384_vm0, %v2006_v49 }
  0x7d   : > { %1873 = vmatmul.mubr.msk.bf16.gmra.mxu1 %vm384_vm0, %v2176_v29  ;;  %1917 = vmatmul.mubr.msk.bf16.gmra.mxu0 %vm384_vm0, %v2007_v50 }
  0xe5   : > { %v1802_v51 = vpop.f32.mrf.mxu0  ;;  %v2253_v52 = vpop.f32.mrf.mxu1 }
  0xe7   : > { %v467_v53 = vpop.f32.mrf.mxu0  ;;  %v2255_v54 = vpop.f32.mrf.mxu1 }
  0xe9   : > { %v1803_v55 = vpop.f32.mrf.mxu0  ;;  %v2257_v56 = vpop.f32.mrf.mxu1 }
  0xeb   : > { %v470_v57 = vpop.f32.mrf.mxu0  ;;  %v2259_v58 = vpop.f32.mrf.mxu1 }
  0xed   : > { %v1806_v59 = vpop.f32.mrf.mxu0  ;;  %v2261_v60 = vpop.f32.mrf.mxu1 }
  0xef   : > { %v483_v61 = vpop.f32.mrf.mxu0  ;;  %v2263_v62 = vpop.f32.mrf.mxu1 }
  0xf1   : > { %v2265_v63 = vpop.f32.mrf.mxu0  ;;  %v2267_v0 = vpop.f32.mrf.mxu1 }
  0xf3   : > { %v2269_v1 = vpop.f32.mrf.mxu0  ;;  %v2271_v2 = vpop.f32.mrf.mxu1 }
  0xf5   : > { %v2273_v3 = vpop.f32.mrf.mxu0  ;;  %v2275_v4 = vpop.f32.mrf.mxu1 }
  0xf7   : > { %v2277_v5 = vpop.f32.mrf.mxu0  ;;  %v2279_v6 = vpop.f32.mrf.mxu1 }
  0xf9   : > { %v2281_v7 = vpop.f32.mrf.mxu0  ;;  %v2283_v8 = vpop.f32.mrf.mxu1 }
  0xfb   : > { %v2285_v9 = vpop.f32.mrf.mxu0  ;;  %v2287_v10 = vpop.f32.mrf.mxu1 }
  0xfd   : > { %v2289_v11 = vpop.f32.mrf.mxu0  ;;  %v2291_v12 = vpop.f32.mrf.mxu1 }
  0xff   : > { %v2293_v13 = vpop.f32.mrf.mxu0  ;;  %v2295_v14 = vpop.f32.mrf.mxu1 }
 0x101   : > { %v2297_v15 = vpop.f32.mrf.mxu0  ;;  %v2299_v16 = vpop.f32.mrf.mxu1 }
 0x103   : > { %v2301_v17 = vpop.f32.mrf.mxu0  ;;  %v2303_v18 = vpop.f32.mrf.mxu1 }
 0x105   : > { %v1846_v19 = vpop.f32.mrf.mxu1  ;;  %v1890_v20 = vpop.f32.mrf.mxu0 }
 0x106   : > { %v681_v21 = vadd.f32 %v1846_v19, %v1802_v51 }
 0x107   : > { %v672_v23 = vpop.f32.mrf.mxu1  ;;  %v1042_v24 = vpop.f32.mrf.mxu0 }
 0x108   : > { %v1171_v25 = vadd.f32 %v1890_v20, %v681_v21  ;;  %v673_v26 = vadd.f32 %v672_v23, %v467_v53 }
 0x109   : > { %v1847_v27 = vpop.f32.mrf.mxu1  ;;  %v1891_v28 = vpop.f32.mrf.mxu0 }
 0x10a   : > { %v1210_v29 = vadd.f32 %v2308_v22, %v1171_v25  ;;  %v1169_v30 = vadd.f32 %v1042_v24, %v673_v26  ;;  %v684_v31 = vadd.f32 %v1847_v27, %v1803_v55 }
 0x10b   : > { %v675_v32 = vpop.f32.mrf.mxu1  ;;  %v1045_v33 = vpop.f32.mrf.mxu0 }
 0x10c   : > { %v1242_v34 = vmax.f32 %v1210_v29, 0.0  ;;  %v1208_v35 = vadd.f32 %v2308_v22, %v1169_v30  ;;  %v1172_v36 = vadd.f32 %v1891_v28, %v684_v31  ;;  %v676_v37 = vadd.f32 %v675_v32, %v470_v57 }
 0x10d   : > { %v1850_v38 = vpop.f32.mrf.mxu1  ;;  %v1894_v39 = vpop.f32.mrf.mxu0 }
 0x10e   : > { %v1692_v40 = vpack.c.bf16 %v1242_v34, %v1242_v34  ;;  %v1240_v41 = vmax.f32 %v1208_v35, 0.0  ;;  %v1211_v42 = vadd.f32 %v2308_v22, %v1172_v36  ;;  %v1170_v43 = vadd.f32 %v1045_v33, %v676_v37 }
 0x10f   : > { %v697_v44 = vadd.f32 %v1850_v38, %v1806_v59  ;;  %v688_v45 = vpop.f32.mrf.mxu1  ;;  %v1058_v46 = vpop.f32.mrf.mxu0 }
 0x110   : > { %1403 = vst.msk [vmem:[%s2316_s11 + $0x8] sm:$0xf] %vm1400_vm1, %v1692_v40  ;;  %v1690_v47 = vpack.c.bf16 %v1240_v41, %v1240_v41  ;;  %v1243_v48 = vmax.f32 %v1211_v42, 0.0  ;;  %v1209_v49 = vadd.f32 %v2308_v22, %v1170_v43  ;;  %v689_v50 = vadd.f32 %v688_v45, %v483_v61 }
 0x111   : > { %v1175_v51 = vadd.f32 %v1894_v39, %v697_v44  ;;  %v1851_v53 = vpop.f32.mrf.mxu1  ;;  %v1895_v55 = vpop.f32.mrf.mxu0 }
 0x112   : > { %1401 = vst.msk [vmem:[%s2316_s11] sm:$0xf] %vm1400_vm1, %v1690_v47  ;;  %v1693_v57 = vpack.c.bf16 %v1243_v48, %v1243_v48  ;;  %v1241_v19 = vmax.f32 %v1209_v49, 0.0  ;;  %v1173_v20 = vadd.f32 %v1058_v46, %v689_v50  ;;  %v700_v59 = vadd.f32 %v1851_v53, %v2265_v63 }
 0x113   : > { %v1214_v21 = vadd.f32 %v2308_v22, %v1175_v51  ;;  %v691_v23 = vpop.f32.mrf.mxu1  ;;  %v1061_v24 = vpop.f32.mrf.mxu0 }
 0x114   : > { %1404 = vst.msk [vmem:[%s2316_s11 + $0xc] sm:$0xf] %vm1400_vm1, %v1693_v57  ;;  %v1691_v25 = vpack.c.bf16 %v1241_v19, %v1241_v19  ;;  %v1212_v61 = vadd.f32 %v2308_v22, %v1173_v20  ;;  %v1176_v26 = vadd.f32 %v1895_v55, %v700_v59  ;;  %v692_v27 = vadd.f32 %v691_v23, %v2269_v1 }
 0x115   : > { %v1246_v28 = vmax.f32 %v1214_v21, 0.0  ;;  %v1854_v29 = vpop.f32.mrf.mxu1  ;;  %v1898_v30 = vpop.f32.mrf.mxu0 }
 0x116   : > { %1402 = vst.msk [vmem:[%s2316_s11 + $0x4] sm:$0xf] %vm1400_vm1, %v1691_v25  ;;  %v1244_v63 = vmax.f32 %v1212_v61, 0.0  ;;  %v1215_v31 = vadd.f32 %v2308_v22, %v1176_v26  ;;  %v1174_v32 = vadd.f32 %v1061_v24, %v692_v27  ;;  %v713_v33 = vadd.f32 %v1854_v29, %v2273_v3 }
 0x117   : > { %v1696_v34 = vpack.c.bf16 %v1246_v28, %v1246_v28  ;;  %v704_v35 = vpop.f32.mrf.mxu1  ;;  %v1074_v36 = vpop.f32.mrf.mxu0 }
 0x118   : > { %v1694_v37 = vpack.c.bf16 %v1244_v63, %v1244_v63  ;;  %v1247_v38 = vmax.f32 %v1215_v31, 0.0  ;;  %v1213_v1 = vadd.f32 %v2308_v22, %v1174_v32  ;;  %v1179_v39 = vadd.f32 %v1898_v30, %v713_v33 }
 0x119   : > { %1407 = vst.msk [vmem:[%s2316_s11 + $0x18] sm:$0xf] %vm1400_vm1, %v1696_v34  ;;  %v705_v40 = vadd.f32 %v704_v35, %v2277_v5  ;;  %v1855_v41 = vpop.f32.mrf.mxu1  ;;  %v1899_v42 = vpop.f32.mrf.mxu0 }
 0x11a   : > { %1405 = vst.msk [vmem:[%s2316_s11 + $0x10] sm:$0xf] %vm1400_vm1, %v1694_v37  ;;  %v1697_v43 = vpack.c.bf16 %v1247_v38, %v1247_v38  ;;  %v1245_v3 = vmax.f32 %v1213_v1, 0.0  ;;  %v1218_v44 = vadd.f32 %v2308_v22, %v1179_v39  ;;  %v716_v45 = vadd.f32 %v1855_v41, %v2281_v7 }
 0x11b   : > { %v1177_v46 = vadd.f32 %v1074_v36, %v705_v40  ;;  %v707_v47 = vpop.f32.mrf.mxu1  ;;  %v1077_v48 = vpop.f32.mrf.mxu0 }
 0x11c   : > { %1408 = vst.msk [vmem:[%s2316_s11 + $0x1c] sm:$0xf] %vm1400_vm1, %v1697_v43  ;;  %v1695_v49 = vpack.c.bf16 %v1245_v3, %v1245_v3  ;;  %v1250_v50 = vmax.f32 %v1218_v44, 0.0  ;;  %v1180_v5 = vadd.f32 %v1899_v42, %v716_v45  ;;  %v708_v51 = vadd.f32 %v707_v47, %v2285_v9 }
 0x11d   : > { %v1216_v53 = vadd.f32 %v2308_v22, %v1177_v46  ;;  %v1858_v55 = vpop.f32.mrf.mxu1  ;;  %v1902_v57 = vpop.f32.mrf.mxu0 }
 0x11e   : > { %1406 = vst.msk [vmem:[%s2316_s11 + $0x14] sm:$0xf] %vm1400_vm1, %v1695_v49  ;;  %v1700_v19 = vpack.c.bf16 %v1250_v50, %v1250_v50  ;;  %v1219_v7 = vadd.f32 %v2308_v22, %v1180_v5  ;;  %v1178_v20 = vadd.f32 %v1077_v48, %v708_v51  ;;  %v729_v59 = vadd.f32 %v1858_v55, %v2289_v11 }
 0x11f   : > { %v1248_v21 = vmax.f32 %v1216_v53, 0.0  ;;  %v720_v23 = vpop.f32.mrf.mxu1  ;;  %v1090_v24 = vpop.f32.mrf.mxu0 }
 0x120   : > { %1411 = vst.msk [vmem:[%s2316_s11 + $0x28] sm:$0xf] %vm1400_vm1, %v1700_v19  ;;  %v1251_v9 = vmax.f32 %v1219_v7, 0.0  ;;  %v1217_v25 = vadd.f32 %v2308_v22, %v1178_v20  ;;  %v1183_v61 = vadd.f32 %v1902_v57, %v729_v59  ;;  %v721_v26 = vadd.f32 %v720_v23, %v2293_v13 }
 0x121   : > { %v1698_v27 = vpack.c.bf16 %v1248_v21, %v1248_v21  ;;  %v1859_v28 = vpop.f32.mrf.mxu1  ;;  %v1903_v29 = vpop.f32.mrf.mxu0 }
 0x122   : > { %v1701_v30 = vpack.c.bf16 %v1251_v9, %v1251_v9  ;;  %v1249_v63 = vmax.f32 %v1217_v25, 0.0  ;;  %v1222_v11 = vadd.f32 %v2308_v22, %v1183_v61  ;;  %v1181_v31 = vadd.f32 %v1090_v24, %v721_v26 }
 0x123   : > { %1409 = vst.msk [vmem:[%s2316_s11 + $0x20] sm:$0xf] %vm1400_vm1, %v1698_v27  ;;  %v732_v32 = vadd.f32 %v1859_v28, %v2297_v15  ;;  %v723_v33 = vpop.f32.mrf.mxu1  ;;  %v1093_v34 = vpop.f32.mrf.mxu0 }
 0x124   : > { %1412 = vst.msk [vmem:[%s2316_s11 + $0x2c] sm:$0xf] %vm1400_vm1, %v1701_v30  ;;  %v1699_v35 = vpack.c.bf16 %v1249_v63, %v1249_v63  ;;  %v1254_v13 = vmax.f32 %v1222_v11, 0.0  ;;  %v1220_v36 = vadd.f32 %v2308_v22, %v1181_v31  ;;  %v724_v37 = vadd.f32 %v723_v33, %v2301_v17 }
 0x125   : > { %v1184_v38 = vadd.f32 %v1903_v29, %v732_v32  ;;  %v1862_v1 = vpop.f32.mrf.mxu1  ;;  %v1906_v39 = vpop.f32.mrf.mxu0 }
 0x126   : > { %1410 = vst.msk [vmem:[%s2316_s11 + $0x24] sm:$0xf] %vm1400_vm1, %v1699_v35  ;;  %v1704_v40 = vpack.c.bf16 %v1254_v13, %v1254_v13  ;;  %v1252_v41 = vmax.f32 %v1220_v36, 0.0  ;;  %v1182_v15 = vadd.f32 %v1093_v34, %v724_v37  ;;  %v745_v42 = vadd.f32 %v1862_v1, %v2253_v52 }
 0x127   : > { %v1223_v43 = vadd.f32 %v2308_v22, %v1184_v38  ;;  %v736_v3 = vpop.f32.mrf.mxu1  ;;  %v1106_v44 = vpop.f32.mrf.mxu0 }
 0x128   : > { %1415 = vst.msk [vmem:[%s2316_s11 + $0x38] sm:$0xf] %vm1400_vm1, %v1704_v40  ;;  %v1702_v45 = vpack.c.bf16 %v1252_v41, %v1252_v41  ;;  %v1221_v17 = vadd.f32 %v2308_v22, %v1182_v15  ;;  %v1187_v46 = vadd.f32 %v1906_v39, %v745_v42  ;;  %v737_v47 = vadd.f32 %v736_v3, %v2255_v54 }
 0x129   : > { %v1255_v48 = vmax.f32 %v1223_v43, 0.0  ;;  %v1863_v49 = vpop.f32.mrf.mxu1  ;;  %v1907_v50 = vpop.f32.mrf.mxu0 }
 0x12a   : > { %1413 = vst.msk [vmem:[%s2316_s11 + $0x30] sm:$0xf] %vm1400_vm1, %v1702_v45  ;;  %v1253_v52 = vmax.f32 %v1221_v17, 0.0  ;;  %v1226_v5 = vadd.f32 %v2308_v22, %v1187_v46  ;;  %v1185_v51 = vadd.f32 %v1106_v44, %v737_v47  ;;  %v748_v53 = vadd.f32 %v1863_v49, %v2257_v56 }
 0x12b   : > { %v1705_v55 = vpack.c.bf16 %v1255_v48, %v1255_v48  ;;  %v739_v57 = vpop.f32.mrf.mxu1  ;;  %v1109_v19 = vpop.f32.mrf.mxu0 }
 0x12c   : > { %v1703_v7 = vpack.c.bf16 %v1253_v52, %v1253_v52  ;;  %v1258_v20 = vmax.f32 %v1226_v5, 0.0  ;;  %v1224_v54 = vadd.f32 %v2308_v22, %v1185_v51  ;;  %v1188_v59 = vadd.f32 %v1907_v50, %v748_v53 }
 0x12d   : > { %1416 = vst.msk [vmem:[%s2316_s11 + $0x3c] sm:$0xf] %vm1400_vm1, %v1705_v55  ;;  %v740_v21 = vadd.f32 %v739_v57, %v2259_v58  ;;  %v1866_v23 = vpop.f32.mrf.mxu1  ;;  %v1910_v24 = vpop.f32.mrf.mxu0 }
 0x12e   : > { %1414 = vst.msk [vmem:[%s2316_s11 + $0x34] sm:$0xf] %vm1400_vm1, %v1703_v7  ;;  %v1708_v9 = vpack.c.bf16 %v1258_v20, %v1258_v20  ;;  %v1256_v56 = vmax.f32 %v1224_v54, 0.0  ;;  %v1227_v25 = vadd.f32 %v2308_v22, %v1188_v59  ;;  %v761_v61 = vadd.f32 %v1866_v23, %v2261_v60 }
 0x12f   : > { %v1186_v26 = vadd.f32 %v1109_v19, %v740_v21  ;;  %v752_v27 = vpop.f32.mrf.mxu1  ;;  %v1122_v28 = vpop.f32.mrf.mxu0 }
 0x130   : > { %1419 = vst.msk [vmem:[%s2316_s11 + $0x48] sm:$0xf] %vm1400_vm1, %v1708_v9  ;;  %v1706_v29 = vpack.c.bf16 %v1256_v56, %v1256_v56  ;;  %v1259_v30 = vmax.f32 %v1227_v25, 0.0  ;;  %v1191_v58 = vadd.f32 %v1910_v24, %v761_v61  ;;  %v753_v63 = vadd.f32 %v752_v27, %v2263_v62 }
 0x131   : > { %v1225_v11 = vadd.f32 %v2308_v22, %v1186_v26  ;;  %v1867_v31 = vpop.f32.mrf.mxu1  ;;  %v1911_v32 = vpop.f32.mrf.mxu0 }
 0x132   : > { %1417 = vst.msk [vmem:[%s2316_s11 + $0x40] sm:$0xf] %vm1400_vm1, %v1706_v29  ;;  %v1709_v33 = vpack.c.bf16 %v1259_v30, %v1259_v30  ;;  %v1230_v60 = vadd.f32 %v2308_v22, %v1191_v58  ;;  %v1189_v34 = vadd.f32 %v1122_v28, %v753_v63  ;;  %v764_v35 = vadd.f32 %v1867_v31, %v2267_v0 }
 0x133   : > { %v1257_v13 = vmax.f32 %v1225_v11, 0.0  ;;  %v755_v36 = vpop.f32.mrf.mxu1  ;;  %v1125_v37 = vpop.f32.mrf.mxu0 }
 0x134   : > { %1420 = vst.msk [vmem:[%s2316_s11 + $0x4c] sm:$0xf] %vm1400_vm1, %v1709_v33  ;;  %v1262_v62 = vmax.f32 %v1230_v60, 0.0  ;;  %v1228_v38 = vadd.f32 %v2308_v22, %v1189_v34  ;;  %v1192_v1 = vadd.f32 %v1911_v32, %v764_v35  ;;  %v756_v39 = vadd.f32 %v755_v36, %v2271_v2 }
 0x135   : > { %v1707_v40 = vpack.c.bf16 %v1257_v13, %v1257_v13  ;;  %v1870_v41 = vpop.f32.mrf.mxu1  ;;  %v1914_v15 = vpop.f32.mrf.mxu0 }
 0x136   : > { %v1712_v42 = vpack.c.bf16 %v1262_v62, %v1262_v62  ;;  %v1260_v43 = vmax.f32 %v1228_v38, 0.0  ;;  %v1231_v0 = vadd.f32 %v2308_v22, %v1192_v1  ;;  %v1190_v3 = vadd.f32 %v1125_v37, %v756_v39 }
 0x137   : > { %1418 = vst.msk [vmem:[%s2316_s11 + $0x44] sm:$0xf] %vm1400_vm1, %v1707_v40  ;;  %v777_v44 = vadd.f32 %v1870_v41, %v2275_v4  ;;  %v768_v45 = vpop.f32.mrf.mxu1  ;;  %v1138_v17 = vpop.f32.mrf.mxu0 }
 0x138   : > { %1423 = vst.msk [vmem:[%s2316_s11 + $0x58] sm:$0xf] %vm1400_vm1, %v1712_v42  ;;  %v1710_v46 = vpack.c.bf16 %v1260_v43, %v1260_v43  ;;  %v1263_v2 = vmax.f32 %v1231_v0, 0.0  ;;  %v1229_v47 = vadd.f32 %v2308_v22, %v1190_v3  ;;  %v769_v48 = vadd.f32 %v768_v45, %v2279_v6 }
 0x139   : > { %v1195_v49 = vadd.f32 %v1914_v15, %v777_v44  ;;  %v1871_v50 = vpop.f32.mrf.mxu1  ;;  %v1915_v52 = vpop.f32.mrf.mxu0 }
 0x13a   : > { %1421 = vst.msk [vmem:[%s2316_s11 + $0x50] sm:$0xf] %vm1400_vm1, %v1710_v46  ;;  %v1713_v5 = vpack.c.bf16 %v1263_v2, %v1263_v2  ;;  %v1261_v51 = vmax.f32 %v1229_v47, 0.0  ;;  %v1193_v4 = vadd.f32 %v1138_v17, %v769_v48  ;;  %v780_v53 = vadd.f32 %v1871_v50, %v2283_v8 }
 0x13b   : > { %v1234_v55 = vadd.f32 %v2308_v22, %v1195_v49  ;;  %v771_v57 = vpop.f32.mrf.mxu1  ;;  %v1141_v19 = vpop.f32.mrf.mxu0 }
 0x13c   : > { %1424 = vst.msk [vmem:[%s2316_s11 + $0x5c] sm:$0xf] %vm1400_vm1, %v1713_v5  ;;  %v1711_v7 = vpack.c.bf16 %v1261_v51, %v1261_v51  ;;  %v1232_v6 = vadd.f32 %v2308_v22, %v1193_v4  ;;  %v1196_v20 = vadd.f32 %v1915_v52, %v780_v53  ;;  %v772_v54 = vadd.f32 %v771_v57, %v2287_v10 }
 0x13d   : > { %v1266_v59 = vmax.f32 %v1234_v55, 0.0  ;;  %v1874_v21 = vpop.f32.mrf.mxu1  ;;  %v1918_v23 = vpop.f32.mrf.mxu0 }
 0x13e   : > { %1422 = vst.msk [vmem:[%s2316_s11 + $0x54] sm:$0xf] %vm1400_vm1, %v1711_v7  ;;  %v1264_v8 = vmax.f32 %v1232_v6, 0.0  ;;  %v1235_v24 = vadd.f32 %v2308_v22, %v1196_v20  ;;  %v1194_v9 = vadd.f32 %v1141_v19, %v772_v54  ;;  %v793_v56 = vadd.f32 %v1874_v21, %v2291_v12 }
 0x13f   : > { %v1716_v25 = vpack.c.bf16 %v1266_v59, %v1266_v59  ;;  %v784_v61 = vpop.f32.mrf.mxu1  ;;  %v1154_v26 = vpop.f32.mrf.mxu0 }
 0x140   : > { %v1714_v27 = vpack.c.bf16 %v1264_v8, %v1264_v8  ;;  %v1267_v28 = vmax.f32 %v1235_v24, 0.0  ;;  %v1233_v10 = vadd.f32 %v2308_v22, %v1194_v9  ;;  %v1199_v29 = vadd.f32 %v1918_v23, %v793_v56 }
 0x141   : > { %1427 = vst.msk [vmem:[%s2316_s11 + $0x68] sm:$0xf] %vm1400_vm1, %v1716_v25  ;;  %v785_v30 = vadd.f32 %v784_v61, %v2295_v14  ;;  %v1875_v58 = vpop.f32.mrf.mxu1  ;;  %v1919_v63 = vpop.f32.mrf.mxu0 }
 0x142   : > { %1425 = vst.msk [vmem:[%s2316_s11 + $0x60] sm:$0xf] %vm1400_vm1, %v1714_v27  ;;  %v1717_v11 = vpack.c.bf16 %v1267_v28, %v1267_v28  ;;  %v1265_v12 = vmax.f32 %v1233_v10, 0.0  ;;  %v1238_v31 = vadd.f32 %v2308_v22, %v1199_v29  ;;  %v796_v32 = vadd.f32 %v1875_v58, %v2299_v16 }
 0x143   : > { %v1197_v33 = vadd.f32 %v1154_v26, %v785_v30  ;;  %v787_v60 = vpop.f32.mrf.mxu1  ;;  %v1157_v37 = vpop.f32.mrf.mxu0 }
 0x144   : > { %1428 = vst.msk [vmem:[%s2316_s11 + $0x6c] sm:$0xf] %vm1400_vm1, %v1717_v11  ;;  %v1715_v34 = vpack.c.bf16 %v1265_v12, %v1265_v12  ;;  %v1270_v35 = vmax.f32 %v1238_v31, 0.0  ;;  %v1200_v14 = vadd.f32 %v1919_v63, %v796_v32  ;;  %v788_v13 = vadd.f32 %v787_v60, %v2303_v18 }
 0x145   : > { %v1236_v36 = vadd.f32 %v2308_v22, %v1197_v33 }
 0x146   : > { %1426 = vst.msk [vmem:[%s2316_s11 + $0x64] sm:$0xf] %vm1400_vm1, %v1715_v34  ;;  %v1720_v62 = vpack.c.bf16 %v1270_v35, %v1270_v35  ;;  %v1239_v16 = vadd.f32 %v2308_v22, %v1200_v14  ;;  %v1198_v38 = vadd.f32 %v1157_v37, %v788_v13 }
 0x147   : > { %v1268_v1 = vmax.f32 %v1236_v36, 0.0 }
 0x148   : > { %1431 = vst.msk [vmem:[%s2316_s11 + $0x78] sm:$0xf] %vm1400_vm1, %v1720_v62  ;;  %v1271_v39 = vmax.f32 %v1239_v16, 0.0  ;;  %v1237_v40 = vadd.f32 %v2308_v22, %v1198_v38 }
 0x149   : > { %v1718_v41 = vpack.c.bf16 %v1268_v1, %v1268_v1 }
 0x14a   : > { %v1721_v15 = vpack.c.bf16 %v1271_v39, %v1271_v39  ;;  %v1269_v42 = vmax.f32 %v1237_v40, 0.0 }
 0x14b   : > { %1429 = vst.msk [vmem:[%s2316_s11 + $0x70] sm:$0xf] %vm1400_vm1, %v1718_v41 }
 0x14c   : > { %1432 = vst.msk [vmem:[%s2316_s11 + $0x7c] sm:$0xf] %vm1400_vm1, %v1721_v15  ;;  %v1719_v18 = vpack.c.bf16 %v1269_v42, %v1269_v42 }
 0x14e   : > { %1430 = vst.msk [vmem:[%s2316_s11 + $0x74] sm:$0xf] %vm1400_vm1, %v1719_v18 }
 0x14f PF: > { %s13_s14 = sadd.s32 1, %s2030_s14   ;;  %s2451_s12 = smov %s2026_s13 }
 0x150   : > { %p10_p5 = scmp.ge.s32.totalorder %s13_s14, 4   ;;  %s2452_s13 = smov %s2454_s15 }
 0x152   :  { %12 = sbr.rel (!%p10_p5) target bundleno = 2 (0x2), region = 64 }

// kernel: cmptrans512_forward.17
= control target key start
LH: loop header
LB: loop body
LE: loop exit
PB: predicated region body
PF: predicated region fallthrough
CT: control target
= control target key end

     0   :  { %s1014_s12 = smov 0   ;;  %s1016_s13 = smov 0   ;;  %s1222_s0 = inlined_call_operand.vmem [shape: bf16[2,1,24,192], index: 0, kind: input, shape index: {}]   ;;  %s1223_s1 = inlined_call_operand.vmem [shape: bf16[3,192,128], index: 1, kind: input, shape index: {}]   ;;  %s1224_s2 = inlined_call_operand.vmem [shape: f32[1,128], index: 2, kind: input, shape index: {}]   ;;  %s1225_s3 = inlined_call_operand.vmem [shape: bf16[2,16,128], index: 3, kind: output, shape index: {}]  }
   0x1   :  { %s1018_s14 = smov 0  }
   0x2 LB: > { %s25_s15 = sadd.s32 1, %s987_s13  ;;  %p787_p0 = scmp.ge.s32.totalorder %s991_s14, 1  ;;  %s991_s14 = sphi %s1018_s14, %s13_s14   ;;  %s987_s13 = sphi %s1016_s13, %s1227_s13   ;;  %s983_s12 = sphi %s1014_s12, %s1226_s12  }
   0x3   : > { %p27_p1 = scmp.ge.s32.totalorder %s25_s15, 2  ;;  %p157_p2 = scmp.lt.s32.totalorder %s991_s14, 3 }
   0x5   : > { %s1229_s15 = smov (%p27_p1, %s25_s15), 0  ;;  %p158_p3 = pnand %p787_p0, %p157_p2 }
   0x6   : > { %p189_p4 = scmp.lt.s32.totalorder (!%p158_p3), %s983_s12, 1 }
   0x7   : > { %161 = sbr.rel (%p158_p3) target bundleno = 315 (0x13b), region = 32 }
   0xc   : > { %v925_v0 = vld [vmem:[%s1223_s1 + $0x98] sm:$0xff]   ;;  %v993_v1 = vmov 0   ;;  %v927_v3 = vld [vmem:[%s1223_s1 + $0x90] sm:$0xff]   ;;  %v929_v5 = vld [vmem:[%s1223_s1 + $0x88] sm:$0xff]   ;;  %s1231_s12 = smov (!%p189_p4, %s983_s12), 1  ;;  %vm355_vm0 = vcmask 523264  }
   0xd   : > { %359 = vmatprep.subr.bf16.mxu0 %v993_v1  ;;  %481 = vmatprep.subr.bf16.mxu1 %v993_v1  ;;  %v926_v2 = vld [vmem:[%s1223_s1 + $0x38] sm:$0xff]   ;;  %v928_v4 = vld [vmem:[%s1223_s1 + $0x30] sm:$0xff]   ;;  %v930_v6 = vld [vmem:[%s1223_s1 + $0x28] sm:$0xff]   ;;  %s899_s9 = smul.u32 24, %s1231_s12  ;;  %vm275_vm1 = vcmask 1045504   ;;  %s891_s26 = sshll.u32 %s1231_s12, 3 }
   0xe   : > { %360 = vmatpush1.bf16.msra.mxu0 %v925_v0  ;;  %482 = vmatpush1.bf16.msra.mxu1 %v926_v2  ;;  %v931_v7 = vld [vmem:[%s1223_s1 + $0x80] sm:$0xff]   ;;  %v933_v9 = vld [vmem:[%s1223_s1 + $0x78] sm:$0xff]   ;;  %v935_v11 = vld [vmem:[%s1223_s1 + $0x70] sm:$0xff]   ;;  %s206_s28 = scalar_lea.vmem %s1225_s3, %s891_s26 }
   0xf   : > { %361 = vmatprep.subr.bf16.mxu0 %v993_v1  ;;  %483 = vmatprep.subr.bf16.mxu1 %v993_v1  ;;  %v932_v8 = vld [vmem:[%s1223_s1 + $0x20] sm:$0xff]   ;;  %v934_v10 = vld [vmem:[%s1223_s1 + $0x18] sm:$0xff]   ;;  %v936_v12 = vld [vmem:[%s1223_s1 + $0x10] sm:$0xff]   ;;  %s1090_s20 = scalar_lea.vmem %s1222_s0, %s899_s9 }
  0x10   : > { %v937_v13 = vld [vmem:[%s1223_s1 + $0x68] sm:$0xff]   ;;  %v235_v16 = vld [vmem:[%s1090_s20] sm:$0xcc]  ;;  %v236_v17 = vld [vmem:[%s1090_s20 + $0x10] sm:$0x33] }
  0x11   : > { %v938_v14 = vld [vmem:[%s1223_s1 + $0x8] sm:$0xff]   ;;  %v818_v19 = vcombine.high %v236_v17, %v236_v17  ;;  %v209_v20 = vld [vmem:[%s1090_s20] sm:$0xff]  ;;  %v941_v27 = vld [vmem:[%s1223_s1 + $0xb8] sm:$0xff]   ;;  %v817_v33 = vcombine.low %v236_v17, %v236_v17 }
  0x12   : > { %362 = vmatpush1.bf16.msra.mxu0 %v927_v3  ;;  %484 = vmatpush1.bf16.msra.mxu1 %v928_v4  ;;  %v1101_v15 = vld [vmem:[%s1090_s20 + $0x8] sm:$0xff]  ;;  %v939_v21 = vld [vmem:[%s1223_s1 + $0x60] sm:$0xff]   ;;  %v942_v28 = vld [vmem:[%s1223_s1 + $0x58] sm:$0xff]  }
  0x13   : > { %363 = vmatprep.subr.bf16.mxu0 %v993_v1  ;;  %485 = vmatprep.subr.bf16.mxu1 %v993_v1  ;;  %v816_v18 = vcombine.high %v235_v16, %v1101_v15  ;;  %v833_v22 = vcombine.high %v209_v20, %v1101_v15  ;;  %v940_v23 = vld [vmem:[%s1223_s1] sm:$0xff]   ;;  %v280_v25 = vrot.slane %v818_v19, 2  ;;  %v943_v29 = vld [vmem:[%s1223_s1 + $0xb0] sm:$0xff]   ;;  %v945_v31 = vld [vmem:[%s1223_s1 + $0xa8] sm:$0xff]   ;;  %v815_v32 = vcombine.low %v235_v16, %v1101_v15 }
  0x14   : > { %v944_v30 = vld [vmem:[%s1223_s1 + $0x50] sm:$0xff]   ;;  %v946_v34 = vld [vmem:[%s1223_s1 + $0x48] sm:$0xff]   ;;  %v947_v35 = vld [vmem:[%s1223_s1 + $0xa0] sm:$0xff]   ;;  %v277_v37 = vrot.slane %v817_v33, 2  ;;  %v832_v40 = vcombine.low %v209_v20, %v1101_v15 }
  0x15   : > { %v279_v24 = vrot.slane %v816_v18, 2  ;;  %846 = vmatprep.mubr.msk.bf16.mxu1 %vm355_vm0, %v833_v22  ;;  %v276_v36 = vrot.slane %v815_v32, 2  ;;  %v948_v38 = vld [vmem:[%s1223_s1 + $0x40] sm:$0xff]   ;;  %v522_v39 = vld [vmem:[%s1090_s20 + $0x10] sm:$0xff]  ;;  %v955_v42 = vld [vmem:[%s1223_s1 + $0xf8] sm:$0xff]  }
  0x16   : > { %364 = vmatpush1.bf16.msra.mxu0 %v929_v5  ;;  %486 = vmatpush1.bf16.msra.mxu1 %v930_v6  ;;  %v872_v43 = vcombine.high %v1101_v15, %v522_v39  ;;  %v956_v44 = vld [vmem:[%s1223_s1 + $0xf0] sm:$0xff]   ;;  %v957_v45 = vld [vmem:[%s1223_s1 + $0xe8] sm:$0xff]   ;;  %v958_v46 = vld [vmem:[%s1223_s1 + $0xe0] sm:$0xff]   ;;  %v871_v55 = vcombine.low %v1101_v15, %v522_v39 }
  0x17   : > { %365 = vmatprep.subr.bf16.mxu0 %v993_v1  ;;  %487 = vmatprep.subr.bf16.mxu1 %v993_v1  ;;  %v281_v26 = vsel %vm275_vm1, %v279_v24, %v280_v25  ;;  %v278_v41 = vsel %vm275_vm1, %v276_v36, %v277_v37  ;;  %v959_v47 = vld [vmem:[%s1223_s1 + $0xd8] sm:$0xff]   ;;  %v960_v48 = vld [vmem:[%s1223_s1 + $0xd0] sm:$0xff]   ;;  %v961_v49 = vld [vmem:[%s1223_s1 + $0xc8] sm:$0xff]  }
  0x18   : > { %831 = vmatprep.mubr.msk.bf16.mxu0 %vm355_vm0, %v281_v26  ;;  %v962_v50 = vld [vmem:[%s1223_s1 + $0xc0] sm:$0xff]   ;;  %v963_v51 = vld [vmem:[%s1223_s1 + $0x118] sm:$0xff]   ;;  %v964_v52 = vld [vmem:[%s1223_s1 + $0x110] sm:$0xff]  }
  0x19   : > { %v965_v53 = vld [vmem:[%s1223_s1 + $0x108] sm:$0xff]   ;;  %v966_v54 = vld [vmem:[%s1223_s1 + $0x100] sm:$0xff]  }
  0x1a   : > { %366 = vmatpush1.bf16.msra.mxu0 %v931_v7  ;;  %488 = vmatpush1.bf16.msra.mxu1 %v932_v8 }
  0x1b   : > { %367 = vmatprep.subr.bf16.mxu0 %v993_v1  ;;  %489 = vmatprep.subr.bf16.mxu1 %v993_v1 }
  0x1e   : > { %368 = vmatpush1.bf16.msra.mxu0 %v933_v9  ;;  %490 = vmatpush1.bf16.msra.mxu1 %v934_v10 }
  0x1f   : > { %369 = vmatprep.subr.bf16.mxu0 %v993_v1  ;;  %491 = vmatprep.subr.bf16.mxu1 %v993_v1 }
  0x22   : > { %370 = vmatpush1.bf16.msra.mxu0 %v935_v11  ;;  %492 = vmatpush1.bf16.msra.mxu1 %v936_v12 }
  0x23   : > { %371 = vmatprep.subr.bf16.mxu0 %v993_v1  ;;  %493 = vmatprep.subr.bf16.mxu1 %v993_v1 }
  0x26   : > { %372 = vmatpush1.bf16.msra.mxu0 %v937_v13  ;;  %494 = vmatpush1.bf16.msra.mxu1 %v938_v14 }
  0x27   : > { %373 = vmatprep.subr.bf16.mxu0 %v993_v1  ;;  %495 = vmatprep.subr.bf16.mxu1 %v993_v1 }
  0x2a   : > { %374 = vmatpush1.bf16.msra.mxu0 %v939_v21  ;;  %496 = vmatpush1.bf16.msra.mxu1 %v940_v23 }
  0x2b   : > { %383 = vmatprep.subr.bf16.mxu0 %v993_v1  ;;  %505 = vmatprep.subr.bf16.mxu1 %v993_v1 }
  0x2e   : > { %384 = vmatpush2.bf16.msra.mxu0 %v941_v27  ;;  %506 = vmatpush2.bf16.msra.mxu1 %v942_v28 }
  0x2f   : > { %385 = vmatprep.subr.bf16.mxu0 %v993_v1  ;;  %507 = vmatprep.subr.bf16.mxu1 %v993_v1 }
  0x32   : > { %386 = vmatpush2.bf16.msra.mxu0 %v943_v29  ;;  %508 = vmatpush2.bf16.msra.mxu1 %v944_v30 }
  0x33   : > { %387 = vmatprep.subr.bf16.mxu0 %v993_v1  ;;  %509 = vmatprep.subr.bf16.mxu1 %v993_v1 }
  0x36   : > { %388 = vmatpush2.bf16.msra.mxu0 %v945_v31  ;;  %510 = vmatpush2.bf16.msra.mxu1 %v946_v34 }
  0x37   : > { %389 = vmatprep.subr.bf16.mxu0 %v993_v1  ;;  %511 = vmatprep.subr.bf16.mxu1 %v993_v1 }
  0x3a   : > { %390 = vmatpush2.bf16.msra.mxu0 %v947_v35  ;;  %512 = vmatpush2.bf16.msra.mxu1 %v948_v38 }
  0x3b   : > { %629 = vmatprep.subr.bf16.mxu0 %v993_v1 }
  0x3d   : > { %392 = vmatmul.mubr.bf16.vlgmr.msra.gmra.mxu0 %v278_v41  ;;  %514 = vmatmul.mubr.bf16.vlgmr.msra.gmra.mxu1 %v832_v40 }
  0x3e   : > { %630 = vmatpush1.bf16.msra.mxu0 %v955_v42  ;;  %885 = vmatprep.mubr.msk.bf16.mxu0 %vm355_vm0, %v872_v43 }
  0x3f   : > { %631 = vmatprep.subr.bf16.mxu0 %v993_v1 }
  0x42   : > { %632 = vmatpush1.bf16.msra.mxu0 %v956_v44 }
  0x43   : > { %633 = vmatprep.subr.bf16.mxu0 %v993_v1 }
  0x46   : > { %634 = vmatpush1.bf16.msra.mxu0 %v957_v45 }
  0x47   : > { %635 = vmatprep.subr.bf16.mxu0 %v993_v1 }
  0x4a   : > { %636 = vmatpush1.bf16.msra.mxu0 %v958_v46 }
  0x4b   : > { %637 = vmatprep.subr.bf16.mxu0 %v993_v1 }
  0x4e   : > { %638 = vmatpush1.bf16.msra.mxu0 %v959_v47 }
  0x4f   : > { %639 = vmatprep.subr.bf16.mxu0 %v993_v1 }
  0x52   : > { %640 = vmatpush1.bf16.msra.mxu0 %v960_v48 }
  0x53   : > { %641 = vmatprep.subr.bf16.mxu0 %v993_v1 }
  0x56   : > { %642 = vmatpush1.bf16.msra.mxu0 %v961_v49 }
  0x57   : > { %643 = vmatprep.subr.bf16.mxu0 %v993_v1 }
  0x5a   : > { %644 = vmatpush1.bf16.msra.mxu0 %v962_v50 }
  0x5b   : > { %653 = vmatprep.subr.bf16.mxu0 %v993_v1 }
  0x5e   : > { %654 = vmatpush2.bf16.msra.mxu0 %v963_v51 }
  0x5f   : > { %655 = vmatprep.subr.bf16.mxu0 %v993_v1 }
  0x62   : > { %656 = vmatpush2.bf16.msra.mxu0 %v964_v52 }
  0x63   : > { %657 = vmatprep.subr.bf16.mxu0 %v993_v1 }
  0x66   : > { %658 = vmatpush2.bf16.msra.mxu0 %v965_v53 }
  0x67   : > { %659 = vmatprep.subr.bf16.mxu0 %v993_v1  ;;  %v886_v1 = vld [vmem:[%s1224_s2] ss:$0 sm:$0xff] }
  0x6a   : > { %660 = vmatpush2.bf16.msra.mxu0 %v966_v54 }
  0x6d   : > { %662 = vmatmul.mubr.bf16.vlgmr.msra.gmra.mxu0 %v871_v55 }
  0xfd   : > { %v393_v56 = vpop.f32.mrf.mxu0  ;;  %v515_v57 = vpop.f32.mrf.mxu1 }
  0xfe   : > { %v516_v0 = vadd.f32 %v515_v57, %v393_v56 }
  0xff   : > { %v395_v58 = vpop.f32.mrf.mxu0  ;;  %v517_v59 = vpop.f32.mrf.mxu1 }
 0x101   : > { %v396_v60 = vpop.f32.mrf.mxu0  ;;  %v518_v61 = vpop.f32.mrf.mxu1 }
 0x102   : > { %v519_v5 = vadd.f32 %v518_v61, %v396_v60 }
 0x103   : > { %v398_v62 = vpop.f32.mrf.mxu0  ;;  %v520_v63 = vpop.f32.mrf.mxu1 }
 0x12d   : > { %v663_v2 = vpop.f32.mrf.mxu0 }
 0x12e   : > { %v670_v3 = vadd.f32 %v663_v2, %v516_v0 }
 0x12f   : > { %v665_v4 = vpop.f32.mrf.mxu0 }
 0x130   : > { %v679_v7 = vadd.f32 %v886_v1, %v670_v3 }
 0x131   : > { %v666_v6 = vpop.f32.mrf.mxu0 }
 0x132   : > { %v671_v8 = vadd.f32 %v666_v6, %v519_v5  ;;  %v681_v11 = vmax.f32 %v679_v7, 0.0 }
 0x133   : > { %v668_v9 = vpop.f32.mrf.mxu0 }
 0x134   : > { %v680_v10 = vadd.f32 %v886_v1, %v671_v8 }
 0x136   : > { %v682_v12 = vmax.f32 %v680_v10, 0.0 }
 0x138   : > { %v897_v13 = vpack.c.bf16 %v682_v12, %v681_v11 }
 0x13a   : > { %898 = vst [vmem:[%s206_s28] sm:$0xff] %v897_v13  }
 0x13b PF: > { %s13_s14 = sadd.s32 1, %s991_s14   ;;  %s1226_s12 = smov %s987_s13 }
 0x13c   : > { %p10_p5 = scmp.ge.s32.totalorder %s13_s14, 4   ;;  %s1227_s13 = smov %s1229_s15 }
 0x13e   :  { %12 = sbr.rel (!%p10_p5) target bundleno = 2 (0x2), region = 64 }

// kernel: cmptrans512_forward.16
= control target key start
LH: loop header
LB: loop body
LE: loop exit
PB: predicated region body
PF: predicated region fallthrough
CT: control target
= control target key end

     0   :  { %vm2798_vm0 = vcmask 523264   ;;  %vm4164_vm1 = vcmask 519168   ;;  %s7539_s1 = inlined_call_operand.vmem [shape: bf16[3136,64], index: 1, kind: input, shape index: {}]   ;;  %s7540_s0 = inlined_call_operand.vmem [shape: bf16[128,3136], index: 0, kind: input, shape index: {}]   ;;  %s7541_s2 = inlined_call_operand.vmem [shape: f32[1,64], index: 2, kind: input, shape index: {}]   ;;  %s7542_s3 = inlined_call_operand.vmem [shape: bf16[128,64], index: 3, kind: output, shape index: {}]  }
   0x1   :  { %v5434_v0 = vld [vmem:[%s7539_s1 + $0x78] sm:$0xff]   ;;  %v5438_v4 = vld [vmem:[%s7539_s1 + $0x70] sm:$0xff]   ;;  %v5442_v8 = vld [vmem:[%s7539_s1 + $0x68] sm:$0xff]  }
   0x2   :  { %v5435_v1 = vld [vmem:[%s7539_s1 + $0xf8] sm:$0xff]   ;;  %4622 = vmatprep.subr.bf16.mxu0 %v5434_v0  ;;  %v5439_v5 = vld [vmem:[%s7539_s1 + $0xf0] sm:$0xff]   ;;  %v5443_v9 = vld [vmem:[%s7539_s1 + $0xe8] sm:$0xff]  }
   0x3   :  { %v5436_v2 = vld [vmem:[%s7539_s1 + $0x38] sm:$0xff]   ;;  %4686 = vmatprep.subr.bf16.mxu1 %v5435_v1  ;;  %v5440_v6 = vld [vmem:[%s7539_s1 + $0x30] sm:$0xff]   ;;  %v5444_v10 = vld [vmem:[%s7539_s1 + $0x28] sm:$0xff]  }
   0x4   :  { %v5437_v3 = vld [vmem:[%s7539_s1 + $0xb8] sm:$0xff]   ;;  %4623 = vmatpush3.bf16.msra.mxu0 %v5436_v2  ;;  %v5441_v7 = vld [vmem:[%s7539_s1 + $0xb0] sm:$0xff]   ;;  %v5445_v11 = vld [vmem:[%s7539_s1 + $0xa8] sm:$0xff]  }
   0x5   :  { %4687 = vmatpush3.bf16.msra.mxu1 %v5437_v3  ;;  %4624 = vmatprep.subr.bf16.mxu0 %v5438_v4  ;;  %v5446_v12 = vld [vmem:[%s7539_s1 + $0x60] sm:$0xff]   ;;  %v5450_v16 = vld [vmem:[%s7539_s1 + $0x58] sm:$0xff]   ;;  %v5454_v20 = vld [vmem:[%s7539_s1 + $0x50] sm:$0xff]  }
   0x6   :  { %4688 = vmatprep.subr.bf16.mxu1 %v5439_v5  ;;  %v5447_v13 = vld [vmem:[%s7539_s1 + $0xe0] sm:$0xff]   ;;  %v5451_v17 = vld [vmem:[%s7539_s1 + $0xd8] sm:$0xff]   ;;  %v5455_v21 = vld [vmem:[%s7539_s1 + $0xd0] sm:$0xff]  }
   0x7   :  { %v5448_v14 = vld [vmem:[%s7539_s1 + $0x20] sm:$0xff]   ;;  %v5452_v18 = vld [vmem:[%s7539_s1 + $0x18] sm:$0xff]   ;;  %v5456_v22 = vld [vmem:[%s7539_s1 + $0x10] sm:$0xff]  }
   0x8   :  { %4625 = vmatpush3.bf16.msra.mxu0 %v5440_v6  ;;  %v5449_v15 = vld [vmem:[%s7539_s1 + $0xa0] sm:$0xff]   ;;  %v5453_v19 = vld [vmem:[%s7539_s1 + $0x98] sm:$0xff]   ;;  %v5457_v23 = vld [vmem:[%s7539_s1 + $0x90] sm:$0xff]  }
   0x9   :  { %4689 = vmatpush3.bf16.msra.mxu1 %v5441_v7  ;;  %4626 = vmatprep.subr.bf16.mxu0 %v5442_v8  ;;  %v5458_v24 = vld [vmem:[%s7539_s1 + $0x48] sm:$0xff]   ;;  %v5462_v28 = vld [vmem:[%s7539_s1 + $0x40] sm:$0xff]   ;;  %v5472_v36 = vld [vmem:[%s7539_s1 + $0x178] sm:$0xff]  }
   0xa   :  { %4690 = vmatprep.subr.bf16.mxu1 %v5443_v9  ;;  %v5459_v25 = vld [vmem:[%s7539_s1 + $0xc8] sm:$0xff]   ;;  %v5463_v29 = vld [vmem:[%s7539_s1 + $0xc0] sm:$0xff]   ;;  %v5473_v37 = vld [vmem:[%s7539_s1 + $0x1f8] sm:$0xff]  }
   0xb   :  { %v5460_v26 = vld [vmem:[%s7539_s1 + $0x8] sm:$0xff]   ;;  %v5464_v30 = vld [vmem:[%s7539_s1] sm:$0xff]   ;;  %v5474_v38 = vld [vmem:[%s7539_s1 + $0x138] sm:$0xff]  }
   0xc   :  { %4627 = vmatpush3.bf16.msra.mxu0 %v5444_v10  ;;  %v5461_v27 = vld [vmem:[%s7539_s1 + $0x88] sm:$0xff]   ;;  %v5465_v31 = vld [vmem:[%s7539_s1 + $0x80] sm:$0xff]   ;;  %v5475_v39 = vld [vmem:[%s7539_s1 + $0x1b8] sm:$0xff]  }
   0xd   :  { %4691 = vmatpush3.bf16.msra.mxu1 %v5445_v11  ;;  %4628 = vmatprep.subr.bf16.mxu0 %v5446_v12  ;;  %v5466_v32 = vld [vmem:[%s7540_s0] ss:$100 sps:$4 sm:$0xff]   ;;  %v5469_v34 = vld [vmem:[%s7540_s0 + $0x8] ss:$100 sps:$4 sm:$0xff]   ;;  %v5478_v41 = vld [vmem:[%s7540_s0 + $0xd4] ss:$100 sps:$4 sm:$0xff]  }
   0xe   :  { %4692 = vmatprep.subr.bf16.mxu1 %v5447_v13  ;;  %v5468_v33 = vld [vmem:[%s7540_s0 + $0x4] ss:$100 sps:$4 sm:$0xff]   ;;  %v5471_v35 = vld [vmem:[%s7540_s0 + $0xc] ss:$100 sps:$4 sm:$0xff]   ;;  %v5486_v48 = vld [vmem:[%s7540_s0 + $0x194] ss:$100 sps:$4 sm:$0xff]  }
   0xf   :  { %2855 = vmatprep.mubr.bf16.mxu0 %v5468_v33  ;;  %2952 = vmatprep.mubr.bf16.mxu1 %v5471_v35  ;;  %v5476_v40 = vld [vmem:[%s7540_s0 + $0xcc] ss:$100 sps:$4 sm:$0xff]   ;;  %v5488_v49 = vld [vmem:[%s7540_s0 + $0x19c] ss:$100 sps:$4 sm:$0xff]   ;;  %v5498_v57 = vld [vmem:[%s7540_s0 + $0x264] ss:$100 sps:$4 sm:$0xff]  }
  0x10   :  { %4629 = vmatpush3.bf16.msra.mxu0 %v5448_v14  ;;  %v5480_v42 = vld [vmem:[%s7540_s0 + $0xc8] ss:$100 sps:$4 sm:$0xff]   ;;  %v5481_v43 = vld [vmem:[%s7540_s0 + $0xd0] ss:$100 sps:$4 sm:$0xff]   ;;  %v5491_v51 = vld [vmem:[%s7540_s0 + $0x198] ss:$100 sps:$4 sm:$0xff]  }
  0x11   :  { %4693 = vmatpush3.bf16.msra.mxu1 %v5449_v15  ;;  %4630 = vmatprep.subr.bf16.mxu0 %v5450_v16  ;;  %v5482_v44 = vld [vmem:[%s7539_s1 + $0x170] sm:$0xff]   ;;  %v5492_v52 = vld [vmem:[%s7539_s1 + $0x168] sm:$0xff]   ;;  %v5496_v56 = vld [vmem:[%s7540_s0 + $0x25c] ss:$100 sps:$4 sm:$0xff]  }
  0x12   :  { %4694 = vmatprep.subr.bf16.mxu1 %v5451_v17  ;;  %v5483_v45 = vld [vmem:[%s7539_s1 + $0x1f0] sm:$0xff]   ;;  %v5493_v53 = vld [vmem:[%s7539_s1 + $0x1e8] sm:$0xff]   ;;  %v5500_v58 = vld [vmem:[%s7540_s0 + $0x258] ss:$100 sps:$4 sm:$0xff]  }
  0x13   :  { %v5484_v46 = vld [vmem:[%s7539_s1 + $0x130] sm:$0xff]   ;;  %v5494_v54 = vld [vmem:[%s7539_s1 + $0x128] sm:$0xff]   ;;  %v5501_v59 = vld [vmem:[%s7540_s0 + $0x260] ss:$100 sps:$4 sm:$0xff]  }
  0x14   :  { %4631 = vmatpush3.bf16.msra.mxu0 %v5452_v18  ;;  %v5485_v47 = vld [vmem:[%s7539_s1 + $0x1b0] sm:$0xff]   ;;  %v5495_v55 = vld [vmem:[%s7539_s1 + $0x1a8] sm:$0xff]   ;;  %v5502_v60 = vld [vmem:[%s7539_s1 + $0x160] sm:$0xff]  }
  0x15   :  { %4695 = vmatpush3.bf16.msra.mxu1 %v5453_v19  ;;  %4632 = vmatprep.subr.bf16.mxu0 %v5454_v20  ;;  %v5490_v50 = vld [vmem:[%s7540_s0 + $0x190] ss:$100 sps:$4 sm:$0xff]   ;;  %v5503_v61 = vld [vmem:[%s7539_s1 + $0x1e0] sm:$0xff]   ;;  %v5512_v3 = vld [vmem:[%s7539_s1 + $0x158] sm:$0xff]  }
  0x16   :  { %4696 = vmatprep.subr.bf16.mxu1 %v5455_v21  ;;  %v5504_v62 = vld [vmem:[%s7539_s1 + $0x120] sm:$0xff]   ;;  %v5508_v1 = vld [vmem:[%s7540_s0 + $0x32c] ss:$100 sps:$4 sm:$0xff]   ;;  %v5513_v5 = vld [vmem:[%s7539_s1 + $0x1d8] sm:$0xff]  }
  0x17   :  { %v5505_v63 = vld [vmem:[%s7539_s1 + $0x1a0] sm:$0xff]   ;;  %v5511_v4 = vld [vmem:[%s7540_s0 + $0x328] ss:$100 sps:$4 sm:$0xff]   ;;  %v5514_v6 = vld [vmem:[%s7539_s1 + $0x118] sm:$0xff]  }
  0x18   :  { %4633 = vmatpush3.bf16.msra.mxu0 %v5456_v22  ;;  %v5506_v0 = vld [vmem:[%s7540_s0 + $0x324] ss:$100 sps:$4 sm:$0xff]   ;;  %v5515_v7 = vld [vmem:[%s7539_s1 + $0x198] sm:$0xff]   ;;  %v5516_v8 = vld [vmem:[%s7540_s0 + $0x3ec] ss:$100 sps:$4 sm:$0xff]  }
  0x19   :  { %4697 = vmatpush3.bf16.msra.mxu1 %v5457_v23  ;;  %4634 = vmatprep.subr.bf16.mxu0 %v5458_v24  ;;  %v5510_v2 = vld [vmem:[%s7540_s0 + $0x320] ss:$100 sps:$4 sm:$0xff]   ;;  %v5518_v9 = vld [vmem:[%s7540_s0 + $0x3f4] ss:$100 sps:$4 sm:$0xff]   ;;  %v5520_v12 = vld [vmem:[%s7540_s0 + $0x3e8] ss:$100 sps:$4 sm:$0xff]  }
  0x1a   :  { %4698 = vmatprep.subr.bf16.mxu1 %v5459_v25  ;;  %v5522_v10 = vld [vmem:[%s7539_s1 + $0x150] sm:$0xff]   ;;  %v5528_v17 = vld [vmem:[%s7540_s0 + $0x4bc] ss:$100 sps:$4 sm:$0xff]   ;;  %v5532_v18 = vld [vmem:[%s7539_s1 + $0x148] sm:$0xff]  }
  0x1b   :  { %v5523_v11 = vld [vmem:[%s7539_s1 + $0x1d0] sm:$0xff]   ;;  %v5533_v19 = vld [vmem:[%s7539_s1 + $0x1c8] sm:$0xff]   ;;  %v5531_v23 = vld [vmem:[%s7540_s0 + $0x4b8] ss:$100 sps:$4 sm:$0xff]  }
  0x1c   :  { %4635 = vmatpush3.bf16.msra.mxu0 %v5460_v26  ;;  %v5524_v13 = vld [vmem:[%s7539_s1 + $0x110] sm:$0xff]   ;;  %v5534_v20 = vld [vmem:[%s7539_s1 + $0x108] sm:$0xff]   ;;  %v5536_v24 = vld [vmem:[%s7540_s0 + $0x57c] ss:$100 sps:$4 sm:$0xff]  }
  0x1d   :  { %4699 = vmatpush3.bf16.msra.mxu1 %v5461_v27  ;;  %4636 = vmatprep.subr.bf16.mxu0 %v5462_v28  ;;  %v5525_v14 = vld [vmem:[%s7539_s1 + $0x190] sm:$0xff]   ;;  %v5535_v21 = vld [vmem:[%s7539_s1 + $0x188] sm:$0xff]   ;;  %v5542_v26 = vld [vmem:[%s7539_s1 + $0x140] sm:$0xff]  }
  0x1e   :  { %4700 = vmatprep.subr.bf16.mxu1 %v5463_v29  ;;  %v5521_v15 = vld [vmem:[%s7540_s0 + $0x3f0] ss:$100 sps:$4 sm:$0xff]   ;;  %v5538_v25 = vld [vmem:[%s7540_s0 + $0x584] ss:$100 sps:$4 sm:$0xff]   ;;  %v5552_v33 = vld [vmem:[%s7539_s1 + $0x278] sm:$0xff]  }
  0x1f   :  { %v5526_v16 = vld [vmem:[%s7540_s0 + $0x4b4] ss:$100 sps:$4 sm:$0xff]   ;;  %v5543_v27 = vld [vmem:[%s7539_s1 + $0x1c0] sm:$0xff]  }
  0x20   :  { %4637 = vmatpush3.bf16.msra.mxu0 %v5464_v30  ;;  %v5530_v22 = vld [vmem:[%s7540_s0 + $0x4b0] ss:$100 sps:$4 sm:$0xff]   ;;  %v5544_v28 = vld [vmem:[%s7539_s1 + $0x100] sm:$0xff]   ;;  %v5540_v30 = vld [vmem:[%s7540_s0 + $0x578] ss:$100 sps:$4 sm:$0xff]  }
  0x21   :  { %4701 = vmatpush3.bf16.msra.mxu1 %v5465_v31  ;;  %4750 = vmatprep.subr.bf16.mxu0 %v5472_v36  ;;  %v5545_v29 = vld [vmem:[%s7539_s1 + $0x180] sm:$0xff]   ;;  %v5546_v36 = vld [vmem:[%s7540_s0 + $0x10] ss:$100 sps:$4 sm:$0xff]  }
  0x22   :  { %4814 = vmatprep.subr.bf16.mxu1 %v5473_v37  ;;  %v5541_v31 = vld [vmem:[%s7540_s0 + $0x580] ss:$100 sps:$4 sm:$0xff]   ;;  %v5549_v37 = vld [vmem:[%s7540_s0 + $0x18] ss:$100 sps:$4 sm:$0xff]  }
  0x23   :  { %2856 = vmatmul.mubr.bf16.vlgmr.msra.gmra.mxu0 %v5466_v32  ;;  %v5548_v32 = vld [vmem:[%s7540_s0 + $0x14] ss:$100 sps:$4 sm:$0xff]   ;;  %v5551_v35 = vld [vmem:[%s7540_s0 + $0x1c] ss:$100 sps:$4 sm:$0xff]  }
  0x24   :  { %2953 = vmatmul.mubr.bf16.vlgmr.msra.gmra.mxu1 %v5469_v34  ;;  %4751 = vmatpush3.bf16.msra.mxu0 %v5474_v38  ;;  %v5553_v34 = vld [vmem:[%s7539_s1 + $0x2f8] sm:$0xff]  }
  0x25   :  { %4815 = vmatpush3.bf16.msra.mxu1 %v5475_v39  ;;  %2863 = vmatprep.mubr.bf16.mxu0 %v5476_v40  ;;  %v5554_v38 = vld [vmem:[%s7539_s1 + $0x238] sm:$0xff]  }
  0x26   :  { %2960 = vmatprep.mubr.bf16.mxu1 %v5478_v41  ;;  %4752 = vmatprep.subr.bf16.mxu0 %v5482_v44  ;;  %v5555_v39 = vld [vmem:[%s7539_s1 + $0x2b8] sm:$0xff]   ;;  %v5558_v41 = vld [vmem:[%s7540_s0 + $0xe4] ss:$100 sps:$4 sm:$0xff]   ;;  %v5564_v44 = vld [vmem:[%s7539_s1 + $0x230] sm:$0xff]  }
  0x27   :  { %4816 = vmatprep.subr.bf16.mxu1 %v5483_v45  ;;  %v5556_v40 = vld [vmem:[%s7540_s0 + $0xdc] ss:$100 sps:$4 sm:$0xff]   ;;  %v5565_v45 = vld [vmem:[%s7539_s1 + $0x2b0] sm:$0xff]  }
  0x28   :  { %4753 = vmatpush3.bf16.msra.mxu0 %v5484_v46  ;;  %v5560_v46 = vld [vmem:[%s7540_s0 + $0xd8] ss:$100 sps:$4 sm:$0xff]  }
  0x29   :  { %4817 = vmatpush3.bf16.msra.mxu1 %v5485_v47  ;;  %4754 = vmatprep.subr.bf16.mxu0 %v5492_v52  ;;  %v5572_v47 = vld [vmem:[%s7539_s1 + $0x268] sm:$0xff]  }
  0x2a   :  { %4818 = vmatprep.subr.bf16.mxu1 %v5493_v53  ;;  %v5574_v52 = vld [vmem:[%s7539_s1 + $0x228] sm:$0xff]  }
  0x2b   :  { %2864 = vmatmul.mubr.bf16.gmra.mxu0 %v5480_v42  ;;  %v5562_v42 = vld [vmem:[%s7539_s1 + $0x270] sm:$0xff]   ;;  %v5575_v53 = vld [vmem:[%s7539_s1 + $0x2a8] sm:$0xff]  }
  0x2c   :  { %2961 = vmatmul.mubr.bf16.gmra.mxu1 %v5481_v43  ;;  %2871 = vmatprep.mubr.bf16.mxu0 %v5486_v48  ;;  %v5563_v43 = vld [vmem:[%s7539_s1 + $0x2f0] sm:$0xff]   ;;  %v5561_v48 = vld [vmem:[%s7540_s0 + $0xe0] ss:$100 sps:$4 sm:$0xff]  }
  0x2d   :  { %2968 = vmatprep.mubr.bf16.mxu1 %v5488_v49  ;;  %4755 = vmatpush3.bf16.msra.mxu0 %v5494_v54  ;;  %v5573_v49 = vld [vmem:[%s7539_s1 + $0x2e8] sm:$0xff]   ;;  %v5582_v54 = vld [vmem:[%s7539_s1 + $0x260] sm:$0xff]  }
  0x2e   :  { %4819 = vmatpush3.bf16.msra.mxu1 %v5495_v55  ;;  %4756 = vmatprep.subr.bf16.mxu0 %v5502_v60  ;;  %v5583_v55 = vld [vmem:[%s7539_s1 + $0x2e0] sm:$0xff]   ;;  %v5576_v60 = vld [vmem:[%s7540_s0 + $0x26c] ss:$100 sps:$4 sm:$0xff]  }
  0x2f   :  { %4820 = vmatprep.subr.bf16.mxu1 %v5503_v61  ;;  %v5578_v61 = vld [vmem:[%s7540_s0 + $0x274] ss:$100 sps:$4 sm:$0xff]  }
  0x31   :  { %4757 = vmatpush3.bf16.msra.mxu0 %v5504_v62  ;;  %v5592_v62 = vld [vmem:[%s7539_s1 + $0x258] sm:$0xff]  }
  0x32   :  { %4821 = vmatpush3.bf16.msra.mxu1 %v5505_v63  ;;  %4758 = vmatprep.subr.bf16.mxu0 %v5512_v3  ;;  %v5593_v63 = vld [vmem:[%s7539_s1 + $0x2d8] sm:$0xff]   ;;  %v5581_v3 = vld [vmem:[%s7540_s0 + $0x270] ss:$100 sps:$4 sm:$0xff]  }
  0x33   :  { %2872 = vmatmul.mubr.bf16.gmra.mxu0 %v5490_v50  ;;  %4822 = vmatprep.subr.bf16.mxu1 %v5513_v5  ;;  %v5566_v50 = vld [vmem:[%s7540_s0 + $0x1a4] ss:$100 sps:$4 sm:$0xff]   ;;  %v5588_v5 = vld [vmem:[%s7540_s0 + $0x33c] ss:$100 sps:$4 sm:$0xff]  }
  0x34   :  { %2969 = vmatmul.mubr.bf16.gmra.mxu1 %v5491_v51  ;;  %2879 = vmatprep.mubr.bf16.mxu0 %v5496_v56  ;;  %v5568_v51 = vld [vmem:[%s7540_s0 + $0x1ac] ss:$100 sps:$4 sm:$0xff]   ;;  %v5570_v56 = vld [vmem:[%s7540_s0 + $0x1a0] ss:$100 sps:$4 sm:$0xff]  }
  0x35   :  { %2976 = vmatprep.mubr.bf16.mxu1 %v5498_v57  ;;  %4759 = vmatpush3.bf16.msra.mxu0 %v5514_v6  ;;  %v5584_v57 = vld [vmem:[%s7539_s1 + $0x220] sm:$0xff]   ;;  %v5602_v6 = vld [vmem:[%s7539_s1 + $0x250] sm:$0xff]  }
  0x36   :  { %4823 = vmatpush3.bf16.msra.mxu1 %v5515_v7  ;;  %4760 = vmatprep.subr.bf16.mxu0 %v5522_v10  ;;  %v5603_v7 = vld [vmem:[%s7539_s1 + $0x2d0] sm:$0xff]  }
  0x37   :  { %4824 = vmatprep.subr.bf16.mxu1 %v5523_v11  ;;  %v5590_v10 = vld [vmem:[%s7540_s0 + $0x330] ss:$100 sps:$4 sm:$0xff]   ;;  %v5591_v11 = vld [vmem:[%s7540_s0 + $0x338] ss:$100 sps:$4 sm:$0xff]  }
  0x39   :  { %4761 = vmatpush3.bf16.msra.mxu0 %v5524_v13  ;;  %v5598_v13 = vld [vmem:[%s7540_s0 + $0x404] ss:$100 sps:$4 sm:$0xff]  }
  0x3a   :  { %4825 = vmatpush3.bf16.msra.mxu1 %v5525_v14  ;;  %4762 = vmatprep.subr.bf16.mxu0 %v5532_v18  ;;  %v5612_v14 = vld [vmem:[%s7539_s1 + $0x248] sm:$0xff]   ;;  %v5600_v18 = vld [vmem:[%s7540_s0 + $0x3f8] ss:$100 sps:$4 sm:$0xff]  }
  0x3b   :  { %2880 = vmatmul.mubr.bf16.gmra.mxu0 %v5500_v58  ;;  %4826 = vmatprep.subr.bf16.mxu1 %v5533_v19  ;;  %v5585_v58 = vld [vmem:[%s7539_s1 + $0x2a0] sm:$0xff]  }
  0x3c   :  { %2977 = vmatmul.mubr.bf16.gmra.mxu1 %v5501_v59  ;;  %2887 = vmatprep.mubr.bf16.mxu0 %v5506_v0  ;;  %v5571_v59 = vld [vmem:[%s7540_s0 + $0x1a8] ss:$100 sps:$4 sm:$0xff]   ;;  %v5594_v0 = vld [vmem:[%s7539_s1 + $0x218] sm:$0xff]   ;;  %v5601_v19 = vld [vmem:[%s7540_s0 + $0x400] ss:$100 sps:$4 sm:$0xff]  }
  0x3d   :  { %2984 = vmatprep.mubr.bf16.mxu1 %v5508_v1  ;;  %4763 = vmatpush3.bf16.msra.mxu0 %v5534_v20  ;;  %v5595_v1 = vld [vmem:[%s7539_s1 + $0x298] sm:$0xff]   ;;  %v5606_v20 = vld [vmem:[%s7540_s0 + $0x4c4] ss:$100 sps:$4 sm:$0xff]  }
  0x3e   :  { %4827 = vmatpush3.bf16.msra.mxu1 %v5535_v21  ;;  %4764 = vmatprep.subr.bf16.mxu0 %v5542_v26  ;;  %v5622_v21 = vld [vmem:[%s7539_s1 + $0x240] sm:$0xff]  }
  0x3f   :  { %4828 = vmatprep.subr.bf16.mxu1 %v5543_v27  ;;  %v5610_v26 = vld [vmem:[%s7540_s0 + $0x4c0] ss:$100 sps:$4 sm:$0xff]   ;;  %v5632_v27 = vld [vmem:[%s7539_s1 + $0x378] sm:$0xff]  }
  0x41   :  { %4765 = vmatpush3.bf16.msra.mxu0 %v5544_v28  ;;  %v5633_v28 = vld [vmem:[%s7539_s1 + $0x3f8] sm:$0xff]  }
  0x42   :  { %4829 = vmatpush3.bf16.msra.mxu1 %v5545_v29  ;;  %4878 = vmatprep.subr.bf16.mxu0 %v5552_v33  ;;  %v5611_v29 = vld [vmem:[%s7540_s0 + $0x4c8] ss:$100 sps:$4 sm:$0xff]   ;;  %v5621_v33 = vld [vmem:[%s7540_s0 + $0x590] ss:$100 sps:$4 sm:$0xff]  }
  0x43   :  { %2888 = vmatmul.mubr.bf16.gmra.mxu0 %v5510_v2  ;;  %4942 = vmatprep.subr.bf16.mxu1 %v5553_v34  ;;  %v5580_v2 = vld [vmem:[%s7540_s0 + $0x268] ss:$100 sps:$4 sm:$0xff]  }
  0x44   :  { %2985 = vmatmul.mubr.bf16.gmra.mxu1 %v5511_v4  ;;  %2895 = vmatprep.mubr.bf16.mxu0 %v5516_v8  ;;  %v5586_v4 = vld [vmem:[%s7540_s0 + $0x334] ss:$100 sps:$4 sm:$0xff]   ;;  %v5628_v34 = vld [vmem:[%s7540_s0 + $0x24] ss:$100 sps:$4 sm:$0xff]  }
  0x45   :  { %2992 = vmatprep.mubr.bf16.mxu1 %v5518_v9  ;;  %v5604_v8 = vld [vmem:[%s7539_s1 + $0x210] sm:$0xff]  }
  0x46   :  { %v5605_v9 = vld [vmem:[%s7539_s1 + $0x290] sm:$0xff]  }
  0x4b   :  { %2896 = vmatmul.mubr.bf16.gmra.mxu0 %v5520_v12  ;;  %v5596_v12 = vld [vmem:[%s7540_s0 + $0x3fc] ss:$100 sps:$4 sm:$0xff]  }
  0x4c   :  { %2993 = vmatmul.mubr.bf16.gmra.mxu1 %v5521_v15  ;;  %2903 = vmatprep.mubr.bf16.mxu0 %v5526_v16  ;;  %v5613_v15 = vld [vmem:[%s7539_s1 + $0x2c8] sm:$0xff]  }
  0x4d   :  { %3000 = vmatprep.mubr.bf16.mxu1 %v5528_v17  ;;  %v5614_v16 = vld [vmem:[%s7539_s1 + $0x208] sm:$0xff]  }
  0x4e   :  { %v5615_v17 = vld [vmem:[%s7539_s1 + $0x288] sm:$0xff]  }
  0x53   :  { %2904 = vmatmul.mubr.bf16.gmra.mxu0 %v5530_v22  ;;  %v5608_v22 = vld [vmem:[%s7540_s0 + $0x4cc] ss:$100 sps:$4 sm:$0xff]  }
  0x54   :  { %3001 = vmatmul.mubr.bf16.gmra.mxu1 %v5531_v23  ;;  %2911 = vmatprep.mubr.bf16.mxu0 %v5536_v24  ;;  %v5623_v23 = vld [vmem:[%s7539_s1 + $0x2c0] sm:$0xff]  }
  0x55   :  { %3008 = vmatprep.mubr.bf16.mxu1 %v5538_v25  ;;  %v5624_v24 = vld [vmem:[%s7539_s1 + $0x200] sm:$0xff]  }
  0x56   :  { %v5625_v25 = vld [vmem:[%s7539_s1 + $0x280] sm:$0xff]  }
  0x5b   :  { %2912 = vmatmul.mubr.bf16.gmra.mxu0 %v5540_v30  ;;  %v5616_v30 = vld [vmem:[%s7540_s0 + $0x58c] ss:$100 sps:$4 sm:$0xff]  }
  0x5c   :  { %3009 = vmatmul.mubr.bf16.gmra.mxu1 %v5541_v31  ;;  %3049 = vmatprep.mubr.bf16.mxu0 %v5548_v32  ;;  %v5618_v31 = vld [vmem:[%s7540_s0 + $0x594] ss:$100 sps:$4 sm:$0xff]   ;;  %v5620_v32 = vld [vmem:[%s7540_s0 + $0x588] ss:$100 sps:$4 sm:$0xff]  }
  0x5d   :  { %3146 = vmatprep.mubr.bf16.mxu1 %v5551_v35  ;;  %v5631_v35 = vld [vmem:[%s7540_s0 + $0x2c] ss:$100 sps:$4 sm:$0xff]  }
  0x63   :  { %3050 = vmatmul.mubr.bf16.vlgmr.msra.gmra.mxu0 %v5546_v36  ;;  %v5626_v36 = vld [vmem:[%s7540_s0 + $0x20] ss:$100 sps:$4 sm:$0xff]  }
  0x64   :  { %3147 = vmatmul.mubr.bf16.vlgmr.msra.gmra.mxu1 %v5549_v37  ;;  %4879 = vmatpush3.bf16.msra.mxu0 %v5554_v38  ;;  %v5629_v37 = vld [vmem:[%s7540_s0 + $0x28] ss:$100 sps:$4 sm:$0xff]   ;;  %v5634_v38 = vld [vmem:[%s7539_s1 + $0x338] sm:$0xff]  }
  0x65   :  { %4943 = vmatpush3.bf16.msra.mxu1 %v5555_v39  ;;  %3057 = vmatprep.mubr.bf16.mxu0 %v5556_v40  ;;  %v5635_v39 = vld [vmem:[%s7539_s1 + $0x3b8] sm:$0xff]   ;;  %v5636_v40 = vld [vmem:[%s7540_s0 + $0xec] ss:$100 sps:$4 sm:$0xff]  }
  0x66   :  { %3154 = vmatprep.mubr.bf16.mxu1 %v5558_v41  ;;  %4880 = vmatprep.subr.bf16.mxu0 %v5562_v42  ;;  %v5638_v41 = vld [vmem:[%s7540_s0 + $0xf4] ss:$100 sps:$4 sm:$0xff]  }
  0x67   :  { %4944 = vmatprep.subr.bf16.mxu1 %v5563_v43  ;;  %v5642_v42 = vld [vmem:[%s7539_s1 + $0x370] sm:$0xff]  }
  0x68   :  { %4881 = vmatpush3.bf16.msra.mxu0 %v5564_v44  ;;  %v5643_v43 = vld [vmem:[%s7539_s1 + $0x3f0] sm:$0xff]  }
  0x69   :  { %4945 = vmatpush3.bf16.msra.mxu1 %v5565_v45  ;;  %4882 = vmatprep.subr.bf16.mxu0 %v5572_v47  ;;  %v5644_v44 = vld [vmem:[%s7539_s1 + $0x330] sm:$0xff]   ;;  %v5652_v47 = vld [vmem:[%s7539_s1 + $0x368] sm:$0xff]  }
  0x6a   :  { %4946 = vmatprep.subr.bf16.mxu1 %v5573_v49  ;;  %v5645_v45 = vld [vmem:[%s7539_s1 + $0x3b0] sm:$0xff]  }
  0x6b   :  { %3058 = vmatmul.mubr.bf16.gmra.mxu0 %v5560_v46  ;;  %v5640_v46 = vld [vmem:[%s7540_s0 + $0xe8] ss:$100 sps:$4 sm:$0xff]   ;;  %v5646_v49 = vld [vmem:[%s7540_s0 + $0x1b4] ss:$100 sps:$4 sm:$0xff]  }
  0x6c   :  { %3155 = vmatmul.mubr.bf16.gmra.mxu1 %v5561_v48  ;;  %3065 = vmatprep.mubr.bf16.mxu0 %v5566_v50  ;;  %v5641_v48 = vld [vmem:[%s7540_s0 + $0xf0] ss:$100 sps:$4 sm:$0xff]   ;;  %v5653_v50 = vld [vmem:[%s7539_s1 + $0x3e8] sm:$0xff]  }
  0x6d   :  { %3162 = vmatprep.mubr.bf16.mxu1 %v5568_v51  ;;  %4883 = vmatpush3.bf16.msra.mxu0 %v5574_v52  ;;  %v5648_v51 = vld [vmem:[%s7540_s0 + $0x1bc] ss:$100 sps:$4 sm:$0xff]   ;;  %v5654_v52 = vld [vmem:[%s7539_s1 + $0x328] sm:$0xff]  }
  0x6e   :  { %4947 = vmatpush3.bf16.msra.mxu1 %v5575_v53  ;;  %4884 = vmatprep.subr.bf16.mxu0 %v5582_v54  ;;  %v5655_v53 = vld [vmem:[%s7539_s1 + $0x3a8] sm:$0xff]   ;;  %v5662_v54 = vld [vmem:[%s7539_s1 + $0x360] sm:$0xff]  }
  0x6f   :  { %4948 = vmatprep.subr.bf16.mxu1 %v5583_v55  ;;  %v5663_v55 = vld [vmem:[%s7539_s1 + $0x3e0] sm:$0xff]  }
  0x71   :  { %4885 = vmatpush3.bf16.msra.mxu0 %v5584_v57  ;;  %v5664_v57 = vld [vmem:[%s7539_s1 + $0x320] sm:$0xff]  }
  0x72   :  { %4949 = vmatpush3.bf16.msra.mxu1 %v5585_v58  ;;  %4886 = vmatprep.subr.bf16.mxu0 %v5592_v62  ;;  %v5665_v58 = vld [vmem:[%s7539_s1 + $0x3a0] sm:$0xff]  }
  0x73   :  { %3066 = vmatmul.mubr.bf16.gmra.mxu0 %v5570_v56  ;;  %4950 = vmatprep.subr.bf16.mxu1 %v5593_v63  ;;  %v5650_v56 = vld [vmem:[%s7540_s0 + $0x1b0] ss:$100 sps:$4 sm:$0xff]   ;;  %v5658_v62 = vld [vmem:[%s7540_s0 + $0x284] ss:$100 sps:$4 sm:$0xff]   ;;  %v5673_v63 = vld [vmem:[%s7539_s1 + $0x3d8] sm:$0xff]  }
  0x74   :  { %3163 = vmatmul.mubr.bf16.gmra.mxu1 %v5571_v59  ;;  %3073 = vmatprep.mubr.bf16.mxu0 %v5576_v60  ;;  %v5651_v59 = vld [vmem:[%s7540_s0 + $0x1b8] ss:$100 sps:$4 sm:$0xff]  }
  0x75   :  { %3170 = vmatprep.mubr.bf16.mxu1 %v5578_v61  ;;  %4887 = vmatpush3.bf16.msra.mxu0 %v5594_v0  ;;  %v5656_v60 = vld [vmem:[%s7540_s0 + $0x27c] ss:$100 sps:$4 sm:$0xff]  }
  0x76   :  { %4951 = vmatpush3.bf16.msra.mxu1 %v5595_v1  ;;  %4888 = vmatprep.subr.bf16.mxu0 %v5602_v6  ;;  %v5672_v61 = vld [vmem:[%s7539_s1 + $0x358] sm:$0xff]   ;;  %v5685_v6 = vld [vmem:[%s7539_s1 + $0x390] sm:$0xff]  }
  0x77   :  { %4952 = vmatprep.subr.bf16.mxu1 %v5603_v7  ;;  %v5674_v0 = vld [vmem:[%s7539_s1 + $0x318] sm:$0xff]   ;;  %v5661_v7 = vld [vmem:[%s7540_s0 + $0x280] ss:$100 sps:$4 sm:$0xff]  }
  0x78   :  { %v5675_v1 = vld [vmem:[%s7539_s1 + $0x398] sm:$0xff]  }
  0x79   :  { %4889 = vmatpush3.bf16.msra.mxu0 %v5604_v8  ;;  %v5666_v8 = vld [vmem:[%s7540_s0 + $0x344] ss:$100 sps:$4 sm:$0xff]  }
  0x7a   :  { %4953 = vmatpush3.bf16.msra.mxu1 %v5605_v9  ;;  %4890 = vmatprep.subr.bf16.mxu0 %v5612_v14  ;;  %v5692_v9 = vld [vmem:[%s7539_s1 + $0x348] sm:$0xff]   ;;  %v5702_v14 = vld [vmem:[%s7539_s1 + $0x340] sm:$0xff]  }
  0x7b   :  { %3074 = vmatmul.mubr.bf16.gmra.mxu0 %v5580_v2  ;;  %4954 = vmatprep.subr.bf16.mxu1 %v5613_v15  ;;  %v5682_v2 = vld [vmem:[%s7539_s1 + $0x350] sm:$0xff]   ;;  %v5703_v15 = vld [vmem:[%s7539_s1 + $0x3c0] sm:$0xff]  }
  0x7c   :  { %3171 = vmatmul.mubr.bf16.gmra.mxu1 %v5581_v3  ;;  %3081 = vmatprep.mubr.bf16.mxu0 %v5586_v4  ;;  %v5683_v3 = vld [vmem:[%s7539_s1 + $0x3d0] sm:$0xff]  }
  0x7d   :  { %3178 = vmatprep.mubr.bf16.mxu1 %v5588_v5  ;;  %4891 = vmatpush3.bf16.msra.mxu0 %v5614_v16  ;;  %v5684_v4 = vld [vmem:[%s7539_s1 + $0x310] sm:$0xff]   ;;  %v5660_v5 = vld [vmem:[%s7540_s0 + $0x278] ss:$100 sps:$4 sm:$0xff]   ;;  %v5670_v16 = vld [vmem:[%s7540_s0 + $0x340] ss:$100 sps:$4 sm:$0xff]  }
  0x7e   :  { %4955 = vmatpush3.bf16.msra.mxu1 %v5615_v17  ;;  %4892 = vmatprep.subr.bf16.mxu0 %v5622_v21  ;;  %v5704_v17 = vld [vmem:[%s7539_s1 + $0x300] sm:$0xff]   ;;  %v5678_v21 = vld [vmem:[%s7540_s0 + $0x414] ss:$100 sps:$4 sm:$0xff]  }
  0x7f   :  { %4956 = vmatprep.subr.bf16.mxu1 %v5623_v23  ;;  %v5713_v23 = vld [vmem:[%s7539_s1 + $0x4f8] sm:$0xff]  }
  0x81   :  { %4893 = vmatpush3.bf16.msra.mxu0 %v5624_v24  ;;  %v5680_v24 = vld [vmem:[%s7540_s0 + $0x408] ss:$100 sps:$4 sm:$0xff]  }
  0x82   :  { %4957 = vmatpush3.bf16.msra.mxu1 %v5625_v25  ;;  %5006 = vmatprep.subr.bf16.mxu0 %v5632_v27  ;;  %v5681_v25 = vld [vmem:[%s7540_s0 + $0x410] ss:$100 sps:$4 sm:$0xff]   ;;  %v5688_v27 = vld [vmem:[%s7540_s0 + $0x4dc] ss:$100 sps:$4 sm:$0xff]  }
  0x83   :  { %3082 = vmatmul.mubr.bf16.gmra.mxu0 %v5590_v10  ;;  %5070 = vmatprep.subr.bf16.mxu1 %v5633_v28  ;;  %v5693_v10 = vld [vmem:[%s7539_s1 + $0x3c8] sm:$0xff]   ;;  %v5690_v28 = vld [vmem:[%s7540_s0 + $0x4d0] ss:$100 sps:$4 sm:$0xff]  }
  0x84   :  { %3179 = vmatmul.mubr.bf16.gmra.mxu1 %v5591_v11  ;;  %3089 = vmatprep.mubr.bf16.mxu0 %v5596_v12  ;;  %v5668_v11 = vld [vmem:[%s7540_s0 + $0x34c] ss:$100 sps:$4 sm:$0xff]  }
  0x85   :  { %3186 = vmatprep.mubr.bf16.mxu1 %v5598_v13  ;;  %v5694_v12 = vld [vmem:[%s7539_s1 + $0x308] sm:$0xff]  }
  0x86   :  { %v5695_v13 = vld [vmem:[%s7539_s1 + $0x388] sm:$0xff]  }
  0x8b   :  { %3090 = vmatmul.mubr.bf16.gmra.mxu0 %v5600_v18  ;;  %v5705_v18 = vld [vmem:[%s7539_s1 + $0x380] sm:$0xff]  }
  0x8c   :  { %3187 = vmatmul.mubr.bf16.gmra.mxu1 %v5601_v19  ;;  %3097 = vmatprep.mubr.bf16.mxu0 %v5606_v20  ;;  %v5671_v19 = vld [vmem:[%s7540_s0 + $0x348] ss:$100 sps:$4 sm:$0xff]  }
  0x8d   :  { %3194 = vmatprep.mubr.bf16.mxu1 %v5608_v22  ;;  %v5676_v20 = vld [vmem:[%s7540_s0 + $0x40c] ss:$100 sps:$4 sm:$0xff]   ;;  %v5712_v22 = vld [vmem:[%s7539_s1 + $0x478] sm:$0xff]  }
  0x93   :  { %3098 = vmatmul.mubr.bf16.gmra.mxu0 %v5610_v26  ;;  %v5686_v26 = vld [vmem:[%s7540_s0 + $0x4d4] ss:$100 sps:$4 sm:$0xff]  }
  0x94   :  { %3195 = vmatmul.mubr.bf16.gmra.mxu1 %v5611_v29  ;;  %3105 = vmatprep.mubr.bf16.mxu0 %v5616_v30  ;;  %v5691_v29 = vld [vmem:[%s7540_s0 + $0x4d8] ss:$100 sps:$4 sm:$0xff]  }
  0x95   :  { %3202 = vmatprep.mubr.bf16.mxu1 %v5618_v31  ;;  %v5696_v30 = vld [vmem:[%s7540_s0 + $0x59c] ss:$100 sps:$4 sm:$0xff]   ;;  %v5698_v31 = vld [vmem:[%s7540_s0 + $0x5a4] ss:$100 sps:$4 sm:$0xff]  }
  0x9b   :  { %3106 = vmatmul.mubr.bf16.gmra.mxu0 %v5620_v32  ;;  %v5700_v32 = vld [vmem:[%s7540_s0 + $0x598] ss:$100 sps:$4 sm:$0xff]  }
  0x9c   :  { %3203 = vmatmul.mubr.bf16.gmra.mxu1 %v5621_v33  ;;  %3243 = vmatprep.mubr.bf16.mxu0 %v5628_v34  ;;  %v5701_v33 = vld [vmem:[%s7540_s0 + $0x5a0] ss:$100 sps:$4 sm:$0xff]   ;;  %v5708_v34 = vld [vmem:[%s7540_s0 + $0x34] ss:$100 sps:$4 sm:$0xff]  }
  0x9d   :  { %3340 = vmatprep.mubr.bf16.mxu1 %v5631_v35  ;;  %v5711_v35 = vld [vmem:[%s7540_s0 + $0x3c] ss:$100 sps:$4 sm:$0xff]  }
  0xa3   :  { %3244 = vmatmul.mubr.bf16.vlgmr.msra.gmra.mxu0 %v5626_v36  ;;  %v5706_v36 = vld [vmem:[%s7540_s0 + $0x30] ss:$100 sps:$4 sm:$0xff]  }
  0xa4   :  { %3341 = vmatmul.mubr.bf16.vlgmr.msra.gmra.mxu1 %v5629_v37  ;;  %5007 = vmatpush3.bf16.msra.mxu0 %v5634_v38  ;;  %v5709_v37 = vld [vmem:[%s7540_s0 + $0x38] ss:$100 sps:$4 sm:$0xff]  }
  0xa5   :  { %5071 = vmatpush3.bf16.msra.mxu1 %v5635_v39  ;;  %3251 = vmatprep.mubr.bf16.mxu0 %v5636_v40  ;;  %v5714_v38 = vld [vmem:[%s7539_s1 + $0x438] sm:$0xff]  }
  0xa6   :  { %3348 = vmatprep.mubr.bf16.mxu1 %v5638_v41  ;;  %5008 = vmatprep.subr.bf16.mxu0 %v5642_v42  ;;  %v5715_v39 = vld [vmem:[%s7539_s1 + $0x4b8] sm:$0xff]   ;;  %v5718_v41 = vld [vmem:[%s7540_s0 + $0x104] ss:$100 sps:$4 sm:$0xff]   ;;  %v5722_v42 = vld [vmem:[%s7539_s1 + $0x470] sm:$0xff]  }
  0xa7   :  { %5072 = vmatprep.subr.bf16.mxu1 %v5643_v43  ;;  %v5716_v40 = vld [vmem:[%s7540_s0 + $0xfc] ss:$100 sps:$4 sm:$0xff]   ;;  %v5723_v43 = vld [vmem:[%s7539_s1 + $0x4f0] sm:$0xff]  }
  0xa8   :  { %5009 = vmatpush3.bf16.msra.mxu0 %v5644_v44 }
  0xa9   :  { %5073 = vmatpush3.bf16.msra.mxu1 %v5645_v45  ;;  %5010 = vmatprep.subr.bf16.mxu0 %v5652_v47  ;;  %v6657_v45 = vld [vmem:[%s7541_s2] ss:$0 sm:$0xff] }
  0xaa   :  { %5074 = vmatprep.subr.bf16.mxu1 %v5653_v50  ;;  %v5720_v50 = vld [vmem:[%s7540_s0 + $0xf8] ss:$100 sps:$4 sm:$0xff]  }
  0xab   :  { %3252 = vmatmul.mubr.bf16.gmra.mxu0 %v5640_v46  ;;  %v5724_v46 = vld [vmem:[%s7539_s1 + $0x430] sm:$0xff]  }
  0xac   :  { %3349 = vmatmul.mubr.bf16.gmra.mxu1 %v5641_v48  ;;  %3259 = vmatprep.mubr.bf16.mxu0 %v5646_v49  ;;  %v5725_v48 = vld [vmem:[%s7539_s1 + $0x4b0] sm:$0xff]  }
  0xad   :  { %3356 = vmatprep.mubr.bf16.mxu1 %v5648_v51  ;;  %5011 = vmatpush3.bf16.msra.mxu0 %v5654_v52  ;;  %v5732_v51 = vld [vmem:[%s7539_s1 + $0x468] sm:$0xff]  }
  0xae   :  { %5075 = vmatpush3.bf16.msra.mxu1 %v5655_v53  ;;  %5012 = vmatprep.subr.bf16.mxu0 %v5662_v54  ;;  %v5733_v54 = vld [vmem:[%s7539_s1 + $0x4e8] sm:$0xff]  }
  0xaf   :  { %5076 = vmatprep.subr.bf16.mxu1 %v5663_v55 }
  0xb1   :  { %5013 = vmatpush3.bf16.msra.mxu0 %v5664_v57  ;;  %v5721_v57 = vld [vmem:[%s7540_s0 + $0x100] ss:$100 sps:$4 sm:$0xff]  }
  0xb2   :  { %5077 = vmatpush3.bf16.msra.mxu1 %v5665_v58  ;;  %5014 = vmatprep.subr.bf16.mxu0 %v5672_v61  ;;  %v5728_v61 = vld [vmem:[%s7540_s0 + $0x1cc] ss:$100 sps:$4 sm:$0xff]  }
  0xb3   :  { %3260 = vmatmul.mubr.bf16.gmra.mxu0 %v5650_v56  ;;  %5078 = vmatprep.subr.bf16.mxu1 %v5673_v63  ;;  %v5734_v63 = vld [vmem:[%s7539_s1 + $0x428] sm:$0xff]  }
  0xb4   :  { %3357 = vmatmul.mubr.bf16.gmra.mxu1 %v5651_v59  ;;  %3267 = vmatprep.mubr.bf16.mxu0 %v5656_v60  ;;  %v5726_v60 = vld [vmem:[%s7540_s0 + $0x1c4] ss:$100 sps:$4 sm:$0xff]  }
  0xb5   :  { %3364 = vmatprep.mubr.bf16.mxu1 %v5658_v62  ;;  %5015 = vmatpush3.bf16.msra.mxu0 %v5674_v0  ;;  %v5735_v0 = vld [vmem:[%s7539_s1 + $0x4a8] sm:$0xff]  }
  0xb6   :  { %5079 = vmatpush3.bf16.msra.mxu1 %v5675_v1  ;;  %5016 = vmatprep.subr.bf16.mxu0 %v5682_v2 }
  0xb7   :  { %5080 = vmatprep.subr.bf16.mxu1 %v5683_v3 }
  0xb9   :  { %5017 = vmatpush3.bf16.msra.mxu0 %v5684_v4  ;;  %v5742_v4 = vld [vmem:[%s7539_s1 + $0x460] sm:$0xff]  }
  0xba   :  { %5081 = vmatpush3.bf16.msra.mxu1 %v5685_v6  ;;  %5018 = vmatprep.subr.bf16.mxu0 %v5692_v9 }
  0xbb   :  { %3268 = vmatmul.mubr.bf16.gmra.mxu0 %v5660_v5  ;;  %5082 = vmatprep.subr.bf16.mxu1 %v5693_v10  ;;  %v5744_v10 = vld [vmem:[%s7539_s1 + $0x420] sm:$0xff]  }
  0xbc   :  { %3365 = vmatmul.mubr.bf16.gmra.mxu1 %v5661_v7  ;;  %3275 = vmatprep.mubr.bf16.mxu0 %v5666_v8  ;;  %v5743_v7 = vld [vmem:[%s7539_s1 + $0x4e0] sm:$0xff]  }
  0xbd   :  { %3372 = vmatprep.mubr.bf16.mxu1 %v5668_v11  ;;  %5019 = vmatpush3.bf16.msra.mxu0 %v5694_v12  ;;  %v5730_v12 = vld [vmem:[%s7540_s0 + $0x1c0] ss:$100 sps:$4 sm:$0xff]  }
  0xbe   :  { %5083 = vmatpush3.bf16.msra.mxu1 %v5695_v13  ;;  %5020 = vmatprep.subr.bf16.mxu0 %v5702_v14  ;;  %v5745_v13 = vld [vmem:[%s7539_s1 + $0x4a0] sm:$0xff]  }
  0xbf   :  { %5084 = vmatprep.subr.bf16.mxu1 %v5703_v15 }
  0xc1   :  { %5021 = vmatpush3.bf16.msra.mxu0 %v5704_v17  ;;  %v5731_v17 = vld [vmem:[%s7540_s0 + $0x1c8] ss:$100 sps:$4 sm:$0xff]  }
  0xc2   :  { %5085 = vmatpush3.bf16.msra.mxu1 %v5705_v18  ;;  %5134 = vmatprep.subr.bf16.mxu0 %v5712_v22  ;;  %v5736_v18 = vld [vmem:[%s7540_s0 + $0x28c] ss:$100 sps:$4 sm:$0xff]   ;;  %v5753_v22 = vld [vmem:[%s7539_s1 + $0x4d8] sm:$0xff]  }
  0xc3   :  { %3276 = vmatmul.mubr.bf16.gmra.mxu0 %v5670_v16  ;;  %5198 = vmatprep.subr.bf16.mxu1 %v5713_v23 }
  0xc4   :  { %3373 = vmatmul.mubr.bf16.gmra.mxu1 %v5671_v19  ;;  %3283 = vmatprep.mubr.bf16.mxu0 %v5676_v20  ;;  %v5752_v19 = vld [vmem:[%s7539_s1 + $0x458] sm:$0xff]  }
  0xc5   :  { %3380 = vmatprep.mubr.bf16.mxu1 %v5678_v21 }
  0xcb   :  { %3284 = vmatmul.mubr.bf16.gmra.mxu0 %v5680_v24 }
  0xcc   :  { %3381 = vmatmul.mubr.bf16.gmra.mxu1 %v5681_v25  ;;  %3291 = vmatprep.mubr.bf16.mxu0 %v5686_v26  ;;  %v5738_v25 = vld [vmem:[%s7540_s0 + $0x294] ss:$100 sps:$4 sm:$0xff]  }
  0xcd   :  { %3388 = vmatprep.mubr.bf16.mxu1 %v5688_v27  ;;  %v5754_v26 = vld [vmem:[%s7539_s1 + $0x418] sm:$0xff]  }
  0xd3   :  { %3292 = vmatmul.mubr.bf16.gmra.mxu0 %v5690_v28  ;;  %v5755_v28 = vld [vmem:[%s7539_s1 + $0x498] sm:$0xff]  }
  0xd4   :  { %3389 = vmatmul.mubr.bf16.gmra.mxu1 %v5691_v29  ;;  %3299 = vmatprep.mubr.bf16.mxu0 %v5696_v30 }
  0xd5   :  { %3396 = vmatprep.mubr.bf16.mxu1 %v5698_v31 }
  0xdb   :  { %3300 = vmatmul.mubr.bf16.gmra.mxu0 %v5700_v32  ;;  %v5762_v32 = vld [vmem:[%s7539_s1 + $0x450] sm:$0xff]  }
  0xdc   :  { %3397 = vmatmul.mubr.bf16.gmra.mxu1 %v5701_v33  ;;  %3437 = vmatprep.mubr.bf16.mxu0 %v5708_v34 }
  0xdd   :  { %3534 = vmatprep.mubr.bf16.mxu1 %v5711_v35  ;;  %v5763_v35 = vld [vmem:[%s7539_s1 + $0x4d0] sm:$0xff]  }
  0xe3   :  { %v4638_v44 = vpop.f32.mrf.mxu0  ;;  %3438 = vmatmul.mubr.bf16.vlgmr.msra.gmra.mxu0 %v5706_v36 }
  0xe4   :  { %v4702_v47 = vpop.f32.mrf.mxu1  ;;  %3535 = vmatmul.mubr.bf16.vlgmr.msra.gmra.mxu1 %v5709_v37  ;;  %5135 = vmatpush3.bf16.msra.mxu0 %v5714_v38 }
  0xe5   :  { %5199 = vmatpush3.bf16.msra.mxu1 %v5715_v39  ;;  %v4639_v49 = vpop.f32.mrf.mxu0  ;;  %3445 = vmatprep.mubr.bf16.mxu0 %v5716_v40  ;;  %v5740_v39 = vld [vmem:[%s7540_s0 + $0x288] ss:$100 sps:$4 sm:$0xff]   ;;  %v5764_v40 = vld [vmem:[%s7539_s1 + $0x410] sm:$0xff]  }
  0xe6   :  { %v4640_v52 = vadd.f32 %v4639_v49, %v4638_v44  ;;  %v4703_v53 = vpop.f32.mrf.mxu1  ;;  %3542 = vmatprep.mubr.bf16.mxu1 %v5718_v41  ;;  %5136 = vmatprep.subr.bf16.mxu0 %v5722_v42  ;;  %v5765_v41 = vld [vmem:[%s7539_s1 + $0x490] sm:$0xff]  }
  0xe7   :  { %v4704_v55 = vadd.f32 %v4703_v53, %v4702_v47  ;;  %v4641_v56 = vpop.f32.mrf.mxu0  ;;  %5200 = vmatprep.subr.bf16.mxu1 %v5723_v43  ;;  %v5748_v47 = vld [vmem:[%s7540_s0 + $0x354] ss:$100 sps:$4 sm:$0xff]  }
  0xe8   :  { %v2858_v58 = vadd.f32 %v4640_v52, %v6657_v45  ;;  %v4705_v59 = vpop.f32.mrf.mxu1  ;;  %5137 = vmatpush3.bf16.msra.mxu0 %v5724_v46  ;;  %v5741_v46 = vld [vmem:[%s7540_s0 + $0x290] ss:$100 sps:$4 sm:$0xff]   ;;  %v5773_v52 = vld [vmem:[%s7539_s1 + $0x4c8] sm:$0xff]  }
  0xe9   :  { %v4642_v62 = vpop.f32.mrf.mxu0  ;;  %5201 = vmatpush3.bf16.msra.mxu1 %v5725_v48  ;;  %5138 = vmatprep.subr.bf16.mxu0 %v5732_v51  ;;  %v5772_v48 = vld [vmem:[%s7539_s1 + $0x448] sm:$0xff]   ;;  %v5751_v51 = vld [vmem:[%s7540_s0 + $0x35c] ss:$100 sps:$4 sm:$0xff]  }
  0xea   :  { %v6690_v1 = vadd.f32 %v4704_v55, %v2858_v58  ;;  %v4643_v2 = vadd.f32 %v4642_v62, %v4641_v56  ;;  %v4706_v3 = vpop.f32.mrf.mxu1  ;;  %5202 = vmatprep.subr.bf16.mxu1 %v5733_v54  ;;  %v5774_v55 = vld [vmem:[%s7539_s1 + $0x408] sm:$0xff]  }
  0xeb   :  { %v4707_v5 = vadd.f32 %v4706_v3, %v4705_v59  ;;  %v4644_v6 = vpop.f32.mrf.mxu0  ;;  %3446 = vmatmul.mubr.bf16.gmra.mxu0 %v5720_v50 }
  0xec   :  { %v2861_v8 = vadd.f32 %v4643_v2, %v6657_v45  ;;  %v4708_v9 = vpop.f32.mrf.mxu1  ;;  %3543 = vmatmul.mubr.bf16.gmra.mxu1 %v5721_v57  ;;  %3453 = vmatprep.mubr.bf16.mxu0 %v5726_v60  ;;  %v5775_v57 = vld [vmem:[%s7539_s1 + $0x488] sm:$0xff]  }
  0xed   :  { %v4645_v11 = vpop.f32.mrf.mxu0  ;;  %3550 = vmatprep.mubr.bf16.mxu1 %v5728_v61  ;;  %5139 = vmatpush3.bf16.msra.mxu0 %v5734_v63  ;;  %v5782_v61 = vld [vmem:[%s7539_s1 + $0x440] sm:$0xff]  }
  0xee   :  { %v6708_v14 = vadd.f32 %v4707_v5, %v2861_v8  ;;  %v4646_v15 = vadd.f32 %v4645_v11, %v4644_v6  ;;  %v4709_v16 = vpop.f32.mrf.mxu1  ;;  %5203 = vmatpush3.bf16.msra.mxu1 %v5735_v0  ;;  %5140 = vmatprep.subr.bf16.mxu0 %v5742_v4  ;;  %v5783_v0 = vld [vmem:[%s7539_s1 + $0x4c0] sm:$0xff]   ;;  %v5746_v5 = vld [vmem:[%s7540_s0 + $0x350] ss:$100 sps:$4 sm:$0xff]   ;;  %v5749_v11 = vld [vmem:[%s7540_s0 + $0x358] ss:$100 sps:$4 sm:$0xff]  }
  0xef   :  { %v4710_v20 = vadd.f32 %v4709_v16, %v4708_v9  ;;  %v4647_v21 = vpop.f32.mrf.mxu0  ;;  %5204 = vmatprep.subr.bf16.mxu1 %v5743_v7  ;;  %v5784_v6 = vld [vmem:[%s7539_s1 + $0x400] sm:$0xff]   ;;  %v5793_v16 = vld [vmem:[%s7539_s1 + $0x5f8] sm:$0xff]  }
  0xf0   :  { %v2866_v23 = vadd.f32 %v4646_v15, %v6657_v45  ;;  %v4711_v24 = vpop.f32.mrf.mxu1  ;;  %v5785_v7 = vld [vmem:[%s7539_s1 + $0x480] sm:$0xff]  }
  0xf1   :  { %v4648_v27 = vpop.f32.mrf.mxu0  ;;  %5141 = vmatpush3.bf16.msra.mxu0 %v5744_v10 }
  0xf2   :  { %v6732_v29 = vadd.f32 %v4710_v20, %v2866_v23  ;;  %v4649_v30 = vadd.f32 %v4648_v27, %v4647_v21  ;;  %v4712_v31 = vpop.f32.mrf.mxu1  ;;  %5205 = vmatpush3.bf16.msra.mxu1 %v5745_v13  ;;  %5142 = vmatprep.subr.bf16.mxu0 %v5752_v19  ;;  %v5758_v19 = vld [vmem:[%s7540_s0 + $0x41c] ss:$100 sps:$4 sm:$0xff]   ;;  %v5761_v21 = vld [vmem:[%s7540_s0 + $0x424] ss:$100 sps:$4 sm:$0xff]  }
  0xf3   :  { %v4713_v33 = vadd.f32 %v4712_v31, %v4711_v24  ;;  %v4650_v34 = vpop.f32.mrf.mxu0  ;;  %3454 = vmatmul.mubr.bf16.gmra.mxu0 %v5730_v12  ;;  %5206 = vmatprep.subr.bf16.mxu1 %v5753_v22  ;;  %v5792_v12 = vld [vmem:[%s7539_s1 + $0x578] sm:$0xff]  }
  0xf4   :  { %v2869_v36 = vadd.f32 %v4649_v30, %v6657_v45  ;;  %v4714_v37 = vpop.f32.mrf.mxu1  ;;  %3551 = vmatmul.mubr.bf16.gmra.mxu1 %v5731_v17  ;;  %3461 = vmatprep.mubr.bf16.mxu0 %v5736_v18 }
  0xf5   :  { %v4651_v38 = vpop.f32.mrf.mxu0  ;;  %3558 = vmatprep.mubr.bf16.mxu1 %v5738_v25  ;;  %5143 = vmatpush3.bf16.msra.mxu0 %v5754_v26 }
  0xf6   :  { %v6750_v42 = vadd.f32 %v4713_v33, %v2869_v36  ;;  %v4652_v43 = vadd.f32 %v4651_v38, %v4650_v34  ;;  %v4715_v44 = vpop.f32.mrf.mxu1  ;;  %5207 = vmatpush3.bf16.msra.mxu1 %v5755_v28  ;;  %5144 = vmatprep.subr.bf16.mxu0 %v5762_v32  ;;  %v5756_v34 = vld [vmem:[%s7540_s0 + $0x418] ss:$100 sps:$4 sm:$0xff]  }
  0xf7   :  { %v4716_v49 = vadd.f32 %v4715_v44, %v4714_v37  ;;  %v4653_v50 = vpop.f32.mrf.mxu0  ;;  %5208 = vmatprep.subr.bf16.mxu1 %v5763_v35  ;;  %v5759_v37 = vld [vmem:[%s7540_s0 + $0x420] ss:$100 sps:$4 sm:$0xff]  }
  0xf8   :  { %v2874_v53 = vadd.f32 %v4652_v43, %v6657_v45  ;;  %v4717_v54 = vpop.f32.mrf.mxu1  ;;  %v5771_v43 = vld [vmem:[%s7540_s0 + $0x4ec] ss:$100 sps:$4 sm:$0xff]  }
  0xf9   :  { %v4654_v56 = vpop.f32.mrf.mxu0  ;;  %5145 = vmatpush3.bf16.msra.mxu0 %v5764_v40  ;;  %v5768_v40 = vld [vmem:[%s7540_s0 + $0x4e4] ss:$100 sps:$4 sm:$0xff]  }
  0xfa   :  { %v6774_v58 = vadd.f32 %v4716_v49, %v2874_v53  ;;  %v4655_v59 = vadd.f32 %v4654_v56, %v4653_v50  ;;  %v4718_v60 = vpop.f32.mrf.mxu1  ;;  %5209 = vmatpush3.bf16.msra.mxu1 %v5765_v41  ;;  %5146 = vmatprep.subr.bf16.mxu0 %v5772_v48 }
  0xfb   :  { %v4719_v62 = vadd.f32 %v4718_v60, %v4717_v54  ;;  %v4656_v63 = vpop.f32.mrf.mxu0  ;;  %3462 = vmatmul.mubr.bf16.gmra.mxu0 %v5740_v39  ;;  %5210 = vmatprep.subr.bf16.mxu1 %v5773_v52 }
  0xfc   :  { %v2877_v2 = vadd.f32 %v4655_v59, %v6657_v45  ;;  %v4720_v3 = vpop.f32.mrf.mxu1  ;;  %3559 = vmatmul.mubr.bf16.gmra.mxu1 %v5741_v46  ;;  %3469 = vmatprep.mubr.bf16.mxu0 %v5748_v47  ;;  %v5766_v59 = vld [vmem:[%s7540_s0 + $0x4e0] ss:$100 sps:$4 sm:$0xff]  }
  0xfd   :  { %v4657_v4 = vpop.f32.mrf.mxu0  ;;  %3566 = vmatprep.mubr.bf16.mxu1 %v5751_v51  ;;  %5147 = vmatpush3.bf16.msra.mxu0 %v5774_v55 }
  0xfe   :  { %v6792_v8 = vadd.f32 %v4719_v62, %v2877_v2  ;;  %v4658_v9 = vadd.f32 %v4657_v4, %v4656_v63  ;;  %v4721_v10 = vpop.f32.mrf.mxu1  ;;  %5211 = vmatpush3.bf16.msra.mxu1 %v5775_v57  ;;  %5148 = vmatprep.subr.bf16.mxu0 %v5782_v61  ;;  %v5769_v62 = vld [vmem:[%s7540_s0 + $0x4e8] ss:$100 sps:$4 sm:$0xff]   ;;  %v5781_v2 = vld [vmem:[%s7540_s0 + $0x5b4] ss:$100 sps:$4 sm:$0xff]  }
  0xff   :  { %v4722_v13 = vadd.f32 %v4721_v10, %v4720_v3  ;;  %v4659_v15 = vpop.f32.mrf.mxu0  ;;  %5212 = vmatprep.subr.bf16.mxu1 %v5783_v0  ;;  %v5778_v63 = vld [vmem:[%s7540_s0 + $0x5ac] ss:$100 sps:$4 sm:$0xff]  }
 0x100   :  { %v2882_v17 = vadd.f32 %v4658_v9, %v6657_v45  ;;  %v4723_v18 = vpop.f32.mrf.mxu1 }
 0x101   :  { %v4660_v20 = vpop.f32.mrf.mxu0  ;;  %5149 = vmatpush3.bf16.msra.mxu0 %v5784_v6 }
 0x102   :  { %v6810_v22 = vadd.f32 %v4722_v13, %v2882_v17  ;;  %v4661_v23 = vadd.f32 %v4660_v20, %v4659_v15  ;;  %v4724_v24 = vpop.f32.mrf.mxu1  ;;  %5213 = vmatpush3.bf16.msra.mxu1 %v5785_v7  ;;  %5262 = vmatprep.subr.bf16.mxu0 %v5792_v12 }
 0x103   :  { %v4725_v25 = vadd.f32 %v4724_v24, %v4723_v18  ;;  %v4662_v26 = vpop.f32.mrf.mxu0  ;;  %3470 = vmatmul.mubr.bf16.gmra.mxu0 %v5746_v5  ;;  %5326 = vmatprep.subr.bf16.mxu1 %v5793_v16  ;;  %v5776_v18 = vld [vmem:[%s7540_s0 + $0x5a8] ss:$100 sps:$4 sm:$0xff]  }
 0x104   :  { %v2885_v27 = vadd.f32 %v4661_v23, %v6657_v45  ;;  %v4726_v28 = vpop.f32.mrf.mxu1  ;;  %3567 = vmatmul.mubr.bf16.gmra.mxu1 %v5749_v11  ;;  %3477 = vmatprep.mubr.bf16.mxu0 %v5758_v19  ;;  %v5788_v23 = vld [vmem:[%s7540_s0 + $0x44] ss:$100 sps:$4 sm:$0xff]  }
 0x105   :  { %v4663_v30 = vpop.f32.mrf.mxu0  ;;  %3574 = vmatprep.mubr.bf16.mxu1 %v5761_v21  ;;  %v5779_v21 = vld [vmem:[%s7540_s0 + $0x5b0] ss:$100 sps:$4 sm:$0xff]  }
 0x106   :  { %v6813_v31 = vadd.f32 %v4725_v25, %v2885_v27  ;;  %v4664_v32 = vadd.f32 %v4663_v30, %v4662_v26  ;;  %v4727_v33 = vpop.f32.mrf.mxu1  ;;  %v5791_v25 = vld [vmem:[%s7540_s0 + $0x4c] ss:$100 sps:$4 sm:$0xff]  }
 0x107   :  { %v4728_v35 = vadd.f32 %v4727_v33, %v4726_v28  ;;  %v4665_v36 = vpop.f32.mrf.mxu0 }
 0x108   :  { %v2890_v38 = vadd.f32 %v4664_v32, %v6657_v45  ;;  %v4729_v39 = vpop.f32.mrf.mxu1 }
 0x109   :  { %v4666_v41 = vpop.f32.mrf.mxu0 }
 0x10a   :  { %v6828_v44 = vadd.f32 %v4728_v35, %v2890_v38  ;;  %v4667_v46 = vadd.f32 %v4666_v41, %v4665_v36  ;;  %v4730_v47 = vpop.f32.mrf.mxu1  ;;  %v5786_v36 = vld [vmem:[%s7540_s0 + $0x40] ss:$100 sps:$4 sm:$0xff]   ;;  %v5794_v41 = vld [vmem:[%s7539_s1 + $0x538] sm:$0xff]  }
 0x10b   :  { %v4731_v48 = vadd.f32 %v4730_v47, %v4729_v39  ;;  %v4668_v49 = vpop.f32.mrf.mxu0  ;;  %3478 = vmatmul.mubr.bf16.gmra.mxu0 %v5756_v34  ;;  %v5795_v47 = vld [vmem:[%s7539_s1 + $0x5b8] sm:$0xff]  }
 0x10c   :  { %v2893_v50 = vadd.f32 %v4667_v46, %v6657_v45  ;;  %v4732_v51 = vpop.f32.mrf.mxu1  ;;  %3575 = vmatmul.mubr.bf16.gmra.mxu1 %v5759_v37  ;;  %3485 = vmatprep.mubr.bf16.mxu0 %v5768_v40  ;;  %v5789_v40 = vld [vmem:[%s7540_s0 + $0x48] ss:$100 sps:$4 sm:$0xff]  }
 0x10d   :  { %v4669_v52 = vpop.f32.mrf.mxu0  ;;  %3582 = vmatprep.mubr.bf16.mxu1 %v5771_v43 }
 0x10e   :  { %v6831_v53 = vadd.f32 %v4731_v48, %v2893_v50  ;;  %v4670_v54 = vadd.f32 %v4669_v52, %v4668_v49  ;;  %v4733_v55 = vpop.f32.mrf.mxu1  ;;  %v5798_v50 = vld [vmem:[%s7540_s0 + $0x10c] ss:$100 sps:$4 sm:$0xff]   ;;  %v5801_v52 = vld [vmem:[%s7540_s0 + $0x114] ss:$100 sps:$4 sm:$0xff]  }
 0x10f   :  { %v4734_v56 = vadd.f32 %v4733_v55, %v4732_v51  ;;  %v4671_v57 = vpop.f32.mrf.mxu0 }
 0x110   :  { %v2898_v60 = vadd.f32 %v4670_v54, %v6657_v45  ;;  %v4735_v61 = vpop.f32.mrf.mxu1 }
 0x111   :  { %v4672_v0 = vpop.f32.mrf.mxu0 }
 0x112   :  { %v6846_v3 = vadd.f32 %v4734_v56, %v2898_v60  ;;  %v4673_v4 = vadd.f32 %v4672_v0, %v4671_v57  ;;  %v4736_v5 = vpop.f32.mrf.mxu1  ;;  %v5802_v57 = vld [vmem:[%s7539_s1 + $0x570] sm:$0xff]  }
 0x113   :  { %v4737_v6 = vadd.f32 %v4736_v5, %v4735_v61  ;;  %v4674_v7 = vpop.f32.mrf.mxu0  ;;  %3486 = vmatmul.mubr.bf16.gmra.mxu0 %v5766_v59  ;;  %v5803_v61 = vld [vmem:[%s7539_s1 + $0x5f0] sm:$0xff]  }
 0x114   :  { %v2901_v9 = vadd.f32 %v4673_v4, %v6657_v45  ;;  %v4738_v10 = vpop.f32.mrf.mxu1  ;;  %3583 = vmatmul.mubr.bf16.gmra.mxu1 %v5769_v62  ;;  %3493 = vmatprep.mubr.bf16.mxu0 %v5778_v63  ;;  %v5804_v0 = vld [vmem:[%s7539_s1 + $0x530] sm:$0xff]   ;;  %v5796_v4 = vld [vmem:[%s7540_s0 + $0x108] ss:$100 sps:$4 sm:$0xff]  }
 0x115   :  { %v4675_v11 = vpop.f32.mrf.mxu0  ;;  %3590 = vmatprep.mubr.bf16.mxu1 %v5781_v2  ;;  %v5805_v5 = vld [vmem:[%s7539_s1 + $0x5b0] sm:$0xff]  }
 0x116   :  { %v6849_v12 = vadd.f32 %v4737_v6, %v2901_v9  ;;  %v4676_v13 = vadd.f32 %v4675_v11, %v4674_v7  ;;  %v4739_v15 = vpop.f32.mrf.mxu1  ;;  %v5808_v11 = vld [vmem:[%s7540_s0 + $0x1d4] ss:$100 sps:$4 sm:$0xff]  }
 0x117   :  { %v4740_v16 = vadd.f32 %v4739_v15, %v4738_v10  ;;  %v4677_v17 = vpop.f32.mrf.mxu0  ;;  %v5799_v10 = vld [vmem:[%s7540_s0 + $0x110] ss:$100 sps:$4 sm:$0xff]  }
 0x118   :  { %v2906_v19 = vadd.f32 %v4676_v13, %v6657_v45  ;;  %v4741_v20 = vpop.f32.mrf.mxu1  ;;  %v5813_v13 = vld [vmem:[%s7539_s1 + $0x5e8] sm:$0xff]  }
 0x119   :  { %v4678_v24 = vpop.f32.mrf.mxu0 }
 0x11a   :  { %v6864_v26 = vadd.f32 %v4740_v16, %v2906_v19  ;;  %v4679_v27 = vadd.f32 %v4678_v24, %v4677_v17  ;;  %v4742_v28 = vpop.f32.mrf.mxu1  ;;  %v5811_v17 = vld [vmem:[%s7540_s0 + $0x1dc] ss:$100 sps:$4 sm:$0xff]  }
 0x11b   :  { %v4743_v30 = vadd.f32 %v4742_v28, %v4741_v20  ;;  %v4680_v32 = vpop.f32.mrf.mxu0  ;;  %3494 = vmatmul.mubr.bf16.gmra.mxu0 %v5776_v18  ;;  %v5814_v20 = vld [vmem:[%s7539_s1 + $0x528] sm:$0xff]  }
 0x11c   :  { %v2909_v33 = vadd.f32 %v4679_v27, %v6657_v45  ;;  %v4744_v34 = vpop.f32.mrf.mxu1  ;;  %3591 = vmatmul.mubr.bf16.gmra.mxu1 %v5779_v21  ;;  %3631 = vmatprep.mubr.bf16.mxu0 %v5788_v23  ;;  %v5815_v23 = vld [vmem:[%s7539_s1 + $0x5a8] sm:$0xff]  }
 0x11d   :  { %v4681_v35 = vpop.f32.mrf.mxu0  ;;  %3728 = vmatprep.mubr.bf16.mxu1 %v5791_v25 }
 0x11e   :  { %v6870_v37 = vadd.f32 %v4743_v30, %v2909_v33  ;;  %v4682_v38 = vadd.f32 %v4681_v35, %v4680_v32  ;;  %v4745_v39 = vpop.f32.mrf.mxu1  ;;  %v5823_v32 = vld [vmem:[%s7539_s1 + $0x5e0] sm:$0xff]  }
 0x11f   :  { %v4746_v43 = vadd.f32 %v4745_v39, %v4744_v34  ;;  %v4683_v46 = vpop.f32.mrf.mxu0 }
 0x120   :  { %v2914_v48 = vadd.f32 %v4682_v38, %v6657_v45  ;;  %v4747_v49 = vpop.f32.mrf.mxu1  ;;  %v5824_v38 = vld [vmem:[%s7539_s1 + $0x520] sm:$0xff]  }
 0x121   :  { %v4684_v51 = vpop.f32.mrf.mxu0 }
 0x122   :  { %v6888_v54 = vadd.f32 %v4746_v43, %v2914_v48  ;;  %v4685_v55 = vadd.f32 %v4684_v51, %v4683_v46  ;;  %v4748_v56 = vpop.f32.mrf.mxu1  ;;  %v5825_v43 = vld [vmem:[%s7539_s1 + $0x5a0] sm:$0xff]   ;;  %v5832_v46 = vld [vmem:[%s7539_s1 + $0x558] sm:$0xff]  }
 0x123   :  { %v4749_v59 = vadd.f32 %v4748_v56, %v4747_v49  ;;  %v4766_v60 = vpop.f32.mrf.mxu0  ;;  %3632 = vmatmul.mubr.bf16.vlgmr.msra.gmra.mxu0 %v5786_v36  ;;  %v5806_v36 = vld [vmem:[%s7540_s0 + $0x1d0] ss:$100 sps:$4 sm:$0xff]   ;;  %v5833_v49 = vld [vmem:[%s7539_s1 + $0x5d8] sm:$0xff]   ;;  %v5821_v56 = vld [vmem:[%s7540_s0 + $0x2a4] ss:$100 sps:$4 sm:$0xff]  }
 0x124   :  { %v2917_v62 = vadd.f32 %v4685_v55, %v6657_v45  ;;  %v4830_v63 = vpop.f32.mrf.mxu1  ;;  %3729 = vmatmul.mubr.bf16.vlgmr.msra.gmra.mxu1 %v5789_v40  ;;  %5263 = vmatpush3.bf16.msra.mxu0 %v5794_v41  ;;  %v5812_v45 = vld [vmem:[%s7539_s1 + $0x568] sm:$0xff]  }
 0x125   :  { %5327 = vmatpush3.bf16.msra.mxu1 %v5795_v47  ;;  %v4767_v2 = vpop.f32.mrf.mxu0  ;;  %3639 = vmatprep.mubr.bf16.mxu0 %v5798_v50 }
 0x126   :  { %v6909_v6 = vadd.f32 %v4749_v59, %v2917_v62  ;;  %v4768_v7 = vadd.f32 %v4767_v2, %v4766_v60  ;;  %v4831_v9 = vpop.f32.mrf.mxu1  ;;  %3736 = vmatprep.mubr.bf16.mxu1 %v5801_v52  ;;  %5264 = vmatprep.subr.bf16.mxu0 %v5802_v57  ;;  %v5818_v52 = vld [vmem:[%s7540_s0 + $0x29c] ss:$100 sps:$4 sm:$0xff]   ;;  %v5842_v62 = vld [vmem:[%s7539_s1 + $0x550] sm:$0xff]  }
 0x127   :  { %v4832_v15 = vadd.f32 %v4831_v9, %v4830_v63  ;;  %v4769_v16 = vpop.f32.mrf.mxu0  ;;  %5328 = vmatprep.subr.bf16.mxu1 %v5803_v61  ;;  %v5834_v57 = vld [vmem:[%s7539_s1 + $0x518] sm:$0xff]   ;;  %v5843_v2 = vld [vmem:[%s7539_s1 + $0x5d0] sm:$0xff]  }
 0x128   :  { %v3052_v18 = vadd.f32 %v4768_v7, %v6690_v1  ;;  %v4833_v19 = vpop.f32.mrf.mxu1  ;;  %5265 = vmatpush3.bf16.msra.mxu0 %v5804_v0  ;;  %v5822_v1 = vld [vmem:[%s7539_s1 + $0x560] sm:$0xff]   ;;  %v5816_v7 = vld [vmem:[%s7540_s0 + $0x298] ss:$100 sps:$4 sm:$0xff]   ;;  %v5844_v9 = vld [vmem:[%s7539_s1 + $0x510] sm:$0xff]  }
 0x129   :  { %v4770_v21 = vpop.f32.mrf.mxu0  ;;  %5329 = vmatpush3.bf16.msra.mxu1 %v5805_v5  ;;  %5266 = vmatprep.subr.bf16.mxu0 %v5812_v45 }
 0x12a   :  { %v6930_v24 = vadd.f32 %v4832_v15, %v3052_v18  ;;  %v4771_v25 = vadd.f32 %v4770_v21, %v4769_v16  ;;  %v4834_v27 = vpop.f32.mrf.mxu1  ;;  %5330 = vmatprep.subr.bf16.mxu1 %v5813_v13  ;;  %v5828_v15 = vld [vmem:[%s7540_s0 + $0x364] ss:$100 sps:$4 sm:$0xff]   ;;  %v5845_v16 = vld [vmem:[%s7539_s1 + $0x590] sm:$0xff]  }
 0x12b   :  { %v4835_v28 = vadd.f32 %v4834_v27, %v4833_v19  ;;  %v4772_v30 = vpop.f32.mrf.mxu0  ;;  %3640 = vmatmul.mubr.bf16.gmra.mxu0 %v5796_v4  ;;  %v5853_v21 = vld [vmem:[%s7539_s1 + $0x5c8] sm:$0xff]  }
 0x12c   :  { %v3055_v33 = vadd.f32 %v4771_v25, %v6708_v14  ;;  %v4836_v34 = vpop.f32.mrf.mxu1  ;;  %3737 = vmatmul.mubr.bf16.gmra.mxu1 %v5799_v10  ;;  %3647 = vmatprep.mubr.bf16.mxu0 %v5808_v11  ;;  %v5809_v14 = vld [vmem:[%s7540_s0 + $0x1d8] ss:$100 sps:$4 sm:$0xff]   ;;  %v5854_v27 = vld [vmem:[%s7539_s1 + $0x508] sm:$0xff]  }
 0x12d   :  { %v4773_v35 = vpop.f32.mrf.mxu0  ;;  %3744 = vmatprep.mubr.bf16.mxu1 %v5811_v17  ;;  %5267 = vmatpush3.bf16.msra.mxu0 %v5814_v20  ;;  %v5852_v17 = vld [vmem:[%s7539_s1 + $0x548] sm:$0xff]  }
 0x12e   :  { %v6945_v39 = vadd.f32 %v4835_v28, %v3055_v33  ;;  %v4774_v40 = vadd.f32 %v4773_v35, %v4772_v30  ;;  %v4837_v41 = vpop.f32.mrf.mxu1  ;;  %5331 = vmatpush3.bf16.msra.mxu1 %v5815_v23  ;;  %5268 = vmatprep.subr.bf16.mxu0 %v5822_v1  ;;  %v5831_v20 = vld [vmem:[%s7540_s0 + $0x36c] ss:$100 sps:$4 sm:$0xff]  }
 0x12f   :  { %v4838_v47 = vadd.f32 %v4837_v41, %v4836_v34  ;;  %v4775_v48 = vpop.f32.mrf.mxu0  ;;  %5332 = vmatprep.subr.bf16.mxu1 %v5823_v32  ;;  %v5855_v28 = vld [vmem:[%s7539_s1 + $0x588] sm:$0xff]   ;;  %v5864_v41 = vld [vmem:[%s7539_s1 + $0x500] sm:$0xff]  }
 0x130   :  { %v3060_v50 = vadd.f32 %v4774_v40, %v6732_v29  ;;  %v4839_v51 = vpop.f32.mrf.mxu1  ;;  %v5835_v29 = vld [vmem:[%s7539_s1 + $0x598] sm:$0xff]  }
 0x131   :  { %v4776_v55 = vpop.f32.mrf.mxu0  ;;  %5269 = vmatpush3.bf16.msra.mxu0 %v5824_v38 }
 0x132   :  { %v6969_v59 = vadd.f32 %v4838_v47, %v3060_v50  ;;  %v4777_v60 = vadd.f32 %v4776_v55, %v4775_v48  ;;  %v4840_v61 = vpop.f32.mrf.mxu1  ;;  %5333 = vmatpush3.bf16.msra.mxu1 %v5825_v43  ;;  %5270 = vmatprep.subr.bf16.mxu0 %v5832_v46  ;;  %v5865_v43 = vld [vmem:[%s7539_s1 + $0x580] sm:$0xff]  }
 0x133   :  { %v4841_v63 = vadd.f32 %v4840_v61, %v4839_v51  ;;  %v4778_v0 = vpop.f32.mrf.mxu0  ;;  %3648 = vmatmul.mubr.bf16.gmra.mxu0 %v5806_v36  ;;  %5334 = vmatprep.subr.bf16.mxu1 %v5833_v49  ;;  %v5863_v36 = vld [vmem:[%s7539_s1 + $0x5c0] sm:$0xff]   ;;  %v5841_v61 = vld [vmem:[%s7540_s0 + $0x434] ss:$100 sps:$4 sm:$0xff]  }
 0x134   :  { %v3063_v4 = vadd.f32 %v4777_v60, %v6750_v42  ;;  %v4842_v5 = vpop.f32.mrf.mxu1  ;;  %3745 = vmatmul.mubr.bf16.gmra.mxu1 %v5809_v14  ;;  %3655 = vmatprep.mubr.bf16.mxu0 %v5818_v52  ;;  %v5819_v42 = vld [vmem:[%s7540_s0 + $0x2a0] ss:$100 sps:$4 sm:$0xff]   ;;  %v5829_v52 = vld [vmem:[%s7540_s0 + $0x368] ss:$100 sps:$4 sm:$0xff]  }
 0x135   :  { %v4779_v45 = vpop.f32.mrf.mxu0  ;;  %3752 = vmatprep.mubr.bf16.mxu1 %v5821_v56  ;;  %5271 = vmatpush3.bf16.msra.mxu0 %v5834_v57  ;;  %v5826_v51 = vld [vmem:[%s7540_s0 + $0x360] ss:$100 sps:$4 sm:$0xff]   ;;  %v5838_v57 = vld [vmem:[%s7540_s0 + $0x42c] ss:$100 sps:$4 sm:$0xff]  }
 0x136   :  { %v6987_v10 = vadd.f32 %v4841_v63, %v3063_v4  ;;  %v4780_v11 = vadd.f32 %v4779_v45, %v4778_v0  ;;  %v4843_v13 = vpop.f32.mrf.mxu1  ;;  %5335 = vmatpush3.bf16.msra.mxu1 %v5835_v29  ;;  %5272 = vmatprep.subr.bf16.mxu0 %v5842_v62 }
 0x137   :  { %v4844_v18 = vadd.f32 %v4843_v13, %v4842_v5  ;;  %v4781_v19 = vpop.f32.mrf.mxu0  ;;  %5336 = vmatprep.subr.bf16.mxu1 %v5843_v2 }
 0x138   :  { %v3068_v23 = vadd.f32 %v4780_v11, %v6774_v58  ;;  %v4845_v25 = vpop.f32.mrf.mxu1  ;;  %v5862_v58 = vld [vmem:[%s7539_s1 + $0x540] sm:$0xff]   ;;  %v5836_v11 = vld [vmem:[%s7540_s0 + $0x428] ss:$100 sps:$4 sm:$0xff]  }
 0x139   :  { %v4782_v1 = vpop.f32.mrf.mxu0  ;;  %5273 = vmatpush3.bf16.msra.mxu0 %v5844_v9 }
 0x13a   :  { %v7014_v30 = vadd.f32 %v4844_v18, %v3068_v23  ;;  %v4783_v32 = vadd.f32 %v4782_v1, %v4781_v19  ;;  %v4846_v33 = vpop.f32.mrf.mxu1  ;;  %5337 = vmatpush3.bf16.msra.mxu1 %v5845_v16  ;;  %5274 = vmatprep.subr.bf16.mxu0 %v5852_v17  ;;  %v5848_v17 = vld [vmem:[%s7540_s0 + $0x4f4] ss:$100 sps:$4 sm:$0xff]   ;;  %v5851_v19 = vld [vmem:[%s7540_s0 + $0x4fc] ss:$100 sps:$4 sm:$0xff]  }
 0x13b   :  { %v4847_v34 = vadd.f32 %v4846_v33, %v4845_v25  ;;  %v4784_v35 = vpop.f32.mrf.mxu0  ;;  %3656 = vmatmul.mubr.bf16.gmra.mxu0 %v5816_v7  ;;  %5338 = vmatprep.subr.bf16.mxu1 %v5853_v21 }
 0x13c   :  { %v3071_v38 = vadd.f32 %v4783_v32, %v6792_v8  ;;  %v4848_v40 = vpop.f32.mrf.mxu1  ;;  %3753 = vmatmul.mubr.bf16.gmra.mxu1 %v5819_v42  ;;  %3663 = vmatprep.mubr.bf16.mxu0 %v5828_v15  ;;  %v7034_v8 = vld [vmem:[%s7539_s1 + $0x618] sm:$0xff]   ;;  %v5839_v15 = vld [vmem:[%s7540_s0 + $0x430] ss:$100 sps:$4 sm:$0xff]  }
 0x13d   :  { %v4785_v14 = vpop.f32.mrf.mxu0  ;;  %3760 = vmatprep.mubr.bf16.mxu1 %v5831_v20  ;;  %5275 = vmatpush3.bf16.msra.mxu0 %v5854_v27 }
 0x13e   :  { %v7029_v46 = vadd.f32 %v4847_v34, %v3071_v38  ;;  %v4786_v47 = vadd.f32 %v4785_v14, %v4784_v35  ;;  %v4849_v48 = vpop.f32.mrf.mxu1  ;;  %5339 = vmatpush3.bf16.msra.mxu1 %v5855_v28  ;;  %5276 = vmatprep.subr.bf16.mxu0 %v5862_v58 }
 0x13f   :  { %v4850_v49 = vadd.f32 %v4849_v48, %v4848_v40  ;;  %v4787_v50 = vpop.f32.mrf.mxu0  ;;  %5340 = vmatprep.subr.bf16.mxu1 %v5863_v36  ;;  %v5846_v36 = vld [vmem:[%s7540_s0 + $0x4f0] ss:$100 sps:$4 sm:$0xff]  }
 0x140   :  { %v3076_v55 = vadd.f32 %v4786_v47, %v6810_v22  ;;  %v4851_v56 = vpop.f32.mrf.mxu1 }
 0x141   :  { %v4788_v60 = vpop.f32.mrf.mxu0  ;;  %5277 = vmatpush3.bf16.msra.mxu0 %v5864_v41  ;;  %v5858_v41 = vld [vmem:[%s7540_s0 + $0x5bc] ss:$100 sps:$4 sm:$0xff]  }
 0x142   :  { %v7049_v29 = vadd.f32 %v4850_v49, %v3076_v55  ;;  %v4789_v62 = vadd.f32 %v4788_v60, %v4787_v50  ;;  %v4852_v63 = vpop.f32.mrf.mxu1  ;;  %5341 = vmatpush3.bf16.msra.mxu1 %v5865_v43  ;;  %5402 = vmatprep.subr.bf16.mxu0 %v7034_v8  ;;  %v5861_v43 = vld [vmem:[%s7540_s0 + $0x5c4] ss:$100 sps:$4 sm:$0xff]  }
 0x143   :  { %v4853_v0 = vadd.f32 %v4852_v63, %v4851_v56  ;;  %v4790_v22 = vpop.f32.mrf.mxu0  ;;  %3664 = vmatmul.mubr.bf16.gmra.mxu0 %v5826_v51  ;;  %5426 = vmatprep.subr.bf16.mxu1 %v7034_v8  ;;  %v5856_v63 = vld [vmem:[%s7540_s0 + $0x5b8] ss:$100 sps:$4 sm:$0xff]  }
 0x144   :  { %v3079_v2 = vadd.f32 %v4789_v62, %v6813_v31  ;;  %v4854_v4 = vpop.f32.mrf.mxu1  ;;  %3761 = vmatmul.mubr.bf16.gmra.mxu1 %v5829_v52  ;;  %3671 = vmatprep.mubr.bf16.mxu0 %v5838_v57 }
 0x145   :  { %v4791_v5 = vpop.f32.mrf.mxu0  ;;  %3768 = vmatprep.mubr.bf16.mxu1 %v5841_v61 }
 0x146   :  { %v7054_v45 = vadd.f32 %v4853_v0, %v3079_v2  ;;  %v4792_v7 = vadd.f32 %v4791_v5, %v4790_v22  ;;  %v4855_v9 = vpop.f32.mrf.mxu1  ;;  %v5868_v2 = vld [vmem:[%s7540_s0 + $0x54] ss:$100 sps:$4 sm:$0xff]   ;;  %v5871_v5 = vld [vmem:[%s7540_s0 + $0x5c] ss:$100 sps:$4 sm:$0xff]  }
 0x147   :  { %v4856_v13 = vadd.f32 %v4855_v9, %v4854_v4  ;;  %v4793_v42 = vpop.f32.mrf.mxu0 }
 0x148   :  { %v3084_v31 = vadd.f32 %v4792_v7, %v6828_v44  ;;  %v4857_v16 = vpop.f32.mrf.mxu1 }
 0x149   :  { %v4794_v18 = vpop.f32.mrf.mxu0 }
 0x14a   :  { %v7069_v20 = vadd.f32 %v4856_v13, %v3084_v31  ;;  %v4795_v21 = vadd.f32 %v4794_v18, %v4793_v42  ;;  %v4858_v23 = vpop.f32.mrf.mxu1 }
 0x14b   :  { %v4859_v25 = vadd.f32 %v4858_v23, %v4857_v16  ;;  %v4796_v27 = vpop.f32.mrf.mxu0  ;;  %3672 = vmatmul.mubr.bf16.gmra.mxu0 %v5836_v11  ;;  %v5866_v23 = vld [vmem:[%s7540_s0 + $0x50] ss:$100 sps:$4 sm:$0xff]  }
 0x14c   :  { %v3087_v1 = vadd.f32 %v4795_v21, %v6831_v53  ;;  %v4860_v44 = vpop.f32.mrf.mxu1  ;;  %3769 = vmatmul.mubr.bf16.gmra.mxu1 %v5839_v15  ;;  %3679 = vmatprep.mubr.bf16.mxu0 %v5848_v17  ;;  %v5849_v53 = vld [vmem:[%s7540_s0 + $0x4f8] ss:$100 sps:$4 sm:$0xff]  }
 0x14d   :  { %v4797_v28 = vpop.f32.mrf.mxu0  ;;  %3776 = vmatprep.mubr.bf16.mxu1 %v5851_v19 }
 0x14e   :  { %v7072_v32 = vadd.f32 %v4859_v25, %v3087_v1  ;;  %v4798_v33 = vadd.f32 %v4797_v28, %v4796_v27  ;;  %v4861_v58 = vpop.f32.mrf.mxu1 }
 0x14f   :  { %v4862_v34 = vadd.f32 %v4861_v58, %v4860_v44  ;;  %v4799_v35 = vpop.f32.mrf.mxu0  ;;  %v5875_v44 = vld [vmem:[%s7540_s0 + $0x11c] ss:$100 sps:$4 sm:$0xff]  }
 0x150   :  { %v3092_v38 = vadd.f32 %v4798_v33, %v6846_v3  ;;  %v4863_v40 = vpop.f32.mrf.mxu1 }
 0x151   :  { %v4800_v14 = vpop.f32.mrf.mxu0 }
 0x152   :  { %v7087_v47 = vadd.f32 %v4862_v34, %v3092_v38  ;;  %v4801_v48 = vadd.f32 %v4800_v14, %v4799_v35  ;;  %v4864_v49 = vpop.f32.mrf.mxu1  ;;  %v5878_v34 = vld [vmem:[%s7540_s0 + $0x124] ss:$100 sps:$4 sm:$0xff]  }
 0x153   :  { %v4865_v50 = vadd.f32 %v4864_v49, %v4863_v40  ;;  %v4802_v3 = vpop.f32.mrf.mxu0  ;;  %3680 = vmatmul.mubr.bf16.gmra.mxu0 %v5846_v36 }
 0x154   :  { %v3095_v51 = vadd.f32 %v4801_v48, %v6849_v12  ;;  %v4866_v52 = vpop.f32.mrf.mxu1  ;;  %3777 = vmatmul.mubr.bf16.gmra.mxu1 %v5849_v53  ;;  %3687 = vmatprep.mubr.bf16.mxu0 %v5858_v41  ;;  %v5859_v12 = vld [vmem:[%s7540_s0 + $0x5c0] ss:$100 sps:$4 sm:$0xff]   ;;  %v5898_v41 = vld [vmem:[%s7539_s1 + $0x608] sm:$0xff]  }
 0x155   :  { %v4803_v55 = vpop.f32.mrf.mxu0  ;;  %3784 = vmatprep.mubr.bf16.mxu1 %v5861_v43 }
 0x156   :  { %v7090_v56 = vadd.f32 %v4865_v50, %v3095_v51  ;;  %v4804_v57 = vadd.f32 %v4803_v55, %v4802_v3  ;;  %v4867_v60 = vpop.f32.mrf.mxu1  ;;  %v5873_v50 = vld [vmem:[%s7540_s0 + $0x118] ss:$100 sps:$4 sm:$0xff]   ;;  %v5876_v51 = vld [vmem:[%s7540_s0 + $0x120] ss:$100 sps:$4 sm:$0xff]  }
 0x157   :  { %v4868_v61 = vadd.f32 %v4867_v60, %v4866_v52  ;;  %v4805_v62 = vpop.f32.mrf.mxu0  ;;  %v5881_v52 = vld [vmem:[%s7540_s0 + $0x1e4] ss:$100 sps:$4 sm:$0xff]  }
 0x158   :  { %v3100_v0 = vadd.f32 %v4804_v57, %v6864_v26  ;;  %v4869_v22 = vpop.f32.mrf.mxu1  ;;  %v5884_v57 = vld [vmem:[%s7540_s0 + $0x1ec] ss:$100 sps:$4 sm:$0xff]  }
 0x159   :  { %v4806_v4 = vpop.f32.mrf.mxu0 }
 0x15a   :  { %v7105_v7 = vadd.f32 %v4868_v61, %v3100_v0  ;;  %v4807_v9 = vadd.f32 %v4806_v4, %v4805_v62  ;;  %v4870_v11 = vpop.f32.mrf.mxu1  ;;  %v5911_v62 = vld [vmem:[%s7539_s1 + $0x600] sm:$0xff]  }
 0x15b   :  { %v4871_v13 = vadd.f32 %v4870_v11, %v4869_v22  ;;  %v4808_v26 = vpop.f32.mrf.mxu0  ;;  %3688 = vmatmul.mubr.bf16.gmra.mxu0 %v5856_v63 }
 0x15c   :  { %v3103_v42 = vadd.f32 %v4807_v9, %v6870_v37  ;;  %v4872_v15 = vpop.f32.mrf.mxu1  ;;  %3785 = vmatmul.mubr.bf16.gmra.mxu1 %v5859_v12  ;;  %3825 = vmatprep.mubr.bf16.mxu0 %v5868_v2  ;;  %v5869_v37 = vld [vmem:[%s7540_s0 + $0x58] ss:$100 sps:$4 sm:$0xff]  }
 0x15d   :  { %v4809_v31 = vpop.f32.mrf.mxu0  ;;  %3922 = vmatprep.mubr.bf16.mxu1 %v5871_v5 }
 0x15e   :  { %v7108_v16 = vadd.f32 %v4871_v13, %v3103_v42  ;;  %v4810_v17 = vadd.f32 %v4809_v31, %v4808_v26  ;;  %v4873_v18 = vpop.f32.mrf.mxu1  ;;  %v5879_v26 = vld [vmem:[%s7540_s0 + $0x1e0] ss:$100 sps:$4 sm:$0xff]   ;;  %v5888_v31 = vld [vmem:[%s7540_s0 + $0x2ac] ss:$100 sps:$4 sm:$0xff]  }
 0x15f   :  { %v4874_v19 = vadd.f32 %v4873_v18, %v4872_v15  ;;  %v4811_v21 = vpop.f32.mrf.mxu0  ;;  %v5882_v15 = vld [vmem:[%s7540_s0 + $0x1e8] ss:$100 sps:$4 sm:$0xff]   ;;  %v5891_v18 = vld [vmem:[%s7540_s0 + $0x2b4] ss:$100 sps:$4 sm:$0xff]  }
 0x160   :  { %v3108_v25 = vadd.f32 %v4810_v17, %v6888_v54  ;;  %v4875_v27 = vpop.f32.mrf.mxu1  ;;  %v5885_v54 = vld [vmem:[%s7539_s1 + $0x610] sm:$0xff]  }
 0x161   :  { %v4812_v1 = vpop.f32.mrf.mxu0 }
 0x162   :  { %v7120_v28 = vadd.f32 %v4874_v19, %v3108_v25  ;;  %v4813_v33 = vadd.f32 %v4812_v1, %v4811_v21  ;;  %v4876_v58 = vpop.f32.mrf.mxu1 }
 0x163   :  { %v4877_v35 = vadd.f32 %v4876_v58, %v4875_v27  ;;  %v4894_v36 = vpop.f32.mrf.mxu0  ;;  %3826 = vmatmul.mubr.bf16.vlgmr.msra.gmra.mxu0 %v5866_v23 }
 0x164   :  { %v3111_v38 = vadd.f32 %v4813_v33, %v6909_v6  ;;  %v4958_v40 = vpop.f32.mrf.mxu1  ;;  %3923 = vmatmul.mubr.bf16.vlgmr.msra.gmra.mxu1 %v5869_v37  ;;  %5403 = vmatpush3.bf16.msra.mxu0 %v7034_v8 }
 0x165   :  { %5430 = vmatpush3.bf16.msra.mxu1 %v7034_v8  ;;  %v4895_v53 = vpop.f32.mrf.mxu0  ;;  %3833 = vmatprep.mubr.bf16.mxu0 %v5875_v44 }
 0x166   :  { %v7134_v14 = vadd.f32 %v4877_v35, %v3111_v38  ;;  %v4896_v43 = vadd.f32 %v4895_v53, %v4894_v36  ;;  %v4959_v48 = vpop.f32.mrf.mxu1  ;;  %3930 = vmatprep.mubr.bf16.mxu1 %v5878_v34  ;;  %5404 = vmatprep.subr.bf16.mxu0 %v5885_v54  ;;  %v5886_v35 = vld [vmem:[%s7540_s0 + $0x2a8] ss:$100 sps:$4 sm:$0xff]  }
 0x167   :  { %v4960_v49 = vadd.f32 %v4959_v48, %v4958_v40  ;;  %v4897_v6 = vpop.f32.mrf.mxu0  ;;  %5427 = vmatprep.subr.bf16.mxu1 %v5885_v54  ;;  %v5894_v40 = vld [vmem:[%s7540_s0 + $0x374] ss:$100 sps:$4 sm:$0xff]  }
 0x168   :  { %v3246_v8 = vadd.f32 %v4896_v43, %v6930_v24  ;;  %v4961_v3 = vpop.f32.mrf.mxu1  ;;  %5405 = vmatpush3.bf16.msra.mxu0 %v5885_v54 }
 0x169   :  { %v4898_v55 = vpop.f32.mrf.mxu0  ;;  %5431 = vmatpush3.bf16.msra.mxu1 %v5885_v54  ;;  %5406 = vmatprep.subr.bf16.mxu0 %v5898_v41 }
 0x16a   :  { %v7149_v60 = vadd.f32 %v4960_v49, %v3246_v8  ;;  %v4899_v24 = vadd.f32 %v4898_v55, %v4897_v6  ;;  %v4962_v61 = vpop.f32.mrf.mxu1  ;;  %5428 = vmatprep.subr.bf16.mxu1 %v5898_v41 }
 0x16b   :  { %v4963_v63 = vadd.f32 %v4962_v61, %v4961_v3  ;;  %v4900_v0 = vpop.f32.mrf.mxu0  ;;  %3834 = vmatmul.mubr.bf16.gmra.mxu0 %v5873_v50  ;;  %v5892_v61 = vld [vmem:[%s7540_s0 + $0x370] ss:$100 sps:$4 sm:$0xff]  }
 0x16c   :  { %v3249_v22 = vadd.f32 %v4899_v24, %v6945_v39  ;;  %v4964_v12 = vpop.f32.mrf.mxu1  ;;  %3931 = vmatmul.mubr.bf16.gmra.mxu1 %v5876_v51  ;;  %3841 = vmatprep.mubr.bf16.mxu0 %v5881_v52 }
 0x16d   :  { %v4901_v2 = vpop.f32.mrf.mxu0  ;;  %3938 = vmatprep.mubr.bf16.mxu1 %v5884_v57  ;;  %5407 = vmatpush3.bf16.msra.mxu0 %v5898_v41 }
 0x16e   :  { %v7155_v4 = vadd.f32 %v4963_v63, %v3249_v22  ;;  %v4902_v5 = vadd.f32 %v4901_v2, %v4900_v0  ;;  %v4965_v9 = vpop.f32.mrf.mxu1  ;;  %5432 = vmatpush3.bf16.msra.mxu1 %v5898_v41  ;;  %5408 = vmatprep.subr.bf16.mxu0 %v5911_v62  ;;  %v5897_v41 = vld [vmem:[%s7540_s0 + $0x37c] ss:$100 sps:$4 sm:$0xff]  }
 0x16f   :  { %v4966_v11 = vadd.f32 %v4965_v9, %v4964_v12  ;;  %v4903_v13 = vpop.f32.mrf.mxu0  ;;  %5429 = vmatprep.subr.bf16.mxu1 %v5911_v62  ;;  %v5901_v0 = vld [vmem:[%s7540_s0 + $0x43c] ss:$100 sps:$4 sm:$0xff]   ;;  %v5904_v12 = vld [vmem:[%s7540_s0 + $0x444] ss:$100 sps:$4 sm:$0xff]  }
 0x170   :  { %v3254_v39 = vadd.f32 %v4902_v5, %v6969_v59  ;;  %v4967_v42 = vpop.f32.mrf.mxu1 }
 0x171   :  { %v4904_v17 = vpop.f32.mrf.mxu0  ;;  %5409 = vmatpush3.bf16.msra.mxu0 %v5911_v62 }
 0x172   :  { %v7170_v19 = vadd.f32 %v4966_v11, %v3254_v39  ;;  %v4905_v21 = vadd.f32 %v4904_v17, %v4903_v13  ;;  %v4968_v23 = vpop.f32.mrf.mxu1  ;;  %5433 = vmatpush3.bf16.msra.mxu1 %v5911_v62 }
 0x173   :  { %v4969_v59 = vadd.f32 %v4968_v23, %v4967_v42  ;;  %v4906_v25 = vpop.f32.mrf.mxu0  ;;  %3842 = vmatmul.mubr.bf16.gmra.mxu0 %v5879_v26 }
 0x174   :  { %v3257_v27 = vadd.f32 %v4905_v21, %v6987_v10  ;;  %v4970_v37 = vpop.f32.mrf.mxu1  ;;  %3939 = vmatmul.mubr.bf16.gmra.mxu1 %v5882_v15  ;;  %3849 = vmatprep.mubr.bf16.mxu0 %v5888_v31  ;;  %v5889_v10 = vld [vmem:[%s7540_s0 + $0x2b0] ss:$100 sps:$4 sm:$0xff]   ;;  %v5899_v21 = vld [vmem:[%s7540_s0 + $0x438] ss:$100 sps:$4 sm:$0xff]  }
 0x175   :  { %v4907_v1 = vpop.f32.mrf.mxu0  ;;  %3946 = vmatprep.mubr.bf16.mxu1 %v5891_v18 }
 0x176   :  { %v7173_v44 = vadd.f32 %v4969_v59, %v3257_v27  ;;  %v4908_v33 = vadd.f32 %v4907_v1, %v4906_v25  ;;  %v4971_v58 = vpop.f32.mrf.mxu1  ;;  %v5907_v25 = vld [vmem:[%s7540_s0 + $0x504] ss:$100 sps:$4 sm:$0xff]  }
 0x177   :  { %v4972_v34 = vadd.f32 %v4971_v58, %v4970_v37  ;;  %v4909_v54 = vpop.f32.mrf.mxu0  ;;  %v5910_v37 = vld [vmem:[%s7540_s0 + $0x50c] ss:$100 sps:$4 sm:$0xff]  }
 0x178   :  { %v3262_v36 = vadd.f32 %v4908_v33, %v7014_v30  ;;  %v4973_v38 = vpop.f32.mrf.mxu1 }
 0x179   :  { %v4910_v53 = vpop.f32.mrf.mxu0 }
 0x17a   :  { %v7188_v43 = vadd.f32 %v4972_v34, %v3262_v36  ;;  %v4911_v48 = vadd.f32 %v4910_v53, %v4909_v54  ;;  %v4974_v49 = vpop.f32.mrf.mxu1 }
 0x17b   :  { %v4975_v6 = vadd.f32 %v4974_v49, %v4973_v38  ;;  %v4912_v30 = vpop.f32.mrf.mxu0  ;;  %3850 = vmatmul.mubr.bf16.gmra.mxu0 %v5886_v35 }
 0x17c   :  { %v3265_v50 = vadd.f32 %v4911_v48, %v7029_v46  ;;  %v4976_v8 = vpop.f32.mrf.mxu1  ;;  %3947 = vmatmul.mubr.bf16.gmra.mxu1 %v5889_v10  ;;  %3857 = vmatprep.mubr.bf16.mxu0 %v5894_v40  ;;  %v5895_v46 = vld [vmem:[%s7540_s0 + $0x378] ss:$100 sps:$4 sm:$0xff]   ;;  %v5905_v48 = vld [vmem:[%s7540_s0 + $0x500] ss:$100 sps:$4 sm:$0xff]  }
 0x17d   :  { %v4913_v3 = vpop.f32.mrf.mxu0  ;;  %3954 = vmatprep.mubr.bf16.mxu1 %v5897_v41 }
 0x17e   :  { %v7191_v51 = vadd.f32 %v4975_v6, %v3265_v50  ;;  %v4914_v52 = vadd.f32 %v4913_v3, %v4912_v30  ;;  %v4977_v55 = vpop.f32.mrf.mxu1  ;;  %v5914_v30 = vld [vmem:[%s7540_s0 + $0x5cc] ss:$100 sps:$4 sm:$0xff]  }
 0x17f   :  { %v4978_v57 = vadd.f32 %v4977_v55, %v4976_v8  ;;  %v4915_v24 = vpop.f32.mrf.mxu0  ;;  %v5917_v8 = vld [vmem:[%s7540_s0 + $0x5d4] ss:$100 sps:$4 sm:$0xff]  }
 0x180   :  { %v3270_v62 = vadd.f32 %v4914_v52, %v7049_v29  ;;  %v4979_v63 = vpop.f32.mrf.mxu1 }
 0x181   :  { %v4916_v22 = vpop.f32.mrf.mxu0 }
 0x182   :  { %v7206_v2 = vadd.f32 %v4978_v57, %v3270_v62  ;;  %v4917_v5 = vadd.f32 %v4916_v22, %v4915_v24  ;;  %v4980_v9 = vpop.f32.mrf.mxu1 }
 0x183   :  { %v4981_v11 = vadd.f32 %v4980_v9, %v4979_v63  ;;  %v4918_v29 = vpop.f32.mrf.mxu0  ;;  %3858 = vmatmul.mubr.bf16.gmra.mxu0 %v5892_v61 }
 0x184   :  { %v3273_v13 = vadd.f32 %v4917_v5, %v7054_v45  ;;  %v4982_v26 = vpop.f32.mrf.mxu1  ;;  %3955 = vmatmul.mubr.bf16.gmra.mxu1 %v5895_v46  ;;  %3865 = vmatprep.mubr.bf16.mxu0 %v5901_v0  ;;  %v5902_v45 = vld [vmem:[%s7540_s0 + $0x440] ss:$100 sps:$4 sm:$0xff]   ;;  %v5912_v5 = vld [vmem:[%s7540_s0 + $0x5c8] ss:$100 sps:$4 sm:$0xff]  }
 0x185   :  { %v4919_v39 = vpop.f32.mrf.mxu0  ;;  %3962 = vmatprep.mubr.bf16.mxu1 %v5904_v12 }
 0x186   :  { %v7209_v42 = vadd.f32 %v4981_v11, %v3273_v13  ;;  %v4920_v15 = vadd.f32 %v4919_v39, %v4918_v29  ;;  %v4983_v31 = vpop.f32.mrf.mxu1  ;;  %v5918_v29 = vld [vmem:[%s7540_s0 + $0x60] ss:$100 sps:$4 sm:$0xff]  }
 0x187   :  { %v4984_v17 = vadd.f32 %v4983_v31, %v4982_v26  ;;  %v4921_v18 = vpop.f32.mrf.mxu0  ;;  %v5919_v26 = vld [vmem:[%s7540_s0 + $0x380] ss:$100 sps:$4 sm:$0xff]  }
 0x188   :  { %v3278_v23 = vadd.f32 %v4920_v15, %v7069_v20  ;;  %v4985_v59 = vpop.f32.mrf.mxu1 }
 0x189   :  { %v4922_v27 = vpop.f32.mrf.mxu0 }
 0x18a   :  { %v7224_v1 = vadd.f32 %v4984_v17, %v3278_v23  ;;  %v4923_v33 = vadd.f32 %v4922_v27, %v4921_v18  ;;  %v4986_v58 = vpop.f32.mrf.mxu1 }
 0x18b   :  { %v4987_v34 = vadd.f32 %v4986_v58, %v4985_v59  ;;  %v4924_v20 = vpop.f32.mrf.mxu0  ;;  %3866 = vmatmul.mubr.bf16.gmra.mxu0 %v5899_v21 }
 0x18c   :  { %v3281_v54 = vadd.f32 %v4923_v33, %v7072_v32  ;;  %v4988_v35 = vpop.f32.mrf.mxu1  ;;  %3963 = vmatmul.mubr.bf16.gmra.mxu1 %v5902_v45  ;;  %3873 = vmatprep.mubr.bf16.mxu0 %v5907_v25  ;;  %v5908_v32 = vld [vmem:[%s7540_s0 + $0x508] ss:$100 sps:$4 sm:$0xff]  }
 0x18d   :  { %v4925_v36 = vpop.f32.mrf.mxu0  ;;  %3970 = vmatprep.mubr.bf16.mxu1 %v5910_v37  ;;  %v5920_v33 = vld [vmem:[%s7540_s0 + $0x128] ss:$100 sps:$4 sm:$0xff]  }
 0x18e   :  { %v7227_v38 = vadd.f32 %v4987_v34, %v3281_v54  ;;  %v4926_v10 = vadd.f32 %v4925_v36, %v4924_v20  ;;  %v4989_v40 = vpop.f32.mrf.mxu1  ;;  %v5921_v34 = vld [vmem:[%s7540_s0 + $0x448] ss:$100 sps:$4 sm:$0xff]   ;;  %v5922_v20 = vld [vmem:[%s7540_s0 + $0x1f0] ss:$100 sps:$4 sm:$0xff]  }
 0x18f   :  { %v4990_v53 = vadd.f32 %v4989_v40, %v4988_v35  ;;  %v4927_v41 = vpop.f32.mrf.mxu0  ;;  %v5923_v35 = vld [vmem:[%s7540_s0 + $0x510] ss:$100 sps:$4 sm:$0xff]  }
 0x190   :  { %v3286_v49 = vadd.f32 %v4926_v10, %v7087_v47  ;;  %v4991_v6 = vpop.f32.mrf.mxu1 }
 0x191   :  { %v4928_v50 = vpop.f32.mrf.mxu0 }
 0x192   :  { %v7242_v3 = vadd.f32 %v4990_v53, %v3286_v49  ;;  %v4929_v52 = vadd.f32 %v4928_v50, %v4927_v41  ;;  %v4992_v55 = vpop.f32.mrf.mxu1 }
 0x193   :  { %v4993_v57 = vadd.f32 %v4992_v55, %v4991_v6  ;;  %v4930_v47 = vpop.f32.mrf.mxu0  ;;  %3874 = vmatmul.mubr.bf16.gmra.mxu0 %v5905_v48 }
 0x194   :  { %v3289_v24 = vadd.f32 %v4929_v52, %v7090_v56  ;;  %v4994_v61 = vpop.f32.mrf.mxu1  ;;  %3971 = vmatmul.mubr.bf16.gmra.mxu1 %v5908_v32  ;;  %3881 = vmatprep.mubr.bf16.mxu0 %v5914_v30  ;;  %v5915_v56 = vld [vmem:[%s7540_s0 + $0x5d0] ss:$100 sps:$4 sm:$0xff]   ;;  %v5924_v52 = vld [vmem:[%s7540_s0 + $0x2b8] ss:$100 sps:$4 sm:$0xff]  }
 0x195   :  { %v4931_v62 = vpop.f32.mrf.mxu0  ;;  %3978 = vmatprep.mubr.bf16.mxu1 %v5917_v8 }
 0x196   :  { %v7245_v63 = vadd.f32 %v4993_v57, %v3289_v24  ;;  %v4932_v46 = vadd.f32 %v4931_v62, %v4930_v47  ;;  %v4995_v0 = vpop.f32.mrf.mxu1  ;;  %v5925_v57 = vld [vmem:[%s7540_s0 + $0x5d8] ss:$100 sps:$4 sm:$0xff]  }
 0x197   :  { %v4996_v22 = vadd.f32 %v4995_v0, %v4994_v61  ;;  %v4933_v12 = vpop.f32.mrf.mxu0 }
 0x198   :  { %v3294_v9 = vadd.f32 %v4932_v46, %v7105_v7  ;;  %v4997_v11 = vpop.f32.mrf.mxu1 }
 0x199   :  { %v4934_v13 = vpop.f32.mrf.mxu0 }
 0x19a   :  { %v7260_v39 = vadd.f32 %v4996_v22, %v3294_v9  ;;  %v4935_v15 = vadd.f32 %v4934_v13, %v4933_v12  ;;  %v4998_v31 = vpop.f32.mrf.mxu1 }
 0x19b   :  { %v4999_v7 = vadd.f32 %v4998_v31, %v4997_v11  ;;  %v4936_v17 = vpop.f32.mrf.mxu0  ;;  %3882 = vmatmul.mubr.bf16.gmra.mxu0 %v5912_v5 }
 0x19c   :  { %v3297_v18 = vadd.f32 %v4935_v15, %v7108_v16  ;;  %v5000_v21 = vpop.f32.mrf.mxu1  ;;  %3979 = vmatmul.mubr.bf16.gmra.mxu1 %v5915_v56  ;;  %5410 = vmatprep.mubr.msk.bf16.mxu0 %vm2798_vm0, %v5918_v29 }
 0x19d   :  { %v4937_v23 = vpop.f32.mrf.mxu0  ;;  %5418 = vmatprep.mubr.msk.bf16.mxu1 %vm2798_vm0, %v5919_v26 }
 0x19e   :  { %v7265_v59 = vadd.f32 %v4999_v7, %v3297_v18  ;;  %v4938_v45 = vadd.f32 %v4937_v23, %v4936_v17  ;;  %v5001_v25 = vpop.f32.mrf.mxu1 }
 0x19f   :  { %v5002_v27 = vadd.f32 %v5001_v25, %v5000_v21  ;;  %v4939_v37 = vpop.f32.mrf.mxu0 }
 0x1a0   :  { %v3302_v58 = vadd.f32 %v4938_v45, %v7120_v28  ;;  %v5003_v16 = vpop.f32.mrf.mxu1 }
 0x1a1   :  { %v4940_v54 = vpop.f32.mrf.mxu0 }
 0x1a2   :  { %v7280_v36 = vadd.f32 %v5002_v27, %v3302_v58  ;;  %v4941_v10 = vadd.f32 %v4940_v54, %v4939_v37  ;;  %v5004_v40 = vpop.f32.mrf.mxu1 }
 0x1a3   :  { %v5005_v53 = vadd.f32 %v5004_v40, %v5003_v16  ;;  %v5022_v28 = vpop.f32.mrf.mxu0  ;;  %5411 = vmatmul.mubr.msk.bf16.vlgmr.msra.gmra.mxu0 %vm2798_vm0, %v5920_v33 }
 0x1a4   :  { %v3305_v41 = vadd.f32 %v4941_v10, %v7134_v14  ;;  %v5086_v48 = vpop.f32.mrf.mxu1  ;;  %5419 = vmatmul.mubr.msk.bf16.vlgmr.msra.gmra.mxu1 %vm2798_vm0, %v5921_v34  ;;  %5414 = vmatprep.mubr.msk.bf16.mxu0 %vm2798_vm0, %v5922_v20 }
 0x1a5   :  { %v5023_v49 = vpop.f32.mrf.mxu0  ;;  %5422 = vmatprep.mubr.msk.bf16.mxu1 %vm2798_vm0, %v5923_v35 }
 0x1a6   :  { %v7287_v6 = vadd.f32 %v5005_v53, %v3305_v41  ;;  %v5024_v32 = vadd.f32 %v5023_v49, %v5022_v28  ;;  %v5087_v30 = vpop.f32.mrf.mxu1 }
 0x1a7   :  { %v5088_v50 = vadd.f32 %v5087_v30, %v5086_v48  ;;  %v5025_v8 = vpop.f32.mrf.mxu0 }
 0x1a8   :  { %v3440_v14 = vadd.f32 %v5024_v32, %v7149_v60  ;;  %v5089_v55 = vpop.f32.mrf.mxu1 }
 0x1a9   :  { %v5026_v47 = vpop.f32.mrf.mxu0 }
 0x1aa   :  { %v7296_v24 = vadd.f32 %v5088_v50, %v3440_v14  ;;  %v5027_v61 = vadd.f32 %v5026_v47, %v5025_v8  ;;  %v5090_v62 = vpop.f32.mrf.mxu1 }
 0x1ab   :  { %v5091_v46 = vadd.f32 %v5090_v62, %v5089_v55  ;;  %v5028_v0 = vpop.f32.mrf.mxu0  ;;  %5415 = vmatmul.mubr.msk.bf16.gmra.mxu0 %vm2798_vm0, %v5924_v52 }
 0x1ac   :  { %v3443_v22 = vadd.f32 %v5027_v61, %v7155_v4  ;;  %v5092_v12 = vpop.f32.mrf.mxu1  ;;  %5423 = vmatmul.mubr.msk.bf16.gmra.mxu1 %vm2798_vm0, %v5925_v57 }
 0x1ad   :  { %v5029_v60 = vpop.f32.mrf.mxu0 }
 0x1ae   :  { %v7301_v5 = vadd.f32 %v5091_v46, %v3443_v22  ;;  %v5030_v9 = vadd.f32 %v5029_v60, %v5028_v0  ;;  %v5093_v11 = vpop.f32.mrf.mxu1 }
 0x1af   :  { %v5094_v56 = vadd.f32 %v5093_v11, %v5092_v12  ;;  %v5031_v29 = vpop.f32.mrf.mxu0 }
 0x1b0   :  { %v3448_v13 = vadd.f32 %v5030_v9, %v7170_v19  ;;  %v5095_v26 = vpop.f32.mrf.mxu1 }
 0x1b1   :  { %v5032_v15 = vpop.f32.mrf.mxu0 }
 0x1b2   :  { %v7304_v31 = vadd.f32 %v5094_v56, %v3448_v13  ;;  %v5033_v7 = vadd.f32 %v5032_v15, %v5031_v29  ;;  %v5096_v17 = vpop.f32.mrf.mxu1 }
 0x1b3   :  { %v5097_v18 = vadd.f32 %v5096_v17, %v5095_v26  ;;  %v5034_v4 = vpop.f32.mrf.mxu0 }
 0x1b4   :  { %v3451_v21 = vadd.f32 %v5033_v7, %v7173_v44  ;;  %v5098_v23 = vpop.f32.mrf.mxu1 }
 0x1b5   :  { %v5035_v45 = vpop.f32.mrf.mxu0 }
 0x1b6   :  { %v7307_v25 = vadd.f32 %v5097_v18, %v3451_v21  ;;  %v5036_v27 = vadd.f32 %v5035_v45, %v5034_v4  ;;  %v5099_v37 = vpop.f32.mrf.mxu1 }
 0x1b7   :  { %v5100_v33 = vadd.f32 %v5099_v37, %v5098_v23  ;;  %v5037_v58 = vpop.f32.mrf.mxu0 }
 0x1b8   :  { %v3456_v19 = vadd.f32 %v5036_v27, %v7188_v43  ;;  %v5101_v16 = vpop.f32.mrf.mxu1 }
 0x1b9   :  { %v5038_v34 = vpop.f32.mrf.mxu0 }
 0x1ba   :  { %v7310_v20 = vadd.f32 %v5100_v33, %v3456_v19  ;;  %v5039_v54 = vadd.f32 %v5038_v34, %v5037_v58  ;;  %v5102_v35 = vpop.f32.mrf.mxu1 }
 0x1bb   :  { %v5103_v10 = vadd.f32 %v5102_v35, %v5101_v16  ;;  %v5040_v40 = vpop.f32.mrf.mxu0 }
 0x1bc   :  { %v3459_v44 = vadd.f32 %v5039_v54, %v7191_v51  ;;  %v5104_v53 = vpop.f32.mrf.mxu1 }
 0x1bd   :  { %v5041_v28 = vpop.f32.mrf.mxu0 }
 0x1be   :  { %v7313_v41 = vadd.f32 %v5103_v10, %v3459_v44  ;;  %v5042_v48 = vadd.f32 %v5041_v28, %v5040_v40  ;;  %v5105_v49 = vpop.f32.mrf.mxu1 }
 0x1bf   :  { %v5106_v32 = vadd.f32 %v5105_v49, %v5104_v53  ;;  %v5043_v30 = vpop.f32.mrf.mxu0 }
 0x1c0   :  { %v3464_v43 = vadd.f32 %v5042_v48, %v7206_v2  ;;  %v5107_v50 = vpop.f32.mrf.mxu1 }
 0x1c1   :  { %v5044_v8 = vpop.f32.mrf.mxu0 }
 0x1c2   :  { %v7316_v52 = vadd.f32 %v5106_v32, %v3464_v43  ;;  %v5045_v14 = vadd.f32 %v5044_v8, %v5043_v30  ;;  %v5108_v55 = vpop.f32.mrf.mxu1 }
 0x1c3   :  { %v5109_v57 = vadd.f32 %v5108_v55, %v5107_v50  ;;  %v5046_v47 = vpop.f32.mrf.mxu0 }
 0x1c4   :  { %v3467_v51 = vadd.f32 %v5045_v14, %v7209_v42  ;;  %v5110_v61 = vpop.f32.mrf.mxu1 }
 0x1c5   :  { %v5047_v62 = vpop.f32.mrf.mxu0 }
 0x1c6   :  { %v7319_v46 = vadd.f32 %v5109_v57, %v3467_v51  ;;  %v5048_v0 = vadd.f32 %v5047_v62, %v5046_v47  ;;  %v5111_v22 = vpop.f32.mrf.mxu1 }
 0x1c7   :  { %v5112_v12 = vadd.f32 %v5111_v22, %v5110_v61  ;;  %v5049_v60 = vpop.f32.mrf.mxu0 }
 0x1c8   :  { %v3472_v2 = vadd.f32 %v5048_v0, %v7224_v1  ;;  %v5113_v9 = vpop.f32.mrf.mxu1 }
 0x1c9   :  { %v5050_v11 = vpop.f32.mrf.mxu0 }
 0x1ca   :  { %v7322_v56 = vadd.f32 %v5112_v12, %v3472_v2  ;;  %v5051_v29 = vadd.f32 %v5050_v11, %v5049_v60  ;;  %v5114_v13 = vpop.f32.mrf.mxu1 }
 0x1cb   :  { %v5115_v26 = vadd.f32 %v5114_v13, %v5113_v9  ;;  %v5052_v15 = vpop.f32.mrf.mxu0 }
 0x1cc   :  { %v3475_v42 = vadd.f32 %v5051_v29, %v7227_v38  ;;  %v5116_v7 = vpop.f32.mrf.mxu1 }
 0x1cd   :  { %v5053_v17 = vpop.f32.mrf.mxu0 }
 0x1ce   :  { %v7325_v18 = vadd.f32 %v5115_v26, %v3475_v42  ;;  %v5054_v4 = vadd.f32 %v5053_v17, %v5052_v15  ;;  %v5117_v21 = vpop.f32.mrf.mxu1 }
 0x1cf   :  { %v5118_v23 = vadd.f32 %v5117_v21, %v5116_v7  ;;  %v5055_v45 = vpop.f32.mrf.mxu0 }
 0x1d0   :  { %v3480_v1 = vadd.f32 %v5054_v4, %v7242_v3  ;;  %v5119_v27 = vpop.f32.mrf.mxu1 }
 0x1d1   :  { %v5056_v37 = vpop.f32.mrf.mxu0 }
 0x1d2   :  { %v7328_v33 = vadd.f32 %v5118_v23, %v3480_v1  ;;  %v5057_v58 = vadd.f32 %v5056_v37, %v5055_v45  ;;  %v5120_v19 = vpop.f32.mrf.mxu1 }
 0x1d3   :  { %v5121_v16 = vadd.f32 %v5120_v19, %v5119_v27  ;;  %v5058_v34 = vpop.f32.mrf.mxu0 }
 0x1d4   :  { %v3483_v38 = vadd.f32 %v5057_v58, %v7245_v63  ;;  %v5122_v54 = vpop.f32.mrf.mxu1 }
 0x1d5   :  { %v5059_v35 = vpop.f32.mrf.mxu0 }
 0x1d6   :  { %v7331_v10 = vadd.f32 %v5121_v16, %v3483_v38  ;;  %v5060_v40 = vadd.f32 %v5059_v35, %v5058_v34  ;;  %v5123_v44 = vpop.f32.mrf.mxu1 }
 0x1d7   :  { %v5124_v53 = vadd.f32 %v5123_v44, %v5122_v54  ;;  %v5061_v28 = vpop.f32.mrf.mxu0 }
 0x1d8   :  { %v3488_v3 = vadd.f32 %v5060_v40, %v7260_v39  ;;  %v5125_v48 = vpop.f32.mrf.mxu1 }
 0x1d9   :  { %v5062_v49 = vpop.f32.mrf.mxu0 }
 0x1da   :  { %v7334_v32 = vadd.f32 %v5124_v53, %v3488_v3  ;;  %v5063_v30 = vadd.f32 %v5062_v49, %v5061_v28  ;;  %v5126_v43 = vpop.f32.mrf.mxu1 }
 0x1db   :  { %v5127_v50 = vadd.f32 %v5126_v43, %v5125_v48  ;;  %v5064_v8 = vpop.f32.mrf.mxu0 }
 0x1dc   :  { %v3491_v63 = vadd.f32 %v5063_v30, %v7265_v59  ;;  %v5128_v14 = vpop.f32.mrf.mxu1 }
 0x1dd   :  { %v5065_v55 = vpop.f32.mrf.mxu0 }
 0x1de   :  { %v7337_v57 = vadd.f32 %v5127_v50, %v3491_v63  ;;  %v5066_v47 = vadd.f32 %v5065_v55, %v5064_v8  ;;  %v5129_v51 = vpop.f32.mrf.mxu1 }
 0x1df   :  { %v5130_v61 = vadd.f32 %v5129_v51, %v5128_v14  ;;  %v5067_v62 = vpop.f32.mrf.mxu0 }
 0x1e0   :  { %v3496_v39 = vadd.f32 %v5066_v47, %v7280_v36  ;;  %v5131_v0 = vpop.f32.mrf.mxu1 }
 0x1e1   :  { %v5068_v22 = vpop.f32.mrf.mxu0 }
 0x1e2   :  { %v7340_v12 = vadd.f32 %v5130_v61, %v3496_v39  ;;  %v5069_v60 = vadd.f32 %v5068_v22, %v5067_v62  ;;  %v5132_v2 = vpop.f32.mrf.mxu1 }
 0x1e3   :  { %v5133_v9 = vadd.f32 %v5132_v2, %v5131_v0  ;;  %v5150_v11 = vpop.f32.mrf.mxu0 }
 0x1e4   :  { %v3499_v59 = vadd.f32 %v5069_v60, %v7287_v6  ;;  %v5214_v29 = vpop.f32.mrf.mxu1 }
 0x1e5   :  { %v5151_v13 = vpop.f32.mrf.mxu0 }
 0x1e6   :  { %v7343_v26 = vadd.f32 %v5133_v9, %v3499_v59  ;;  %v5152_v15 = vadd.f32 %v5151_v13, %v5150_v11  ;;  %v5215_v42 = vpop.f32.mrf.mxu1 }
 0x1e7   :  { %v5216_v7 = vadd.f32 %v5215_v42, %v5214_v29  ;;  %v5153_v17 = vpop.f32.mrf.mxu0 }
 0x1e8   :  { %v3634_v36 = vadd.f32 %v5152_v15, %v7296_v24  ;;  %v5217_v4 = vpop.f32.mrf.mxu1 }
 0x1e9   :  { %v5154_v21 = vpop.f32.mrf.mxu0 }
 0x1ea   :  { %v7346_v23 = vadd.f32 %v5216_v7, %v3634_v36  ;;  %v5155_v45 = vadd.f32 %v5154_v21, %v5153_v17  ;;  %v5218_v1 = vpop.f32.mrf.mxu1 }
 0x1eb   :  { %v5219_v27 = vadd.f32 %v5218_v1, %v5217_v4  ;;  %v5156_v37 = vpop.f32.mrf.mxu0 }
 0x1ec   :  { %v3637_v6 = vadd.f32 %v5155_v45, %v7301_v5  ;;  %v5220_v58 = vpop.f32.mrf.mxu1 }
 0x1ed   :  { %v5157_v19 = vpop.f32.mrf.mxu0 }
 0x1ee   :  { %v7349_v16 = vadd.f32 %v5219_v27, %v3637_v6  ;;  %v5158_v34 = vadd.f32 %v5157_v19, %v5156_v37  ;;  %v5221_v38 = vpop.f32.mrf.mxu1 }
 0x1ef   :  { %v5222_v54 = vadd.f32 %v5221_v38, %v5220_v58  ;;  %v5159_v35 = vpop.f32.mrf.mxu0 }
 0x1f0   :  { %v3642_v24 = vadd.f32 %v5158_v34, %v7304_v31  ;;  %v5223_v40 = vpop.f32.mrf.mxu1 }
 0x1f1   :  { %v5160_v44 = vpop.f32.mrf.mxu0 }
 0x1f2   :  { %v7352_v53 = vadd.f32 %v5222_v54, %v3642_v24  ;;  %v5161_v28 = vadd.f32 %v5160_v44, %v5159_v35  ;;  %v5224_v3 = vpop.f32.mrf.mxu1 }
 0x1f3   :  { %v5225_v48 = vadd.f32 %v5224_v3, %v5223_v40  ;;  %v5162_v49 = vpop.f32.mrf.mxu0 }
 0x1f4   :  { %v3645_v5 = vadd.f32 %v5161_v28, %v7307_v25  ;;  %v5226_v30 = vpop.f32.mrf.mxu1 }
 0x1f5   :  { %v5163_v43 = vpop.f32.mrf.mxu0 }
 0x1f6   :  { %v7355_v50 = vadd.f32 %v5225_v48, %v3645_v5  ;;  %v5164_v8 = vadd.f32 %v5163_v43, %v5162_v49  ;;  %v5227_v63 = vpop.f32.mrf.mxu1 }
 0x1f7   :  { %v5228_v14 = vadd.f32 %v5227_v63, %v5226_v30  ;;  %v5165_v55 = vpop.f32.mrf.mxu0 }
 0x1f8   :  { %v3650_v31 = vadd.f32 %v5164_v8, %v7310_v20  ;;  %v5229_v47 = vpop.f32.mrf.mxu1 }
 0x1f9   :  { %v5166_v51 = vpop.f32.mrf.mxu0 }
 0x1fa   :  { %v7358_v61 = vadd.f32 %v5228_v14, %v3650_v31  ;;  %v5167_v62 = vadd.f32 %v5166_v51, %v5165_v55  ;;  %v5230_v39 = vpop.f32.mrf.mxu1 }
 0x1fb   :  { %v5231_v0 = vadd.f32 %v5230_v39, %v5229_v47  ;;  %v5168_v22 = vpop.f32.mrf.mxu0 }
 0x1fc   :  { %v3653_v25 = vadd.f32 %v5167_v62, %v7313_v41  ;;  %v5232_v60 = vpop.f32.mrf.mxu1 }
 0x1fd   :  { %v5169_v2 = vpop.f32.mrf.mxu0 }
 0x1fe   :  { %v7361_v9 = vadd.f32 %v5231_v0, %v3653_v25  ;;  %v5170_v11 = vadd.f32 %v5169_v2, %v5168_v22  ;;  %v5233_v59 = vpop.f32.mrf.mxu1 }
 0x1ff   :  { %v5234_v29 = vadd.f32 %v5233_v59, %v5232_v60  ;;  %v5171_v13 = vpop.f32.mrf.mxu0 }
 0x200   :  { %7543 = vst [vmem:[#allocation2_spill] sm:$0xff] %v7361_v9  ;;  %v3658_v20 = vadd.f32 %v5170_v11, %v7316_v52  ;;  %v5235_v15 = vpop.f32.mrf.mxu1 }
 0x201   :  { %v5172_v42 = vpop.f32.mrf.mxu0 }
 0x202   :  { %v7364_v7 = vadd.f32 %v5234_v29, %v3658_v20  ;;  %v5173_v17 = vadd.f32 %v5172_v42, %v5171_v13  ;;  %v5236_v36 = vpop.f32.mrf.mxu1 }
 0x203   :  { %v5237_v4 = vadd.f32 %v5236_v36, %v5235_v15  ;;  %v5174_v21 = vpop.f32.mrf.mxu0 }
 0x204   :  { %v3661_v41 = vadd.f32 %v5173_v17, %v7319_v46  ;;  %v5238_v45 = vpop.f32.mrf.mxu1 }
 0x205   :  { %v5175_v1 = vpop.f32.mrf.mxu0 }
 0x206   :  { %v7367_v27 = vadd.f32 %v5237_v4, %v3661_v41  ;;  %v5176_v37 = vadd.f32 %v5175_v1, %v5174_v21  ;;  %v5239_v6 = vpop.f32.mrf.mxu1 }
 0x207   :  { %v5240_v58 = vadd.f32 %v5239_v6, %v5238_v45  ;;  %v5177_v19 = vpop.f32.mrf.mxu0 }
 0x208   :  { %v3666_v52 = vadd.f32 %v5176_v37, %v7322_v56  ;;  %v5241_v34 = vpop.f32.mrf.mxu1 }
 0x209   :  { %v5178_v38 = vpop.f32.mrf.mxu0 }
 0x20a   :  { %v7370_v54 = vadd.f32 %v5240_v58, %v3666_v52  ;;  %v5179_v35 = vadd.f32 %v5178_v38, %v5177_v19  ;;  %v5242_v24 = vpop.f32.mrf.mxu1 }
 0x20b   :  { %v5243_v40 = vadd.f32 %v5242_v24, %v5241_v34  ;;  %v5180_v44 = vpop.f32.mrf.mxu0 }
 0x20c   :  { %v3669_v46 = vadd.f32 %v5179_v35, %v7325_v18  ;;  %v5244_v28 = vpop.f32.mrf.mxu1 }
 0x20d   :  { %v5181_v3 = vpop.f32.mrf.mxu0 }
 0x20e   :  { %v7373_v48 = vadd.f32 %v5243_v40, %v3669_v46  ;;  %v5182_v49 = vadd.f32 %v5181_v3, %v5180_v44  ;;  %v5245_v5 = vpop.f32.mrf.mxu1 }
 0x20f   :  { %v5246_v30 = vadd.f32 %v5245_v5, %v5244_v28  ;;  %v5183_v43 = vpop.f32.mrf.mxu0 }
 0x210   :  { %7544 = vst [vmem:[#allocation3_spill] sm:$0xff] %v7373_v48  ;;  %v3674_v56 = vadd.f32 %v5182_v49, %v7328_v33  ;;  %v5247_v8 = vpop.f32.mrf.mxu1 }
 0x211   :  { %v5184_v63 = vpop.f32.mrf.mxu0 }
 0x212   :  { %v7376_v14 = vadd.f32 %v5246_v30, %v3674_v56  ;;  %v5185_v55 = vadd.f32 %v5184_v63, %v5183_v43  ;;  %v5248_v31 = vpop.f32.mrf.mxu1 }
 0x213   :  { %v5249_v47 = vadd.f32 %v5248_v31, %v5247_v8  ;;  %v5186_v51 = vpop.f32.mrf.mxu0 }
 0x214   :  { %v3677_v18 = vadd.f32 %v5185_v55, %v7331_v10  ;;  %v5250_v62 = vpop.f32.mrf.mxu1 }
 0x215   :  { %v5187_v39 = vpop.f32.mrf.mxu0 }
 0x216   :  { %v7379_v0 = vadd.f32 %v5249_v47, %v3677_v18  ;;  %v5188_v22 = vadd.f32 %v5187_v39, %v5186_v51  ;;  %v5251_v25 = vpop.f32.mrf.mxu1 }
 0x217   :  { %v5252_v60 = vadd.f32 %v5251_v25, %v5250_v62  ;;  %v5189_v2 = vpop.f32.mrf.mxu0 }
 0x218   :  { %7545 = vst [vmem:[#allocation4_spill] sm:$0xff] %v7379_v0  ;;  %v3682_v33 = vadd.f32 %v5188_v22, %v7334_v32  ;;  %v5253_v11 = vpop.f32.mrf.mxu1 }
 0x219   :  { %v5190_v59 = vpop.f32.mrf.mxu0 }
 0x21a   :  { %v7382_v29 = vadd.f32 %v5252_v60, %v3682_v33  ;;  %v5191_v13 = vadd.f32 %v5190_v59, %v5189_v2  ;;  %v5254_v20 = vpop.f32.mrf.mxu1 }
 0x21b   :  { %v5255_v15 = vadd.f32 %v5254_v20, %v5253_v11  ;;  %v5192_v42 = vpop.f32.mrf.mxu0 }
 0x21c   :  { %7546 = vst [vmem:[#allocation5_spill] sm:$0xff] %v7382_v29  ;;  %v3685_v10 = vadd.f32 %v5191_v13, %v7337_v57  ;;  %v5256_v17 = vpop.f32.mrf.mxu1 }
 0x21d   :  { %v5193_v36 = vpop.f32.mrf.mxu0 }
 0x21e   :  { %v7385_v4 = vadd.f32 %v5255_v15, %v3685_v10  ;;  %v5194_v21 = vadd.f32 %v5193_v36, %v5192_v42  ;;  %v5257_v41 = vpop.f32.mrf.mxu1 }
 0x21f   :  { %v5258_v45 = vadd.f32 %v5257_v41, %v5256_v17  ;;  %v5195_v1 = vpop.f32.mrf.mxu0 }
 0x220   :  { %7547 = vst [vmem:[#allocation6_spill] sm:$0xff] %v7385_v4  ;;  %v3690_v32 = vadd.f32 %v5194_v21, %v7340_v12  ;;  %v5259_v37 = vpop.f32.mrf.mxu1 }
 0x221   :  { %v5196_v6 = vpop.f32.mrf.mxu0 }
 0x222   :  { %v7388_v58 = vadd.f32 %v5258_v45, %v3690_v32  ;;  %v5197_v19 = vadd.f32 %v5196_v6, %v5195_v1  ;;  %v5260_v52 = vpop.f32.mrf.mxu1 }
 0x223   :  { %v5261_v34 = vadd.f32 %v5260_v52, %v5259_v37  ;;  %v5278_v38 = vpop.f32.mrf.mxu0 }
 0x224   :  { %7548 = vst [vmem:[#allocation7_spill] sm:$0xff] %v7388_v58  ;;  %v3693_v57 = vadd.f32 %v5197_v19, %v7343_v26  ;;  %v5342_v35 = vpop.f32.mrf.mxu1 }
 0x225   :  { %v5279_v24 = vpop.f32.mrf.mxu0 }
 0x226   :  { %v7391_v40 = vadd.f32 %v5261_v34, %v3693_v57  ;;  %v5343_v44 = vpop.f32.mrf.mxu1  ;;  %v5280_v29 = vadd.f32 %v5279_v24, %v5278_v38 }
 0x227   :  { %v5281_v46 = vpop.f32.mrf.mxu0  ;;  %v5344_v0 = vadd.f32 %v5343_v44, %v5342_v35 }
 0x228   :  { %7549 = vst [vmem:[#allocation8_spill] sm:$0xff] %v7391_v40  ;;  %v5345_v28 = vpop.f32.mrf.mxu1 }
 0x229   :  { %v5282_v3 = vpop.f32.mrf.mxu0 }
 0x22a   :  { %v5346_v49 = vpop.f32.mrf.mxu1  ;;  %v5283_v9 = vadd.f32 %v5282_v3, %v5281_v46 }
 0x22b   :  { %v5284_v12 = vpop.f32.mrf.mxu0  ;;  %v5347_v24 = vadd.f32 %v5346_v49, %v5345_v28 }
 0x22c   :  { %v5348_v5 = vpop.f32.mrf.mxu1  ;;  %v3831_v48 = vadd.f32 %v5283_v9, %v7349_v16 }
 0x22d   :  { %v5285_v30 = vpop.f32.mrf.mxu0 }
 0x22e   :  { %v5349_v43 = vpop.f32.mrf.mxu1  ;;  %v3928_v28 = vadd.f32 %v5347_v24, %v3831_v48 }
 0x22f   :  { %v5287_v56 = vpop.f32.mrf.mxu0 }
 0x230   :  { %v5351_v8 = vpop.f32.mrf.mxu1 }
 0x231   :  { %v5288_v63 = vpop.f32.mrf.mxu0 }
 0x232   :  { %v5352_v55 = vpop.f32.mrf.mxu1 }
 0x233   :  { %v5290_v31 = vpop.f32.mrf.mxu0 }
 0x234   :  { %v5354_v47 = vpop.f32.mrf.mxu1 }
 0x235   :  { %v5291_v26 = vpop.f32.mrf.mxu0 }
 0x236   :  { %v5355_v51 = vpop.f32.mrf.mxu1 }
 0x237   :  { %v7393_v18 = vpop.f32.mrf.mxu0 }
 0x238   :  { %v7395_v62 = vpop.f32.mrf.mxu1 }
 0x239   :  { %v5294_v39 = vpop.f32.mrf.mxu0 }
 0x23a   :  { %v7397_v22 = vpop.f32.mrf.mxu1 }
 0x23b   :  { %v5296_v25 = vpop.f32.mrf.mxu0 }
 0x23c   :  { %v7399_v60 = vpop.f32.mrf.mxu1 }
 0x23d   :  { %7550 = vst [vmem:[#allocation9_spill] sm:$0xff] %v7399_v60  ;;  %v5297_v2 = vpop.f32.mrf.mxu0  ;;  %v3828_v60 = vadd.f32 %v5280_v29, %v7346_v23  ;;  %v5353_v23 = vadd.f32 %v5352_v55, %v5351_v8  ;;  %v5356_v29 = vadd.f32 %v5355_v51, %v5354_v47  ;;  %v7438_v8 = vadd.f32 %v7397_v22, %v7395_v62 }
 0x23e   :  { %v7401_v33 = vpop.f32.mrf.mxu1 }
 0x23f   :  { %7551 = vst [vmem:[#allocation10_spill] sm:$0xff] %v7401_v33  ;;  %v5299_v11 = vpop.f32.mrf.mxu0 }
 0x240   :  { %v7403_v59 = vpop.f32.mrf.mxu1 }
 0x241   :  { %7552 = vst [vmem:[#allocation11_spill] sm:$0xff] %v7403_v59  ;;  %v5300_v13 = vpop.f32.mrf.mxu0 }
 0x242   :  { %v7405_v20 = vpop.f32.mrf.mxu1 }
 0x243   :  { %7553 = vst [vmem:[#allocation12_spill] sm:$0xff] %v7405_v20  ;;  %v5302_v15 = vpop.f32.mrf.mxu0  ;;  %v5292_v20 = vadd.f32 %v5291_v26, %v5290_v31  ;;  %v5301_v31 = vadd.f32 %v5300_v13, %v5299_v11 }
 0x244   :  { %v7407_v42 = vpop.f32.mrf.mxu1 }
 0x245   :  { %7554 = vst [vmem:[#allocation13_spill] sm:$0xff] %v7407_v42  ;;  %v5303_v10 = vpop.f32.mrf.mxu0  ;;  %v3844_v3 = vadd.f32 %v5292_v20, %v7358_v61  ;;  %v3855_v47 = vadd.f32 %v5301_v31, %v7367_v27 }
 0x246   :  { %v7409_v17 = vpop.f32.mrf.mxu1  ;;  %v5304_v26 = vadd.f32 %v5303_v10, %v5302_v15  ;;  %v7563_v11 = vld [vmem:[#allocation10_spill] sm:$0xff] }
 0x247   :  { %7555 = vst [vmem:[#allocation14_spill] sm:$0xff] %v7409_v17  ;;  %v5305_v36 = vpop.f32.mrf.mxu0  ;;  %v5286_v17 = vadd.f32 %v5285_v30, %v5284_v12 }
 0x248   :  { %v7411_v21 = vpop.f32.mrf.mxu1  ;;  %v7564_v62 = vld [vmem:[#allocation11_spill] sm:$0xff] }
 0x249   :  { %7556 = vst [vmem:[#allocation15_spill] sm:$0xff] %v7411_v21  ;;  %v5306_v41 = vpop.f32.mrf.mxu0  ;;  %v5289_v21 = vadd.f32 %v5288_v63, %v5287_v56  ;;  %v5350_v56 = vadd.f32 %v5349_v43, %v5348_v5  ;;  %v5298_v63 = vadd.f32 %v5297_v2, %v5296_v25  ;;  %v7434_v43 = vadd.f32 %v5356_v29, %v3844_v3  ;;  %v7562_v2 = vld [vmem:[#allocation9_spill] sm:$0xff]  ;;  %v7573_v29 = vld [vmem:[#allocation7_spill] sm:$0xff] }
 0x24a   :  { %v7413_v45 = vpop.f32.mrf.mxu1  ;;  %v5307_v35 = vadd.f32 %v5306_v41, %v5305_v36  ;;  %v5362_v13 = vadd.f32 %v7563_v11, %v7562_v2  ;;  %v7565_v22 = vld [vmem:[#allocation12_spill] sm:$0xff]  ;;  %v7568_v36 = vld [vmem:[#allocation2_spill] sm:$0xff]  ;;  %v7571_v3 = vld [vmem:[#allocation5_spill] sm:$0xff] }
 0x24b   :  { %7557 = vst [vmem:[#allocation16_spill] sm:$0xff] %v7413_v45  ;;  %v5308_v1 = vpop.f32.mrf.mxu0  ;;  %v3839_v46 = vadd.f32 %v5289_v21, %v7355_v50  ;;  %v5295_v50 = vadd.f32 %v5294_v39, %v7393_v18  ;;  %v3852_v55 = vadd.f32 %v5298_v63, %v7364_v7  ;;  %v7561_v18 = vld [vmem:[#allocation4_spill] sm:$0xff]  ;;  %v5365_v20 = vadd.f32 %v7565_v22, %v7564_v62  ;;  %v7575_v22 = vld [vmem:[#allocation6_spill] sm:$0xff] }
 0x24c   :  { %v5372_v32 = vpop.f32.mrf.mxu1  ;;  %v7566_v7 = vld [vmem:[#allocation13_spill] sm:$0xff] }
 0x24d   :  { %v5309_v37 = vpop.f32.mrf.mxu0  ;;  %v3936_v5 = vadd.f32 %v5353_v23, %v3839_v46  ;;  %v7454_v21 = vadd.f32 %v5295_v50, %v7568_v36  ;;  %v3949_v24 = vadd.f32 %v5362_v13, %v3852_v55  ;;  %v7458_v46 = vadd.f32 %v5365_v20, %v3855_v47 }
 0x24e   :  { %v5373_v6 = vpop.f32.mrf.mxu1  ;;  %v5310_v12 = vadd.f32 %v5309_v37, %v5308_v1  ;;  %v7567_v15 = vld [vmem:[#allocation14_spill] sm:$0xff] }
 0x24f   :  { %v5311_v19 = vpop.f32.mrf.mxu0  ;;  %v5368_v27 = vadd.f32 %v7567_v15, %v7566_v7 }
 0x250   :  { %v5375_v52 = vpop.f32.mrf.mxu1  ;;  %v3868_v61 = vadd.f32 %v5310_v12, %v7376_v14  ;;  %v5374_v14 = vadd.f32 %v5373_v6, %v5372_v32  ;;  %v7569_v41 = vld [vmem:[#allocation15_spill] sm:$0xff] }
 0x251   :  { %v5312_v34 = vpop.f32.mrf.mxu0 }
 0x252   :  { %v5376_v57 = vpop.f32.mrf.mxu1  ;;  %v5313_v16 = vadd.f32 %v5312_v34, %v5311_v19  ;;  %v7570_v1 = vld [vmem:[#allocation16_spill] sm:$0xff] }
 0x253   :  { %v5314_v4 = vpop.f32.mrf.mxu0  ;;  %v5371_v32 = vadd.f32 %v7570_v1, %v7569_v41  ;;  %v5377_v37 = vadd.f32 %v5376_v57, %v5375_v52 }
 0x254   :  { %v7415_v40 = vpop.f32.mrf.mxu1  ;;  %v3871_v39 = vadd.f32 %v5313_v16, %v7561_v18 }
 0x255   :  { %7558 = vst [vmem:[#allocation17_spill] sm:$0xff] %v7415_v40  ;;  %v5315_v58 = vpop.f32.mrf.mxu0  ;;  %v3836_v40 = vadd.f32 %v5286_v17, %v7352_v53  ;;  %v3925_v17 = vadd.f32 %v5344_v0, %v3828_v60  ;;  %v3860_v0 = vadd.f32 %v5304_v26, %v7370_v54 }
 0x256   :  { %v7417_v42 = vpop.f32.mrf.mxu1  ;;  %v5316_v25 = vadd.f32 %v5315_v58, %v5314_v4  ;;  %v3965_v58 = vadd.f32 %v5374_v14, %v3868_v61  ;;  %v3968_v63 = vadd.f32 %v5377_v37, %v3871_v39 }
 0x257   :  { %v7419_v45 = vpop.f32.mrf.mxu0  ;;  %v3933_v44 = vadd.f32 %v5350_v56, %v3836_v40  ;;  %v7560_v40 = vld [vmem:[#allocation3_spill] sm:$0xff]  ;;  %v3957_v34 = vadd.f32 %v5368_v27, %v3860_v0 }
 0x258   :  { %v7421_v59 = vpop.f32.mrf.mxu1  ;;  %v3863_v51 = vadd.f32 %v5307_v35, %v7560_v40  ;;  %v3876_v12 = vadd.f32 %v5316_v25, %v7571_v3 }
 0x259   :  { %7559 = vst [vmem:[#allocation18_spill] sm:$0xff] %v7421_v59  ;;  %v7423_v33 = vpop.f32.mrf.mxu0 }
 0x25a   :  { %v7428_v38 = vpop.f32.mrf.mxu1  ;;  %v3960_v31 = vadd.f32 %v5371_v32, %v3863_v51 }
 0x25b   :  { %v5320_v30 = vpop.f32.mrf.mxu0 }
 0x25c   :  { %v5384_v59 = vpop.f32.mrf.mxu1  ;;  %v7572_v26 = vld [vmem:[#allocation17_spill] sm:$0xff] }
 0x25d   :  { %v5321_v9 = vpop.f32.mrf.mxu0  ;;  %v5380_v23 = vadd.f32 %v7417_v42, %v7572_v26 }
 0x25e   :  { %v5385_v53 = vpop.f32.mrf.mxu1  ;;  %v5322_v10 = vadd.f32 %v5321_v9, %v5320_v30  ;;  %v5319_v9 = vadd.f32 %v7423_v33, %v7419_v45 }
 0x25f   :  { %v5323_v49 = vpop.f32.mrf.mxu0  ;;  %v5386_v47 = vadd.f32 %v5385_v53, %v5384_v59  ;;  %v3973_v2 = vadd.f32 %v5380_v23, %v3876_v12  ;;  %v7574_v59 = vld [vmem:[#allocation8_spill] sm:$0xff] }
 0x260   :  { %v7443_v48 = vpop.f32.mrf.mxu1  ;;  %v3884_v35 = vadd.f32 %v5322_v10, %v7573_v29  ;;  %v3879_v20 = vadd.f32 %v5319_v9, %v7575_v22  ;;  %v7576_v37 = vld [vmem:[#allocation18_spill] sm:$0xff] }
 0x261   :  { %v5324_v60 = vpop.f32.mrf.mxu0 }
 0x262   :  { %v5388_v54 = vpop.f32.mrf.mxu1 }
 0x263   :  { %v5412_v4 = vpop.f32.mrf.mxu0  ;;  %v5389_v10 = vadd.f32 %v5388_v54, %v7443_v48 }
 0x264   :  { %v4030_v6 = vadd.f32 %v5412_v4, %v3933_v44  ;;  %v5420_v19 = vpop.f32.mrf.mxu1  ;;  %v5325_v44 = vadd.f32 %v5324_v60, %v5323_v49  ;;  %v3981_v60 = vadd.f32 %v5386_v47, %v3884_v35  ;;  %v5383_v4 = vadd.f32 %v7428_v38, %v7576_v37 }
 0x265   :  { %v4062_v56 = vadd.f32 %v5420_v19, %v3965_v58  ;;  %v4021_v30 = vpop.f32.mrf.mxu0 }
 0x266   :  { %v4086_v52 = vmax.f32 %v4030_v6, 0.0  ;;  %v4022_v57 = vadd.f32 %v4021_v30, %v3925_v17  ;;  %v4053_v16 = vpop.f32.mrf.mxu1  ;;  %v3887_v53 = vadd.f32 %v5325_v44, %v7574_v59  ;;  %v3976_v35 = vadd.f32 %v5383_v4, %v3879_v20 }
 0x267   :  { %v4094_v50 = vmax.f32 %v4062_v56, 0.0  ;;  %v4054_v61 = vadd.f32 %v4053_v16, %v3957_v34  ;;  %v5413_v55 = vpop.f32.mrf.mxu0 }
 0x268   :  { %v4608_v0 = vpack.c.bf16 %v4086_v52, %v4086_v52  ;;  %v4084_v40 = vmax.f32 %v4022_v57, 0.0  ;;  %v4033_v14 = vadd.f32 %v5413_v55, %v3936_v5  ;;  %v5421_v51 = vpop.f32.mrf.mxu1  ;;  %v3984_v38 = vadd.f32 %v5389_v10, %v3887_v53 }
 0x269   :  { %v4616_v18 = vpack.c.bf16 %v4094_v50, %v4094_v50  ;;  %v4092_v39 = vmax.f32 %v4054_v61, 0.0  ;;  %v4065_v42 = vadd.f32 %v5421_v51, %v3968_v63  ;;  %v4024_v25 = vpop.f32.mrf.mxu0  ;;  %v3944_v63 = vadd.f32 %v7438_v8, %v7454_v21 }
 0x26a   :  { %4167 = vst.msk [vmem:[%s7542_s3 + $0x8] sm:$0xf] %vm4164_vm1, %v4608_v0  ;;  %v4606_v33 = vpack.c.bf16 %v4084_v40, %v4084_v40  ;;  %v4087_v45 = vmax.f32 %v4033_v14, 0.0  ;;  %v4025_v17 = vadd.f32 %v4024_v25, %v3928_v28  ;;  %v4056_v49 = vpop.f32.mrf.mxu1 }
 0x26b   :  { %4175 = vst.msk [vmem:[%s7542_s3 + $0x28] sm:$0xf] %vm4164_vm1, %v4616_v18  ;;  %v4614_v5 = vpack.c.bf16 %v4092_v39, %v4092_v39  ;;  %v4095_v11 = vmax.f32 %v4065_v42, 0.0  ;;  %v4057_v13 = vadd.f32 %v4056_v49, %v3960_v31  ;;  %v5416_v62 = vpop.f32.mrf.mxu0 }
 0x26c   :  { %4165 = vst.msk [vmem:[%s7542_s3] sm:$0xf] %vm4164_vm1, %v4606_v33  ;;  %v4609_v28 = vpack.c.bf16 %v4087_v45, %v4087_v45  ;;  %v4085_v7 = vmax.f32 %v4025_v17, 0.0  ;;  %v4046_v15 = vadd.f32 %v5416_v62, %v3949_v24  ;;  %v5424_v27 = vpop.f32.mrf.mxu1 }
 0x26d   :  { %4173 = vst.msk [vmem:[%s7542_s3 + $0x20] sm:$0xf] %vm4164_vm1, %v4614_v5  ;;  %v4617_v36 = vpack.c.bf16 %v4095_v11, %v4095_v11  ;;  %v4093_v41 = vmax.f32 %v4057_v13, 0.0  ;;  %v4078_v1 = vadd.f32 %v5424_v27, %v3981_v60  ;;  %v4037_v32 = vpop.f32.mrf.mxu0 }
 0x26e   :  { %4168 = vst.msk [vmem:[%s7542_s3 + $0xc] sm:$0xf] %vm4164_vm1, %v4609_v28  ;;  %v4607_v58 = vpack.c.bf16 %v4085_v7, %v4085_v7  ;;  %v4090_v6 = vmax.f32 %v4046_v15, 0.0  ;;  %v4038_v48 = vadd.f32 %v4037_v32, %v7434_v43  ;;  %v4069_v54 = vpop.f32.mrf.mxu1 }
 0x26f   :  { %4176 = vst.msk [vmem:[%s7542_s3 + $0x2c] sm:$0xf] %vm4164_vm1, %v4617_v36  ;;  %v4615_v19 = vpack.c.bf16 %v4093_v41, %v4093_v41  ;;  %v4098_v34 = vmax.f32 %v4078_v1, 0.0  ;;  %v4070_v24 = vadd.f32 %v4069_v54, %v3973_v2  ;;  %v5417_v3 = vpop.f32.mrf.mxu0 }
 0x270   :  { %4166 = vst.msk [vmem:[%s7542_s3 + $0x4] sm:$0xf] %vm4164_vm1, %v4607_v58  ;;  %v4612_v12 = vpack.c.bf16 %v4090_v6, %v4090_v6  ;;  %v4088_v56 = vmax.f32 %v4038_v48, 0.0  ;;  %v4049_v43 = vadd.f32 %v5417_v3, %v7458_v46  ;;  %v5425_v30 = vpop.f32.mrf.mxu1 }
 0x271   :  { %4174 = vst.msk [vmem:[%s7542_s3 + $0x24] sm:$0xf] %vm4164_vm1, %v4615_v19  ;;  %v4620_v31 = vpack.c.bf16 %v4098_v34, %v4098_v34  ;;  %v4096_v26 = vmax.f32 %v4070_v24, 0.0  ;;  %v4081_v23 = vadd.f32 %v5425_v30, %v3984_v38  ;;  %v4040_v29 = vpop.f32.mrf.mxu0 }
 0x272   :  { %4171 = vst.msk [vmem:[%s7542_s3 + $0x18] sm:$0xf] %vm4164_vm1, %v4612_v12  ;;  %v4610_v46 = vpack.c.bf16 %v4088_v56, %v4088_v56  ;;  %v4091_v52 = vmax.f32 %v4049_v43, 0.0  ;;  %v4041_v57 = vadd.f32 %v4040_v29, %v3944_v63  ;;  %v4072_v16 = vpop.f32.mrf.mxu1 }
 0x273   :  { %4179 = vst.msk [vmem:[%s7542_s3 + $0x38] sm:$0xf] %vm4164_vm1, %v4620_v31  ;;  %v4618_v8 = vpack.c.bf16 %v4096_v26, %v4096_v26  ;;  %v4099_v21 = vmax.f32 %v4081_v23, 0.0  ;;  %v4073_v9 = vadd.f32 %v4072_v16, %v3976_v35 }
 0x274   :  { %4169 = vst.msk [vmem:[%s7542_s3 + $0x10] sm:$0xf] %vm4164_vm1, %v4610_v46  ;;  %v4613_v44 = vpack.c.bf16 %v4091_v52, %v4091_v52  ;;  %v4089_v50 = vmax.f32 %v4041_v57, 0.0 }
 0x275   :  { %4177 = vst.msk [vmem:[%s7542_s3 + $0x30] sm:$0xf] %vm4164_vm1, %v4618_v8  ;;  %v4621_v61 = vpack.c.bf16 %v4099_v21, %v4099_v21  ;;  %v4097_v55 = vmax.f32 %v4073_v9, 0.0 }
 0x276   :  { %4172 = vst.msk [vmem:[%s7542_s3 + $0x1c] sm:$0xf] %vm4164_vm1, %v4613_v44  ;;  %v4611_v47 = vpack.c.bf16 %v4089_v50, %v4089_v50 }
 0x277   :  { %4180 = vst.msk [vmem:[%s7542_s3 + $0x3c] sm:$0xf] %vm4164_vm1, %v4621_v61  ;;  %v4619_v0 = vpack.c.bf16 %v4097_v55, %v4097_v55 }
 0x278   :  { %4170 = vst.msk [vmem:[%s7542_s3 + $0x14] sm:$0xf] %vm4164_vm1, %v4611_v47 }
 0x279   :  { %4178 = vst.msk [vmem:[%s7542_s3 + $0x34] sm:$0xf] %vm4164_vm1, %v4619_v0 }

// kernel: cmptrans512_forward.19
= control target key start
LH: loop header
LB: loop body
LE: loop exit
PB: predicated region body
PF: predicated region fallthrough
CT: control target
= control target key end

     0   :  { %s1726_s12 = smov 0   ;;  %s1728_s13 = smov 0   ;;  %s2043_s0 = inlined_call_operand.vmem [shape: bf16[2,1,24,384], index: 0, kind: input, shape index: {}]   ;;  %s2044_s1 = inlined_call_operand.vmem [shape: bf16[3,384,64], index: 1, kind: input, shape index: {}]   ;;  %s2045_s2 = inlined_call_operand.vmem [shape: f32[1,64], index: 2, kind: input, shape index: {}]   ;;  %s2046_s3 = inlined_call_operand.vmem [shape: bf16[2,16,64], index: 3, kind: output, shape index: {}]  }
   0x1   :  { %s1730_s14 = smov 0  }
   0x2 LB: > { %s25_s15 = sadd.s32 1, %s1698_s13  ;;  %p1224_p0 = scmp.ge.s32.totalorder %s1702_s14, 1  ;;  %s1702_s14 = sphi %s1730_s14, %s13_s14   ;;  %s1698_s13 = sphi %s1728_s13, %s2048_s13   ;;  %s1694_s12 = sphi %s1726_s12, %s2047_s12  }
   0x3   : > { %p27_p1 = scmp.ge.s32.totalorder %s25_s15, 2  ;;  %p157_p2 = scmp.lt.s32.totalorder %s1702_s14, 3 }
   0x5   : > { %s2050_s15 = smov (%p27_p1, %s25_s15), 0  ;;  %p158_p3 = pnand %p1224_p0, %p157_p2 }
   0x6   : > { %p189_p4 = scmp.lt.s32.totalorder (!%p158_p3), %s1694_s12, 1 }
   0x7   : > { %161 = sbr.rel (%p158_p3) target bundleno = 322 (0x142), region = 32 }
   0xc   : > { %v1596_v0 = vld [vmem:[%s2044_s1 + $0x138] sm:$0xff]   ;;  %v1704_v1 = vmov 0.0   ;;  %vm1705_vm0 = vmmov 0   ;;  %v1599_v4 = vld [vmem:[%s2044_s1 + $0x130] sm:$0xff]   ;;  %v1602_v7 = vld [vmem:[%s2044_s1 + $0x128] sm:$0xff]   ;;  %s2052_s12 = smov (!%p189_p4, %s1694_s12), 1 }
   0xd   : > { %1509 = vmatprep.subr.bf16.mxu1 %v1704_v1  ;;  %v1597_v2 = vld [vmem:[%s2044_s1 + $0x178] sm:$0xff]   ;;  %1416 = vmatprep.subr.bf16.mxu0 %v1596_v0  ;;  %v1600_v5 = vld [vmem:[%s2044_s1 + $0x170] sm:$0xff]   ;;  %v1603_v8 = vld [vmem:[%s2044_s1 + $0x168] sm:$0xff]   ;;  %s1569_s25 = smul.u32 36, %s2052_s12  ;;  %vm337_vm1 = vcmask 1045504   ;;  %s1413_s4 = sshll.u32 %s2052_s12, 3 }
   0xe   : > { %v1598_v3 = vld [vmem:[%s2044_s1 + $0xf8] sm:$0xff]   ;;  %1525 = vmatprep.mubr.msk.bf16.mxu1 %vm1705_vm0, %v1704_v1  ;;  %1510 = vmatpush3.bf16.msra.mxu1 %v1597_v2  ;;  %v1601_v6 = vld [vmem:[%s2044_s1 + $0xf0] sm:$0xff]   ;;  %v1604_v9 = vld [vmem:[%s2044_s1 + $0xe8] sm:$0xff]   ;;  %s206_s7 = scalar_lea.vmem %s2046_s3, %s1413_s4  ;;  %vm1127_vm2 = vcmask 519168  }
   0xf   : > { %1417 = vmatpush3.bf16.msra.mxu0 %v1598_v3  ;;  %1511 = vmatprep.subr.bf16.mxu1 %v1704_v1  ;;  %v1605_v10 = vld [vmem:[%s2044_s1 + $0x120] sm:$0xff]   ;;  %v1608_v13 = vld [vmem:[%s2044_s1 + $0x118] sm:$0xff]   ;;  %v1611_v16 = vld [vmem:[%s2044_s1 + $0x110] sm:$0xff]   ;;  %s1822_s9 = scalar_lea.vmem %s2043_s0, %s1569_s25 }
  0x10   : > { %1418 = vmatprep.subr.bf16.mxu0 %v1599_v4  ;;  %v1606_v11 = vld [vmem:[%s2044_s1 + $0x160] sm:$0xff]   ;;  %v1609_v14 = vld [vmem:[%s2044_s1 + $0x158] sm:$0xff]   ;;  %v1612_v17 = vld [vmem:[%s2044_s1 + $0x150] sm:$0xff]  }
  0x11   : > { %v1607_v12 = vld [vmem:[%s2044_s1 + $0xe0] sm:$0xff]   ;;  %v1610_v15 = vld [vmem:[%s2044_s1 + $0xd8] sm:$0xff]   ;;  %v1613_v18 = vld [vmem:[%s2044_s1 + $0xd0] sm:$0xff]  }
  0x12   : > { %1512 = vmatpush3.bf16.msra.mxu1 %v1600_v5  ;;  %v1614_v19 = vld [vmem:[%s2044_s1 + $0x108] sm:$0xff]   ;;  %v1617_v22 = vld [vmem:[%s2044_s1 + $0x100] sm:$0xff]   ;;  %v265_v25 = vld [vmem:[%s1822_s9 + $0x18] sm:$0x33] }
  0x13   : > { %1419 = vmatpush3.bf16.msra.mxu0 %v1601_v6  ;;  %1513 = vmatprep.subr.bf16.mxu1 %v1704_v1  ;;  %v1615_v20 = vld [vmem:[%s2044_s1 + $0x148] sm:$0xff]   ;;  %v261_v23 = vld [vmem:[%s1822_s9] sm:$0xcc]  ;;  %v1280_v28 = vcombine.high %v265_v25, %v265_v25  ;;  %v1842_v30 = vld [vmem:[%s1822_s9 + $0x14] sm:$0xf]  ;;  %v1279_v32 = vcombine.low %v265_v25, %v265_v25 }
  0x14   : > { %1420 = vmatprep.subr.bf16.mxu0 %v1602_v7  ;;  %v1616_v21 = vld [vmem:[%s2044_s1 + $0xc8] sm:$0xff]   ;;  %v1618_v26 = vld [vmem:[%s2044_s1 + $0x140] sm:$0xff]   ;;  %v1626_v43 = vld [vmem:[%s2044_s1 + $0x78] sm:$0xff]  }
  0x15   : > { %v1833_v24 = vld [vmem:[%s1822_s9 + $0xc] sm:$0xff]  ;;  %v262_v29 = vld [vmem:[%s1822_s9 + $0x8] sm:$0xc]  ;;  %v1619_v33 = vld [vmem:[%s2044_s1 + $0xc0] sm:$0xff]   ;;  %v342_v37 = vrot.slane %v1280_v28, 2  ;;  %v339_v39 = vrot.slane %v1279_v32, 2 }
  0x16   : > { %1514 = vmatpush3.bf16.msra.mxu1 %v1603_v8  ;;  %v1277_v27 = vcombine.high %v261_v23, %v1833_v24  ;;  %v1276_v31 = vcombine.low %v261_v23, %v1833_v24  ;;  %v1278_v34 = vcombine.low %v262_v29, %v1842_v30  ;;  %v1623_v35 = vld [vmem:[%s1822_s9 + $0x20] ss:$0 sps:$4 sm:$0x33]   ;;  %v1627_v45 = vld [vmem:[%s2044_s1 + $0xb8] sm:$0xff]   ;;  %v1629_v48 = vld [vmem:[%s2044_s1 + $0x70] sm:$0xff]  }
  0x17   : > { %1421 = vmatpush3.bf16.msra.mxu0 %v1604_v9  ;;  %1515 = vmatprep.subr.bf16.mxu1 %v1704_v1  ;;  %v345_v41 = vrot.slane %v1623_v35, 2  ;;  %v1628_v47 = vld [vmem:[%s2044_s1 + $0x38] sm:$0xff]   ;;  %v1630_v49 = vld [vmem:[%s2044_s1 + $0xb0] sm:$0xff]   ;;  %v1632_v51 = vld [vmem:[%s2044_s1 + $0x68] sm:$0xff]  }
  0x18   : > { %1422 = vmatprep.subr.bf16.mxu0 %v1605_v10  ;;  %v341_v36 = vrot.slane %v1277_v27, 2  ;;  %v338_v38 = vrot.slane %v1276_v31, 2  ;;  %v344_v40 = vrot.slane %v1278_v34, 2  ;;  %v1631_v50 = vld [vmem:[%s2044_s1 + $0x30] sm:$0xff]   ;;  %v1633_v52 = vld [vmem:[%s2044_s1 + $0xa8] sm:$0xff]   ;;  %v1635_v54 = vld [vmem:[%s2044_s1 + $0x60] sm:$0xff]  }
  0x19   : > { %v1634_v53 = vld [vmem:[%s2044_s1 + $0x28] sm:$0xff]   ;;  %v1636_v55 = vld [vmem:[%s2044_s1 + $0xa0] sm:$0xff]   ;;  %v1638_v57 = vld [vmem:[%s2044_s1 + $0x58] sm:$0xff]  }
  0x1a   : > { %1516 = vmatpush3.bf16.msra.mxu1 %v1606_v11  ;;  %v343_v42 = vsel %vm337_vm1, %v341_v36, %v342_v37  ;;  %v346_v44 = vsel %vm337_vm1, %v344_v40, %v345_v41  ;;  %v340_v46 = vsel %vm337_vm1, %v338_v38, %v339_v39  ;;  %v1637_v56 = vld [vmem:[%s2044_s1 + $0x20] sm:$0xff]   ;;  %v1639_v58 = vld [vmem:[%s2044_s1 + $0x98] sm:$0xff]   ;;  %v1641_v60 = vld [vmem:[%s2044_s1 + $0x50] sm:$0xff]  }
  0x1b   : > { %1423 = vmatpush3.bf16.msra.mxu0 %v1607_v12  ;;  %1517 = vmatprep.subr.bf16.mxu1 %v1704_v1  ;;  %v1640_v59 = vld [vmem:[%s2044_s1 + $0x18] sm:$0xff]   ;;  %v1642_v61 = vld [vmem:[%s2044_s1 + $0x90] sm:$0xff]   ;;  %v209_v62 = vld [vmem:[%s1822_s9] sm:$0xff] }
  0x1c   : > { %1424 = vmatprep.subr.bf16.mxu0 %v1608_v13  ;;  %526 = vmatprep.mubr.bf16.mxu0 %v343_v42  ;;  %v1643_v63 = vld [vmem:[%s2044_s1 + $0x10] sm:$0xff]   ;;  %v1307_v0 = vcombine.high %v209_v62, %v1833_v24  ;;  %v1644_v2 = vld [vmem:[%s2044_s1 + $0x48] sm:$0xff]   ;;  %v1647_v5 = vld [vmem:[%s2044_s1 + $0x40] sm:$0xff]   ;;  %v1306_v10 = vcombine.low %v209_v62, %v1833_v24 }
  0x1d   : > { %v1645_v3 = vld [vmem:[%s2044_s1 + $0x88] sm:$0xff]   ;;  %v1648_v6 = vld [vmem:[%s2044_s1 + $0x80] sm:$0xff]   ;;  %v1653_v8 = vld [vmem:[%s2044_s1 + $0x1f8] sm:$0xff]  }
  0x1e   : > { %1518 = vmatpush3.bf16.msra.mxu1 %v1609_v14  ;;  %v1646_v4 = vld [vmem:[%s2044_s1 + $0x8] sm:$0xff]   ;;  %v1649_v7 = vld [vmem:[%s2044_s1] sm:$0xff]   ;;  %v1654_v11 = vld [vmem:[%s2044_s1 + $0x238] sm:$0xff]  }
  0x1f   : > { %1425 = vmatpush3.bf16.msra.mxu0 %v1610_v15  ;;  %1519 = vmatprep.subr.bf16.mxu1 %v1704_v1  ;;  %v1652_v9 = vld [vmem:[%s1822_s9 + $0x8] ss:$12 sps:$4 sm:$0xff]   ;;  %v1655_v12 = vld [vmem:[%s2044_s1 + $0x1b8] sm:$0xff]   ;;  %v1674_v36 = vld [vmem:[%s2044_s1 + $0x1c0] sm:$0xff]  }
  0x20   : > { %1426 = vmatprep.subr.bf16.mxu0 %v1611_v16  ;;  %v1656_v13 = vld [vmem:[%s2044_s1 + $0x1f0] sm:$0xff]   ;;  %v1659_v16 = vld [vmem:[%s2044_s1 + $0x1e8] sm:$0xff]   ;;  %v1665_v23 = vld [vmem:[%s2044_s1 + $0x1d8] sm:$0xff]  }
  0x21   : > { %v1657_v14 = vld [vmem:[%s2044_s1 + $0x230] sm:$0xff]   ;;  %v1666_v28 = vld [vmem:[%s2044_s1 + $0x218] sm:$0xff]   ;;  %v1672_v34 = vld [vmem:[%s2044_s1 + $0x208] sm:$0xff]  }
  0x22   : > { %1520 = vmatpush3.bf16.msra.mxu1 %v1612_v17  ;;  %v1658_v15 = vld [vmem:[%s2044_s1 + $0x1b0] sm:$0xff]   ;;  %v1660_v17 = vld [vmem:[%s2044_s1 + $0x228] sm:$0xff]   ;;  %v1667_v29 = vld [vmem:[%s2044_s1 + $0x198] sm:$0xff]  }
  0x23   : > { %1427 = vmatpush3.bf16.msra.mxu0 %v1613_v18  ;;  %1521 = vmatprep.subr.bf16.mxu1 %v1704_v1  ;;  %v1661_v18 = vld [vmem:[%s2044_s1 + $0x1a8] sm:$0xff]   ;;  %v1668_v31 = vld [vmem:[%s2044_s1 + $0x1d0] sm:$0xff]   ;;  %v1675_v37 = vld [vmem:[%s2044_s1 + $0x200] sm:$0xff]  }
  0x24   : > { %1428 = vmatprep.subr.bf16.mxu0 %v1614_v19  ;;  %v1662_v19 = vld [vmem:[%s2044_s1 + $0x1e0] sm:$0xff]   ;;  %v1670_v32 = vld [vmem:[%s2044_s1 + $0x190] sm:$0xff]   ;;  %v1673_v35 = vld [vmem:[%s2044_s1 + $0x188] sm:$0xff]  }
  0x25   : > { %v1676_v38 = vld [vmem:[%s2044_s1 + $0x180] sm:$0xff]  }
  0x26   : > { %1522 = vmatpush3.bf16.msra.mxu1 %v1615_v20  ;;  %v1663_v20 = vld [vmem:[%s2044_s1 + $0x220] sm:$0xff]  }
  0x27   : > { %1429 = vmatpush3.bf16.msra.mxu0 %v1616_v21  ;;  %1523 = vmatprep.subr.bf16.mxu1 %v1704_v1  ;;  %v1664_v21 = vld [vmem:[%s2044_s1 + $0x1a0] sm:$0xff]  }
  0x28   : > { %1430 = vmatprep.subr.bf16.mxu0 %v1617_v22  ;;  %v818_v22 = vld [vmem:[%s1822_s9 + $0x18] sm:$0xff] }
  0x29   : > { %v1382_v25 = vcombine.high %v1833_v24, %v818_v22  ;;  %v1381_v39 = vcombine.low %v1833_v24, %v818_v22 }
  0x2a   : > { %1524 = vmatpush3.bf16.msra.mxu1 %v1618_v26  ;;  %v819_v26 = vld [vmem:[%s1822_s9 + $0x20] sm:$0xf] }
  0x2b   : > { %1431 = vmatpush3.bf16.msra.mxu0 %v1619_v33  ;;  %1529 = vmatprep.subr.bf16.mxu1 %v1704_v1  ;;  %v1383_v27 = vcombine.low %v1842_v30, %v819_v26  ;;  %v1669_v30 = vld [vmem:[%s2044_s1 + $0x210] sm:$0xff]   ;;  %v1671_v33 = vld [vmem:[%s2044_s1 + $0x1c8] sm:$0xff]  }
  0x2c   : > { %1447 = vmatprep.subr.bf16.mxu0 %v1626_v43 }
  0x2d   : > { %1526 = vmatmul.mubr.bf16.vlgmr.msra.gmra.mxu1 %v346_v44 }
  0x2e   : > { %527 = vmatmul.mubr.bf16.vlgmr.msra.gmra.mxu0 %v340_v46  ;;  %1530 = vmatpush3.bf16.msra.mxu1 %v1627_v45 }
  0x2f   : > { %1448 = vmatpush3.bf16.msra.mxu0 %v1628_v47  ;;  %1531 = vmatprep.subr.bf16.mxu1 %v1704_v1 }
  0x30   : > { %1449 = vmatprep.subr.bf16.mxu0 %v1629_v48  ;;  %1545 = vmatprep.mubr.msk.bf16.mxu1 %vm1705_vm0, %v1704_v1 }
  0x31   : > { %768 = vmatprep.mubr.bf16.mxu0 %v1307_v0 }
  0x32   : > { %1532 = vmatpush3.bf16.msra.mxu1 %v1630_v49 }
  0x33   : > { %1450 = vmatpush3.bf16.msra.mxu0 %v1631_v50  ;;  %1533 = vmatprep.subr.bf16.mxu1 %v1704_v1 }
  0x34   : > { %1451 = vmatprep.subr.bf16.mxu0 %v1632_v51 }
  0x36   : > { %1534 = vmatpush3.bf16.msra.mxu1 %v1633_v52 }
  0x37   : > { %1452 = vmatpush3.bf16.msra.mxu0 %v1634_v53  ;;  %1535 = vmatprep.subr.bf16.mxu1 %v1704_v1 }
  0x38   : > { %1453 = vmatprep.subr.bf16.mxu0 %v1635_v54 }
  0x3a   : > { %1536 = vmatpush3.bf16.msra.mxu1 %v1636_v55 }
  0x3b   : > { %1454 = vmatpush3.bf16.msra.mxu0 %v1637_v56  ;;  %1537 = vmatprep.subr.bf16.mxu1 %v1704_v1 }
  0x3c   : > { %1455 = vmatprep.subr.bf16.mxu0 %v1638_v57 }
  0x3e   : > { %1538 = vmatpush3.bf16.msra.mxu1 %v1639_v58 }
  0x3f   : > { %1456 = vmatpush3.bf16.msra.mxu0 %v1640_v59  ;;  %1539 = vmatprep.subr.bf16.mxu1 %v1704_v1 }
  0x40   : > { %1457 = vmatprep.subr.bf16.mxu0 %v1641_v60 }
  0x42   : > { %1540 = vmatpush3.bf16.msra.mxu1 %v1642_v61 }
  0x43   : > { %1458 = vmatpush3.bf16.msra.mxu0 %v1643_v63  ;;  %1541 = vmatprep.subr.bf16.mxu1 %v1704_v1 }
  0x44   : > { %1459 = vmatprep.subr.bf16.mxu0 %v1644_v2 }
  0x46   : > { %1542 = vmatpush3.bf16.msra.mxu1 %v1645_v3 }
  0x47   : > { %1460 = vmatpush3.bf16.msra.mxu0 %v1646_v4  ;;  %1543 = vmatprep.subr.bf16.mxu1 %v1704_v1 }
  0x48   : > { %1461 = vmatprep.subr.bf16.mxu0 %v1647_v5 }
  0x4a   : > { %1544 = vmatpush3.bf16.msra.mxu1 %v1648_v6 }
  0x4b   : > { %1462 = vmatpush3.bf16.msra.mxu0 %v1649_v7  ;;  %1549 = vmatprep.subr.bf16.mxu1 %v1704_v1 }
  0x4c   : > { %1478 = vmatprep.subr.bf16.mxu0 %v1653_v8 }
  0x4d   : > { %1546 = vmatmul.mubr.bf16.vlgmr.msra.gmra.mxu1 %v1652_v9  ;;  %v1408_v9 = vld [vmem:[%s2045_s2] ss:$0 sm:$0xff] }
  0x4e   : > { %769 = vmatmul.mubr.bf16.vlgmr.msra.gmra.mxu0 %v1306_v10  ;;  %1550 = vmatpush3.bf16.msra.mxu1 %v1654_v11 }
  0x4f   : > { %1479 = vmatpush3.bf16.msra.mxu0 %v1655_v12  ;;  %1551 = vmatprep.subr.bf16.mxu1 %v1704_v1 }
  0x50   : > { %1480 = vmatprep.subr.bf16.mxu0 %v1656_v13  ;;  %1565 = vmatprep.mubr.msk.bf16.mxu1 %vm1705_vm0, %v1704_v1 }
  0x51   : > { %1056 = vmatprep.mubr.bf16.mxu0 %v1382_v25 }
  0x52   : > { %1552 = vmatpush3.bf16.msra.mxu1 %v1657_v14 }
  0x53   : > { %1481 = vmatpush3.bf16.msra.mxu0 %v1658_v15  ;;  %1553 = vmatprep.subr.bf16.mxu1 %v1704_v1 }
  0x54   : > { %1482 = vmatprep.subr.bf16.mxu0 %v1659_v16 }
  0x56   : > { %1554 = vmatpush3.bf16.msra.mxu1 %v1660_v17 }
  0x57   : > { %1483 = vmatpush3.bf16.msra.mxu0 %v1661_v18  ;;  %1555 = vmatprep.subr.bf16.mxu1 %v1704_v1 }
  0x58   : > { %1484 = vmatprep.subr.bf16.mxu0 %v1662_v19 }
  0x5a   : > { %1556 = vmatpush3.bf16.msra.mxu1 %v1663_v20 }
  0x5b   : > { %1485 = vmatpush3.bf16.msra.mxu0 %v1664_v21  ;;  %1557 = vmatprep.subr.bf16.mxu1 %v1704_v1 }
  0x5c   : > { %1486 = vmatprep.subr.bf16.mxu0 %v1665_v23 }
  0x5e   : > { %1558 = vmatpush3.bf16.msra.mxu1 %v1666_v28 }
  0x5f   : > { %1487 = vmatpush3.bf16.msra.mxu0 %v1667_v29  ;;  %1559 = vmatprep.subr.bf16.mxu1 %v1704_v1 }
  0x60   : > { %1488 = vmatprep.subr.bf16.mxu0 %v1668_v31 }
  0x62   : > { %1560 = vmatpush3.bf16.msra.mxu1 %v1669_v30 }
  0x63   : > { %1489 = vmatpush3.bf16.msra.mxu0 %v1670_v32  ;;  %1561 = vmatprep.subr.bf16.mxu1 %v1704_v1 }
  0x64   : > { %1490 = vmatprep.subr.bf16.mxu0 %v1671_v33 }
  0x66   : > { %1562 = vmatpush3.bf16.msra.mxu1 %v1672_v34 }
  0x67   : > { %1491 = vmatpush3.bf16.msra.mxu0 %v1673_v35  ;;  %1563 = vmatprep.subr.bf16.mxu1 %v1704_v1 }
  0x68   : > { %1492 = vmatprep.subr.bf16.mxu0 %v1674_v36 }
  0x6a   : > { %1564 = vmatpush3.bf16.msra.mxu1 %v1675_v37 }
  0x6b   : > { %1493 = vmatpush3.bf16.msra.mxu0 %v1676_v38 }
  0x6d   : > { %1566 = vmatmul.mubr.bf16.vlgmr.msra.gmra.mxu1 %v1383_v27 }
  0x6e   : > { %1057 = vmatmul.mubr.bf16.vlgmr.msra.gmra.mxu0 %v1381_v39 }
  0xed   : > { %v569_v40 = vpop.f32.mrf.mxu1 }
  0xee   : > { %v1432_v47 = vpop.f32.mrf.mxu0 }
  0xef   : > { %v1527_v41 = vpop.f32.mrf.mxu1 }
  0xf0   : > { %v1433_v48 = vpop.f32.mrf.mxu0 }
  0xf1   : > { %v572_v42 = vpop.f32.mrf.mxu1  ;;  %v1434_v54 = vadd.f32 %v1433_v48, %v1432_v47 }
  0xf2   : > { %v1435_v49 = vpop.f32.mrf.mxu0 }
  0xf3   : > { %v1528_v43 = vpop.f32.mrf.mxu1  ;;  %v570_v56 = vadd.f32 %v1434_v54, %v569_v40 }
  0xf4   : > { %v1436_v50 = vpop.f32.mrf.mxu0 }
  0xf5   : > { %v1437_v57 = vadd.f32 %v1436_v50, %v1435_v49 }
  0xf7   : > { %v573_v0 = vadd.f32 %v1437_v57, %v572_v42 }
 0x10d   : > { %v811_v44 = vpop.f32.mrf.mxu1 }
 0x10e   : > { %v1463_v51 = vpop.f32.mrf.mxu0 }
 0x10f   : > { %v1547_v45 = vpop.f32.mrf.mxu1 }
 0x110   : > { %v1464_v52 = vpop.f32.mrf.mxu0 }
 0x111   : > { %v814_v46 = vpop.f32.mrf.mxu1  ;;  %v1465_v24 = vadd.f32 %v1464_v52, %v1463_v51 }
 0x112   : > { %v1466_v53 = vpop.f32.mrf.mxu0 }
 0x113   : > { %v1548_v1 = vpop.f32.mrf.mxu1  ;;  %v771_v60 = vadd.f32 %v1465_v24, %v570_v56 }
 0x114   : > { %v1467_v55 = vpop.f32.mrf.mxu0 }
 0x115   : > { %v1468_v61 = vadd.f32 %v1467_v55, %v1466_v53  ;;  %v812_v5 = vadd.f32 %v811_v44, %v771_v60 }
 0x117   : > { %v774_v6 = vadd.f32 %v1468_v61, %v573_v0 }
 0x119   : > { %v815_v13 = vadd.f32 %v814_v46, %v774_v6 }
 0x12d   : > { %v1099_v58 = vpop.f32.mrf.mxu1 }
 0x12e   : > { %v1494_v59 = vpop.f32.mrf.mxu0 }
 0x12f   : > { %v1567_v62 = vpop.f32.mrf.mxu1 }
 0x130   : > { %v1495_v63 = vpop.f32.mrf.mxu0 }
 0x131   : > { %v1496_v2 = vadd.f32 %v1495_v63, %v1494_v59  ;;  %v1102_v3 = vpop.f32.mrf.mxu1 }
 0x132   : > { %v1497_v4 = vpop.f32.mrf.mxu0 }
 0x133   : > { %v1100_v7 = vadd.f32 %v1496_v2, %v1099_v58  ;;  %v1568_v8 = vpop.f32.mrf.mxu1 }
 0x134   : > { %v1498_v10 = vpop.f32.mrf.mxu0 }
 0x135   : > { %v1106_v11 = vadd.f32 %v1100_v7, %v812_v5  ;;  %v1499_v12 = vadd.f32 %v1498_v10, %v1497_v4 }
 0x137   : > { %v1115_v14 = vadd.f32 %v1408_v9, %v1106_v11  ;;  %v1103_v15 = vadd.f32 %v1499_v12, %v1102_v3 }
 0x139   : > { %v1117_v16 = vmax.f32 %v1115_v14, 0.0  ;;  %v1107_v17 = vadd.f32 %v1103_v15, %v815_v13 }
 0x13b   : > { %v1414_v18 = vpack.c.bf16 %v1117_v16, %v1117_v16  ;;  %v1116_v19 = vadd.f32 %v1408_v9, %v1107_v17 }
 0x13d   : > { %1128 = vst.msk [vmem:[%s206_s7] sm:$0xf] %vm1127_vm2, %v1414_v18  ;;  %v1118_v20 = vmax.f32 %v1116_v19, 0.0 }
 0x13f   : > { %v1415_v21 = vpack.c.bf16 %v1118_v20, %v1118_v20 }
 0x141   : > { %1129 = vst.msk [vmem:[%s206_s7 + $0x4] sm:$0xf] %vm1127_vm2, %v1415_v21 }
 0x142 PF: > { %s13_s14 = sadd.s32 1, %s1702_s14   ;;  %s2047_s12 = smov %s1698_s13 }
 0x143   : > { %p10_p5 = scmp.ge.s32.totalorder %s13_s14, 4   ;;  %s2048_s13 = smov %s2050_s15 }
 0x145   :  { %12 = sbr.rel (!%p10_p5) target bundleno = 2 (0x2), region = 64 }

// kernel: cmptrans512_forward.18
= control target key start
LH: loop header
LB: loop body
LE: loop exit
PB: predicated region body
PF: predicated region fallthrough
CT: control target
= control target key end

     0   :  { %vm110_vm0 = vcmask 523264   ;;  %vm392_vm1 = vcmask 519168   ;;  %s733_s1 = inlined_call_operand.vmem [shape: bf16[64,64], index: 1, kind: input, shape index: {}]   ;;  %s734_s0 = inlined_call_operand.vmem [shape: bf16[128,64], index: 0, kind: input, shape index: {}]   ;;  %s735_s2 = inlined_call_operand.vmem [shape: f32[1,64], index: 2, kind: input, shape index: {}]   ;;  %s736_s3 = inlined_call_operand.vmem [shape: bf16[128,64], index: 3, kind: output, shape index: {}]  }
   0x1   :  { %v526_v0 = vld [vmem:[%s733_s1 + $0x18] sm:$0xff]   ;;  %v527_v1 = vld [vmem:[%s733_s1 + $0x10] sm:$0xff]   ;;  %v528_v2 = vld [vmem:[%s733_s1 + $0x8] sm:$0xff]  }
   0x2   :  { %494 = vmatprep.subr.bf16.mxu0 %v526_v0  ;;  %518 = vmatprep.subr.bf16.mxu1 %v526_v0  ;;  %v530_v3 = vld [vmem:[%s734_s0] sm:$0xff]   ;;  %v532_v6 = vld [vmem:[%s734_s0 + $0x8] sm:$0xff]   ;;  %v534_v8 = vld [vmem:[%s734_s0 + $0x10] sm:$0xff]  }
   0x3   :  { %495 = vmatpush3.bf16.msra.mxu0 %v526_v0  ;;  %522 = vmatpush3.bf16.msra.mxu1 %v526_v0  ;;  %v531_v4 = vld [vmem:[%s734_s0 + $0x20] sm:$0xff]   ;;  %v533_v7 = vld [vmem:[%s734_s0 + $0x28] sm:$0xff]   ;;  %v535_v9 = vld [vmem:[%s734_s0 + $0x30] sm:$0xff]  }
   0x4   :  { %496 = vmatprep.subr.bf16.mxu0 %v527_v1  ;;  %519 = vmatprep.subr.bf16.mxu1 %v527_v1  ;;  %v529_v5 = vld [vmem:[%s733_s1] sm:$0xff]   ;;  %v536_v10 = vld [vmem:[%s734_s0 + $0x18] sm:$0xff]  }
   0x5   :  { %502 = vmatprep.mubr.msk.bf16.mxu0 %vm110_vm0, %v530_v3  ;;  %510 = vmatprep.mubr.msk.bf16.mxu1 %vm110_vm0, %v531_v4  ;;  %v537_v11 = vld [vmem:[%s734_s0 + $0x38] sm:$0xff]   ;;  %v413_v12 = vld [vmem:[%s735_s2] ss:$0 sm:$0xff] }
   0x7   :  { %497 = vmatpush3.bf16.msra.mxu0 %v527_v1  ;;  %523 = vmatpush3.bf16.msra.mxu1 %v527_v1 }
   0x8   :  { %498 = vmatprep.subr.bf16.mxu0 %v528_v2  ;;  %520 = vmatprep.subr.bf16.mxu1 %v528_v2 }
   0xb   :  { %499 = vmatpush3.bf16.msra.mxu0 %v528_v2  ;;  %524 = vmatpush3.bf16.msra.mxu1 %v528_v2 }
   0xc   :  { %500 = vmatprep.subr.bf16.mxu0 %v529_v5  ;;  %521 = vmatprep.subr.bf16.mxu1 %v529_v5 }
   0xf   :  { %501 = vmatpush3.bf16.msra.mxu0 %v529_v5  ;;  %525 = vmatpush3.bf16.msra.mxu1 %v529_v5 }
  0x12   :  { %503 = vmatmul.mubr.msk.bf16.vlgmr.msra.gmra.mxu0 %vm110_vm0, %v532_v6  ;;  %511 = vmatmul.mubr.msk.bf16.vlgmr.msra.gmra.mxu1 %vm110_vm0, %v533_v7 }
  0x13   :  { %506 = vmatprep.mubr.msk.bf16.mxu0 %vm110_vm0, %v534_v8  ;;  %514 = vmatprep.mubr.msk.bf16.mxu1 %vm110_vm0, %v535_v9 }
  0x1a   :  { %507 = vmatmul.mubr.msk.bf16.gmra.mxu0 %vm110_vm0, %v536_v10  ;;  %515 = vmatmul.mubr.msk.bf16.gmra.mxu1 %vm110_vm0, %v537_v11 }
  0xd2   :  { %v504_v13 = vpop.f32.mrf.mxu0  ;;  %v512_v14 = vpop.f32.mrf.mxu1 }
  0xd3   :  { %v178_v15 = vadd.f32 %v504_v13, %v413_v12  ;;  %v210_v16 = vadd.f32 %v512_v14, %v413_v12 }
  0xd4   :  { %v169_v17 = vpop.f32.mrf.mxu0  ;;  %v201_v18 = vpop.f32.mrf.mxu1 }
  0xd5   :  { %v436_v19 = vmul.f32 -1.442695, %v178_v15  ;;  %v444_v20 = vmul.f32 -1.442695, %v210_v16  ;;  %v170_v21 = vadd.f32 %v413_v12, %v169_v17  ;;  %v202_v22 = vadd.f32 %v413_v12, %v201_v18 }
  0xd6   :  { %v505_v23 = vpop.f32.mrf.mxu0  ;;  %v513_v24 = vpop.f32.mrf.mxu1 }
  0xd7   :  { %538 = vpow2.f32 %v436_v19  ;;  %v434_v25 = vmul.f32 -1.442695, %v170_v21  ;;  %v442_v26 = vmul.f32 -1.442695, %v202_v22  ;;  %v181_v27 = vadd.f32 %v505_v23, %v413_v12 }
  0xd8   :  { %540 = vpow2.f32 %v444_v20  ;;  %v213_v28 = vadd.f32 %v513_v24, %v413_v12  ;;  %v172_v29 = vpop.f32.mrf.mxu0  ;;  %v204_v30 = vpop.f32.mrf.mxu1 }
  0xd9   :  { %542 = vpow2.f32 %v434_v25  ;;  %v437_v31 = vmul.f32 -1.442695, %v181_v27  ;;  %v173_v32 = vadd.f32 %v413_v12, %v172_v29  ;;  %v205_v33 = vadd.f32 %v413_v12, %v204_v30 }
  0xda   :  { %544 = vpow2.f32 %v442_v26  ;;  %v445_v34 = vmul.f32 -1.442695, %v213_v28  ;;  %v508_v35 = vpop.f32.mrf.mxu0  ;;  %v516_v36 = vpop.f32.mrf.mxu1 }
  0xdb   :  { %546 = vpow2.f32 %v437_v31  ;;  %v435_v37 = vmul.f32 -1.442695, %v173_v32  ;;  %v443_v38 = vmul.f32 -1.442695, %v205_v33  ;;  %v194_v39 = vadd.f32 %v508_v35, %v413_v12 }
  0xdc   :  { %548 = vpow2.f32 %v445_v34  ;;  %v226_v40 = vadd.f32 %v516_v36, %v413_v12  ;;  %v185_v41 = vpop.f32.mrf.mxu0  ;;  %v217_v42 = vpop.f32.mrf.mxu1 }
  0xdd   :  { %550 = vpow2.f32 %v435_v37  ;;  %v440_v43 = vmul.f32 -1.442695, %v194_v39  ;;  %v186_v44 = vadd.f32 %v413_v12, %v185_v41  ;;  %v218_v45 = vadd.f32 %v413_v12, %v217_v42 }
  0xde   :  { %552 = vpow2.f32 %v443_v38  ;;  %v448_v46 = vmul.f32 -1.442695, %v226_v40  ;;  %v509_v47 = vpop.f32.mrf.mxu0  ;;  %v517_v48 = vpop.f32.mrf.mxu1 }
  0xdf   :  { %554 = vpow2.f32 %v440_v43  ;;  %v438_v49 = vmul.f32 -1.442695, %v186_v44  ;;  %v446_v50 = vmul.f32 -1.442695, %v218_v45  ;;  %v197_v51 = vadd.f32 %v509_v47, %v413_v12 }
  0xe0   :  { %556 = vpow2.f32 %v448_v46  ;;  %v229_v52 = vadd.f32 %v517_v48, %v413_v12  ;;  %v188_v53 = vpop.f32.mrf.mxu0  ;;  %v220_v54 = vpop.f32.mrf.mxu1 }
  0xe1   :  { %558 = vpow2.f32 %v438_v49  ;;  %v441_v55 = vmul.f32 -1.442695, %v197_v51  ;;  %v189_v56 = vadd.f32 %v413_v12, %v188_v53  ;;  %v221_v57 = vadd.f32 %v413_v12, %v220_v54 }
  0xe2   :  { %560 = vpow2.f32 %v446_v50  ;;  %v449_v58 = vmul.f32 -1.442695, %v229_v52 }
  0xe3   :  { %562 = vpow2.f32 %v441_v55  ;;  %v439_v59 = vmul.f32 -1.442695, %v189_v56  ;;  %v447_v60 = vmul.f32 -1.442695, %v221_v57 }
  0xe4   :  { %v539_v61 = vpop.eup %538  ;;  %564 = vpow2.f32 %v449_v58 }
  0xe5   :  { %v541_v62 = vpop.eup %540  ;;  %v282_v63 = vadd.f32 1.0, %v539_v61  ;;  %566 = vpow2.f32 %v439_v59 }
  0xe6   :  { %v543_v0 = vpop.eup %542  ;;  %v290_v1 = vadd.f32 1.0, %v541_v62  ;;  %568 = vpow2.f32 %v447_v60 }
  0xe7   :  { %v545_v2 = vpop.eup %544  ;;  %570 = vrcp.f32 %v282_v63  ;;  %v280_v3 = vadd.f32 1.0, %v543_v0 }
  0xe8   :  { %v547_v4 = vpop.eup %546  ;;  %572 = vrcp.f32 %v290_v1  ;;  %v288_v5 = vadd.f32 1.0, %v545_v2 }
  0xe9   :  { %v549_v6 = vpop.eup %548  ;;  %574 = vrcp.f32 %v280_v3  ;;  %v283_v7 = vadd.f32 1.0, %v547_v4 }
  0xea   :  { %v551_v8 = vpop.eup %550  ;;  %576 = vrcp.f32 %v288_v5  ;;  %v291_v9 = vadd.f32 1.0, %v549_v6 }
  0xeb   :  { %v553_v10 = vpop.eup %552  ;;  %578 = vrcp.f32 %v283_v7  ;;  %v281_v11 = vadd.f32 1.0, %v551_v8 }
  0xec   :  { %v555_v12 = vpop.eup %554  ;;  %580 = vrcp.f32 %v291_v9  ;;  %v289_v13 = vadd.f32 1.0, %v553_v10 }
  0xed   :  { %v557_v14 = vpop.eup %556  ;;  %582 = vrcp.f32 %v281_v11  ;;  %v286_v15 = vadd.f32 1.0, %v555_v12 }
  0xee   :  { %v559_v16 = vpop.eup %558  ;;  %584 = vrcp.f32 %v289_v13  ;;  %v294_v17 = vadd.f32 1.0, %v557_v14 }
  0xef   :  { %v561_v18 = vpop.eup %560  ;;  %586 = vrcp.f32 %v286_v15  ;;  %v284_v19 = vadd.f32 1.0, %v559_v16 }
  0xf0   :  { %v563_v20 = vpop.eup %562  ;;  %588 = vrcp.f32 %v294_v17  ;;  %v292_v21 = vadd.f32 1.0, %v561_v18 }
  0xf1   :  { %v565_v22 = vpop.eup %564  ;;  %590 = vrcp.f32 %v284_v19  ;;  %v287_v23 = vadd.f32 1.0, %v563_v20 }
  0xf2   :  { %v567_v24 = vpop.eup %566  ;;  %592 = vrcp.f32 %v292_v21  ;;  %v295_v25 = vadd.f32 1.0, %v565_v22 }
  0xf3   :  { %v569_v26 = vpop.eup %568  ;;  %594 = vrcp.f32 %v287_v23  ;;  %v285_v27 = vadd.f32 1.0, %v567_v24 }
  0xf4   :  { %v571_v28 = vpop.eup %570  ;;  %596 = vrcp.f32 %v295_v25  ;;  %v293_v29 = vadd.f32 1.0, %v569_v26 }
  0xf5   :  { %v573_v30 = vpop.eup %572  ;;  %v468_v31 = vpack.c.bf16 %v571_v28, %v571_v28  ;;  %598 = vrcp.f32 %v285_v27 }
  0xf6   :  { %v575_v32 = vpop.eup %574  ;;  %v476_v33 = vpack.c.bf16 %v573_v30, %v573_v30  ;;  %600 = vrcp.f32 %v293_v29 }
  0xf7   :  { %v577_v34 = vpop.eup %576  ;;  %395 = vst.msk [vmem:[%s736_s3 + $0x8] sm:$0xf] %vm392_vm1, %v468_v31  ;;  %v466_v35 = vpack.c.bf16 %v575_v32, %v575_v32 }
  0xf8   :  { %v579_v36 = vpop.eup %578  ;;  %403 = vst.msk [vmem:[%s736_s3 + $0x28] sm:$0xf] %vm392_vm1, %v476_v33  ;;  %v474_v37 = vpack.c.bf16 %v577_v34, %v577_v34 }
  0xf9   :  { %v581_v38 = vpop.eup %580  ;;  %393 = vst.msk [vmem:[%s736_s3] sm:$0xf] %vm392_vm1, %v466_v35  ;;  %v469_v39 = vpack.c.bf16 %v579_v36, %v579_v36 }
  0xfa   :  { %v583_v40 = vpop.eup %582  ;;  %401 = vst.msk [vmem:[%s736_s3 + $0x20] sm:$0xf] %vm392_vm1, %v474_v37  ;;  %v477_v41 = vpack.c.bf16 %v581_v38, %v581_v38 }
  0xfb   :  { %v585_v42 = vpop.eup %584  ;;  %396 = vst.msk [vmem:[%s736_s3 + $0xc] sm:$0xf] %vm392_vm1, %v469_v39  ;;  %v467_v43 = vpack.c.bf16 %v583_v40, %v583_v40 }
  0xfc   :  { %v587_v44 = vpop.eup %586  ;;  %404 = vst.msk [vmem:[%s736_s3 + $0x2c] sm:$0xf] %vm392_vm1, %v477_v41  ;;  %v475_v45 = vpack.c.bf16 %v585_v42, %v585_v42 }
  0xfd   :  { %v589_v46 = vpop.eup %588  ;;  %394 = vst.msk [vmem:[%s736_s3 + $0x4] sm:$0xf] %vm392_vm1, %v467_v43  ;;  %v472_v47 = vpack.c.bf16 %v587_v44, %v587_v44 }
  0xfe   :  { %v591_v48 = vpop.eup %590  ;;  %402 = vst.msk [vmem:[%s736_s3 + $0x24] sm:$0xf] %vm392_vm1, %v475_v45  ;;  %v480_v49 = vpack.c.bf16 %v589_v46, %v589_v46 }
  0xff   :  { %v593_v50 = vpop.eup %592  ;;  %399 = vst.msk [vmem:[%s736_s3 + $0x18] sm:$0xf] %vm392_vm1, %v472_v47  ;;  %v470_v51 = vpack.c.bf16 %v591_v48, %v591_v48 }
 0x100   :  { %v595_v52 = vpop.eup %594  ;;  %407 = vst.msk [vmem:[%s736_s3 + $0x38] sm:$0xf] %vm392_vm1, %v480_v49  ;;  %v478_v53 = vpack.c.bf16 %v593_v50, %v593_v50 }
 0x101   :  { %v597_v54 = vpop.eup %596  ;;  %397 = vst.msk [vmem:[%s736_s3 + $0x10] sm:$0xf] %vm392_vm1, %v470_v51  ;;  %v473_v55 = vpack.c.bf16 %v595_v52, %v595_v52 }
 0x102   :  { %v599_v56 = vpop.eup %598  ;;  %405 = vst.msk [vmem:[%s736_s3 + $0x30] sm:$0xf] %vm392_vm1, %v478_v53  ;;  %v481_v57 = vpack.c.bf16 %v597_v54, %v597_v54 }
 0x103   :  { %v601_v58 = vpop.eup %600  ;;  %400 = vst.msk [vmem:[%s736_s3 + $0x1c] sm:$0xf] %vm392_vm1, %v473_v55  ;;  %v471_v59 = vpack.c.bf16 %v599_v56, %v599_v56 }
 0x104   :  { %408 = vst.msk [vmem:[%s736_s3 + $0x3c] sm:$0xf] %vm392_vm1, %v481_v57  ;;  %v479_v60 = vpack.c.bf16 %v601_v58, %v601_v58 }
 0x105   :  { %398 = vst.msk [vmem:[%s736_s3 + $0x14] sm:$0xf] %vm392_vm1, %v471_v59 }
 0x106   :  { %406 = vst.msk [vmem:[%s736_s3 + $0x34] sm:$0xf] %vm392_vm1, %v479_v60 }

// kernel: cmptrans512_forward.20
= control target key start
LH: loop header
LB: loop body
LE: loop exit
PB: predicated region body
PF: predicated region fallthrough
CT: control target
= control target key end

     0   :  { %s1556_s12 = smov 0   ;;  %s1558_s13 = smov 0   ;;  %s1883_s0 = inlined_call_operand.vmem [shape: bf16[128,64], index: 0, kind: input, shape index: {}]   ;;  %s1884_s1 = inlined_call_operand.vmem [shape: bf16[64,1024], index: 1, kind: input, shape index: {}]   ;;  %s1885_s2 = inlined_call_operand.vmem [shape: f32[1,1024], index: 2, kind: input, shape index: {}]   ;;  %s1886_s3 = inlined_call_operand.vmem [shape: bf16[128,1024], index: 3, kind: output, shape index: {}]  }
   0x1   :  { %s1560_s14 = smov 0   ;;  %s1562_s15 = smov 0  }
   0x2   :  { %s1564_s16 = smov 0  }
   0x3 LB: > { %s22_s17 = sadd.s32 1, %s1529_s15  ;;  %s1299_s18 = sadd.s32 4294967295, %s1533_s16   ;;  %s1533_s16 = sphi %s1564_s16, %s13_s16   ;;  %s1529_s15 = sphi %s1562_s15, %s1891_s15   ;;  %s1525_s14 = sphi %s1560_s14, %s1890_s14   ;;  %s1521_s13 = sphi %s1558_s13, %s1889_s13   ;;  %s1517_s12 = sphi %s1556_s12, %s1888_s12  }
   0x4   : > { %p23_p0 = scmp.ge.s32.totalorder %s22_s17, 2  ;;  %p65_p1 = scmp.ne.s32.totalorder %s1521_s13, %s1517_s12 }
   0x5   : > { %p66_p2 = scmp.eq.s32.totalorder %s1533_s16, 0  ;;  %p123_p4 = scmp.eq.s32.totalorder %s1299_s18, 1 }
   0x6   : > { %s1893_s17 = smov (%p23_p0, %s22_s17), 0  ;;  %s58_s20 = sadd.s32 1, %s1521_s13 }
   0x7   : > { %p67_p3 = por %p66_p2, %p65_p1  ;;  %s55_s19 = ssub.s32 %s1529_s15, %s1893_s17 }
   0x8   : > { %p56_p5 = scmp.eq.s32.totalorder %s55_s19, 0  ;;  %p1591_p6 = por %p123_p4, %p65_p1 }
   0x9   : > { %p1303_p7 = scmp.ge.s32.totalorder %s1533_s16, 2 }
   0xa   : > { %s1596_s22 = scalar_select %p56_p5, %s1521_s13, %s58_s20  }
   0xb   : > { %154 = sbr.rel (%p1303_p7) target bundleno = 28 (0x1c), region = 20 }
  0x10   : > { %157 = sbr.rel (!%p67_p3) target bundleno = 28 (0x1c), region = 24  ;;  %s159_s23 = sand.u32 (%p67_p3), 1, %s1521_s13  }
  0x11   : > { %s1388_s24 = sshll.u32 (%p67_p3), %s1529_s15, 4  ;;  %s1304_s25 = sshll.u32 (%p67_p3), %s159_s23, 7 }
  0x12   : > { %s1604_s28 = scalar_lea.vmem (%p67_p3), %s1884_s1, %s1388_s24  ;;  %s161_s29 = scalar_lea.vmem (%p67_p3), [#allocation2], %s1304_s25 }
  0x13   : > { %v177_v0 = vld [vmem:[%s1604_s28] sm:$0xff] (%p67_p3)  ;;  %v179_v1 = vld [vmem:[%s1604_s28 + $0x8] sm:$0xff] (%p67_p3) }
  0x14   : > { %v181_v2 = vld [vmem:[%s1604_s28 + $0x20] sm:$0xff] (%p67_p3)  ;;  %178 = vst [vmem:[%s161_s29] sm:$0xff] (%p67_p3), %v177_v0  ;;  %180 = vst [vmem:[%s161_s29 + $0x8] sm:$0xff] (%p67_p3), %v179_v1  ;;  %v183_v3 = vld [vmem:[%s1604_s28 + $0x28] sm:$0xff] (%p67_p3) }
  0x15   : > { %182 = vst [vmem:[%s161_s29 + $0x10] sm:$0xff] %v181_v2  ;;  %v185_v4 = vld [vmem:[%s1604_s28 + $0x40] sm:$0xff]  ;;  %v187_v5 = vld [vmem:[%s1604_s28 + $0x48] sm:$0xff]  ;;  %184 = vst [vmem:[%s161_s29 + $0x18] sm:$0xff] %v183_v3 }
  0x16   : > { %186 = vst [vmem:[%s161_s29 + $0x20] sm:$0xff] %v185_v4  ;;  %188 = vst [vmem:[%s161_s29 + $0x28] sm:$0xff] %v187_v5  ;;  %v189_v6 = vld [vmem:[%s1604_s28 + $0x60] sm:$0xff]  ;;  %v191_v7 = vld [vmem:[%s1604_s28 + $0x68] sm:$0xff] }
  0x17   : > { %v193_v8 = vld [vmem:[%s1604_s28 + $0x80] sm:$0xff]  ;;  %190 = vst [vmem:[%s161_s29 + $0x30] sm:$0xff] %v189_v6  ;;  %192 = vst [vmem:[%s161_s29 + $0x38] sm:$0xff] %v191_v7  ;;  %v195_v9 = vld [vmem:[%s1604_s28 + $0x88] sm:$0xff] }
  0x18   : > { %194 = vst [vmem:[%s161_s29 + $0x40] sm:$0xff] %v193_v8  ;;  %v197_v10 = vld [vmem:[%s1604_s28 + $0xa0] sm:$0xff]  ;;  %v199_v11 = vld [vmem:[%s1604_s28 + $0xa8] sm:$0xff]  ;;  %196 = vst [vmem:[%s161_s29 + $0x48] sm:$0xff] %v195_v9 }
  0x19   : > { %198 = vst [vmem:[%s161_s29 + $0x50] sm:$0xff] %v197_v10  ;;  %200 = vst [vmem:[%s161_s29 + $0x58] sm:$0xff] %v199_v11  ;;  %v201_v12 = vld [vmem:[%s1604_s28 + $0xc0] sm:$0xff]  ;;  %v203_v13 = vld [vmem:[%s1604_s28 + $0xc8] sm:$0xff] }
  0x1a   : > { %v205_v14 = vld [vmem:[%s1604_s28 + $0xe0] sm:$0xff]  ;;  %202 = vst [vmem:[%s161_s29 + $0x60] sm:$0xff] %v201_v12  ;;  %204 = vst [vmem:[%s161_s29 + $0x68] sm:$0xff] %v203_v13  ;;  %v207_v15 = vld [vmem:[%s1604_s28 + $0xe8] sm:$0xff] }
  0x1b   : > { %206 = vst [vmem:[%s161_s29 + $0x70] sm:$0xff] %v205_v14  ;;  %208 = vst [vmem:[%s161_s29 + $0x78] sm:$0xff] %v207_v15 }
  0x1c PF: > { %p1307_p8 = scmp.ge.s32.totalorder %s1533_s16, 1  ;;  %p221_p9 = scmp.lt.s32.totalorder %s1533_s16, 3 }
  0x1e   : > { %p222_p10 = pnand %p1307_p8, %p221_p9 }
  0x1f   : > { %s228_s30 = sand.u32 (!%p222_p10), 1, %s1517_s12  }
  0x20   : > { %225 = sbr.rel (%p222_p10) target bundleno = 334 (0x14e), region = 51  ;;  %s1308_s4 = sshll.u32 (!%p222_p10), %s228_s30, 7 }
  0x21   : > { %s230_s5 = scalar_lea.vmem (!%p222_p10), [#allocation2], %s1308_s4  ;;  %s1310_s4 = sshll.u32 (!%p222_p10), %s1525_s14, 2 }
  0x22   : > { %p267_p11 = scmp.lt.s32.totalorder (!%p222_p10), %s1310_s4, 7  ;;  %s1309_s8 = sshll.u32 (!%p222_p10), %s228_s30, 8 }
  0x23   : > { %s1705_s12 = scalar_lea.vmem (!%p222_p10), [#allocation3], %s1309_s8 }
  0x25   : > { %v1535_v16 = vmov 0   ;;  %v1463_v17 = vld [vmem:[%s230_s5 + $0x64] ss:$16 sps:$4 sm:$0xff]   ;;  %v1465_v18 = vld [vmem:[%s230_s5 + $0x6c] ss:$16 sps:$4 sm:$0xff]   ;;  %vm448_vm0 = vcmask 523264   ;;  %v308_v41 = vlaneseq }
  0x26   : > { %505 = vmatprep.mubr.bf16.mxu0 %v1535_v16  ;;  %618 = vmatprep.mubr.bf16.mxu1 %v1535_v16  ;;  %v1467_v19 = vld [vmem:[%s230_s5 + $0x60] ss:$16 sps:$4 sm:$0xff]   ;;  %v1468_v20 = vld [vmem:[%s230_s5 + $0x68] ss:$16 sps:$4 sm:$0xff]   ;;  %v1469_v21 = vld [vmem:[%s230_s5 + $0x44] ss:$16 sps:$4 sm:$0xff]  }
  0x27   : > { %481 = vmatprep.subr.bf16.mxu0 %v1463_v17  ;;  %594 = vmatprep.subr.bf16.mxu1 %v1465_v18  ;;  %v1471_v22 = vld [vmem:[%s230_s5 + $0x4c] ss:$16 sps:$4 sm:$0xff]   ;;  %v1473_v23 = vld [vmem:[%s230_s5 + $0x40] ss:$16 sps:$4 sm:$0xff]   ;;  %v1474_v24 = vld [vmem:[%s230_s5 + $0x48] ss:$16 sps:$4 sm:$0xff]  }
  0x28   : > { %482 = vmatpush1.bf16.msra.mxu0 %v1467_v19  ;;  %595 = vmatpush1.bf16.msra.mxu1 %v1468_v20  ;;  %v1475_v25 = vld [vmem:[%s230_s5 + $0x24] ss:$16 sps:$4 sm:$0xff]   ;;  %v1477_v26 = vld [vmem:[%s230_s5 + $0x2c] ss:$16 sps:$4 sm:$0xff]   ;;  %v1479_v27 = vld [vmem:[%s230_s5 + $0x20] ss:$16 sps:$4 sm:$0xff]  }
  0x29   : > { %483 = vmatprep.subr.bf16.mxu0 %v1469_v21  ;;  %596 = vmatprep.subr.bf16.mxu1 %v1471_v22  ;;  %v1480_v28 = vld [vmem:[%s230_s5 + $0x28] ss:$16 sps:$4 sm:$0xff]   ;;  %v1481_v29 = vld [vmem:[%s230_s5 + $0x4] ss:$16 sps:$4 sm:$0xff]   ;;  %v1483_v30 = vld [vmem:[%s230_s5 + $0xc] ss:$16 sps:$4 sm:$0xff]  }
  0x2a   : > { %v1485_v31 = vld [vmem:[%s230_s5] ss:$16 sps:$4 sm:$0xff]   ;;  %v1486_v32 = vld [vmem:[%s230_s5 + $0x8] ss:$16 sps:$4 sm:$0xff]   ;;  %s1895_s4 = smov (!%p267_p11, %s1310_s4), 7  ;;  %v309_v42 = vshrl.u32 %v308_v41, 7 }
  0x2b   : > { %v1487_v33 = vld [vmem:[%s1883_s0] sm:$0xff]   ;;  %v1488_v34 = vld [vmem:[%s1883_s0 + $0x8] sm:$0xff]   ;;  %v1489_v35 = vld [vmem:[%s1883_s0 + $0x10] sm:$0xff]   ;;  %s269_s7 = scalar_lea.vmem %s1885_s2, %s1895_s4  ;;  %s1421_s30 = sshll.u32 (%p1591_p6), %s1525_s14, 4 }
  0x2c   : > { %484 = vmatpush1.bf16.msra.mxu0 %v1473_v23  ;;  %597 = vmatpush1.bf16.msra.mxu1 %v1474_v24  ;;  %v1490_v36 = vld [vmem:[%s1883_s0 + $0x18] sm:$0xff]   ;;  %v1491_v37 = vld [vmem:[%s1883_s0 + $0x20] sm:$0xff]   ;;  %v1492_v38 = vld [vmem:[%s1883_s0 + $0x28] sm:$0xff]   ;;  %v310_v43 = vsub.s32 0, %v309_v42  ;;  %v318_v44 = vsub.s32 2, %v309_v42  ;;  %v314_v46 = vsub.s32 1, %v309_v42  ;;  %s1805_s11 = scalar_lea.vmem (%p1591_p6), %s1886_s3, %s1421_s30 }
  0x2d   : > { %485 = vmatprep.subr.bf16.mxu0 %v1475_v25  ;;  %598 = vmatprep.subr.bf16.mxu1 %v1477_v26  ;;  %v1493_v39 = vld [vmem:[%s1883_s0 + $0x30] sm:$0xff]   ;;  %v1494_v40 = vld [vmem:[%s1883_s0 + $0x38] sm:$0xff]   ;;  %v306_v45 = vld [vmem:[%s269_s7] sm:$0xf]  ;;  %v322_v47 = vsub.s32 3, %v309_v42 }
  0x2e   : > { %v1687_v48 = vrot.slane %v306_v45, %v310_v43  ;;  %v1689_v49 = vrot.slane %v306_v45, %v318_v44  ;;  %v1691_v52 = vrot.slane %v306_v45, %v314_v46 }
  0x2f   : > { %v1693_v53 = vrot.slane %v306_v45, %v322_v47 }
  0x30   : > { %486 = vmatpush1.bf16.msra.mxu0 %v1479_v27  ;;  %599 = vmatpush1.bf16.msra.mxu1 %v1480_v28 }
  0x31   : > { %487 = vmatprep.subr.bf16.mxu0 %v1481_v29  ;;  %600 = vmatprep.subr.bf16.mxu1 %v1483_v30 }
  0x34   : > { %488 = vmatpush1.bf16.msra.mxu0 %v1485_v31  ;;  %601 = vmatpush1.bf16.msra.mxu1 %v1486_v32 }
  0x37   : > { %1335 = vmatmul.mubr.msk.bf16.vlgmr.msra.gmra.mxu0 %vm448_vm0, %v1487_v33  ;;  %1343 = vmatmul.mubr.msk.bf16.vlgmr.msra.gmra.mxu1 %vm448_vm0, %v1487_v33 }
  0x38   : > { %515 = vmatprep.mubr.bf16.mxu0 %v1535_v16  ;;  %628 = vmatprep.mubr.bf16.mxu1 %v1535_v16 }
  0x3f   : > { %1336 = vmatmul.mubr.msk.bf16.gmra.mxu0 %vm448_vm0, %v1488_v34  ;;  %1344 = vmatmul.mubr.msk.bf16.gmra.mxu1 %vm448_vm0, %v1488_v34 }
  0x40   : > { %525 = vmatprep.mubr.bf16.mxu0 %v1535_v16  ;;  %638 = vmatprep.mubr.bf16.mxu1 %v1535_v16 }
  0x47   : > { %1337 = vmatmul.mubr.msk.bf16.gmra.mxu0 %vm448_vm0, %v1489_v35  ;;  %1345 = vmatmul.mubr.msk.bf16.gmra.mxu1 %vm448_vm0, %v1489_v35 }
  0x48   : > { %535 = vmatprep.mubr.bf16.mxu0 %v1535_v16  ;;  %648 = vmatprep.mubr.bf16.mxu1 %v1535_v16 }
  0x4f   : > { %1338 = vmatmul.mubr.msk.bf16.gmra.mxu0 %vm448_vm0, %v1490_v36  ;;  %1346 = vmatmul.mubr.msk.bf16.gmra.mxu1 %vm448_vm0, %v1490_v36 }
  0x50   : > { %545 = vmatprep.mubr.bf16.mxu0 %v1535_v16  ;;  %658 = vmatprep.mubr.bf16.mxu1 %v1535_v16 }
  0x57   : > { %1339 = vmatmul.mubr.msk.bf16.gmra.mxu0 %vm448_vm0, %v1491_v37  ;;  %1347 = vmatmul.mubr.msk.bf16.gmra.mxu1 %vm448_vm0, %v1491_v37 }
  0x58   : > { %555 = vmatprep.mubr.bf16.mxu0 %v1535_v16  ;;  %668 = vmatprep.mubr.bf16.mxu1 %v1535_v16 }
  0x5f   : > { %1340 = vmatmul.mubr.msk.bf16.gmra.mxu0 %vm448_vm0, %v1492_v38  ;;  %1348 = vmatmul.mubr.msk.bf16.gmra.mxu1 %vm448_vm0, %v1492_v38 }
  0x60   : > { %565 = vmatprep.mubr.bf16.mxu0 %v1535_v16  ;;  %678 = vmatprep.mubr.bf16.mxu1 %v1535_v16 }
  0x67   : > { %1341 = vmatmul.mubr.msk.bf16.gmra.mxu0 %vm448_vm0, %v1493_v39  ;;  %1349 = vmatmul.mubr.msk.bf16.gmra.mxu1 %vm448_vm0, %v1493_v39 }
  0x68   : > { %575 = vmatprep.mubr.bf16.mxu0 %v1535_v16  ;;  %688 = vmatprep.mubr.bf16.mxu1 %v1535_v16 }
  0x6f   : > { %1342 = vmatmul.mubr.msk.bf16.gmra.mxu0 %vm448_vm0, %v1494_v40  ;;  %1350 = vmatmul.mubr.msk.bf16.gmra.mxu1 %vm448_vm0, %v1494_v40 }
  0xf7   : > { %v507_v50 = vpop.f32.mrf.mxu0  ;;  %v620_v51 = vpop.f32.mrf.mxu1 }
  0xf8   : > { %v508_v54 = vadd.f32 %v507_v50, %v1687_v48  ;;  %v621_v55 = vadd.f32 %v620_v51, %v1689_v49 }
  0xf9   : > { %v509_v56 = vpop.f32.mrf.mxu0  ;;  %v622_v57 = vpop.f32.mrf.mxu1 }
  0xfa   : > { %v763_v58 = vmul.f32 0.01, %v508_v54  ;;  %v765_v59 = vmul.f32 0.01, %v621_v55  ;;  %vm699_vm1 = vcmp.ge.f32.partialorder %v508_v54, 0.0  ;;  %vm701_vm2 = vcmp.ge.f32.partialorder %v621_v55, 0.0 }
  0xfb   : > { %v510_v60 = vadd.f32 %v509_v56, %v1691_v52  ;;  %v623_v61 = vadd.f32 %v622_v57, %v1693_v53  ;;  %v511_v62 = vpop.f32.mrf.mxu0  ;;  %v624_v63 = vpop.f32.mrf.mxu1 }
  0xfc   : > { %v512_v0 = vadd.f32 %v511_v62, %v1687_v48  ;;  %v625_v1 = vadd.f32 %v624_v63, %v1689_v49  ;;  %v827_v6 = vsel %vm699_vm1, %v508_v54, %v763_v58  ;;  %v829_v7 = vsel %vm701_vm2, %v621_v55, %v765_v59 }
  0xfd   : > { %vm700_vm3 = vcmp.ge.f32.partialorder %v510_v60, 0.0  ;;  %v764_v2 = vmul.f32 0.01, %v510_v60  ;;  %vm702_vm4 = vcmp.ge.f32.partialorder %v623_v61, 0.0  ;;  %v766_v3 = vmul.f32 0.01, %v623_v61  ;;  %v513_v4 = vpop.f32.mrf.mxu0  ;;  %v626_v5 = vpop.f32.mrf.mxu1 }
  0xfe   : > { %v767_v8 = vmul.f32 0.01, %v512_v0  ;;  %v769_v9 = vmul.f32 0.01, %v625_v1  ;;  %v514_v12 = vadd.f32 %v513_v4, %v1691_v52  ;;  %v627_v13 = vadd.f32 %v626_v5, %v1693_v53 }
  0xff   : > { %v828_v10 = vsel %vm700_vm3, %v510_v60, %v764_v2  ;;  %v830_v11 = vsel %vm702_vm4, %v623_v61, %v766_v3  ;;  %v517_v14 = vpop.f32.mrf.mxu0  ;;  %v630_v15 = vpop.f32.mrf.mxu1  ;;  %vm703_vm5 = vcmp.ge.f32.partialorder %v512_v0, 0.0  ;;  %vm705_vm6 = vcmp.ge.f32.partialorder %v625_v1, 0.0 }
 0x100   : > { %v1389_v16 = vpack.c.bf16 %v828_v10, %v827_v6  ;;  %v1390_v17 = vpack.c.bf16 %v830_v11, %v829_v7  ;;  %vm704_vm7 = vcmp.ge.f32.partialorder %v514_v12, 0.0  ;;  %v768_v18 = vmul.f32 0.01, %v514_v12 }
 0x101   : > { %vm706_vm8 = vcmp.ge.f32.partialorder %v627_v13, 0.0  ;;  %v770_v19 = vmul.f32 0.01, %v627_v13  ;;  %v519_v20 = vpop.f32.mrf.mxu0  ;;  %v632_v21 = vpop.f32.mrf.mxu1  ;;  %v518_v22 = vadd.f32 %v517_v14, %v1687_v48  ;;  %v631_v23 = vadd.f32 %v630_v15, %v1689_v49 }
 0x102   : > { %1083 = vst [vmem:[%s1705_s12] sm:$0xff] %v1389_v16  ;;  %1084 = vst [vmem:[%s1705_s12 + $0x8] sm:$0xff] %v1390_v17  ;;  %v520_v24 = vadd.f32 %v519_v20, %v1691_v52  ;;  %v633_v25 = vadd.f32 %v632_v21, %v1693_v53  ;;  %v831_v26 = vsel %vm703_vm5, %v512_v0, %v767_v8 }
 0x103   : > { %v833_v27 = vsel %vm705_vm6, %v625_v1, %v769_v9  ;;  %v832_v28 = vsel %vm704_vm7, %v514_v12, %v768_v18  ;;  %v834_v29 = vsel %vm706_vm8, %v627_v13, %v770_v19  ;;  %v521_v30 = vpop.f32.mrf.mxu0  ;;  %v634_v31 = vpop.f32.mrf.mxu1  ;;  %vm707_vm9 = vcmp.ge.f32.partialorder %v518_v22, 0.0 }
 0x104   : > { %v1391_v32 = vpack.c.bf16 %v832_v28, %v831_v26  ;;  %v1392_v33 = vpack.c.bf16 %v834_v29, %v833_v27  ;;  %v771_v34 = vmul.f32 0.01, %v518_v22  ;;  %vm709_vm10 = vcmp.ge.f32.partialorder %v631_v23, 0.0 }
 0x105   : > { %v773_v35 = vmul.f32 0.01, %v631_v23  ;;  %vm708_vm11 = vcmp.ge.f32.partialorder %v520_v24, 0.0  ;;  %v772_v36 = vmul.f32 0.01, %v520_v24  ;;  %v523_v37 = vpop.f32.mrf.mxu0  ;;  %v636_v38 = vpop.f32.mrf.mxu1  ;;  %vm710_vm12 = vcmp.ge.f32.partialorder %v633_v25, 0.0 }
 0x106   : > { %1085 = vst [vmem:[%s1705_s12 + $0x10] sm:$0xff] %v1391_v32  ;;  %1086 = vst [vmem:[%s1705_s12 + $0x18] sm:$0xff] %v1392_v33  ;;  %v835_v39 = vsel %vm707_vm9, %v518_v22, %v771_v34  ;;  %v774_v40 = vmul.f32 0.01, %v633_v25  ;;  %v522_v41 = vadd.f32 %v521_v30, %v1687_v48  ;;  %v635_v44 = vadd.f32 %v634_v31, %v1689_v49 }
 0x107   : > { %v837_v42 = vsel %vm709_vm10, %v631_v23, %v773_v35  ;;  %v836_v43 = vsel %vm708_vm11, %v520_v24, %v772_v36  ;;  %v524_v45 = vadd.f32 %v523_v37, %v1691_v52  ;;  %v527_v46 = vpop.f32.mrf.mxu0  ;;  %v640_v47 = vpop.f32.mrf.mxu1  ;;  %v637_v61 = vadd.f32 %v636_v38, %v1693_v53 }
 0x108   : > { %v1393_v50 = vpack.c.bf16 %v836_v43, %v835_v39  ;;  %v838_v51 = vsel %vm710_vm12, %v633_v25, %v774_v40  ;;  %vm711_vm13 = vcmp.ge.f32.partialorder %v522_v41, 0.0  ;;  %v775_v54 = vmul.f32 0.01, %v522_v41 }
 0x109   : > { %v1394_v55 = vpack.c.bf16 %v838_v51, %v837_v42  ;;  %vm713_vm14 = vcmp.ge.f32.partialorder %v635_v44, 0.0  ;;  %v777_v56 = vmul.f32 0.01, %v635_v44  ;;  %vm712_vm15 = vcmp.ge.f32.partialorder %v524_v45, 0.0  ;;  %v529_v57 = vpop.f32.mrf.mxu0  ;;  %v642_v58 = vpop.f32.mrf.mxu1 }
 0x10a   : > { %1087 = vst [vmem:[%s1705_s12 + $0x20] sm:$0xff] %v1393_v50  ;;  %v839_v59 = vsel %vm711_vm13, %v522_v41, %v775_v54  ;;  %v776_v60 = vmul.f32 0.01, %v524_v45  ;;  %v528_v62 = vadd.f32 %v527_v46, %v1687_v48  ;;  %v641_v0 = vadd.f32 %v640_v47, %v1689_v49 }
 0x10b   : > { %1088 = vst [vmem:[%s1705_s12 + $0x28] sm:$0xff] %v1394_v55  ;;  %v841_v63 = vsel %vm713_vm14, %v635_v44, %v777_v56  ;;  %v530_v1 = vadd.f32 %v529_v57, %v1691_v52  ;;  %v643_v2 = vadd.f32 %v642_v58, %v1693_v53  ;;  %v531_v3 = vpop.f32.mrf.mxu0  ;;  %v644_v4 = vpop.f32.mrf.mxu1  ;;  %vm714_vm0 = vcmp.ge.f32.partialorder %v637_v61, 0.0 }
 0x10c   : > { %v840_v5 = vsel %vm712_vm15, %v524_v45, %v776_v60  ;;  %v778_v6 = vmul.f32 0.01, %v637_v61  ;;  %vm715_vm1 = vcmp.ge.f32.partialorder %v528_v62, 0.0  ;;  %v779_v8 = vmul.f32 0.01, %v528_v62 }
 0x10d   : > { %v1395_v7 = vpack.c.bf16 %v840_v5, %v839_v59  ;;  %vm717_vm2 = vcmp.ge.f32.partialorder %v641_v0, 0.0  ;;  %v781_v9 = vmul.f32 0.01, %v641_v0  ;;  %v533_v10 = vpop.f32.mrf.mxu0  ;;  %v646_v11 = vpop.f32.mrf.mxu1  ;;  %vm716_vm3 = vcmp.ge.f32.partialorder %v530_v1, 0.0 }
 0x10e   : > { %v842_v12 = vsel %vm714_vm0, %v637_v61, %v778_v6  ;;  %v780_v13 = vmul.f32 0.01, %v530_v1  ;;  %vm718_vm4 = vcmp.ge.f32.partialorder %v643_v2, 0.0  ;;  %v843_v15 = vsel %vm715_vm1, %v528_v62, %v779_v8 }
 0x10f   : > { %1089 = vst [vmem:[%s1705_s12 + $0x30] sm:$0xff] %v1395_v7  ;;  %v1396_v14 = vpack.c.bf16 %v842_v12, %v841_v63  ;;  %v845_v16 = vsel %vm717_vm2, %v641_v0, %v781_v9  ;;  %v782_v17 = vmul.f32 0.01, %v643_v2  ;;  %v537_v18 = vpop.f32.mrf.mxu0  ;;  %v650_v19 = vpop.f32.mrf.mxu1  ;;  %v532_v21 = vadd.f32 %v531_v3, %v1687_v48 }
 0x110   : > { %v844_v20 = vsel %vm716_vm3, %v530_v1, %v780_v13  ;;  %v645_v22 = vadd.f32 %v644_v4, %v1689_v49  ;;  %v534_v23 = vadd.f32 %v533_v10, %v1691_v52  ;;  %v647_v26 = vadd.f32 %v646_v11, %v1693_v53 }
 0x111   : > { %1090 = vst [vmem:[%s1705_s12 + $0x38] sm:$0xff] %v1396_v14  ;;  %v1397_v24 = vpack.c.bf16 %v844_v20, %v843_v15  ;;  %v846_v25 = vsel %vm718_vm4, %v643_v2, %v782_v17  ;;  %v538_v27 = vadd.f32 %v537_v18, %v1687_v48  ;;  %v539_v28 = vpop.f32.mrf.mxu0  ;;  %v652_v29 = vpop.f32.mrf.mxu1  ;;  %vm719_vm5 = vcmp.ge.f32.partialorder %v532_v21, 0.0 }
 0x112   : > { %v1398_v30 = vpack.c.bf16 %v846_v25, %v845_v16  ;;  %v783_v31 = vmul.f32 0.01, %v532_v21  ;;  %vm721_vm6 = vcmp.ge.f32.partialorder %v645_v22, 0.0  ;;  %v785_v32 = vmul.f32 0.01, %v645_v22 }
 0x113   : > { %1091 = vst [vmem:[%s1705_s12 + $0x40] sm:$0xff] %v1397_v24  ;;  %vm720_vm7 = vcmp.ge.f32.partialorder %v534_v23, 0.0  ;;  %v784_v33 = vmul.f32 0.01, %v534_v23  ;;  %vm722_vm8 = vcmp.ge.f32.partialorder %v647_v26, 0.0  ;;  %v541_v34 = vpop.f32.mrf.mxu0  ;;  %v654_v35 = vpop.f32.mrf.mxu1  ;;  %vm723_vm9 = vcmp.ge.f32.partialorder %v538_v27, 0.0 }
 0x114   : > { %1092 = vst [vmem:[%s1705_s12 + $0x48] sm:$0xff] %v1398_v30  ;;  %v847_v36 = vsel %vm719_vm5, %v532_v21, %v783_v31  ;;  %v786_v37 = vmul.f32 0.01, %v647_v26  ;;  %v787_v38 = vmul.f32 0.01, %v538_v27  ;;  %v849_v39 = vsel %vm721_vm6, %v645_v22, %v785_v32 }
 0x115   : > { %v848_v40 = vsel %vm720_vm7, %v534_v23, %v784_v33  ;;  %v651_v41 = vadd.f32 %v650_v19, %v1689_v49  ;;  %v540_v42 = vadd.f32 %v539_v28, %v1691_v52  ;;  %v543_v43 = vpop.f32.mrf.mxu0  ;;  %v656_v44 = vpop.f32.mrf.mxu1  ;;  %v653_v50 = vadd.f32 %v652_v29, %v1693_v53 }
 0x116   : > { %v1399_v45 = vpack.c.bf16 %v848_v40, %v847_v36  ;;  %v850_v46 = vsel %vm722_vm8, %v647_v26, %v786_v37  ;;  %v851_v47 = vsel %vm723_vm9, %v538_v27, %v787_v38  ;;  %v542_v59 = vadd.f32 %v541_v34, %v1687_v48 }
 0x117   : > { %v1400_v51 = vpack.c.bf16 %v850_v46, %v849_v39  ;;  %vm725_vm10 = vcmp.ge.f32.partialorder %v651_v41, 0.0  ;;  %v789_v54 = vmul.f32 0.01, %v651_v41  ;;  %vm724_vm11 = vcmp.ge.f32.partialorder %v540_v42, 0.0  ;;  %v547_v55 = vpop.f32.mrf.mxu0  ;;  %v660_v56 = vpop.f32.mrf.mxu1 }
 0x118   : > { %1093 = vst [vmem:[%s1705_s12 + $0x50] sm:$0xff] %v1399_v45  ;;  %v788_v57 = vmul.f32 0.01, %v540_v42  ;;  %vm726_vm12 = vcmp.ge.f32.partialorder %v653_v50, 0.0  ;;  %v790_v58 = vmul.f32 0.01, %v653_v50  ;;  %v655_v61 = vadd.f32 %v654_v35, %v1689_v49 }
 0x119   : > { %1094 = vst [vmem:[%s1705_s12 + $0x58] sm:$0xff] %v1400_v51  ;;  %v853_v60 = vsel %vm725_vm10, %v651_v41, %v789_v54  ;;  %v544_v62 = vadd.f32 %v543_v43, %v1691_v52  ;;  %v657_v63 = vadd.f32 %v656_v44, %v1693_v53  ;;  %v549_v0 = vpop.f32.mrf.mxu0  ;;  %v662_v1 = vpop.f32.mrf.mxu1  ;;  %vm727_vm13 = vcmp.ge.f32.partialorder %v542_v59, 0.0 }
 0x11a   : > { %v852_v2 = vsel %vm724_vm11, %v540_v42, %v788_v57  ;;  %v854_v3 = vsel %vm726_vm12, %v653_v50, %v790_v58  ;;  %v791_v4 = vmul.f32 0.01, %v542_v59  ;;  %vm729_vm14 = vcmp.ge.f32.partialorder %v655_v61, 0.0 }
 0x11b   : > { %v1401_v5 = vpack.c.bf16 %v852_v2, %v851_v47  ;;  %v1402_v6 = vpack.c.bf16 %v854_v3, %v853_v60  ;;  %v793_v7 = vmul.f32 0.01, %v655_v61  ;;  %v551_v8 = vpop.f32.mrf.mxu0  ;;  %v664_v9 = vpop.f32.mrf.mxu1  ;;  %vm728_vm15 = vcmp.ge.f32.partialorder %v544_v62, 0.0 }
 0x11c   : > { %v855_v10 = vsel %vm727_vm13, %v542_v59, %v791_v4  ;;  %v792_v11 = vmul.f32 0.01, %v544_v62  ;;  %vm730_vm0 = vcmp.ge.f32.partialorder %v657_v63, 0.0  ;;  %v794_v13 = vmul.f32 0.01, %v657_v63 }
 0x11d   : > { %1095 = vst [vmem:[%s1705_s12 + $0x60] sm:$0xff] %v1401_v5  ;;  %1096 = vst [vmem:[%s1705_s12 + $0x68] sm:$0xff] %v1402_v6  ;;  %v857_v12 = vsel %vm729_vm14, %v655_v61, %v793_v7  ;;  %v548_v14 = vadd.f32 %v547_v55, %v1687_v48  ;;  %v661_v15 = vadd.f32 %v660_v56, %v1689_v49  ;;  %v553_v16 = vpop.f32.mrf.mxu0  ;;  %v666_v17 = vpop.f32.mrf.mxu1 }
 0x11e   : > { %v856_v18 = vsel %vm728_vm15, %v544_v62, %v792_v11  ;;  %v550_v19 = vadd.f32 %v549_v0, %v1691_v52  ;;  %v663_v20 = vadd.f32 %v662_v1, %v1693_v53  ;;  %v552_v21 = vadd.f32 %v551_v8, %v1687_v48 }
 0x11f   : > { %v1403_v22 = vpack.c.bf16 %v856_v18, %v855_v10  ;;  %v858_v23 = vsel %vm730_vm0, %v657_v63, %v794_v13  ;;  %vm731_vm1 = vcmp.ge.f32.partialorder %v548_v14, 0.0  ;;  %v795_v24 = vmul.f32 0.01, %v548_v14  ;;  %v557_v25 = vpop.f32.mrf.mxu0  ;;  %v670_v26 = vpop.f32.mrf.mxu1 }
 0x120   : > { %v1404_v27 = vpack.c.bf16 %v858_v23, %v857_v12  ;;  %vm733_vm2 = vcmp.ge.f32.partialorder %v661_v15, 0.0  ;;  %v797_v28 = vmul.f32 0.01, %v661_v15  ;;  %vm732_vm3 = vcmp.ge.f32.partialorder %v550_v19, 0.0 }
 0x121   : > { %1097 = vst [vmem:[%s1705_s12 + $0x70] sm:$0xff] %v1403_v22  ;;  %v859_v29 = vsel %vm731_vm1, %v548_v14, %v795_v24  ;;  %v796_v30 = vmul.f32 0.01, %v550_v19  ;;  %vm734_vm4 = vcmp.ge.f32.partialorder %v663_v20, 0.0  ;;  %v798_v31 = vmul.f32 0.01, %v663_v20  ;;  %v559_v32 = vpop.f32.mrf.mxu0  ;;  %v672_v33 = vpop.f32.mrf.mxu1 }
 0x122   : > { %1098 = vst [vmem:[%s1705_s12 + $0x78] sm:$0xff] %v1404_v27  ;;  %v861_v34 = vsel %vm733_vm2, %v661_v15, %v797_v28  ;;  %vm735_vm5 = vcmp.ge.f32.partialorder %v552_v21, 0.0  ;;  %v799_v35 = vmul.f32 0.01, %v552_v21  ;;  %v665_v36 = vadd.f32 %v664_v9, %v1689_v49 }
 0x123   : > { %v860_v37 = vsel %vm732_vm3, %v550_v19, %v796_v30  ;;  %v862_v38 = vsel %vm734_vm4, %v663_v20, %v798_v31  ;;  %v554_v39 = vadd.f32 %v553_v16, %v1691_v52  ;;  %v667_v40 = vadd.f32 %v666_v17, %v1693_v53  ;;  %v561_v41 = vpop.f32.mrf.mxu0  ;;  %v674_v42 = vpop.f32.mrf.mxu1 }
 0x124   : > { %v1405_v43 = vpack.c.bf16 %v860_v37, %v859_v29  ;;  %v1406_v44 = vpack.c.bf16 %v862_v38, %v861_v34  ;;  %v863_v45 = vsel %vm735_vm5, %v552_v21, %v799_v35  ;;  %vm737_vm6 = vcmp.ge.f32.partialorder %v665_v36, 0.0 }
 0x125   : > { %v801_v46 = vmul.f32 0.01, %v665_v36  ;;  %vm736_vm7 = vcmp.ge.f32.partialorder %v554_v39, 0.0  ;;  %v800_v47 = vmul.f32 0.01, %v554_v39  ;;  %vm738_vm8 = vcmp.ge.f32.partialorder %v667_v40, 0.0  ;;  %v563_v50 = vpop.f32.mrf.mxu0  ;;  %v676_v51 = vpop.f32.mrf.mxu1 }
 0x126   : > { %1099 = vst [vmem:[%s1705_s12 + $0x80] sm:$0xff] %v1405_v43  ;;  %1100 = vst [vmem:[%s1705_s12 + $0x88] sm:$0xff] %v1406_v44  ;;  %v802_v54 = vmul.f32 0.01, %v667_v40  ;;  %v558_v55 = vadd.f32 %v557_v25, %v1687_v48  ;;  %v671_v56 = vadd.f32 %v670_v26, %v1689_v49  ;;  %v560_v57 = vadd.f32 %v559_v32, %v1691_v52 }
 0x127   : > { %v865_v58 = vsel %vm737_vm6, %v665_v36, %v801_v46  ;;  %v864_v59 = vsel %vm736_vm7, %v554_v39, %v800_v47  ;;  %v673_v60 = vadd.f32 %v672_v33, %v1693_v53  ;;  %v562_v61 = vadd.f32 %v561_v41, %v1687_v48  ;;  %v567_v62 = vpop.f32.mrf.mxu0  ;;  %v680_v63 = vpop.f32.mrf.mxu1 }
 0x128   : > { %v1407_v0 = vpack.c.bf16 %v864_v59, %v863_v45  ;;  %v866_v1 = vsel %vm738_vm8, %v667_v40, %v802_v54  ;;  %vm739_vm9 = vcmp.ge.f32.partialorder %v558_v55, 0.0  ;;  %v803_v2 = vmul.f32 0.01, %v558_v55 }
 0x129   : > { %v1408_v3 = vpack.c.bf16 %v866_v1, %v865_v58  ;;  %vm741_vm10 = vcmp.ge.f32.partialorder %v671_v56, 0.0  ;;  %v805_v4 = vmul.f32 0.01, %v671_v56  ;;  %vm740_vm11 = vcmp.ge.f32.partialorder %v560_v57, 0.0  ;;  %v569_v5 = vpop.f32.mrf.mxu0  ;;  %v682_v6 = vpop.f32.mrf.mxu1 }
 0x12a   : > { %1101 = vst [vmem:[%s1705_s12 + $0x90] sm:$0xff] %v1407_v0  ;;  %v867_v7 = vsel %vm739_vm9, %v558_v55, %v803_v2  ;;  %v804_v8 = vmul.f32 0.01, %v560_v57  ;;  %vm742_vm12 = vcmp.ge.f32.partialorder %v673_v60, 0.0  ;;  %v806_v9 = vmul.f32 0.01, %v673_v60 }
 0x12b   : > { %1102 = vst [vmem:[%s1705_s12 + $0x98] sm:$0xff] %v1408_v3  ;;  %v869_v10 = vsel %vm741_vm10, %v671_v56, %v805_v4  ;;  %vm743_vm13 = vcmp.ge.f32.partialorder %v562_v61, 0.0  ;;  %v807_v11 = vmul.f32 0.01, %v562_v61  ;;  %v675_v12 = vadd.f32 %v674_v42, %v1689_v49  ;;  %v571_v13 = vpop.f32.mrf.mxu0  ;;  %v684_v14 = vpop.f32.mrf.mxu1 }
 0x12c   : > { %v868_v15 = vsel %vm740_vm11, %v560_v57, %v804_v8  ;;  %v870_v16 = vsel %vm742_vm12, %v673_v60, %v806_v9  ;;  %v564_v17 = vadd.f32 %v563_v50, %v1691_v52  ;;  %v677_v18 = vadd.f32 %v676_v51, %v1693_v53 }
 0x12d   : > { %v1409_v19 = vpack.c.bf16 %v868_v15, %v867_v7  ;;  %v1410_v20 = vpack.c.bf16 %v870_v16, %v869_v10  ;;  %v871_v21 = vsel %vm743_vm13, %v562_v61, %v807_v11  ;;  %vm745_vm14 = vcmp.ge.f32.partialorder %v675_v12, 0.0  ;;  %v573_v22 = vpop.f32.mrf.mxu0  ;;  %v686_v23 = vpop.f32.mrf.mxu1 }
 0x12e   : > { %v809_v24 = vmul.f32 0.01, %v675_v12  ;;  %vm744_vm15 = vcmp.ge.f32.partialorder %v564_v17, 0.0  ;;  %v808_v25 = vmul.f32 0.01, %v564_v17  ;;  %vm746_vm0 = vcmp.ge.f32.partialorder %v677_v18, 0.0 }
 0x12f   : > { %1103 = vst [vmem:[%s1705_s12 + $0xa0] sm:$0xff] %v1409_v19  ;;  %1104 = vst [vmem:[%s1705_s12 + $0xa8] sm:$0xff] %v1410_v20  ;;  %v810_v26 = vmul.f32 0.01, %v677_v18  ;;  %v568_v27 = vadd.f32 %v567_v62, %v1687_v48  ;;  %v681_v28 = vadd.f32 %v680_v63, %v1689_v49  ;;  %v570_v29 = vadd.f32 %v569_v5, %v1691_v52  ;;  %v577_v30 = vpop.f32.mrf.mxu0  ;;  %v690_v31 = vpop.f32.mrf.mxu1 }
 0x130   : > { %v873_v32 = vsel %vm745_vm14, %v675_v12, %v809_v24  ;;  %v872_v33 = vsel %vm744_vm15, %v564_v17, %v808_v25  ;;  %v683_v34 = vadd.f32 %v682_v6, %v1693_v53  ;;  %v572_v35 = vadd.f32 %v571_v13, %v1687_v48 }
 0x131   : > { %v1411_v36 = vpack.c.bf16 %v872_v33, %v871_v21  ;;  %v874_v37 = vsel %vm746_vm0, %v677_v18, %v810_v26  ;;  %vm747_vm1 = vcmp.ge.f32.partialorder %v568_v27, 0.0  ;;  %v811_v38 = vmul.f32 0.01, %v568_v27  ;;  %v579_v41 = vpop.f32.mrf.mxu0  ;;  %v692_v45 = vpop.f32.mrf.mxu1  ;;  %v1142_v33 = vld [vmem:[%s1705_s12 + $0x8] sm:$0xff] (%p1591_p6) }
 0x132   : > { %v1412_v39 = vpack.c.bf16 %v874_v37, %v873_v32  ;;  %vm749_vm2 = vcmp.ge.f32.partialorder %v681_v28, 0.0  ;;  %v813_v40 = vmul.f32 0.01, %v681_v28  ;;  %vm748_vm3 = vcmp.ge.f32.partialorder %v570_v29, 0.0  ;;  %v1150_v37 = vld [vmem:[%s1705_s12 + $0x28] sm:$0xff] (%p1591_p6)  ;;  %1143 = vst [vmem:[%s1805_s11 + $0x8] sm:$0xff] (%p1591_p6), %v1142_v33 }
 0x133   : > { %1105 = vst [vmem:[%s1705_s12 + $0xb0] sm:$0xff] %v1411_v36  ;;  %v875_v42 = vsel %vm747_vm1, %v568_v27, %v811_v38  ;;  %v812_v43 = vmul.f32 0.01, %v570_v29  ;;  %vm750_vm4 = vcmp.ge.f32.partialorder %v683_v34, 0.0  ;;  %v814_v44 = vmul.f32 0.01, %v683_v34  ;;  %v581_v60 = vpop.f32.mrf.mxu0  ;;  %v694_v63 = vpop.f32.mrf.mxu1 }
 0x134   : > { %1106 = vst [vmem:[%s1705_s12 + $0xb8] sm:$0xff] %v1412_v39  ;;  %v877_v46 = vsel %vm749_vm2, %v681_v28, %v813_v40  ;;  %vm751_vm5 = vcmp.ge.f32.partialorder %v572_v35, 0.0  ;;  %v815_v47 = vmul.f32 0.01, %v572_v35  ;;  %v685_v50 = vadd.f32 %v684_v14, %v1689_v49  ;;  %v1148_v36 = vld [vmem:[%s1705_s12 + $0x20] sm:$0xff] (%p1591_p6)  ;;  %1151 = vst [vmem:[%s1805_s11 + $0x48] sm:$0xff] (%p1591_p6), %v1150_v37 }
 0x135   : > { %v876_v51 = vsel %vm748_vm3, %v570_v29, %v812_v43  ;;  %v878_v54 = vsel %vm750_vm4, %v683_v34, %v814_v44  ;;  %v574_v55 = vadd.f32 %v573_v22, %v1691_v52  ;;  %v687_v56 = vadd.f32 %v686_v23, %v1693_v53  ;;  %v583_v13 = vpop.f32.mrf.mxu0  ;;  %v696_v14 = vpop.f32.mrf.mxu1  ;;  %v1144_v34 = vld [vmem:[%s1705_s12 + $0x10] sm:$0xff] (%p1591_p6)  ;;  %1149 = vst [vmem:[%s1805_s11 + $0x40] sm:$0xff] (%p1591_p6), %v1148_v36  ;;  %v1154_v39 = vld [vmem:[%s1705_s12 + $0x38] sm:$0xff] (%p1591_p6)  ;;  %v1156_v40 = vld [vmem:[%s1705_s12 + $0x40] sm:$0xff] (%p1591_p6) }
 0x136   : > { %v1413_v57 = vpack.c.bf16 %v876_v51, %v875_v42  ;;  %v1414_v58 = vpack.c.bf16 %v878_v54, %v877_v46  ;;  %v879_v59 = vsel %vm751_vm5, %v572_v35, %v815_v47  ;;  %vm753_vm6 = vcmp.ge.f32.partialorder %v685_v50, 0.0  ;;  %v1146_v35 = vld [vmem:[%s1705_s12 + $0x18] sm:$0xff] (%p1591_p6)  ;;  %1145 = vst [vmem:[%s1805_s11 + $0x20] sm:$0xff] (%p1591_p6), %v1144_v34  ;;  %v1152_v38 = vld [vmem:[%s1705_s12 + $0x30] sm:$0xff] (%p1591_p6)  ;;  %1155 = vst [vmem:[%s1805_s11 + $0x68] sm:$0xff] (%p1591_p6), %v1154_v39 }
 0x137   : > { %v817_v61 = vmul.f32 0.01, %v685_v50  ;;  %vm752_vm7 = vcmp.ge.f32.partialorder %v574_v55, 0.0  ;;  %v816_v62 = vmul.f32 0.01, %v574_v55  ;;  %vm754_vm8 = vcmp.ge.f32.partialorder %v687_v56, 0.0 }
 0x138   : > { %1107 = vst [vmem:[%s1705_s12 + $0xc0] sm:$0xff] %v1413_v57  ;;  %1108 = vst [vmem:[%s1705_s12 + $0xc8] sm:$0xff] %v1414_v58  ;;  %v818_v0 = vmul.f32 0.01, %v687_v56  ;;  %v578_v1 = vadd.f32 %v577_v30, %v1687_v48  ;;  %v691_v2 = vadd.f32 %v690_v31, %v1689_v49  ;;  %v580_v3 = vadd.f32 %v579_v41, %v1691_v52  ;;  %v1158_v41 = vld [vmem:[%s1705_s12 + $0x48] sm:$0xff] (%p1591_p6)  ;;  %v1160_v42 = vld [vmem:[%s1705_s12 + $0x50] sm:$0xff] (%p1591_p6) }
 0x139   : > { %v881_v4 = vsel %vm753_vm6, %v685_v50, %v817_v61  ;;  %v880_v5 = vsel %vm752_vm7, %v574_v55, %v816_v62  ;;  %v693_v6 = vadd.f32 %v692_v45, %v1693_v53  ;;  %v582_v7 = vadd.f32 %v581_v60, %v1687_v48  ;;  %1147 = vst [vmem:[%s1805_s11 + $0x28] sm:$0xff] (%p1591_p6), %v1146_v35  ;;  %v1162_v43 = vld [vmem:[%s1705_s12 + $0x58] sm:$0xff] (%p1591_p6)  ;;  %v1164_v44 = vld [vmem:[%s1705_s12 + $0x60] sm:$0xff] (%p1591_p6)  ;;  %v1166_v45 = vld [vmem:[%s1705_s12 + $0x68] sm:$0xff] (%p1591_p6) }
 0x13a   : > { %v1415_v8 = vpack.c.bf16 %v880_v5, %v879_v59  ;;  %v882_v9 = vsel %vm754_vm8, %v687_v56, %v818_v0  ;;  %vm755_vm9 = vcmp.ge.f32.partialorder %v578_v1, 0.0  ;;  %v819_v10 = vmul.f32 0.01, %v578_v1  ;;  %1153 = vst [vmem:[%s1805_s11 + $0x60] sm:$0xff] (%p1591_p6), %v1152_v38  ;;  %1157 = vst [vmem:[%s1805_s11 + $0x80] sm:$0xff] (%p1591_p6), %v1156_v40  ;;  %v1168_v46 = vld [vmem:[%s1705_s12 + $0x70] sm:$0xff] (%p1591_p6) }
 0x13b   : > { %v1416_v11 = vpack.c.bf16 %v882_v9, %v881_v4  ;;  %vm757_vm10 = vcmp.ge.f32.partialorder %v691_v2, 0.0  ;;  %v821_v12 = vmul.f32 0.01, %v691_v2  ;;  %vm756_vm11 = vcmp.ge.f32.partialorder %v580_v3, 0.0  ;;  %1159 = vst [vmem:[%s1805_s11 + $0x88] sm:$0xff] (%p1591_p6), %v1158_v41  ;;  %1161 = vst [vmem:[%s1805_s11 + $0xa0] sm:$0xff] (%p1591_p6), %v1160_v42 }
 0x13c   : > { %1109 = vst [vmem:[%s1705_s12 + $0xd0] sm:$0xff] %v1415_v8  ;;  %v820_v15 = vmul.f32 0.01, %v580_v3  ;;  %vm758_vm12 = vcmp.ge.f32.partialorder %v693_v6, 0.0  ;;  %v822_v16 = vmul.f32 0.01, %v693_v6  ;;  %v883_v17 = vsel %vm755_vm9, %v578_v1, %v819_v10 }
 0x13d   : > { %1110 = vst [vmem:[%s1705_s12 + $0xd8] sm:$0xff] %v1416_v11  ;;  %v885_v18 = vsel %vm757_vm10, %v691_v2, %v821_v12  ;;  %v823_v48 = vmul.f32 0.01, %v582_v7  ;;  %v695_v19 = vadd.f32 %v694_v63, %v1689_v49  ;;  %v584_v22 = vadd.f32 %v583_v13, %v1691_v52  ;;  %1163 = vst [vmem:[%s1805_s11 + $0xa8] sm:$0xff] (%p1591_p6), %v1162_v43  ;;  %v1170_v47 = vld [vmem:[%s1705_s12 + $0x78] sm:$0xff] (%p1591_p6)  ;;  %v1172_v50 = vld [vmem:[%s1705_s12 + $0x80] sm:$0xff] (%p1591_p6) }
 0x13e   : > { %v884_v20 = vsel %vm756_vm11, %v580_v3, %v820_v15  ;;  %v886_v21 = vsel %vm758_vm12, %v693_v6, %v822_v16  ;;  %v697_v23 = vadd.f32 %v696_v14, %v1693_v53  ;;  %vm759_vm13 = vcmp.ge.f32.partialorder %v582_v7, 0.0  ;;  %v1140_v53 = vld [vmem:[%s1705_s12] sm:$0xff] (%p1591_p6)  ;;  %1165 = vst [vmem:[%s1805_s11 + $0xc0] sm:$0xff] (%p1591_p6), %v1164_v44  ;;  %1167 = vst [vmem:[%s1805_s11 + $0xc8] sm:$0xff] (%p1591_p6), %v1166_v45  ;;  %v1174_v51 = vld [vmem:[%s1705_s12 + $0x88] sm:$0xff] (%p1591_p6) }
 0x13f   : > { %v1417_v24 = vpack.c.bf16 %v884_v20, %v883_v17  ;;  %v1418_v25 = vpack.c.bf16 %v886_v21, %v885_v18  ;;  %vm761_vm14 = vcmp.ge.f32.partialorder %v695_v19, 0.0  ;;  %v825_v26 = vmul.f32 0.01, %v695_v19  ;;  %1141 = vst [vmem:[%s1805_s11] sm:$0xff] (%p1591_p6), %v1140_v53  ;;  %1169 = vst [vmem:[%s1805_s11 + $0xe0] sm:$0xff] (%p1591_p6), %v1168_v46  ;;  %v1176_v54 = vld [vmem:[%s1705_s12 + $0x90] sm:$0xff] (%p1591_p6)  ;;  %v1178_v55 = vld [vmem:[%s1705_s12 + $0x98] sm:$0xff] (%p1591_p6) }
 0x140   : > { %vm760_vm15 = vcmp.ge.f32.partialorder %v584_v22, 0.0  ;;  %v824_v27 = vmul.f32 0.01, %v584_v22  ;;  %vm762_vm0 = vcmp.ge.f32.partialorder %v697_v23, 0.0  ;;  %v826_v28 = vmul.f32 0.01, %v697_v23 }
 0x141   : > { %1111 = vst [vmem:[%s1705_s12 + $0xe0] sm:$0xff] %v1417_v24  ;;  %1112 = vst [vmem:[%s1705_s12 + $0xe8] sm:$0xff] %v1418_v25  ;;  %v887_v49 = vsel %vm759_vm13, %v582_v7, %v823_v48  ;;  %v889_v30 = vsel %vm761_vm14, %v695_v19, %v825_v26  ;;  %1121 = sbr.rel (!%p1591_p6) target bundleno = 334 (0x14e), region = 59  ;;  %v1180_v56 = vld [vmem:[%s1705_s12 + $0xa0] sm:$0xff] (%p1591_p6)  ;;  %v1182_v57 = vld [vmem:[%s1705_s12 + $0xa8] sm:$0xff] (%p1591_p6) }
 0x142   : > { %v888_v29 = vsel %vm760_vm15, %v584_v22, %v824_v27  ;;  %v890_v52 = vsel %vm762_vm0, %v697_v23, %v826_v28  ;;  %1171 = vst [vmem:[%s1805_s11 + $0xe8] sm:$0xff] (%p1591_p6), %v1170_v47  ;;  %1173 = vst [vmem:[%s1805_s11 + $0x100] sm:$0xff] (%p1591_p6), %v1172_v50  ;;  %v1184_v58 = vld [vmem:[%s1705_s12 + $0xb0] sm:$0xff] (%p1591_p6)  ;;  %v1186_v59 = vld [vmem:[%s1705_s12 + $0xb8] sm:$0xff] (%p1591_p6) }
 0x143   : > { %v1419_v31 = vpack.c.bf16 %v888_v29, %v887_v49  ;;  %v1420_v32 = vpack.c.bf16 %v890_v52, %v889_v30  ;;  %1175 = vst [vmem:[%s1805_s11 + $0x108] sm:$0xff] (%p1591_p6), %v1174_v51  ;;  %1177 = vst [vmem:[%s1805_s11 + $0x120] sm:$0xff] (%p1591_p6), %v1176_v54  ;;  %v1188_v60 = vld [vmem:[%s1705_s12 + $0xc0] sm:$0xff] (%p1591_p6)  ;;  %v1190_v61 = vld [vmem:[%s1705_s12 + $0xc8] sm:$0xff] (%p1591_p6) }
 0x144   : > { %1179 = vst [vmem:[%s1805_s11 + $0x128] sm:$0xff] (%p1591_p6), %v1178_v55  ;;  %1181 = vst [vmem:[%s1805_s11 + $0x140] sm:$0xff] (%p1591_p6), %v1180_v56  ;;  %v1192_v62 = vld [vmem:[%s1705_s12 + $0xd0] sm:$0xff] (%p1591_p6)  ;;  %v1194_v63 = vld [vmem:[%s1705_s12 + $0xd8] sm:$0xff] (%p1591_p6) }
 0x145   : > { %1113 = vst [vmem:[%s1705_s12 + $0xf0] sm:$0xff] %v1419_v31  ;;  %1114 = vst [vmem:[%s1705_s12 + $0xf8] sm:$0xff] %v1420_v32 }
 0x146   : > { %1183 = vst [vmem:[%s1805_s11 + $0x148] sm:$0xff] %v1182_v57  ;;  %1185 = vst [vmem:[%s1805_s11 + $0x160] sm:$0xff] %v1184_v58 }
 0x147   : > { %1187 = vst [vmem:[%s1805_s11 + $0x168] sm:$0xff] %v1186_v59  ;;  %1189 = vst [vmem:[%s1805_s11 + $0x180] sm:$0xff] %v1188_v60 }
 0x148   : > { %1191 = vst [vmem:[%s1805_s11 + $0x188] sm:$0xff] %v1190_v61  ;;  %1193 = vst [vmem:[%s1805_s11 + $0x1a0] sm:$0xff] %v1192_v62  ;;  %v1196_v0 = vld [vmem:[%s1705_s12 + $0xe0] sm:$0xff]  ;;  %v1198_v1 = vld [vmem:[%s1705_s12 + $0xe8] sm:$0xff] }
 0x149   : > { %1195 = vst [vmem:[%s1805_s11 + $0x1a8] sm:$0xff] %v1194_v63  ;;  %1197 = vst [vmem:[%s1805_s11 + $0x1c0] sm:$0xff] %v1196_v0 }
 0x14a   : > { %1199 = vst [vmem:[%s1805_s11 + $0x1c8] sm:$0xff] %v1198_v1 }
 0x14c   : > { %v1200_v2 = vld [vmem:[%s1705_s12 + $0xf0] sm:$0xff]  ;;  %v1202_v3 = vld [vmem:[%s1705_s12 + $0xf8] sm:$0xff] }
 0x14d   : > { %1201 = vst [vmem:[%s1805_s11 + $0x1e0] sm:$0xff] %v1200_v2  ;;  %1203 = vst [vmem:[%s1805_s11 + $0x1e8] sm:$0xff] %v1202_v3 }
 0x14e PF: > { %s13_s16 = sadd.s32 1, %s1533_s16   ;;  %s1888_s12 = smov %s1521_s13 }
 0x14f   : > { %p10_p12 = scmp.ge.s32.totalorder %s13_s16, 4   ;;  %s1889_s13 = smov %s1596_s22 }
 0x150   : > { %s1890_s14 = smov %s1529_s15  ;;  %s1891_s15 = smov %s1893_s17 }
 0x151   :  { %12 = sbr.rel (!%p10_p12) target bundleno = 3 (0x3), region = 119 }

// kernel: mul.68
= control target key start
LH: loop header
LB: loop body
LE: loop exit
PB: predicated region body
PF: predicated region fallthrough
CT: control target
= control target key end

     0   :  { %v1150_v25 = vmov 0.0   ;;  %s1614_s0 = inlined_call_operand.vmem [shape: bf16[512,32], index: 0, kind: input, shape index: {}]   ;;  %s1615_s1 = inlined_call_operand.vmem [shape: bf16[512,32], index: 1, kind: input, shape index: {}]   ;;  %s1616_s2 = inlined_call_operand.vmem [shape: bf16[512,32], index: 2, kind: output, shape index: {}]  }
   0x1   :  { %v3_v0 = vld [vmem:[%s1614_s0] sm:$0xff]   ;;  %v963_v2 = vld [vmem:[%s1614_s0 + $0x8] sm:$0xff]   ;;  %v969_v8 = vld [vmem:[%s1614_s0 + $0x10] sm:$0xff]  }
   0x2   :  { %v6_v1 = vld [vmem:[%s1615_s1] sm:$0xff]   ;;  %v4_v3 = vunpack.c.l.bf16 %v3_v0  ;;  %v17_v5 = vunpack.c.h.bf16 %v3_v0  ;;  %v964_v7 = vld [vmem:[%s1615_s1 + $0x8] sm:$0xff]   ;;  %v970_v9 = vld [vmem:[%s1615_s1 + $0x10] sm:$0xff]   ;;  %v32_v10 = vunpack.c.l.bf16 %v963_v2  ;;  %v47_v12 = vunpack.c.h.bf16 %v963_v2 }
   0x3   :  { %v7_v4 = vunpack.c.l.bf16 %v6_v1  ;;  %v21_v6 = vunpack.c.h.bf16 %v6_v1  ;;  %v36_v11 = vunpack.c.l.bf16 %v964_v7  ;;  %v51_v13 = vunpack.c.h.bf16 %v964_v7  ;;  %v975_v14 = vld [vmem:[%s1614_s0 + $0x18] sm:$0xff]   ;;  %v981_v24 = vld [vmem:[%s1614_s0 + $0x20] sm:$0xff]   ;;  %v987_v35 = vld [vmem:[%s1614_s0 + $0x28] sm:$0xff]  }
   0x4   :  { %v62_v17 = vunpack.c.l.bf16 %v969_v8  ;;  %v66_v18 = vunpack.c.l.bf16 %v970_v9  ;;  %v976_v19 = vld [vmem:[%s1615_s1 + $0x18] sm:$0xff]   ;;  %v77_v22 = vunpack.c.h.bf16 %v969_v8  ;;  %v81_v23 = vunpack.c.h.bf16 %v970_v9  ;;  %v982_v30 = vld [vmem:[%s1615_s1 + $0x20] sm:$0xff]   ;;  %v988_v36 = vld [vmem:[%s1615_s1 + $0x28] sm:$0xff]  }
   0x5   :  { %v11_v15 = vmul.f32 %v7_v4, %v4_v3  ;;  %v25_v16 = vmul.f32 %v21_v6, %v17_v5  ;;  %v40_v20 = vmul.f32 %v36_v11, %v32_v10  ;;  %v55_v21 = vmul.f32 %v51_v13, %v47_v12  ;;  %v993_v45 = vld [vmem:[%s1614_s0 + $0x30] sm:$0xff]   ;;  %v999_v55 = vld [vmem:[%s1614_s0 + $0x38] sm:$0xff]   ;;  %v1005_v1 = vld [vmem:[%s1614_s0 + $0x40] sm:$0xff]  }
   0x6   :  { %v70_v28 = vmul.f32 %v66_v18, %v62_v17  ;;  %v92_v29 = vunpack.c.l.bf16 %v975_v14  ;;  %v85_v33 = vmul.f32 %v81_v23, %v77_v22  ;;  %v96_v34 = vunpack.c.l.bf16 %v976_v19  ;;  %v994_v50 = vld [vmem:[%s1615_s1 + $0x30] sm:$0xff]   ;;  %v1000_v60 = vld [vmem:[%s1615_s1 + $0x38] sm:$0xff]   ;;  %v1006_v2 = vld [vmem:[%s1615_s1 + $0x40] sm:$0xff]  }
   0x7   :  { %v13_v26 = vpack.c.bf16 %v1150_v25, %v11_v15  ;;  %v28_v27 = vpack.c.bf16 %v1150_v25, %v25_v16  ;;  %v43_v31 = vpack.c.bf16 %v1150_v25, %v40_v20  ;;  %v58_v32 = vpack.c.bf16 %v1150_v25, %v55_v21  ;;  %v1011_v11 = vld [vmem:[%s1614_s0 + $0x48] sm:$0xff]   ;;  %v1017_v21 = vld [vmem:[%s1614_s0 + $0x50] sm:$0xff]  }
   0x8   :  { %v73_v37 = vpack.c.bf16 %v1150_v25, %v70_v28  ;;  %v107_v38 = vunpack.c.h.bf16 %v975_v14  ;;  %v111_v39 = vunpack.c.h.bf16 %v976_v19  ;;  %v122_v40 = vunpack.c.l.bf16 %v981_v24  ;;  %v1012_v16 = vld [vmem:[%s1615_s1 + $0x48] sm:$0xff]  }
   0x9   :  { %14 = vst [vmem:[%s1616_s2] sm:$0xf] %v13_v26  ;;  %962 = vst [vmem:[%s1616_s2 + $0x4] sm:$0xf] %v28_v27  ;;  %v88_v41 = vpack.c.bf16 %v1150_v25, %v85_v33  ;;  %v100_v42 = vmul.f32 %v96_v34, %v92_v29  ;;  %v126_v43 = vunpack.c.l.bf16 %v982_v30  ;;  %v137_v44 = vunpack.c.h.bf16 %v981_v24  ;;  %v1018_v27 = vld [vmem:[%s1615_s1 + $0x50] sm:$0xff]   ;;  %v1024_v33 = vld [vmem:[%s1615_s1 + $0x58] sm:$0xff]  }
   0xa   :  { %965 = vst [vmem:[%s1616_s2 + $0x8] sm:$0xf] %v43_v31  ;;  %968 = vst [vmem:[%s1616_s2 + $0xc] sm:$0xf] %v58_v32  ;;  %v115_v46 = vmul.f32 %v111_v39, %v107_v38  ;;  %v141_v47 = vunpack.c.h.bf16 %v982_v30  ;;  %v152_v48 = vunpack.c.l.bf16 %v987_v35  ;;  %v156_v49 = vunpack.c.l.bf16 %v988_v36  ;;  %v1023_v32 = vld [vmem:[%s1614_s0 + $0x58] sm:$0xff]  }
   0xb   :  { %971 = vst [vmem:[%s1616_s2 + $0x10] sm:$0xf] %v73_v37  ;;  %974 = vst [vmem:[%s1616_s2 + $0x14] sm:$0xf] %v88_v41  ;;  %v103_v51 = vpack.c.bf16 %v1150_v25, %v100_v42  ;;  %v130_v52 = vmul.f32 %v126_v43, %v122_v40  ;;  %v167_v53 = vunpack.c.h.bf16 %v987_v35  ;;  %v171_v54 = vunpack.c.h.bf16 %v988_v36  ;;  %v1029_v42 = vld [vmem:[%s1614_s0 + $0x60] sm:$0xff]  }
   0xc   :  { %v118_v56 = vpack.c.bf16 %v1150_v25, %v115_v46  ;;  %v145_v57 = vmul.f32 %v141_v47, %v137_v44  ;;  %v160_v58 = vmul.f32 %v156_v49, %v152_v48  ;;  %v182_v59 = vunpack.c.l.bf16 %v993_v45  ;;  %v1030_v47 = vld [vmem:[%s1615_s1 + $0x60] sm:$0xff]  }
   0xd   :  { %977 = vst [vmem:[%s1616_s2 + $0x18] sm:$0xf] %v103_v51  ;;  %v133_v61 = vpack.c.bf16 %v1150_v25, %v130_v52  ;;  %v175_v62 = vmul.f32 %v171_v54, %v167_v53  ;;  %v186_v63 = vunpack.c.l.bf16 %v994_v50  ;;  %v197_v0 = vunpack.c.h.bf16 %v993_v45  ;;  %v1035_v52 = vld [vmem:[%s1614_s0 + $0x68] sm:$0xff]  }
   0xe   :  { %980 = vst [vmem:[%s1616_s2 + $0x1c] sm:$0xf] %v118_v56  ;;  %v148_v3 = vpack.c.bf16 %v1150_v25, %v145_v57  ;;  %v163_v4 = vpack.c.bf16 %v1150_v25, %v160_v58  ;;  %v201_v5 = vunpack.c.h.bf16 %v994_v50  ;;  %v212_v6 = vunpack.c.l.bf16 %v999_v55  ;;  %v1036_v57 = vld [vmem:[%s1615_s1 + $0x68] sm:$0xff]  }
   0xf   :  { %983 = vst [vmem:[%s1616_s2 + $0x20] sm:$0xf] %v133_v61  ;;  %v178_v7 = vpack.c.bf16 %v1150_v25, %v175_v62  ;;  %v190_v8 = vmul.f32 %v186_v63, %v182_v59  ;;  %v216_v9 = vunpack.c.l.bf16 %v1000_v60  ;;  %v227_v10 = vunpack.c.h.bf16 %v999_v55  ;;  %v1041_v62 = vld [vmem:[%s1614_s0 + $0x70] sm:$0xff]  }
  0x10   :  { %986 = vst [vmem:[%s1616_s2 + $0x24] sm:$0xf] %v148_v3  ;;  %989 = vst [vmem:[%s1616_s2 + $0x28] sm:$0xf] %v163_v4  ;;  %v205_v12 = vmul.f32 %v201_v5, %v197_v0  ;;  %v231_v13 = vunpack.c.h.bf16 %v1000_v60  ;;  %v242_v14 = vunpack.c.l.bf16 %v1005_v1  ;;  %v246_v15 = vunpack.c.l.bf16 %v1006_v2  ;;  %v1042_v63 = vld [vmem:[%s1615_s1 + $0x70] sm:$0xff]  }
  0x11   :  { %992 = vst [vmem:[%s1616_s2 + $0x2c] sm:$0xf] %v178_v7  ;;  %v193_v17 = vpack.c.bf16 %v1150_v25, %v190_v8  ;;  %v220_v18 = vmul.f32 %v216_v9, %v212_v6  ;;  %v257_v19 = vunpack.c.h.bf16 %v1005_v1  ;;  %v261_v20 = vunpack.c.h.bf16 %v1006_v2  ;;  %v1047_v8 = vld [vmem:[%s1614_s0 + $0x78] sm:$0xff]  }
  0x12   :  { %v208_v22 = vpack.c.bf16 %v1150_v25, %v205_v12  ;;  %v235_v23 = vmul.f32 %v231_v13, %v227_v10  ;;  %v250_v24 = vmul.f32 %v246_v15, %v242_v14  ;;  %v272_v26 = vunpack.c.l.bf16 %v1011_v11  ;;  %v1048_v13 = vld [vmem:[%s1615_s1 + $0x78] sm:$0xff]  }
  0x13   :  { %995 = vst [vmem:[%s1616_s2 + $0x30] sm:$0xf] %v193_v17  ;;  %v223_v28 = vpack.c.bf16 %v1150_v25, %v220_v18  ;;  %v265_v29 = vmul.f32 %v261_v20, %v257_v19  ;;  %v276_v30 = vunpack.c.l.bf16 %v1012_v16  ;;  %v287_v31 = vunpack.c.h.bf16 %v1011_v11  ;;  %v1053_v18 = vld [vmem:[%s1614_s0 + $0x80] sm:$0xff]  }
  0x14   :  { %998 = vst [vmem:[%s1616_s2 + $0x34] sm:$0xf] %v208_v22  ;;  %v238_v34 = vpack.c.bf16 %v1150_v25, %v235_v23  ;;  %v253_v35 = vpack.c.bf16 %v1150_v25, %v250_v24  ;;  %v291_v36 = vunpack.c.h.bf16 %v1012_v16  ;;  %v302_v37 = vunpack.c.l.bf16 %v1017_v21  ;;  %v1054_v23 = vld [vmem:[%s1615_s1 + $0x80] sm:$0xff]  }
  0x15   :  { %1001 = vst [vmem:[%s1616_s2 + $0x38] sm:$0xf] %v223_v28  ;;  %v268_v38 = vpack.c.bf16 %v1150_v25, %v265_v29  ;;  %v280_v39 = vmul.f32 %v276_v30, %v272_v26  ;;  %v306_v40 = vunpack.c.l.bf16 %v1018_v27  ;;  %v317_v41 = vunpack.c.h.bf16 %v1017_v21  ;;  %v1059_v29 = vld [vmem:[%s1614_s0 + $0x88] sm:$0xff]  }
  0x16   :  { %1004 = vst [vmem:[%s1616_s2 + $0x3c] sm:$0xf] %v238_v34  ;;  %1007 = vst [vmem:[%s1616_s2 + $0x40] sm:$0xf] %v253_v35  ;;  %v295_v43 = vmul.f32 %v291_v36, %v287_v31  ;;  %v321_v44 = vunpack.c.h.bf16 %v1018_v27  ;;  %v332_v45 = vunpack.c.l.bf16 %v1023_v32  ;;  %v336_v46 = vunpack.c.l.bf16 %v1024_v33  ;;  %v1060_v30 = vld [vmem:[%s1615_s1 + $0x88] sm:$0xff]  }
  0x17   :  { %1010 = vst [vmem:[%s1616_s2 + $0x44] sm:$0xf] %v268_v38  ;;  %v283_v48 = vpack.c.bf16 %v1150_v25, %v280_v39  ;;  %v310_v49 = vmul.f32 %v306_v40, %v302_v37  ;;  %v347_v50 = vunpack.c.h.bf16 %v1023_v32  ;;  %v351_v51 = vunpack.c.h.bf16 %v1024_v33  ;;  %v1065_v39 = vld [vmem:[%s1614_s0 + $0x90] sm:$0xff]  }
  0x18   :  { %v298_v53 = vpack.c.bf16 %v1150_v25, %v295_v43  ;;  %v325_v54 = vmul.f32 %v321_v44, %v317_v41  ;;  %v340_v55 = vmul.f32 %v336_v46, %v332_v45  ;;  %v362_v56 = vunpack.c.l.bf16 %v1029_v42  ;;  %v1066_v44 = vld [vmem:[%s1615_s1 + $0x90] sm:$0xff]  }
  0x19   :  { %1013 = vst [vmem:[%s1616_s2 + $0x48] sm:$0xf] %v283_v48  ;;  %v313_v58 = vpack.c.bf16 %v1150_v25, %v310_v49  ;;  %v355_v59 = vmul.f32 %v351_v51, %v347_v50  ;;  %v366_v60 = vunpack.c.l.bf16 %v1030_v47  ;;  %v377_v61 = vunpack.c.h.bf16 %v1029_v42  ;;  %v1071_v49 = vld [vmem:[%s1614_s0 + $0x98] sm:$0xff]  }
  0x1a   :  { %1016 = vst [vmem:[%s1616_s2 + $0x4c] sm:$0xf] %v298_v53  ;;  %v328_v0 = vpack.c.bf16 %v1150_v25, %v325_v54  ;;  %v343_v1 = vpack.c.bf16 %v1150_v25, %v340_v55  ;;  %v381_v2 = vunpack.c.h.bf16 %v1030_v47  ;;  %v392_v3 = vunpack.c.l.bf16 %v1035_v52  ;;  %v1072_v54 = vld [vmem:[%s1615_s1 + $0x98] sm:$0xff]  }
  0x1b   :  { %1019 = vst [vmem:[%s1616_s2 + $0x50] sm:$0xf] %v313_v58  ;;  %v358_v4 = vpack.c.bf16 %v1150_v25, %v355_v59  ;;  %v370_v5 = vmul.f32 %v366_v60, %v362_v56  ;;  %v396_v6 = vunpack.c.l.bf16 %v1036_v57  ;;  %v407_v7 = vunpack.c.h.bf16 %v1035_v52  ;;  %v1077_v59 = vld [vmem:[%s1614_s0 + $0xa0] sm:$0xff]  }
  0x1c   :  { %1022 = vst [vmem:[%s1616_s2 + $0x54] sm:$0xf] %v328_v0  ;;  %1025 = vst [vmem:[%s1616_s2 + $0x58] sm:$0xf] %v343_v1  ;;  %v385_v9 = vmul.f32 %v381_v2, %v377_v61  ;;  %v411_v10 = vunpack.c.h.bf16 %v1036_v57  ;;  %v422_v11 = vunpack.c.l.bf16 %v1041_v62  ;;  %v426_v12 = vunpack.c.l.bf16 %v1042_v63  ;;  %v1078_v60 = vld [vmem:[%s1615_s1 + $0xa0] sm:$0xff]  }
  0x1d   :  { %1028 = vst [vmem:[%s1616_s2 + $0x5c] sm:$0xf] %v358_v4  ;;  %v373_v14 = vpack.c.bf16 %v1150_v25, %v370_v5  ;;  %v400_v15 = vmul.f32 %v396_v6, %v392_v3  ;;  %v437_v16 = vunpack.c.h.bf16 %v1041_v62  ;;  %v441_v17 = vunpack.c.h.bf16 %v1042_v63  ;;  %v1083_v5 = vld [vmem:[%s1614_s0 + $0xa8] sm:$0xff]  }
  0x1e   :  { %v388_v19 = vpack.c.bf16 %v1150_v25, %v385_v9  ;;  %v415_v20 = vmul.f32 %v411_v10, %v407_v7  ;;  %v430_v21 = vmul.f32 %v426_v12, %v422_v11  ;;  %v452_v22 = vunpack.c.l.bf16 %v1047_v8  ;;  %v1084_v10 = vld [vmem:[%s1615_s1 + $0xa8] sm:$0xff]  }
  0x1f   :  { %1031 = vst [vmem:[%s1616_s2 + $0x60] sm:$0xf] %v373_v14  ;;  %v403_v24 = vpack.c.bf16 %v1150_v25, %v400_v15  ;;  %v445_v26 = vmul.f32 %v441_v17, %v437_v16  ;;  %v456_v27 = vunpack.c.l.bf16 %v1048_v13  ;;  %v467_v28 = vunpack.c.h.bf16 %v1047_v8  ;;  %v1089_v15 = vld [vmem:[%s1614_s0 + $0xb0] sm:$0xff]  }
  0x20   :  { %1034 = vst [vmem:[%s1616_s2 + $0x64] sm:$0xf] %v388_v19  ;;  %v418_v31 = vpack.c.bf16 %v1150_v25, %v415_v20  ;;  %v433_v32 = vpack.c.bf16 %v1150_v25, %v430_v21  ;;  %v471_v33 = vunpack.c.h.bf16 %v1048_v13  ;;  %v482_v34 = vunpack.c.l.bf16 %v1053_v18  ;;  %v1090_v20 = vld [vmem:[%s1615_s1 + $0xb0] sm:$0xff]  }
  0x21   :  { %1037 = vst [vmem:[%s1616_s2 + $0x68] sm:$0xf] %v403_v24  ;;  %v448_v35 = vpack.c.bf16 %v1150_v25, %v445_v26  ;;  %v460_v36 = vmul.f32 %v456_v27, %v452_v22  ;;  %v486_v37 = vunpack.c.l.bf16 %v1054_v23  ;;  %v497_v38 = vunpack.c.h.bf16 %v1053_v18  ;;  %v1095_v26 = vld [vmem:[%s1614_s0 + $0xb8] sm:$0xff]  }
  0x22   :  { %1040 = vst [vmem:[%s1616_s2 + $0x6c] sm:$0xf] %v418_v31  ;;  %1043 = vst [vmem:[%s1616_s2 + $0x70] sm:$0xf] %v433_v32  ;;  %v475_v40 = vmul.f32 %v471_v33, %v467_v28  ;;  %v501_v41 = vunpack.c.h.bf16 %v1054_v23  ;;  %v512_v42 = vunpack.c.l.bf16 %v1059_v29  ;;  %v516_v43 = vunpack.c.l.bf16 %v1060_v30  ;;  %v1096_v27 = vld [vmem:[%s1615_s1 + $0xb8] sm:$0xff]  }
  0x23   :  { %1046 = vst [vmem:[%s1616_s2 + $0x74] sm:$0xf] %v448_v35  ;;  %v463_v45 = vpack.c.bf16 %v1150_v25, %v460_v36  ;;  %v490_v46 = vmul.f32 %v486_v37, %v482_v34  ;;  %v527_v47 = vunpack.c.h.bf16 %v1059_v29  ;;  %v531_v48 = vunpack.c.h.bf16 %v1060_v30  ;;  %v1101_v36 = vld [vmem:[%s1614_s0 + $0xc0] sm:$0xff]  }
  0x24   :  { %v478_v50 = vpack.c.bf16 %v1150_v25, %v475_v40  ;;  %v505_v51 = vmul.f32 %v501_v41, %v497_v38  ;;  %v520_v52 = vmul.f32 %v516_v43, %v512_v42  ;;  %v542_v53 = vunpack.c.l.bf16 %v1065_v39  ;;  %v1102_v41 = vld [vmem:[%s1615_s1 + $0xc0] sm:$0xff]  }
  0x25   :  { %1049 = vst [vmem:[%s1616_s2 + $0x78] sm:$0xf] %v463_v45  ;;  %v493_v55 = vpack.c.bf16 %v1150_v25, %v490_v46  ;;  %v535_v56 = vmul.f32 %v531_v48, %v527_v47  ;;  %v546_v57 = vunpack.c.l.bf16 %v1066_v44  ;;  %v557_v58 = vunpack.c.h.bf16 %v1065_v39  ;;  %v1107_v46 = vld [vmem:[%s1614_s0 + $0xc8] sm:$0xff]  }
  0x26   :  { %1052 = vst [vmem:[%s1616_s2 + $0x7c] sm:$0xf] %v478_v50  ;;  %v508_v61 = vpack.c.bf16 %v1150_v25, %v505_v51  ;;  %v523_v62 = vpack.c.bf16 %v1150_v25, %v520_v52  ;;  %v561_v63 = vunpack.c.h.bf16 %v1066_v44  ;;  %v572_v0 = vunpack.c.l.bf16 %v1071_v49  ;;  %v1108_v51 = vld [vmem:[%s1615_s1 + $0xc8] sm:$0xff]  }
  0x27   :  { %1055 = vst [vmem:[%s1616_s2 + $0x80] sm:$0xf] %v493_v55  ;;  %v538_v1 = vpack.c.bf16 %v1150_v25, %v535_v56  ;;  %v550_v2 = vmul.f32 %v546_v57, %v542_v53  ;;  %v576_v3 = vunpack.c.l.bf16 %v1072_v54  ;;  %v587_v4 = vunpack.c.h.bf16 %v1071_v49  ;;  %v1113_v56 = vld [vmem:[%s1614_s0 + $0xd0] sm:$0xff]  }
  0x28   :  { %1058 = vst [vmem:[%s1616_s2 + $0x84] sm:$0xf] %v508_v61  ;;  %1061 = vst [vmem:[%s1616_s2 + $0x88] sm:$0xf] %v523_v62  ;;  %v565_v6 = vmul.f32 %v561_v63, %v557_v58  ;;  %v591_v7 = vunpack.c.h.bf16 %v1072_v54  ;;  %v602_v8 = vunpack.c.l.bf16 %v1077_v59  ;;  %v606_v9 = vunpack.c.l.bf16 %v1078_v60  ;;  %v1114_v57 = vld [vmem:[%s1615_s1 + $0xd0] sm:$0xff]  }
  0x29   :  { %1064 = vst [vmem:[%s1616_s2 + $0x8c] sm:$0xf] %v538_v1  ;;  %v553_v11 = vpack.c.bf16 %v1150_v25, %v550_v2  ;;  %v580_v12 = vmul.f32 %v576_v3, %v572_v0  ;;  %v617_v13 = vunpack.c.h.bf16 %v1077_v59  ;;  %v621_v14 = vunpack.c.h.bf16 %v1078_v60  ;;  %v1119_v2 = vld [vmem:[%s1614_s0 + $0xd8] sm:$0xff]  }
  0x2a   :  { %v568_v16 = vpack.c.bf16 %v1150_v25, %v565_v6  ;;  %v595_v17 = vmul.f32 %v591_v7, %v587_v4  ;;  %v610_v18 = vmul.f32 %v606_v9, %v602_v8  ;;  %v632_v19 = vunpack.c.l.bf16 %v1083_v5  ;;  %v1120_v7 = vld [vmem:[%s1615_s1 + $0xd8] sm:$0xff]  }
  0x2b   :  { %1067 = vst [vmem:[%s1616_s2 + $0x90] sm:$0xf] %v553_v11  ;;  %v583_v21 = vpack.c.bf16 %v1150_v25, %v580_v12  ;;  %v625_v22 = vmul.f32 %v621_v14, %v617_v13  ;;  %v636_v23 = vunpack.c.l.bf16 %v1084_v10  ;;  %v647_v24 = vunpack.c.h.bf16 %v1083_v5  ;;  %v1125_v12 = vld [vmem:[%s1614_s0 + $0xe0] sm:$0xff]  }
  0x2c   :  { %1070 = vst [vmem:[%s1616_s2 + $0x94] sm:$0xf] %v568_v16  ;;  %v598_v28 = vpack.c.bf16 %v1150_v25, %v595_v17  ;;  %v613_v29 = vpack.c.bf16 %v1150_v25, %v610_v18  ;;  %v651_v30 = vunpack.c.h.bf16 %v1084_v10  ;;  %v662_v31 = vunpack.c.l.bf16 %v1089_v15  ;;  %v1126_v17 = vld [vmem:[%s1615_s1 + $0xe0] sm:$0xff]  }
  0x2d   :  { %1073 = vst [vmem:[%s1616_s2 + $0x98] sm:$0xf] %v583_v21  ;;  %v628_v32 = vpack.c.bf16 %v1150_v25, %v625_v22  ;;  %v640_v33 = vmul.f32 %v636_v23, %v632_v19  ;;  %v666_v34 = vunpack.c.l.bf16 %v1090_v20  ;;  %v677_v35 = vunpack.c.h.bf16 %v1089_v15  ;;  %v1131_v22 = vld [vmem:[%s1614_s0 + $0xe8] sm:$0xff]  }
  0x2e   :  { %1076 = vst [vmem:[%s1616_s2 + $0x9c] sm:$0xf] %v598_v28  ;;  %1079 = vst [vmem:[%s1616_s2 + $0xa0] sm:$0xf] %v613_v29  ;;  %v655_v37 = vmul.f32 %v651_v30, %v647_v24  ;;  %v681_v38 = vunpack.c.h.bf16 %v1090_v20  ;;  %v692_v39 = vunpack.c.l.bf16 %v1095_v26  ;;  %v696_v40 = vunpack.c.l.bf16 %v1096_v27  ;;  %v1132_v23 = vld [vmem:[%s1615_s1 + $0xe8] sm:$0xff]  }
  0x2f   :  { %1082 = vst [vmem:[%s1616_s2 + $0xa4] sm:$0xf] %v628_v32  ;;  %v643_v42 = vpack.c.bf16 %v1150_v25, %v640_v33  ;;  %v670_v43 = vmul.f32 %v666_v34, %v662_v31  ;;  %v707_v44 = vunpack.c.h.bf16 %v1095_v26  ;;  %v711_v45 = vunpack.c.h.bf16 %v1096_v27  ;;  %v1137_v33 = vld [vmem:[%s1614_s0 + $0xf0] sm:$0xff]  }
  0x30   :  { %v658_v47 = vpack.c.bf16 %v1150_v25, %v655_v37  ;;  %v685_v48 = vmul.f32 %v681_v38, %v677_v35  ;;  %v700_v49 = vmul.f32 %v696_v40, %v692_v39  ;;  %v722_v50 = vunpack.c.l.bf16 %v1101_v36  ;;  %v1138_v38 = vld [vmem:[%s1615_s1 + $0xf0] sm:$0xff]  }
  0x31   :  { %1085 = vst [vmem:[%s1616_s2 + $0xa8] sm:$0xf] %v643_v42  ;;  %v673_v52 = vpack.c.bf16 %v1150_v25, %v670_v43  ;;  %v715_v53 = vmul.f32 %v711_v45, %v707_v44  ;;  %v726_v54 = vunpack.c.l.bf16 %v1102_v41  ;;  %v737_v55 = vunpack.c.h.bf16 %v1101_v36  ;;  %v1143_v43 = vld [vmem:[%s1614_s0 + $0xf8] sm:$0xff]  }
  0x32   :  { %1088 = vst [vmem:[%s1616_s2 + $0xac] sm:$0xf] %v658_v47  ;;  %v688_v58 = vpack.c.bf16 %v1150_v25, %v685_v48  ;;  %v703_v59 = vpack.c.bf16 %v1150_v25, %v700_v49  ;;  %v741_v60 = vunpack.c.h.bf16 %v1102_v41  ;;  %v752_v61 = vunpack.c.l.bf16 %v1107_v46  ;;  %v1144_v48 = vld [vmem:[%s1615_s1 + $0xf8] sm:$0xff]  }
  0x33   :  { %1091 = vst [vmem:[%s1616_s2 + $0xb0] sm:$0xf] %v673_v52  ;;  %v718_v62 = vpack.c.bf16 %v1150_v25, %v715_v53  ;;  %v730_v63 = vmul.f32 %v726_v54, %v722_v50  ;;  %v756_v0 = vunpack.c.l.bf16 %v1108_v51  ;;  %v767_v1 = vunpack.c.h.bf16 %v1107_v46 }
  0x34   :  { %1094 = vst [vmem:[%s1616_s2 + $0xb4] sm:$0xf] %v688_v58  ;;  %1097 = vst [vmem:[%s1616_s2 + $0xb8] sm:$0xf] %v703_v59  ;;  %v745_v3 = vmul.f32 %v741_v60, %v737_v55  ;;  %v771_v4 = vunpack.c.h.bf16 %v1108_v51  ;;  %v782_v5 = vunpack.c.l.bf16 %v1113_v56  ;;  %v786_v6 = vunpack.c.l.bf16 %v1114_v57 }
  0x35   :  { %1100 = vst [vmem:[%s1616_s2 + $0xbc] sm:$0xf] %v718_v62  ;;  %v733_v8 = vpack.c.bf16 %v1150_v25, %v730_v63  ;;  %v760_v9 = vmul.f32 %v756_v0, %v752_v61  ;;  %v797_v10 = vunpack.c.h.bf16 %v1113_v56  ;;  %v801_v11 = vunpack.c.h.bf16 %v1114_v57 }
  0x36   :  { %v748_v13 = vpack.c.bf16 %v1150_v25, %v745_v3  ;;  %v775_v14 = vmul.f32 %v771_v4, %v767_v1  ;;  %v790_v15 = vmul.f32 %v786_v6, %v782_v5  ;;  %v812_v16 = vunpack.c.l.bf16 %v1119_v2 }
  0x37   :  { %1103 = vst [vmem:[%s1616_s2 + $0xc0] sm:$0xf] %v733_v8  ;;  %v763_v18 = vpack.c.bf16 %v1150_v25, %v760_v9  ;;  %v805_v19 = vmul.f32 %v801_v11, %v797_v10  ;;  %v816_v20 = vunpack.c.l.bf16 %v1120_v7  ;;  %v827_v21 = vunpack.c.h.bf16 %v1119_v2 }
  0x38   :  { %1106 = vst [vmem:[%s1616_s2 + $0xc4] sm:$0xf] %v748_v13  ;;  %v778_v24 = vpack.c.bf16 %v1150_v25, %v775_v14  ;;  %v793_v26 = vpack.c.bf16 %v1150_v25, %v790_v15  ;;  %v831_v27 = vunpack.c.h.bf16 %v1120_v7  ;;  %v842_v28 = vunpack.c.l.bf16 %v1125_v12 }
  0x39   :  { %1109 = vst [vmem:[%s1616_s2 + $0xc8] sm:$0xf] %v763_v18  ;;  %v808_v29 = vpack.c.bf16 %v1150_v25, %v805_v19  ;;  %v820_v30 = vmul.f32 %v816_v20, %v812_v16  ;;  %v846_v31 = vunpack.c.l.bf16 %v1126_v17  ;;  %v857_v32 = vunpack.c.h.bf16 %v1125_v12 }
  0x3a   :  { %1112 = vst [vmem:[%s1616_s2 + $0xcc] sm:$0xf] %v778_v24  ;;  %1115 = vst [vmem:[%s1616_s2 + $0xd0] sm:$0xf] %v793_v26  ;;  %v835_v34 = vmul.f32 %v831_v27, %v827_v21  ;;  %v861_v35 = vunpack.c.h.bf16 %v1126_v17  ;;  %v872_v36 = vunpack.c.l.bf16 %v1131_v22  ;;  %v876_v37 = vunpack.c.l.bf16 %v1132_v23 }
  0x3b   :  { %1118 = vst [vmem:[%s1616_s2 + $0xd4] sm:$0xf] %v808_v29  ;;  %v823_v39 = vpack.c.bf16 %v1150_v25, %v820_v30  ;;  %v850_v40 = vmul.f32 %v846_v31, %v842_v28  ;;  %v887_v41 = vunpack.c.h.bf16 %v1131_v22  ;;  %v891_v42 = vunpack.c.h.bf16 %v1132_v23 }
  0x3c   :  { %v838_v44 = vpack.c.bf16 %v1150_v25, %v835_v34  ;;  %v865_v45 = vmul.f32 %v861_v35, %v857_v32  ;;  %v880_v46 = vmul.f32 %v876_v37, %v872_v36  ;;  %v902_v47 = vunpack.c.l.bf16 %v1137_v33 }
  0x3d   :  { %1121 = vst [vmem:[%s1616_s2 + $0xd8] sm:$0xf] %v823_v39  ;;  %v853_v49 = vpack.c.bf16 %v1150_v25, %v850_v40  ;;  %v895_v50 = vmul.f32 %v891_v42, %v887_v41  ;;  %v906_v51 = vunpack.c.l.bf16 %v1138_v38  ;;  %v917_v52 = vunpack.c.h.bf16 %v1137_v33 }
  0x3e   :  { %1124 = vst [vmem:[%s1616_s2 + $0xdc] sm:$0xf] %v838_v44  ;;  %v868_v53 = vpack.c.bf16 %v1150_v25, %v865_v45  ;;  %v883_v54 = vpack.c.bf16 %v1150_v25, %v880_v46  ;;  %v921_v55 = vunpack.c.h.bf16 %v1138_v38  ;;  %v932_v56 = vunpack.c.l.bf16 %v1143_v43 }
  0x3f   :  { %1127 = vst [vmem:[%s1616_s2 + $0xe0] sm:$0xf] %v853_v49  ;;  %v898_v57 = vpack.c.bf16 %v1150_v25, %v895_v50  ;;  %v910_v58 = vmul.f32 %v906_v51, %v902_v47  ;;  %v936_v59 = vunpack.c.l.bf16 %v1144_v48  ;;  %v947_v60 = vunpack.c.h.bf16 %v1143_v43 }
  0x40   :  { %1130 = vst [vmem:[%s1616_s2 + $0xe4] sm:$0xf] %v868_v53  ;;  %1133 = vst [vmem:[%s1616_s2 + $0xe8] sm:$0xf] %v883_v54  ;;  %v925_v61 = vmul.f32 %v921_v55, %v917_v52  ;;  %v951_v62 = vunpack.c.h.bf16 %v1144_v48 }
  0x41   :  { %1136 = vst [vmem:[%s1616_s2 + $0xec] sm:$0xf] %v898_v57  ;;  %v913_v63 = vpack.c.bf16 %v1150_v25, %v910_v58  ;;  %v940_v0 = vmul.f32 %v936_v59, %v932_v56 }
  0x42   :  { %v928_v1 = vpack.c.bf16 %v1150_v25, %v925_v61  ;;  %v955_v2 = vmul.f32 %v951_v62, %v947_v60 }
  0x43   :  { %1139 = vst [vmem:[%s1616_s2 + $0xf0] sm:$0xf] %v913_v63  ;;  %v943_v3 = vpack.c.bf16 %v1150_v25, %v940_v0 }
  0x44   :  { %1142 = vst [vmem:[%s1616_s2 + $0xf4] sm:$0xf] %v928_v1  ;;  %v958_v25 = vpack.c.bf16 %v1150_v25, %v955_v2 }
  0x45   :  { %1145 = vst [vmem:[%s1616_s2 + $0xf8] sm:$0xf] %v943_v3 }
  0x46   :  { %1148 = vst [vmem:[%s1616_s2 + $0xfc] sm:$0xf] %v958_v25 }

// kernel: cmptrans512_forward.21
= control target key start
LH: loop header
LB: loop body
LE: loop exit
PB: predicated region body
PF: predicated region fallthrough
CT: control target
= control target key end

     0   :  { %s2258_s12 = smov 0   ;;  %s2260_s13 = smov 0   ;;  %s2867_s0 = inlined_call_operand.vmem [shape: bf16[2,1,288,192], index: 0, kind: input, shape index: {}]   ;;  %s2868_s1 = inlined_call_operand.vmem [shape: bf16[3,192,32], index: 1, kind: input, shape index: {}]   ;;  %s2869_s2 = inlined_call_operand.vmem [shape: f32[1,32], index: 2, kind: input, shape index: {}]   ;;  %s2870_s3 = inlined_call_operand.vmem [shape: bf16[2,256,32], index: 3, kind: output, shape index: {}]  }
   0x1   :  { %s2262_s14 = smov 0  }
   0x2 LB: > { %s25_s15 = sadd.s32 1, %s2231_s13  ;;  %p1803_p0 = scmp.ge.s32.totalorder %s2235_s14, 1  ;;  %s2235_s14 = sphi %s2262_s14, %s13_s14   ;;  %s2231_s13 = sphi %s2260_s13, %s2872_s13   ;;  %s2227_s12 = sphi %s2258_s12, %s2871_s12  }
   0x3   : > { %p27_p1 = scmp.ge.s32.totalorder %s25_s15, 2  ;;  %p157_p2 = scmp.lt.s32.totalorder %s2235_s14, 3 }
   0x5   : > { %s2874_s15 = smov (%p27_p1, %s25_s15), 0  ;;  %p158_p3 = pnand %p1803_p0, %p157_p2 }
   0x6   : > { %p189_p4 = scmp.lt.s32.totalorder (!%p158_p3), %s2227_s12, 1 }
   0x7   : > { %161 = sbr.rel (%p158_p3) target bundleno = 453 (0x1c5), region = 32 }
   0xc   : > { %v2123_v0 = vld [vmem:[%s2868_s1 + $0x98] sm:$0xff]   ;;  %v2237_v1 = vmov 0   ;;  %v2124_v2 = vld [vmem:[%s2868_s1 + $0x90] sm:$0xff]   ;;  %s2876_s12 = smov (!%p189_p4, %s2227_s12), 1  ;;  %v2125_v3 = vld [vmem:[%s2868_s1 + $0x88] sm:$0xff]   ;;  %vm508_vm0 = vcmask 523264  }
   0xd   : > { %557 = vmatprep.subr.bf16.mxu0 %v2237_v1  ;;  %2073 = vmatprep.subr.bf16.mxu1 %v2237_v1  ;;  %s2097_s22 = smul.u32 288, %s2876_s12  ;;  %v2126_v4 = vld [vmem:[%s2868_s1 + $0x80] sm:$0xff]   ;;  %v2127_v6 = vld [vmem:[%s2868_s1 + $0x78] sm:$0xff]   ;;  %v2128_v8 = vld [vmem:[%s2868_s1 + $0x70] sm:$0xff]   ;;  %s2040_s26 = sshll.u32 %s2876_s12, 7  ;;  %vm1676_vm1 = vcmask 257024  }
   0xe   : > { %558 = vmatpush1.bf16.msra.mxu0 %v2123_v0  ;;  %2085 = vmatpush1.bf16.msra.mxu1 %v2123_v0  ;;  %v2129_v9 = vld [vmem:[%s2868_s1 + $0x68] sm:$0xff]   ;;  %v2130_v10 = vld [vmem:[%s2868_s1 + $0x60] sm:$0xff]   ;;  %v2131_v11 = vld [vmem:[%s2868_s1 + $0xb8] sm:$0xff]   ;;  %s2731_s30 = scalar_lea.vmem %s2870_s3, %s2040_s26 }
   0xf   : > { %559 = vmatprep.subr.bf16.mxu0 %v2237_v1  ;;  %2074 = vmatprep.subr.bf16.mxu1 %v2237_v1  ;;  %s2300_s27 = scalar_lea.vmem %s2867_s0, %s2097_s22  ;;  %v2132_v12 = vld [vmem:[%s2868_s1 + $0xb0] sm:$0xff]   ;;  %v2133_v13 = vld [vmem:[%s2868_s1 + $0xa8] sm:$0xff]   ;;  %v2134_v14 = vld [vmem:[%s2868_s1 + $0xa0] sm:$0xff]  }
  0x10   : > { %v2305_v5 = vld [vmem:[%s2300_s27 + $0x14] ss:$8 sps:$4 sm:$0xff]   ;;  %v2355_v15 = vld [vmem:[%s2300_s27 + $0x10] ss:$8 sps:$4 sm:$0xff]   ;;  %v2369_v19 = vld [vmem:[%s2300_s27 + $0x24] ss:$8 sps:$4 sm:$0xff]  }
  0x11   : > { %v2311_v7 = vld [vmem:[%s2300_s27 + $0x94] ss:$8 sps:$4 sm:$0xff]   ;;  %1875 = vmatprep.mubr.msk.bf16.mxu0 %vm508_vm0, %v2305_v5  ;;  %v2358_v16 = vld [vmem:[%s2300_s27 + $0x90] ss:$8 sps:$4 sm:$0xff]   ;;  %v2372_v20 = vld [vmem:[%s2300_s27 + $0xa4] ss:$8 sps:$4 sm:$0xff]  }
  0x12   : > { %560 = vmatpush1.bf16.msra.mxu0 %v2124_v2  ;;  %2086 = vmatpush1.bf16.msra.mxu1 %v2124_v2  ;;  %v2141_v17 = vld [vmem:[%s2868_s1 + $0x38] sm:$0xff]   ;;  %v2147_v21 = vld [vmem:[%s2868_s1 + $0x30] sm:$0xff]   ;;  %v2386_v23 = vld [vmem:[%s2300_s27 + $0x20] ss:$8 sps:$4 sm:$0xff]  }
  0x13   : > { %561 = vmatprep.subr.bf16.mxu0 %v2237_v1  ;;  %2075 = vmatprep.subr.bf16.mxu1 %v2237_v1  ;;  %v2142_v18 = vld [vmem:[%s2868_s1 + $0xf8] sm:$0xff]   ;;  %v2150_v22 = vld [vmem:[%s2868_s1 + $0xf0] sm:$0xff]   ;;  %v2391_v24 = vld [vmem:[%s2300_s27 + $0xa0] ss:$8 sps:$4 sm:$0xff]  }
  0x14   : > { %1883 = vmatprep.mubr.msk.bf16.mxu1 %vm508_vm0, %v2311_v7  ;;  %v2151_v25 = vld [vmem:[%s2868_s1 + $0x28] sm:$0xff]   ;;  %v2401_v27 = vld [vmem:[%s2300_s27 + $0x34] ss:$8 sps:$4 sm:$0xff]   ;;  %v2159_v29 = vld [vmem:[%s2868_s1 + $0x20] sm:$0xff]  }
  0x15   : > { %v2152_v26 = vld [vmem:[%s2868_s1 + $0xe8] sm:$0xff]   ;;  %v2406_v28 = vld [vmem:[%s2300_s27 + $0xb4] ss:$8 sps:$4 sm:$0xff]   ;;  %v2160_v30 = vld [vmem:[%s2868_s1 + $0xe0] sm:$0xff]  }
  0x16   : > { %562 = vmatpush1.bf16.msra.mxu0 %v2125_v3  ;;  %2087 = vmatpush1.bf16.msra.mxu1 %v2125_v3  ;;  %v2423_v31 = vld [vmem:[%s2300_s27 + $0x30] ss:$8 sps:$4 sm:$0xff]   ;;  %v2429_v33 = vld [vmem:[%s2300_s27 + $0x44] ss:$8 sps:$4 sm:$0xff]   ;;  %v2457_v39 = vld [vmem:[%s2300_s27 + $0x40] ss:$8 sps:$4 sm:$0xff]  }
  0x17   : > { %563 = vmatprep.subr.bf16.mxu0 %v2237_v1  ;;  %2076 = vmatprep.subr.bf16.mxu1 %v2237_v1  ;;  %v2426_v32 = vld [vmem:[%s2300_s27 + $0xb0] ss:$8 sps:$4 sm:$0xff]   ;;  %v2432_v34 = vld [vmem:[%s2300_s27 + $0xc4] ss:$8 sps:$4 sm:$0xff]   ;;  %v2460_v40 = vld [vmem:[%s2300_s27 + $0xc0] ss:$8 sps:$4 sm:$0xff]  }
  0x18   : > { %v2165_v35 = vld [vmem:[%s2868_s1 + $0x18] sm:$0xff]   ;;  %v2169_v37 = vld [vmem:[%s2868_s1 + $0x10] sm:$0xff]   ;;  %v2177_v43 = vld [vmem:[%s2868_s1 + $0x8] sm:$0xff]  }
  0x19   : > { %v2168_v36 = vld [vmem:[%s2868_s1 + $0xd8] sm:$0xff]   ;;  %v2170_v38 = vld [vmem:[%s2868_s1 + $0xd0] sm:$0xff]   ;;  %v2178_v44 = vld [vmem:[%s2868_s1 + $0xc8] sm:$0xff]  }
  0x1a   : > { %564 = vmatpush1.bf16.msra.mxu0 %v2126_v4  ;;  %2088 = vmatpush1.bf16.msra.mxu1 %v2126_v4  ;;  %v2463_v41 = vld [vmem:[%s2300_s27 + $0x54] ss:$8 sps:$4 sm:$0xff]   ;;  %v2183_v45 = vld [vmem:[%s2868_s1] sm:$0xff]   ;;  %v2491_v47 = vld [vmem:[%s2300_s27 + $0x50] ss:$8 sps:$4 sm:$0xff]  }
  0x1b   : > { %565 = vmatprep.subr.bf16.mxu0 %v2237_v1  ;;  %2077 = vmatprep.subr.bf16.mxu1 %v2237_v1  ;;  %v2466_v42 = vld [vmem:[%s2300_s27 + $0xd4] ss:$8 sps:$4 sm:$0xff]   ;;  %v2186_v46 = vld [vmem:[%s2868_s1 + $0xc0] sm:$0xff]   ;;  %v2494_v48 = vld [vmem:[%s2300_s27 + $0xd0] ss:$8 sps:$4 sm:$0xff]  }
  0x1c   : > { %v2497_v49 = vld [vmem:[%s2300_s27 + $0x64] ss:$8 sps:$4 sm:$0xff]   ;;  %v2187_v51 = vld [vmem:[%s2868_s1 + $0x58] sm:$0xff]   ;;  %v2195_v53 = vld [vmem:[%s2868_s1 + $0x50] sm:$0xff]  }
  0x1d   : > { %v2500_v50 = vld [vmem:[%s2300_s27 + $0xe4] ss:$8 sps:$4 sm:$0xff]   ;;  %v2188_v52 = vld [vmem:[%s2868_s1 + $0x118] sm:$0xff]   ;;  %v2196_v54 = vld [vmem:[%s2868_s1 + $0x110] sm:$0xff]  }
  0x1e   : > { %566 = vmatpush1.bf16.msra.mxu0 %v2127_v6  ;;  %2089 = vmatpush1.bf16.msra.mxu1 %v2127_v6  ;;  %v2184_v55 = vld [vmem:[%s2300_s27 + $0x60] ss:$8 sps:$4 sm:$0xff]   ;;  %v2189_v57 = vld [vmem:[%s2300_s27 + $0x74] ss:$8 sps:$4 sm:$0xff]   ;;  %v2193_v63 = vld [vmem:[%s2300_s27 + $0x70] ss:$8 sps:$4 sm:$0xff]  }
  0x1f   : > { %567 = vmatprep.subr.bf16.mxu0 %v2237_v1  ;;  %2078 = vmatprep.subr.bf16.mxu1 %v2237_v1  ;;  %v2526_v56 = vld [vmem:[%s2300_s27 + $0xe0] ss:$8 sps:$4 sm:$0xff]   ;;  %v2530_v58 = vld [vmem:[%s2300_s27 + $0xf4] ss:$8 sps:$4 sm:$0xff]   ;;  %v2554_v0 = vld [vmem:[%s2300_s27 + $0xf0] ss:$8 sps:$4 sm:$0xff]  }
  0x20   : > { %v2201_v59 = vld [vmem:[%s2868_s1 + $0x48] sm:$0xff]   ;;  %v2205_v61 = vld [vmem:[%s2868_s1 + $0x40] sm:$0xff]  }
  0x21   : > { %v2204_v60 = vld [vmem:[%s2868_s1 + $0x108] sm:$0xff]   ;;  %v2206_v62 = vld [vmem:[%s2868_s1 + $0x100] sm:$0xff]  }
  0x22   : > { %568 = vmatpush1.bf16.msra.mxu0 %v2128_v8  ;;  %2090 = vmatpush1.bf16.msra.mxu1 %v2128_v8  ;;  %v2197_v2 = vld [vmem:[%s2300_s27 + $0x84] ss:$8 sps:$4 sm:$0xff]   ;;  %v2202_v4 = vld [vmem:[%s2300_s27 + $0x80] ss:$8 sps:$4 sm:$0xff]  }
  0x23   : > { %569 = vmatprep.subr.bf16.mxu0 %v2237_v1  ;;  %2079 = vmatprep.subr.bf16.mxu1 %v2237_v1  ;;  %v2558_v3 = vld [vmem:[%s2300_s27 + $0x104] ss:$8 sps:$4 sm:$0xff]   ;;  %v2566_v6 = vld [vmem:[%s2300_s27 + $0x100] ss:$8 sps:$4 sm:$0xff]  }
  0x24   : > { %v2207_v8 = vld [vmem:[%s2300_s27] ss:$8 sps:$4 sm:$0xff]  }
  0x26   : > { %570 = vmatpush1.bf16.msra.mxu0 %v2129_v9  ;;  %2091 = vmatpush1.bf16.msra.mxu1 %v2129_v9 }
  0x27   : > { %571 = vmatprep.subr.bf16.mxu0 %v2237_v1  ;;  %2080 = vmatprep.subr.bf16.mxu1 %v2237_v1 }
  0x2a   : > { %572 = vmatpush1.bf16.msra.mxu0 %v2130_v10  ;;  %2092 = vmatpush1.bf16.msra.mxu1 %v2130_v10 }
  0x2b   : > { %581 = vmatprep.subr.bf16.mxu0 %v2237_v1  ;;  %2081 = vmatprep.subr.bf16.mxu1 %v2237_v1 }
  0x2e   : > { %582 = vmatpush2.bf16.msra.mxu0 %v2131_v11  ;;  %2093 = vmatpush2.bf16.msra.mxu1 %v2131_v11 }
  0x2f   : > { %583 = vmatprep.subr.bf16.mxu0 %v2237_v1  ;;  %2082 = vmatprep.subr.bf16.mxu1 %v2237_v1 }
  0x32   : > { %584 = vmatpush2.bf16.msra.mxu0 %v2132_v12  ;;  %2094 = vmatpush2.bf16.msra.mxu1 %v2132_v12 }
  0x33   : > { %585 = vmatprep.subr.bf16.mxu0 %v2237_v1  ;;  %2083 = vmatprep.subr.bf16.mxu1 %v2237_v1 }
  0x36   : > { %586 = vmatpush2.bf16.msra.mxu0 %v2133_v13  ;;  %2095 = vmatpush2.bf16.msra.mxu1 %v2133_v13 }
  0x37   : > { %587 = vmatprep.subr.bf16.mxu0 %v2237_v1  ;;  %2084 = vmatprep.subr.bf16.mxu1 %v2237_v1 }
  0x3a   : > { %588 = vmatpush2.bf16.msra.mxu0 %v2134_v14  ;;  %2096 = vmatpush2.bf16.msra.mxu1 %v2134_v14 }
  0x3b   : > { %802 = vmatprep.subr.bf16.mxu1 %v2237_v1  ;;  %1284 = vmatprep.subr.bf16.mxu0 %v2237_v1 }
  0x3d   : > { %590 = vmatmul.mubr.bf16.vlgmr.msra.gmra.mxu0 %v2355_v15  ;;  %654 = vmatmul.mubr.bf16.vlgmr.msra.gmra.mxu1 %v2358_v16 }
  0x3e   : > { %803 = vmatpush1.bf16.msra.mxu1 %v2141_v17  ;;  %1285 = vmatpush1.bf16.msra.mxu0 %v2142_v18 }
  0x3f   : > { %804 = vmatprep.subr.bf16.mxu1 %v2237_v1  ;;  %1876 = vmatprep.mubr.msk.bf16.mxu0 %vm508_vm0, %v2369_v19 }
  0x40   : > { %1884 = vmatprep.mubr.msk.bf16.mxu1 %vm508_vm0, %v2372_v20  ;;  %1286 = vmatprep.subr.bf16.mxu0 %v2237_v1 }
  0x42   : > { %805 = vmatpush1.bf16.msra.mxu1 %v2147_v21  ;;  %1287 = vmatpush1.bf16.msra.mxu0 %v2150_v22 }
  0x43   : > { %806 = vmatprep.subr.bf16.mxu1 %v2237_v1  ;;  %1288 = vmatprep.subr.bf16.mxu0 %v2237_v1 }
  0x45   : > { %598 = vmatmul.mubr.bf16.gmra.mxu0 %v2386_v23  ;;  %662 = vmatmul.mubr.bf16.gmra.mxu1 %v2391_v24 }
  0x46   : > { %807 = vmatpush1.bf16.msra.mxu1 %v2151_v25  ;;  %1289 = vmatpush1.bf16.msra.mxu0 %v2152_v26 }
  0x47   : > { %1877 = vmatprep.mubr.msk.bf16.mxu0 %vm508_vm0, %v2401_v27  ;;  %1885 = vmatprep.mubr.msk.bf16.mxu1 %vm508_vm0, %v2406_v28 }
  0x48   : > { %808 = vmatprep.subr.bf16.mxu1 %v2237_v1  ;;  %1290 = vmatprep.subr.bf16.mxu0 %v2237_v1 }
  0x4a   : > { %809 = vmatpush1.bf16.msra.mxu1 %v2159_v29  ;;  %1291 = vmatpush1.bf16.msra.mxu0 %v2160_v30 }
  0x4b   : > { %810 = vmatprep.subr.bf16.mxu1 %v2237_v1  ;;  %1292 = vmatprep.subr.bf16.mxu0 %v2237_v1 }
  0x4d   : > { %606 = vmatmul.mubr.bf16.gmra.mxu0 %v2423_v31  ;;  %670 = vmatmul.mubr.bf16.gmra.mxu1 %v2426_v32 }
  0x4e   : > { %1878 = vmatprep.mubr.msk.bf16.mxu0 %vm508_vm0, %v2429_v33  ;;  %1886 = vmatprep.mubr.msk.bf16.mxu1 %vm508_vm0, %v2432_v34 }
  0x4f   : > { %811 = vmatpush1.bf16.msra.mxu1 %v2165_v35  ;;  %1293 = vmatpush1.bf16.msra.mxu0 %v2168_v36 }
  0x50   : > { %812 = vmatprep.subr.bf16.mxu1 %v2237_v1  ;;  %1294 = vmatprep.subr.bf16.mxu0 %v2237_v1 }
  0x53   : > { %813 = vmatpush1.bf16.msra.mxu1 %v2169_v37  ;;  %1295 = vmatpush1.bf16.msra.mxu0 %v2170_v38 }
  0x54   : > { %814 = vmatprep.subr.bf16.mxu1 %v2237_v1  ;;  %1296 = vmatprep.subr.bf16.mxu0 %v2237_v1 }
  0x55   : > { %614 = vmatmul.mubr.bf16.gmra.mxu0 %v2457_v39  ;;  %678 = vmatmul.mubr.bf16.gmra.mxu1 %v2460_v40 }
  0x56   : > { %1879 = vmatprep.mubr.msk.bf16.mxu0 %vm508_vm0, %v2463_v41  ;;  %1887 = vmatprep.mubr.msk.bf16.mxu1 %vm508_vm0, %v2466_v42 }
  0x57   : > { %815 = vmatpush1.bf16.msra.mxu1 %v2177_v43  ;;  %1297 = vmatpush1.bf16.msra.mxu0 %v2178_v44 }
  0x58   : > { %816 = vmatprep.subr.bf16.mxu1 %v2237_v1  ;;  %1298 = vmatprep.subr.bf16.mxu0 %v2237_v1 }
  0x5b   : > { %817 = vmatpush1.bf16.msra.mxu1 %v2183_v45  ;;  %1299 = vmatpush1.bf16.msra.mxu0 %v2186_v46 }
  0x5c   : > { %826 = vmatprep.subr.bf16.mxu1 %v2237_v1  ;;  %1308 = vmatprep.subr.bf16.mxu0 %v2237_v1 }
  0x5d   : > { %622 = vmatmul.mubr.bf16.gmra.mxu0 %v2491_v47  ;;  %686 = vmatmul.mubr.bf16.gmra.mxu1 %v2494_v48 }
  0x5e   : > { %1880 = vmatprep.mubr.msk.bf16.mxu0 %vm508_vm0, %v2497_v49  ;;  %1888 = vmatprep.mubr.msk.bf16.mxu1 %vm508_vm0, %v2500_v50 }
  0x5f   : > { %827 = vmatpush2.bf16.msra.mxu1 %v2187_v51  ;;  %1309 = vmatpush2.bf16.msra.mxu0 %v2188_v52 }
  0x60   : > { %828 = vmatprep.subr.bf16.mxu1 %v2237_v1  ;;  %1310 = vmatprep.subr.bf16.mxu0 %v2237_v1 }
  0x63   : > { %829 = vmatpush2.bf16.msra.mxu1 %v2195_v53  ;;  %1311 = vmatpush2.bf16.msra.mxu0 %v2196_v54 }
  0x64   : > { %830 = vmatprep.subr.bf16.mxu1 %v2237_v1  ;;  %1312 = vmatprep.subr.bf16.mxu0 %v2237_v1 }
  0x65   : > { %630 = vmatmul.mubr.bf16.gmra.mxu0 %v2184_v55  ;;  %694 = vmatmul.mubr.bf16.gmra.mxu1 %v2526_v56 }
  0x66   : > { %1881 = vmatprep.mubr.msk.bf16.mxu0 %vm508_vm0, %v2189_v57  ;;  %1889 = vmatprep.mubr.msk.bf16.mxu1 %vm508_vm0, %v2530_v58 }
  0x67   : > { %831 = vmatpush2.bf16.msra.mxu1 %v2201_v59  ;;  %1313 = vmatpush2.bf16.msra.mxu0 %v2204_v60 }
  0x68   : > { %832 = vmatprep.subr.bf16.mxu1 %v2237_v1  ;;  %1314 = vmatprep.subr.bf16.mxu0 %v2237_v1  ;;  %v2209_v1 = vld [vmem:[%s2300_s27 + $0x4] ss:$8 sps:$4 sm:$0xff]  }
  0x6b   : > { %833 = vmatpush2.bf16.msra.mxu1 %v2205_v61  ;;  %1315 = vmatpush2.bf16.msra.mxu0 %v2206_v62 }
  0x6d   : > { %638 = vmatmul.mubr.bf16.gmra.mxu0 %v2193_v63  ;;  %702 = vmatmul.mubr.bf16.gmra.mxu1 %v2554_v0 }
  0x6e   : > { %1882 = vmatprep.mubr.msk.bf16.mxu0 %vm508_vm0, %v2197_v2  ;;  %1890 = vmatprep.mubr.msk.bf16.mxu1 %vm508_vm0, %v2558_v3 }
  0x75   : > { %646 = vmatmul.mubr.bf16.gmra.mxu0 %v2202_v4  ;;  %710 = vmatmul.mubr.bf16.gmra.mxu1 %v2566_v6 }
  0x76   : > { %1905 = vmatprep.mubr.msk.bf16.mxu1 %vm508_vm0, %v2209_v1  ;;  %1989 = vmatprep.mubr.msk.bf16.mxu0 %vm508_vm0, %v2369_v19 }
  0x7d   : > { %835 = vmatmul.mubr.bf16.vlgmr.msra.gmra.mxu1 %v2207_v8  ;;  %1317 = vmatmul.mubr.bf16.vlgmr.msra.gmra.mxu0 %v2386_v23 }
  0x7e   : > { %1906 = vmatprep.mubr.msk.bf16.mxu1 %vm508_vm0, %v2305_v5  ;;  %1990 = vmatprep.mubr.msk.bf16.mxu0 %vm508_vm0, %v2401_v27  ;;  %v2210_v5 = vld [vmem:[%s2300_s27 + $0x114] ss:$8 sps:$4 sm:$0xff]  }
  0x85   : > { %843 = vmatmul.mubr.bf16.gmra.mxu1 %v2355_v15  ;;  %1325 = vmatmul.mubr.bf16.gmra.mxu0 %v2423_v31 }
  0x86   : > { %1907 = vmatprep.mubr.msk.bf16.mxu1 %vm508_vm0, %v2369_v19  ;;  %1991 = vmatprep.mubr.msk.bf16.mxu0 %vm508_vm0, %v2429_v33 }
  0x8d   : > { %851 = vmatmul.mubr.bf16.gmra.mxu1 %v2386_v23  ;;  %1333 = vmatmul.mubr.bf16.gmra.mxu0 %v2457_v39 }
  0x8e   : > { %1908 = vmatprep.mubr.msk.bf16.mxu1 %vm508_vm0, %v2401_v27  ;;  %1992 = vmatprep.mubr.msk.bf16.mxu0 %vm508_vm0, %v2463_v41 }
  0x95   : > { %859 = vmatmul.mubr.bf16.gmra.mxu1 %v2423_v31  ;;  %1341 = vmatmul.mubr.bf16.gmra.mxu0 %v2491_v47 }
  0x96   : > { %1909 = vmatprep.mubr.msk.bf16.mxu1 %vm508_vm0, %v2429_v33  ;;  %1993 = vmatprep.mubr.msk.bf16.mxu0 %vm508_vm0, %v2497_v49 }
  0x9d   : > { %867 = vmatmul.mubr.bf16.gmra.mxu1 %v2457_v39  ;;  %1349 = vmatmul.mubr.bf16.gmra.mxu0 %v2184_v55 }
  0x9e   : > { %1910 = vmatprep.mubr.msk.bf16.mxu1 %vm508_vm0, %v2463_v41  ;;  %1994 = vmatprep.mubr.msk.bf16.mxu0 %vm508_vm0, %v2189_v57 }
  0xa5   : > { %875 = vmatmul.mubr.bf16.gmra.mxu1 %v2491_v47  ;;  %1357 = vmatmul.mubr.bf16.gmra.mxu0 %v2193_v63 }
  0xa6   : > { %1911 = vmatprep.mubr.msk.bf16.mxu1 %vm508_vm0, %v2497_v49  ;;  %1995 = vmatprep.mubr.msk.bf16.mxu0 %vm508_vm0, %v2197_v2 }
  0xad   : > { %883 = vmatmul.mubr.bf16.gmra.mxu1 %v2184_v55  ;;  %1365 = vmatmul.mubr.bf16.gmra.mxu0 %v2202_v4 }
  0xae   : > { %1912 = vmatprep.mubr.msk.bf16.mxu1 %vm508_vm0, %v2189_v57  ;;  %1996 = vmatprep.mubr.msk.bf16.mxu0 %vm508_vm0, %v2311_v7 }
  0xb5   : > { %891 = vmatmul.mubr.bf16.gmra.mxu1 %v2193_v63  ;;  %1373 = vmatmul.mubr.bf16.gmra.mxu0 %v2358_v16 }
  0xb6   : > { %1913 = vmatprep.mubr.msk.bf16.mxu1 %vm508_vm0, %v2197_v2  ;;  %1997 = vmatprep.mubr.msk.bf16.mxu0 %vm508_vm0, %v2372_v20 }
  0xbd   : > { %899 = vmatmul.mubr.bf16.gmra.mxu1 %v2202_v4  ;;  %1381 = vmatmul.mubr.bf16.gmra.mxu0 %v2391_v24 }
  0xbe   : > { %1914 = vmatprep.mubr.msk.bf16.mxu1 %vm508_vm0, %v2311_v7  ;;  %1998 = vmatprep.mubr.msk.bf16.mxu0 %vm508_vm0, %v2406_v28  ;;  %v2212_v7 = vld [vmem:[%s2300_s27 + $0x110] ss:$8 sps:$4 sm:$0xff]  }
  0xc5   : > { %907 = vmatmul.mubr.bf16.gmra.mxu1 %v2358_v16  ;;  %1389 = vmatmul.mubr.bf16.gmra.mxu0 %v2426_v32 }
  0xc6   : > { %1915 = vmatprep.mubr.msk.bf16.mxu1 %vm508_vm0, %v2372_v20  ;;  %1999 = vmatprep.mubr.msk.bf16.mxu0 %vm508_vm0, %v2432_v34 }
  0xcd   : > { %915 = vmatmul.mubr.bf16.gmra.mxu1 %v2391_v24  ;;  %1397 = vmatmul.mubr.bf16.gmra.mxu0 %v2460_v40 }
  0xce   : > { %1916 = vmatprep.mubr.msk.bf16.mxu1 %vm508_vm0, %v2406_v28  ;;  %2000 = vmatprep.mubr.msk.bf16.mxu0 %vm508_vm0, %v2466_v42 }
  0xd5   : > { %923 = vmatmul.mubr.bf16.gmra.mxu1 %v2426_v32  ;;  %1405 = vmatmul.mubr.bf16.gmra.mxu0 %v2494_v48 }
  0xd6   : > { %1917 = vmatprep.mubr.msk.bf16.mxu1 %vm508_vm0, %v2432_v34  ;;  %2001 = vmatprep.mubr.msk.bf16.mxu0 %vm508_vm0, %v2500_v50 }
  0xdd   : > { %931 = vmatmul.mubr.bf16.gmra.mxu1 %v2460_v40  ;;  %1413 = vmatmul.mubr.bf16.gmra.mxu0 %v2526_v56 }
  0xde   : > { %1918 = vmatprep.mubr.msk.bf16.mxu1 %vm508_vm0, %v2466_v42  ;;  %2002 = vmatprep.mubr.msk.bf16.mxu0 %vm508_vm0, %v2530_v58 }
  0xe5   : > { %939 = vmatmul.mubr.bf16.gmra.mxu1 %v2494_v48  ;;  %1421 = vmatmul.mubr.bf16.gmra.mxu0 %v2554_v0 }
  0xe6   : > { %1919 = vmatprep.mubr.msk.bf16.mxu1 %vm508_vm0, %v2500_v50  ;;  %2003 = vmatprep.mubr.msk.bf16.mxu0 %vm508_vm0, %v2558_v3 }
  0xed   : > { %947 = vmatmul.mubr.bf16.gmra.mxu1 %v2526_v56  ;;  %1429 = vmatmul.mubr.bf16.gmra.mxu0 %v2566_v6 }
  0xee   : > { %1920 = vmatprep.mubr.msk.bf16.mxu1 %vm508_vm0, %v2530_v58  ;;  %2004 = vmatprep.mubr.msk.bf16.mxu0 %vm508_vm0, %v2210_v5 }
  0xf5   : > { %955 = vmatmul.mubr.bf16.gmra.mxu1 %v2554_v0  ;;  %1437 = vmatmul.mubr.bf16.gmra.mxu0 %v2212_v7 }
  0xfd   : > { %v2655_v9 = vpop.f32.mrf.mxu0  ;;  %v2657_v10 = vpop.f32.mrf.mxu1 }
  0xff   : > { %v593_v11 = vpop.f32.mrf.mxu0  ;;  %v657_v12 = vpop.f32.mrf.mxu1 }
 0x101   : > { %v2659_v13 = vpop.f32.mrf.mxu0  ;;  %v2661_v14 = vpop.f32.mrf.mxu1 }
 0x103   : > { %v596_v15 = vpop.f32.mrf.mxu0  ;;  %v660_v16 = vpop.f32.mrf.mxu1 }
 0x104   : > { %v2723_v16 = vld [vmem:[%s2869_s2] ss:$0 sm:$0xff] }
 0x105   : > { %v2663_v17 = vpop.f32.mrf.mxu0  ;;  %v2665_v18 = vpop.f32.mrf.mxu1 }
 0x107   : > { %v601_v19 = vpop.f32.mrf.mxu0  ;;  %v665_v20 = vpop.f32.mrf.mxu1 }
 0x109   : > { %v2667_v21 = vpop.f32.mrf.mxu0  ;;  %v2669_v22 = vpop.f32.mrf.mxu1 }
 0x10b   : > { %v604_v23 = vpop.f32.mrf.mxu0  ;;  %v668_v24 = vpop.f32.mrf.mxu1 }
 0x10d   : > { %v2671_v25 = vpop.f32.mrf.mxu0  ;;  %v2673_v26 = vpop.f32.mrf.mxu1 }
 0x10f   : > { %v609_v27 = vpop.f32.mrf.mxu0  ;;  %v673_v28 = vpop.f32.mrf.mxu1 }
 0x111   : > { %v2675_v29 = vpop.f32.mrf.mxu0  ;;  %v2677_v30 = vpop.f32.mrf.mxu1 }
 0x113   : > { %v612_v31 = vpop.f32.mrf.mxu0  ;;  %v676_v32 = vpop.f32.mrf.mxu1 }
 0x115   : > { %v2679_v33 = vpop.f32.mrf.mxu0  ;;  %v2681_v34 = vpop.f32.mrf.mxu1 }
 0x117   : > { %v617_v35 = vpop.f32.mrf.mxu0  ;;  %v681_v36 = vpop.f32.mrf.mxu1 }
 0x119   : > { %v2683_v37 = vpop.f32.mrf.mxu0  ;;  %v2685_v38 = vpop.f32.mrf.mxu1 }
 0x11b   : > { %v620_v39 = vpop.f32.mrf.mxu0  ;;  %v684_v40 = vpop.f32.mrf.mxu1 }
 0x11d   : > { %v2687_v41 = vpop.f32.mrf.mxu0  ;;  %v2689_v42 = vpop.f32.mrf.mxu1 }
 0x11f   : > { %v625_v43 = vpop.f32.mrf.mxu0  ;;  %v689_v44 = vpop.f32.mrf.mxu1 }
 0x121   : > { %v2691_v45 = vpop.f32.mrf.mxu0  ;;  %v2693_v46 = vpop.f32.mrf.mxu1 }
 0x123   : > { %v628_v47 = vpop.f32.mrf.mxu0  ;;  %v692_v48 = vpop.f32.mrf.mxu1 }
 0x125   : > { %v2695_v49 = vpop.f32.mrf.mxu0  ;;  %v2697_v50 = vpop.f32.mrf.mxu1 }
 0x127   : > { %v633_v51 = vpop.f32.mrf.mxu0  ;;  %v697_v52 = vpop.f32.mrf.mxu1 }
 0x129   : > { %v2699_v53 = vpop.f32.mrf.mxu0  ;;  %v2701_v54 = vpop.f32.mrf.mxu1 }
 0x12b   : > { %v636_v55 = vpop.f32.mrf.mxu0  ;;  %v700_v56 = vpop.f32.mrf.mxu1 }
 0x12d   : > { %v2703_v57 = vpop.f32.mrf.mxu0  ;;  %v2705_v58 = vpop.f32.mrf.mxu1 }
 0x12f   : > { %v641_v59 = vpop.f32.mrf.mxu0  ;;  %v705_v60 = vpop.f32.mrf.mxu1 }
 0x131   : > { %v2707_v61 = vpop.f32.mrf.mxu0  ;;  %v2709_v62 = vpop.f32.mrf.mxu1 }
 0x133   : > { %v644_v63 = vpop.f32.mrf.mxu0  ;;  %v708_v0 = vpop.f32.mrf.mxu1 }
 0x135   : > { %v2711_v2 = vpop.f32.mrf.mxu0  ;;  %v2713_v3 = vpop.f32.mrf.mxu1 }
 0x137   : > { %v649_v4 = vpop.f32.mrf.mxu0  ;;  %v713_v6 = vpop.f32.mrf.mxu1 }
 0x139   : > { %v2715_v1 = vpop.f32.mrf.mxu0  ;;  %v2717_v8 = vpop.f32.mrf.mxu1 }
 0x13b   : > { %v652_v5 = vpop.f32.mrf.mxu0  ;;  %v716_v7 = vpop.f32.mrf.mxu1 }
 0x13d   : > { %v836_v11 = vpop.f32.mrf.mxu1  ;;  %v1318_v12 = vpop.f32.mrf.mxu0 }
 0x13e   : > { %v837_v15 = vadd.f32 %v836_v11, %v2655_v9 }
 0x13f   : > { %v838_v19 = vpop.f32.mrf.mxu1  ;;  %v1320_v20 = vpop.f32.mrf.mxu0 }
 0x140   : > { %v1445_v23 = vadd.f32 %v1318_v12, %v837_v15 }
 0x141   : > { %v839_v24 = vpop.f32.mrf.mxu1  ;;  %v1321_v27 = vpop.f32.mrf.mxu0 }
 0x142   : > { %v1484_v28 = vadd.f32 %v2723_v16, %v1445_v23  ;;  %v840_v31 = vadd.f32 %v839_v24, %v2659_v13 }
 0x143   : > { %v841_v32 = vpop.f32.mrf.mxu1  ;;  %v1323_v35 = vpop.f32.mrf.mxu0 }
 0x144   : > { %v1516_v36 = vmax.f32 %v1484_v28, 0.0  ;;  %v1446_v39 = vadd.f32 %v1321_v27, %v840_v31 }
 0x145   : > { %v844_v9 = vpop.f32.mrf.mxu1  ;;  %v1326_v40 = vpop.f32.mrf.mxu0 }
 0x146   : > { %v2041_v43 = vpack.c.bf16 %v1516_v36, %v1516_v36  ;;  %v1485_v44 = vadd.f32 %v2723_v16, %v1446_v39  ;;  %v845_v47 = vadd.f32 %v844_v9, %v2663_v17 }
 0x147   : > { %v846_v13 = vpop.f32.mrf.mxu1  ;;  %v1328_v48 = vpop.f32.mrf.mxu0 }
 0x148   : > { %1677 = vst.msk [vmem:[%s2731_s30] sm:$0xf] %vm1676_vm1, %v2041_v43  ;;  %v1517_v51 = vmax.f32 %v1485_v44, 0.0  ;;  %v1447_v52 = vadd.f32 %v1326_v40, %v845_v47 }
 0x149   : > { %v847_v55 = vpop.f32.mrf.mxu1  ;;  %v1329_v56 = vpop.f32.mrf.mxu0 }
 0x14a   : > { %v2042_v59 = vpack.c.bf16 %v1517_v51, %v1517_v51  ;;  %v1486_v60 = vadd.f32 %v2723_v16, %v1447_v52  ;;  %v848_v63 = vadd.f32 %v847_v55, %v2667_v21 }
 0x14b   : > { %v849_v0 = vpop.f32.mrf.mxu1  ;;  %v1331_v4 = vpop.f32.mrf.mxu0 }
 0x14c   : > { %1678 = vst.msk [vmem:[%s2731_s30 + $0x4] sm:$0xf] %vm1676_vm1, %v2042_v59  ;;  %v1518_v6 = vmax.f32 %v1486_v60, 0.0  ;;  %v1448_v17 = vadd.f32 %v1329_v56, %v848_v63 }
 0x14d   : > { %v852_v5 = vpop.f32.mrf.mxu1  ;;  %v1334_v7 = vpop.f32.mrf.mxu0 }
 0x14e   : > { %v2043_v11 = vpack.c.bf16 %v1518_v6, %v1518_v6  ;;  %v1487_v12 = vadd.f32 %v2723_v16, %v1448_v17  ;;  %v853_v15 = vadd.f32 %v852_v5, %v2671_v25 }
 0x14f   : > { %v854_v19 = vpop.f32.mrf.mxu1  ;;  %v1336_v20 = vpop.f32.mrf.mxu0 }
 0x150   : > { %1679 = vst.msk [vmem:[%s2731_s30 + $0x8] sm:$0xf] %vm1676_vm1, %v2043_v11  ;;  %v1519_v23 = vmax.f32 %v1487_v12, 0.0  ;;  %v1449_v21 = vadd.f32 %v1334_v7, %v853_v15 }
 0x151   : > { %v855_v24 = vpop.f32.mrf.mxu1  ;;  %v1337_v27 = vpop.f32.mrf.mxu0 }
 0x152   : > { %v2044_v28 = vpack.c.bf16 %v1519_v23, %v1519_v23  ;;  %v1488_v31 = vadd.f32 %v2723_v16, %v1449_v21  ;;  %v856_v32 = vadd.f32 %v855_v24, %v2675_v29 }
 0x153   : > { %v857_v35 = vpop.f32.mrf.mxu1  ;;  %v1339_v36 = vpop.f32.mrf.mxu0 }
 0x154   : > { %1680 = vst.msk [vmem:[%s2731_s30 + $0xc] sm:$0xf] %vm1676_vm1, %v2044_v28  ;;  %v1520_v39 = vmax.f32 %v1488_v31, 0.0  ;;  %v1450_v25 = vadd.f32 %v1337_v27, %v856_v32 }
 0x155   : > { %v860_v9 = vpop.f32.mrf.mxu1  ;;  %v1342_v40 = vpop.f32.mrf.mxu0 }
 0x156   : > { %v2045_v43 = vpack.c.bf16 %v1520_v39, %v1520_v39  ;;  %v1489_v44 = vadd.f32 %v2723_v16, %v1450_v25  ;;  %v861_v47 = vadd.f32 %v860_v9, %v2679_v33 }
 0x157   : > { %v862_v13 = vpop.f32.mrf.mxu1  ;;  %v1344_v48 = vpop.f32.mrf.mxu0 }
 0x158   : > { %1681 = vst.msk [vmem:[%s2731_s30 + $0x10] sm:$0xf] %vm1676_vm1, %v2045_v43  ;;  %v1521_v51 = vmax.f32 %v1489_v44, 0.0  ;;  %v1451_v29 = vadd.f32 %v1342_v40, %v861_v47 }
 0x159   : > { %v863_v52 = vpop.f32.mrf.mxu1  ;;  %v1345_v55 = vpop.f32.mrf.mxu0 }
 0x15a   : > { %v2046_v56 = vpack.c.bf16 %v1521_v51, %v1521_v51  ;;  %v1490_v59 = vadd.f32 %v2723_v16, %v1451_v29  ;;  %v864_v60 = vadd.f32 %v863_v52, %v2683_v37 }
 0x15b   : > { %v865_v63 = vpop.f32.mrf.mxu1  ;;  %v1347_v0 = vpop.f32.mrf.mxu0 }
 0x15c   : > { %1682 = vst.msk [vmem:[%s2731_s30 + $0x14] sm:$0xf] %vm1676_vm1, %v2046_v56  ;;  %v1522_v4 = vmax.f32 %v1490_v59, 0.0  ;;  %v1452_v33 = vadd.f32 %v1345_v55, %v864_v60 }
 0x15d   : > { %v868_v6 = vpop.f32.mrf.mxu1  ;;  %v1350_v17 = vpop.f32.mrf.mxu0 }
 0x15e   : > { %v2047_v5 = vpack.c.bf16 %v1522_v4, %v1522_v4  ;;  %v1491_v7 = vadd.f32 %v2723_v16, %v1452_v33  ;;  %v869_v11 = vadd.f32 %v868_v6, %v2687_v41 }
 0x15f   : > { %v870_v12 = vpop.f32.mrf.mxu1  ;;  %v1352_v15 = vpop.f32.mrf.mxu0 }
 0x160   : > { %1683 = vst.msk [vmem:[%s2731_s30 + $0x18] sm:$0xf] %vm1676_vm1, %v2047_v5  ;;  %v1523_v19 = vmax.f32 %v1491_v7, 0.0  ;;  %v1453_v37 = vadd.f32 %v1350_v17, %v869_v11 }
 0x161   : > { %v871_v20 = vpop.f32.mrf.mxu1  ;;  %v1353_v23 = vpop.f32.mrf.mxu0 }
 0x162   : > { %v2048_v21 = vpack.c.bf16 %v1523_v19, %v1523_v19  ;;  %v1492_v24 = vadd.f32 %v2723_v16, %v1453_v37  ;;  %v872_v27 = vadd.f32 %v871_v20, %v2691_v45 }
 0x163   : > { %v873_v28 = vpop.f32.mrf.mxu1  ;;  %v1355_v31 = vpop.f32.mrf.mxu0 }
 0x164   : > { %1684 = vst.msk [vmem:[%s2731_s30 + $0x1c] sm:$0xf] %vm1676_vm1, %v2048_v21  ;;  %v1524_v32 = vmax.f32 %v1492_v24, 0.0  ;;  %v1454_v41 = vadd.f32 %v1353_v23, %v872_v27 }
 0x165   : > { %v876_v35 = vpop.f32.mrf.mxu1  ;;  %v1358_v36 = vpop.f32.mrf.mxu0 }
 0x166   : > { %v2049_v39 = vpack.c.bf16 %v1524_v32, %v1524_v32  ;;  %v1493_v25 = vadd.f32 %v2723_v16, %v1454_v41  ;;  %v877_v9 = vadd.f32 %v876_v35, %v2695_v49 }
 0x167   : > { %v878_v40 = vpop.f32.mrf.mxu1  ;;  %v1360_v43 = vpop.f32.mrf.mxu0 }
 0x168   : > { %1685 = vst.msk [vmem:[%s2731_s30 + $0x20] sm:$0xf] %vm1676_vm1, %v2049_v39  ;;  %v1525_v44 = vmax.f32 %v1493_v25, 0.0  ;;  %v1455_v45 = vadd.f32 %v1358_v36, %v877_v9 }
 0x169   : > { %v879_v47 = vpop.f32.mrf.mxu1  ;;  %v1361_v13 = vpop.f32.mrf.mxu0 }
 0x16a   : > { %v2050_v48 = vpack.c.bf16 %v1525_v44, %v1525_v44  ;;  %v1494_v51 = vadd.f32 %v2723_v16, %v1455_v45  ;;  %v880_v29 = vadd.f32 %v879_v47, %v2699_v53 }
 0x16b   : > { %v881_v52 = vpop.f32.mrf.mxu1  ;;  %v1363_v55 = vpop.f32.mrf.mxu0 }
 0x16c   : > { %1686 = vst.msk [vmem:[%s2731_s30 + $0x24] sm:$0xf] %vm1676_vm1, %v2050_v48  ;;  %v1526_v56 = vmax.f32 %v1494_v51, 0.0  ;;  %v1456_v49 = vadd.f32 %v1361_v13, %v880_v29 }
 0x16d   : > { %v884_v59 = vpop.f32.mrf.mxu1  ;;  %v1366_v60 = vpop.f32.mrf.mxu0 }
 0x16e   : > { %v2051_v63 = vpack.c.bf16 %v1526_v56, %v1526_v56  ;;  %v1495_v0 = vadd.f32 %v2723_v16, %v1456_v49  ;;  %v885_v4 = vadd.f32 %v884_v59, %v2703_v57 }
 0x16f   : > { %v886_v33 = vpop.f32.mrf.mxu1  ;;  %v1368_v6 = vpop.f32.mrf.mxu0 }
 0x170   : > { %1687 = vst.msk [vmem:[%s2731_s30 + $0x28] sm:$0xf] %vm1676_vm1, %v2051_v63  ;;  %v1527_v17 = vmax.f32 %v1495_v0, 0.0  ;;  %v1457_v53 = vadd.f32 %v1366_v60, %v885_v4 }
 0x171   : > { %v887_v5 = vpop.f32.mrf.mxu1  ;;  %v1369_v7 = vpop.f32.mrf.mxu0 }
 0x172   : > { %v2052_v11 = vpack.c.bf16 %v1527_v17, %v1527_v17  ;;  %v1496_v12 = vadd.f32 %v2723_v16, %v1457_v53  ;;  %v888_v15 = vadd.f32 %v887_v5, %v2707_v61 }
 0x173   : > { %v889_v19 = vpop.f32.mrf.mxu1  ;;  %v1371_v37 = vpop.f32.mrf.mxu0 }
 0x174   : > { %1688 = vst.msk [vmem:[%s2731_s30 + $0x2c] sm:$0xf] %vm1676_vm1, %v2052_v11  ;;  %v1528_v20 = vmax.f32 %v1496_v12, 0.0  ;;  %v1458_v57 = vadd.f32 %v1369_v7, %v888_v15 }
 0x175   : > { %v892_v23 = vpop.f32.mrf.mxu1  ;;  %v1374_v21 = vpop.f32.mrf.mxu0 }
 0x176   : > { %v2053_v24 = vpack.c.bf16 %v1528_v20, %v1528_v20  ;;  %v1497_v27 = vadd.f32 %v2723_v16, %v1458_v57  ;;  %v893_v28 = vadd.f32 %v892_v23, %v2711_v2 }
 0x177   : > { %v894_v31 = vpop.f32.mrf.mxu1  ;;  %v1376_v32 = vpop.f32.mrf.mxu0 }
 0x178   : > { %1689 = vst.msk [vmem:[%s2731_s30 + $0x30] sm:$0xf] %vm1676_vm1, %v2053_v24  ;;  %v1529_v41 = vmax.f32 %v1497_v27, 0.0  ;;  %v1459_v61 = vadd.f32 %v1374_v21, %v893_v28 }
 0x179   : > { %v895_v35 = vpop.f32.mrf.mxu1  ;;  %v1377_v36 = vpop.f32.mrf.mxu0 }
 0x17a   : > { %v2054_v39 = vpack.c.bf16 %v1529_v41, %v1529_v41  ;;  %v1498_v25 = vadd.f32 %v2723_v16, %v1459_v61  ;;  %v896_v9 = vadd.f32 %v895_v35, %v2715_v1 }
 0x17b   : > { %v897_v40 = vpop.f32.mrf.mxu1  ;;  %v1379_v43 = vpop.f32.mrf.mxu0 }
 0x17c   : > { %1690 = vst.msk [vmem:[%s2731_s30 + $0x34] sm:$0xf] %vm1676_vm1, %v2054_v39  ;;  %v1530_v44 = vmax.f32 %v1498_v25, 0.0  ;;  %v1460_v2 = vadd.f32 %v1377_v36, %v896_v9 }
 0x17d   : > { %v900_v45 = vpop.f32.mrf.mxu1  ;;  %v1382_v47 = vpop.f32.mrf.mxu0 }
 0x17e   : > { %v2055_v13 = vpack.c.bf16 %v1530_v44, %v1530_v44  ;;  %v1499_v48 = vadd.f32 %v2723_v16, %v1460_v2  ;;  %v901_v51 = vadd.f32 %v900_v45, %v2657_v10 }
 0x17f   : > { %v902_v29 = vpop.f32.mrf.mxu1  ;;  %v1384_v52 = vpop.f32.mrf.mxu0 }
 0x180   : > { %1691 = vst.msk [vmem:[%s2731_s30 + $0x38] sm:$0xf] %vm1676_vm1, %v2055_v13  ;;  %v1531_v55 = vmax.f32 %v1499_v48, 0.0  ;;  %v1461_v1 = vadd.f32 %v1382_v47, %v901_v51 }
 0x181   : > { %v903_v56 = vpop.f32.mrf.mxu1  ;;  %v1385_v49 = vpop.f32.mrf.mxu0 }
 0x182   : > { %v2056_v59 = vpack.c.bf16 %v1531_v55, %v1531_v55  ;;  %v1500_v60 = vadd.f32 %v2723_v16, %v1461_v1  ;;  %v904_v63 = vadd.f32 %v903_v56, %v2661_v14 }
 0x183   : > { %v905_v0 = vpop.f32.mrf.mxu1  ;;  %v1387_v4 = vpop.f32.mrf.mxu0 }
 0x184   : > { %1692 = vst.msk [vmem:[%s2731_s30 + $0x3c] sm:$0xf] %vm1676_vm1, %v2056_v59  ;;  %v1532_v33 = vmax.f32 %v1500_v60, 0.0  ;;  %v1462_v10 = vadd.f32 %v1385_v49, %v904_v63 }
 0x185   : > { %v908_v6 = vpop.f32.mrf.mxu1  ;;  %v1390_v17 = vpop.f32.mrf.mxu0 }
 0x186   : > { %v2057_v53 = vpack.c.bf16 %v1532_v33, %v1532_v33  ;;  %v1501_v5 = vadd.f32 %v2723_v16, %v1462_v10  ;;  %v909_v7 = vadd.f32 %v908_v6, %v2665_v18 }
 0x187   : > { %v910_v11 = vpop.f32.mrf.mxu1  ;;  %v1392_v12 = vpop.f32.mrf.mxu0 }
 0x188   : > { %1693 = vst.msk [vmem:[%s2731_s30 + $0x40] sm:$0xf] %vm1676_vm1, %v2057_v53  ;;  %v1533_v15 = vmax.f32 %v1501_v5, 0.0  ;;  %v1463_v14 = vadd.f32 %v1390_v17, %v909_v7 }
 0x189   : > { %v911_v19 = vpop.f32.mrf.mxu1  ;;  %v1393_v37 = vpop.f32.mrf.mxu0 }
 0x18a   : > { %v2058_v20 = vpack.c.bf16 %v1533_v15, %v1533_v15  ;;  %v1502_v57 = vadd.f32 %v2723_v16, %v1463_v14  ;;  %v912_v23 = vadd.f32 %v911_v19, %v2669_v22 }
 0x18b   : > { %v913_v21 = vpop.f32.mrf.mxu1  ;;  %v1395_v24 = vpop.f32.mrf.mxu0 }
 0x18c   : > { %1694 = vst.msk [vmem:[%s2731_s30 + $0x44] sm:$0xf] %vm1676_vm1, %v2058_v20  ;;  %v1534_v27 = vmax.f32 %v1502_v57, 0.0  ;;  %v1464_v18 = vadd.f32 %v1393_v37, %v912_v23 }
 0x18d   : > { %v916_v28 = vpop.f32.mrf.mxu1  ;;  %v1398_v31 = vpop.f32.mrf.mxu0 }
 0x18e   : > { %v2059_v32 = vpack.c.bf16 %v1534_v27, %v1534_v27  ;;  %v1503_v41 = vadd.f32 %v2723_v16, %v1464_v18  ;;  %v917_v61 = vadd.f32 %v916_v28, %v2673_v26 }
 0x18f   : > { %v918_v35 = vpop.f32.mrf.mxu1  ;;  %v1400_v36 = vpop.f32.mrf.mxu0 }
 0x190   : > { %1695 = vst.msk [vmem:[%s2731_s30 + $0x48] sm:$0xf] %vm1676_vm1, %v2059_v32  ;;  %v1535_v39 = vmax.f32 %v1503_v41, 0.0  ;;  %v1465_v22 = vadd.f32 %v1398_v31, %v917_v61 }
 0x191   : > { %v919_v25 = vpop.f32.mrf.mxu1  ;;  %v1401_v9 = vpop.f32.mrf.mxu0 }
 0x192   : > { %v2060_v40 = vpack.c.bf16 %v1535_v39, %v1535_v39  ;;  %v1504_v43 = vadd.f32 %v2723_v16, %v1465_v22  ;;  %v920_v44 = vadd.f32 %v919_v25, %v2677_v30 }
 0x193   : > { %v921_v2 = vpop.f32.mrf.mxu1  ;;  %v1403_v45 = vpop.f32.mrf.mxu0 }
 0x194   : > { %1696 = vst.msk [vmem:[%s2731_s30 + $0x4c] sm:$0xf] %vm1676_vm1, %v2060_v40  ;;  %v1536_v47 = vmax.f32 %v1504_v43, 0.0  ;;  %v1466_v26 = vadd.f32 %v1401_v9, %v920_v44 }
 0x195   : > { %v924_v13 = vpop.f32.mrf.mxu1  ;;  %v1406_v48 = vpop.f32.mrf.mxu0 }
 0x196   : > { %v2061_v51 = vpack.c.bf16 %v1536_v47, %v1536_v47  ;;  %v1505_v29 = vadd.f32 %v2723_v16, %v1466_v26  ;;  %v925_v52 = vadd.f32 %v924_v13, %v2681_v34 }
 0x197   : > { %v926_v55 = vpop.f32.mrf.mxu1  ;;  %v1408_v1 = vpop.f32.mrf.mxu0 }
 0x198   : > { %1697 = vst.msk [vmem:[%s2731_s30 + $0x50] sm:$0xf] %vm1676_vm1, %v2061_v51  ;;  %v1537_v56 = vmax.f32 %v1505_v29, 0.0  ;;  %v1467_v30 = vadd.f32 %v1406_v48, %v925_v52 }
 0x199   : > { %v927_v49 = vpop.f32.mrf.mxu1  ;;  %v1409_v59 = vpop.f32.mrf.mxu0 }
 0x19a   : > { %v2062_v60 = vpack.c.bf16 %v1537_v56, %v1537_v56  ;;  %v1506_v63 = vadd.f32 %v2723_v16, %v1467_v30  ;;  %v928_v0 = vadd.f32 %v927_v49, %v2685_v38 }
 0x19b   : > { %v929_v4 = vpop.f32.mrf.mxu1  ;;  %v1411_v33 = vpop.f32.mrf.mxu0 }
 0x19c   : > { %1698 = vst.msk [vmem:[%s2731_s30 + $0x54] sm:$0xf] %vm1676_vm1, %v2062_v60  ;;  %v1538_v10 = vmax.f32 %v1506_v63, 0.0  ;;  %v1468_v34 = vadd.f32 %v1409_v59, %v928_v0 }
 0x19d   : > { %v932_v6 = vpop.f32.mrf.mxu1  ;;  %v1414_v17 = vpop.f32.mrf.mxu0 }
 0x19e   : > { %v2063_v53 = vpack.c.bf16 %v1538_v10, %v1538_v10  ;;  %v1507_v5 = vadd.f32 %v2723_v16, %v1468_v34  ;;  %v933_v7 = vadd.f32 %v932_v6, %v2689_v42 }
 0x19f   : > { %v934_v11 = vpop.f32.mrf.mxu1  ;;  %v1416_v12 = vpop.f32.mrf.mxu0 }
 0x1a0   : > { %1699 = vst.msk [vmem:[%s2731_s30 + $0x58] sm:$0xf] %vm1676_vm1, %v2063_v53  ;;  %v1539_v15 = vmax.f32 %v1507_v5, 0.0  ;;  %v1469_v38 = vadd.f32 %v1414_v17, %v933_v7 }
 0x1a1   : > { %v935_v14 = vpop.f32.mrf.mxu1  ;;  %v1417_v19 = vpop.f32.mrf.mxu0 }
 0x1a2   : > { %v2064_v37 = vpack.c.bf16 %v1539_v15, %v1539_v15  ;;  %v1508_v20 = vadd.f32 %v2723_v16, %v1469_v38  ;;  %v936_v57 = vadd.f32 %v935_v14, %v2693_v46 }
 0x1a3   : > { %v937_v23 = vpop.f32.mrf.mxu1  ;;  %v1419_v21 = vpop.f32.mrf.mxu0 }
 0x1a4   : > { %1700 = vst.msk [vmem:[%s2731_s30 + $0x5c] sm:$0xf] %vm1676_vm1, %v2064_v37  ;;  %v1540_v24 = vmax.f32 %v1508_v20, 0.0  ;;  %v1470_v42 = vadd.f32 %v1417_v19, %v936_v57 }
 0x1a5   : > { %v940_v27 = vpop.f32.mrf.mxu1  ;;  %v1422_v18 = vpop.f32.mrf.mxu0 }
 0x1a6   : > { %v2065_v28 = vpack.c.bf16 %v1540_v24, %v1540_v24  ;;  %v1509_v31 = vadd.f32 %v2723_v16, %v1470_v42  ;;  %v941_v32 = vadd.f32 %v940_v27, %v2697_v50 }
 0x1a7   : > { %v942_v41 = vpop.f32.mrf.mxu1  ;;  %v1424_v61 = vpop.f32.mrf.mxu0 }
 0x1a8   : > { %1701 = vst.msk [vmem:[%s2731_s30 + $0x60] sm:$0xf] %vm1676_vm1, %v2065_v28  ;;  %v1541_v35 = vmax.f32 %v1509_v31, 0.0  ;;  %v1471_v46 = vadd.f32 %v1422_v18, %v941_v32 }
 0x1a9   : > { %v943_v36 = vpop.f32.mrf.mxu1  ;;  %v1425_v39 = vpop.f32.mrf.mxu0 }
 0x1aa   : > { %v2066_v22 = vpack.c.bf16 %v1541_v35, %v1541_v35  ;;  %v1510_v25 = vadd.f32 %v2723_v16, %v1471_v46  ;;  %v944_v9 = vadd.f32 %v943_v36, %v2701_v54 }
 0x1ab   : > { %v945_v40 = vpop.f32.mrf.mxu1  ;;  %v1427_v43 = vpop.f32.mrf.mxu0 }
 0x1ac   : > { %1702 = vst.msk [vmem:[%s2731_s30 + $0x64] sm:$0xf] %vm1676_vm1, %v2066_v22  ;;  %v1542_v44 = vmax.f32 %v1510_v25, 0.0  ;;  %v1472_v50 = vadd.f32 %v1425_v39, %v944_v9 }
 0x1ad   : > { %v948_v2 = vpop.f32.mrf.mxu1  ;;  %v1430_v45 = vpop.f32.mrf.mxu0 }
 0x1ae   : > { %v2067_v47 = vpack.c.bf16 %v1542_v44, %v1542_v44  ;;  %v1511_v26 = vadd.f32 %v2723_v16, %v1472_v50  ;;  %v949_v13 = vadd.f32 %v948_v2, %v2705_v58 }
 0x1af   : > { %v950_v48 = vpop.f32.mrf.mxu1  ;;  %v1432_v51 = vpop.f32.mrf.mxu0 }
 0x1b0   : > { %1703 = vst.msk [vmem:[%s2731_s30 + $0x68] sm:$0xf] %vm1676_vm1, %v2067_v47  ;;  %v1543_v29 = vmax.f32 %v1511_v26, 0.0  ;;  %v1473_v54 = vadd.f32 %v1430_v45, %v949_v13 }
 0x1b1   : > { %v951_v52 = vpop.f32.mrf.mxu1  ;;  %v1433_v55 = vpop.f32.mrf.mxu0 }
 0x1b2   : > { %v2068_v1 = vpack.c.bf16 %v1543_v29, %v1543_v29  ;;  %v1512_v56 = vadd.f32 %v2723_v16, %v1473_v54  ;;  %v952_v30 = vadd.f32 %v951_v52, %v2709_v62 }
 0x1b3   : > { %v953_v49 = vpop.f32.mrf.mxu1  ;;  %v1435_v59 = vpop.f32.mrf.mxu0 }
 0x1b4   : > { %1704 = vst.msk [vmem:[%s2731_s30 + $0x6c] sm:$0xf] %vm1676_vm1, %v2068_v1  ;;  %v1544_v60 = vmax.f32 %v1512_v56, 0.0  ;;  %v1474_v58 = vadd.f32 %v1433_v55, %v952_v30 }
 0x1b5   : > { %v956_v63 = vpop.f32.mrf.mxu1  ;;  %v1438_v0 = vpop.f32.mrf.mxu0 }
 0x1b6   : > { %v2069_v4 = vpack.c.bf16 %v1544_v60, %v1544_v60  ;;  %v1513_v33 = vadd.f32 %v2723_v16, %v1474_v58  ;;  %v957_v10 = vadd.f32 %v956_v63, %v2713_v3 }
 0x1b7   : > { %v958_v34 = vpop.f32.mrf.mxu1  ;;  %v1440_v6 = vpop.f32.mrf.mxu0 }
 0x1b8   : > { %1705 = vst.msk [vmem:[%s2731_s30 + $0x70] sm:$0xf] %vm1676_vm1, %v2069_v4  ;;  %v1545_v62 = vmax.f32 %v1513_v33, 0.0  ;;  %v1475_v17 = vadd.f32 %v1438_v0, %v957_v10 }
 0x1b9   : > { %v959_v53 = vpop.f32.mrf.mxu1  ;;  %v1441_v5 = vpop.f32.mrf.mxu0 }
 0x1ba   : > { %v2070_v7 = vpack.c.bf16 %v1545_v62, %v1545_v62  ;;  %v1514_v11 = vadd.f32 %v2723_v16, %v1475_v17  ;;  %v960_v12 = vadd.f32 %v959_v53, %v2717_v8 }
 0x1bb   : > { %v961_v15 = vpop.f32.mrf.mxu1  ;;  %v1443_v38 = vpop.f32.mrf.mxu0 }
 0x1bc   : > { %1706 = vst.msk [vmem:[%s2731_s30 + $0x74] sm:$0xf] %vm1676_vm1, %v2070_v7  ;;  %v1546_v3 = vmax.f32 %v1514_v11, 0.0  ;;  %v1476_v14 = vadd.f32 %v1441_v5, %v960_v12 }
 0x1be   : > { %v2071_v19 = vpack.c.bf16 %v1546_v3, %v1546_v3  ;;  %v1515_v37 = vadd.f32 %v2723_v16, %v1476_v14 }
 0x1c0   : > { %1707 = vst.msk [vmem:[%s2731_s30 + $0x78] sm:$0xf] %vm1676_vm1, %v2071_v19  ;;  %v1547_v20 = vmax.f32 %v1515_v37, 0.0 }
 0x1c2   : > { %v2072_v57 = vpack.c.bf16 %v1547_v20, %v1547_v20 }
 0x1c4   : > { %1708 = vst.msk [vmem:[%s2731_s30 + $0x7c] sm:$0xf] %vm1676_vm1, %v2072_v57 }
 0x1c5 PF: > { %s13_s14 = sadd.s32 1, %s2235_s14   ;;  %s2871_s12 = smov %s2231_s13 }
 0x1c6   : > { %p10_p5 = scmp.ge.s32.totalorder %s13_s14, 4   ;;  %s2872_s13 = smov %s2874_s15 }
 0x1c8   :  { %12 = sbr.rel (!%p10_p5) target bundleno = 2 (0x2), region = 64 }

// kernel: cmptrans512_forward.22
= control target key start
LH: loop header
LB: loop body
LE: loop exit
PB: predicated region body
PF: predicated region fallthrough
CT: control target
= control target key end

     0   :  { %vm262_vm0 = vcmask 261120   ;;  %vm1288_vm1 = vcmask 257024   ;;  %s2506_s1 = inlined_call_operand.vmem [shape: bf16[32,32], index: 1, kind: input, shape index: {}]   ;;  %s2507_s0 = inlined_call_operand.vmem [shape: bf16[512,32], index: 0, kind: input, shape index: {}]   ;;  %s2508_s2 = inlined_call_operand.vmem [shape: f32[1,32], index: 2, kind: input, shape index: {}]   ;;  %s2509_s3 = inlined_call_operand.vmem [shape: bf16[512,32], index: 3, kind: output, shape index: {}]  }
   0x1   :  { %v1722_v0 = vld [vmem:[%s2506_s1 + $0x8] sm:$0xff]   ;;  %v1723_v1 = vld [vmem:[%s2506_s1] sm:$0xff]   ;;  %v1728_v6 = vld [vmem:[%s2507_s0 + $0x10] sm:$0xff]  }
   0x2   :  { %1650 = vmatprep.subr.bf16.mxu0 %v1722_v0  ;;  %1718 = vmatprep.subr.bf16.mxu1 %v1722_v0  ;;  %v1724_v2 = vld [vmem:[%s2507_s0] sm:$0xff]   ;;  %v1726_v4 = vld [vmem:[%s2507_s0 + $0x8] sm:$0xff]   ;;  %v1729_v7 = vld [vmem:[%s2507_s0 + $0x90] sm:$0xff]  }
   0x3   :  { %1651 = vmatpush3.bf16.msra.mxu0 %v1722_v0  ;;  %1720 = vmatpush3.bf16.msra.mxu1 %v1722_v0  ;;  %v1725_v3 = vld [vmem:[%s2507_s0 + $0x80] sm:$0xff]   ;;  %v1727_v5 = vld [vmem:[%s2507_s0 + $0x88] sm:$0xff]   ;;  %v1730_v8 = vld [vmem:[%s2507_s0 + $0x18] sm:$0xff]  }
   0x4   :  { %1652 = vmatprep.subr.bf16.mxu0 %v1723_v1  ;;  %1719 = vmatprep.subr.bf16.mxu1 %v1723_v1  ;;  %v1731_v9 = vld [vmem:[%s2507_s0 + $0x98] sm:$0xff]   ;;  %v1732_v10 = vld [vmem:[%s2507_s0 + $0x20] sm:$0xff]   ;;  %v1734_v12 = vld [vmem:[%s2507_s0 + $0x28] sm:$0xff]  }
   0x5   :  { %1654 = vmatprep.mubr.msk.bf16.mxu0 %vm262_vm0, %v1724_v2  ;;  %1686 = vmatprep.mubr.msk.bf16.mxu1 %vm262_vm0, %v1725_v3  ;;  %v1733_v11 = vld [vmem:[%s2507_s0 + $0xa0] sm:$0xff]   ;;  %v1735_v13 = vld [vmem:[%s2507_s0 + $0xa8] sm:$0xff]   ;;  %v1736_v14 = vld [vmem:[%s2507_s0 + $0x30] sm:$0xff]  }
   0x6   :  { %v1737_v15 = vld [vmem:[%s2507_s0 + $0xb0] sm:$0xff]   ;;  %v1738_v16 = vld [vmem:[%s2507_s0 + $0x38] sm:$0xff]   ;;  %v1740_v18 = vld [vmem:[%s2507_s0 + $0x40] sm:$0xff]  }
   0x7   :  { %1653 = vmatpush3.bf16.msra.mxu0 %v1723_v1  ;;  %1721 = vmatpush3.bf16.msra.mxu1 %v1723_v1  ;;  %v1739_v17 = vld [vmem:[%s2507_s0 + $0xb8] sm:$0xff]   ;;  %v1741_v19 = vld [vmem:[%s2507_s0 + $0xc0] sm:$0xff]   ;;  %v1742_v20 = vld [vmem:[%s2507_s0 + $0x48] sm:$0xff]  }
   0x8   :  { %v1743_v21 = vld [vmem:[%s2507_s0 + $0xc8] sm:$0xff]   ;;  %v1744_v22 = vld [vmem:[%s2507_s0 + $0x50] sm:$0xff]   ;;  %v1746_v24 = vld [vmem:[%s2507_s0 + $0x58] sm:$0xff]  }
   0x9   :  { %v1745_v23 = vld [vmem:[%s2507_s0 + $0xd0] sm:$0xff]   ;;  %v1747_v25 = vld [vmem:[%s2507_s0 + $0xd8] sm:$0xff]   ;;  %v1748_v26 = vld [vmem:[%s2507_s0 + $0x60] sm:$0xff]  }
   0xa   :  { %1655 = vmatmul.mubr.msk.bf16.vlgmr.msra.gmra.mxu0 %vm262_vm0, %v1726_v4  ;;  %1687 = vmatmul.mubr.msk.bf16.vlgmr.msra.gmra.mxu1 %vm262_vm0, %v1727_v5  ;;  %v1749_v27 = vld [vmem:[%s2507_s0 + $0xe0] sm:$0xff]   ;;  %v1750_v28 = vld [vmem:[%s2507_s0 + $0x68] sm:$0xff]   ;;  %v1752_v30 = vld [vmem:[%s2507_s0 + $0x70] sm:$0xff]  }
   0xb   :  { %1658 = vmatprep.mubr.msk.bf16.mxu0 %vm262_vm0, %v1728_v6  ;;  %1690 = vmatprep.mubr.msk.bf16.mxu1 %vm262_vm0, %v1729_v7  ;;  %v1751_v29 = vld [vmem:[%s2507_s0 + $0xe8] sm:$0xff]   ;;  %v1753_v31 = vld [vmem:[%s2507_s0 + $0xf0] sm:$0xff]   ;;  %v1754_v32 = vld [vmem:[%s2507_s0 + $0x78] sm:$0xff]  }
   0xc   :  { %v1755_v33 = vld [vmem:[%s2507_s0 + $0xf8] sm:$0xff]   ;;  %v2170_v34 = vld [vmem:[%s2508_s2] ss:$0 sm:$0xff] }
  0x12   :  { %1659 = vmatmul.mubr.msk.bf16.gmra.mxu0 %vm262_vm0, %v1730_v8  ;;  %1691 = vmatmul.mubr.msk.bf16.gmra.mxu1 %vm262_vm0, %v1731_v9 }
  0x13   :  { %1662 = vmatprep.mubr.msk.bf16.mxu0 %vm262_vm0, %v1732_v10  ;;  %1694 = vmatprep.mubr.msk.bf16.mxu1 %vm262_vm0, %v1733_v11 }
  0x1a   :  { %1663 = vmatmul.mubr.msk.bf16.gmra.mxu0 %vm262_vm0, %v1734_v12  ;;  %1695 = vmatmul.mubr.msk.bf16.gmra.mxu1 %vm262_vm0, %v1735_v13 }
  0x1b   :  { %1666 = vmatprep.mubr.msk.bf16.mxu0 %vm262_vm0, %v1736_v14  ;;  %1698 = vmatprep.mubr.msk.bf16.mxu1 %vm262_vm0, %v1737_v15 }
  0x22   :  { %1667 = vmatmul.mubr.msk.bf16.gmra.mxu0 %vm262_vm0, %v1738_v16  ;;  %1699 = vmatmul.mubr.msk.bf16.gmra.mxu1 %vm262_vm0, %v1739_v17 }
  0x23   :  { %1670 = vmatprep.mubr.msk.bf16.mxu0 %vm262_vm0, %v1740_v18  ;;  %1702 = vmatprep.mubr.msk.bf16.mxu1 %vm262_vm0, %v1741_v19 }
  0x2a   :  { %1671 = vmatmul.mubr.msk.bf16.gmra.mxu0 %vm262_vm0, %v1742_v20  ;;  %1703 = vmatmul.mubr.msk.bf16.gmra.mxu1 %vm262_vm0, %v1743_v21 }
  0x2b   :  { %1674 = vmatprep.mubr.msk.bf16.mxu0 %vm262_vm0, %v1744_v22  ;;  %1706 = vmatprep.mubr.msk.bf16.mxu1 %vm262_vm0, %v1745_v23 }
  0x32   :  { %1675 = vmatmul.mubr.msk.bf16.gmra.mxu0 %vm262_vm0, %v1746_v24  ;;  %1707 = vmatmul.mubr.msk.bf16.gmra.mxu1 %vm262_vm0, %v1747_v25 }
  0x33   :  { %1678 = vmatprep.mubr.msk.bf16.mxu0 %vm262_vm0, %v1748_v26  ;;  %1710 = vmatprep.mubr.msk.bf16.mxu1 %vm262_vm0, %v1749_v27 }
  0x3a   :  { %1679 = vmatmul.mubr.msk.bf16.gmra.mxu0 %vm262_vm0, %v1750_v28  ;;  %1711 = vmatmul.mubr.msk.bf16.gmra.mxu1 %vm262_vm0, %v1751_v29 }
  0x3b   :  { %1682 = vmatprep.mubr.msk.bf16.mxu0 %vm262_vm0, %v1752_v30  ;;  %1714 = vmatprep.mubr.msk.bf16.mxu1 %vm262_vm0, %v1753_v31 }
  0x42   :  { %1683 = vmatmul.mubr.msk.bf16.gmra.mxu0 %vm262_vm0, %v1754_v32  ;;  %1715 = vmatmul.mubr.msk.bf16.gmra.mxu1 %vm262_vm0, %v1755_v33 }
  0xca   :  { %v1656_v35 = vpop.f32.mrf.mxu0  ;;  %v1688_v36 = vpop.f32.mrf.mxu1 }
  0xcb   :  { %v402_v37 = vadd.f32 %v1656_v35, %v2170_v34  ;;  %v530_v38 = vadd.f32 %v1688_v36, %v2170_v34 }
  0xcc   :  { %v393_v39 = vpop.f32.mrf.mxu0  ;;  %v521_v40 = vpop.f32.mrf.mxu1 }
  0xcd   :  { %v1426_v41 = vmul.f32 -1.442695, %v402_v37  ;;  %v1458_v42 = vmul.f32 -1.442695, %v530_v38  ;;  %v394_v43 = vadd.f32 %v2170_v34, %v393_v39  ;;  %v522_v44 = vadd.f32 %v2170_v34, %v521_v40 }
  0xce   :  { %v1657_v45 = vpop.f32.mrf.mxu0  ;;  %v1689_v46 = vpop.f32.mrf.mxu1 }
  0xcf   :  { %1756 = vpow2.f32 %v1426_v41  ;;  %v1424_v47 = vmul.f32 -1.442695, %v394_v43  ;;  %v1456_v48 = vmul.f32 -1.442695, %v522_v44  ;;  %v405_v49 = vadd.f32 %v1657_v45, %v2170_v34 }
  0xd0   :  { %1758 = vpow2.f32 %v1458_v42  ;;  %v533_v50 = vadd.f32 %v1689_v46, %v2170_v34  ;;  %v396_v51 = vpop.f32.mrf.mxu0  ;;  %v524_v52 = vpop.f32.mrf.mxu1 }
  0xd1   :  { %1760 = vpow2.f32 %v1424_v47  ;;  %v1427_v53 = vmul.f32 -1.442695, %v405_v49  ;;  %v397_v54 = vadd.f32 %v2170_v34, %v396_v51  ;;  %v525_v55 = vadd.f32 %v2170_v34, %v524_v52 }
  0xd2   :  { %1762 = vpow2.f32 %v1456_v48  ;;  %v1459_v56 = vmul.f32 -1.442695, %v533_v50  ;;  %v1660_v57 = vpop.f32.mrf.mxu0  ;;  %v1692_v58 = vpop.f32.mrf.mxu1 }
  0xd3   :  { %1764 = vpow2.f32 %v1427_v53  ;;  %v1425_v59 = vmul.f32 -1.442695, %v397_v54  ;;  %v1457_v60 = vmul.f32 -1.442695, %v525_v55  ;;  %v418_v61 = vadd.f32 %v1660_v57, %v2170_v34 }
  0xd4   :  { %1766 = vpow2.f32 %v1459_v56  ;;  %v546_v62 = vadd.f32 %v1692_v58, %v2170_v34  ;;  %v409_v63 = vpop.f32.mrf.mxu0  ;;  %v537_v0 = vpop.f32.mrf.mxu1 }
  0xd5   :  { %1768 = vpow2.f32 %v1425_v59  ;;  %v1430_v1 = vmul.f32 -1.442695, %v418_v61  ;;  %v410_v2 = vadd.f32 %v2170_v34, %v409_v63  ;;  %v538_v3 = vadd.f32 %v2170_v34, %v537_v0 }
  0xd6   :  { %1770 = vpow2.f32 %v1457_v60  ;;  %v1462_v4 = vmul.f32 -1.442695, %v546_v62  ;;  %v1661_v5 = vpop.f32.mrf.mxu0  ;;  %v1693_v6 = vpop.f32.mrf.mxu1 }
  0xd7   :  { %1772 = vpow2.f32 %v1430_v1  ;;  %v1428_v7 = vmul.f32 -1.442695, %v410_v2  ;;  %v1460_v8 = vmul.f32 -1.442695, %v538_v3  ;;  %v421_v9 = vadd.f32 %v1661_v5, %v2170_v34 }
  0xd8   :  { %1774 = vpow2.f32 %v1462_v4  ;;  %v549_v10 = vadd.f32 %v1693_v6, %v2170_v34  ;;  %v412_v11 = vpop.f32.mrf.mxu0  ;;  %v540_v12 = vpop.f32.mrf.mxu1 }
  0xd9   :  { %1776 = vpow2.f32 %v1428_v7  ;;  %v1431_v13 = vmul.f32 -1.442695, %v421_v9  ;;  %v413_v14 = vadd.f32 %v2170_v34, %v412_v11  ;;  %v541_v15 = vadd.f32 %v2170_v34, %v540_v12 }
  0xda   :  { %1778 = vpow2.f32 %v1460_v8  ;;  %v1463_v16 = vmul.f32 -1.442695, %v549_v10  ;;  %v1664_v17 = vpop.f32.mrf.mxu0  ;;  %v1696_v18 = vpop.f32.mrf.mxu1 }
  0xdb   :  { %1780 = vpow2.f32 %v1431_v13  ;;  %v1429_v19 = vmul.f32 -1.442695, %v413_v14  ;;  %v1461_v20 = vmul.f32 -1.442695, %v541_v15  ;;  %v434_v52 = vadd.f32 %v1664_v17, %v2170_v34 }
  0xdc   :  { %v1757_v21 = vpop.eup %1756  ;;  %1782 = vpow2.f32 %v1463_v16  ;;  %v425_v22 = vpop.f32.mrf.mxu0  ;;  %v562_v56 = vadd.f32 %v1696_v18, %v2170_v34 }
  0xdd   :  { %v553_v23 = vpop.f32.mrf.mxu1  ;;  %v1759_v24 = vpop.eup %1758  ;;  %v842_v25 = vadd.f32 1.0, %v1757_v21  ;;  %1784 = vpow2.f32 %v1429_v19  ;;  %v426_v59 = vadd.f32 %v2170_v34, %v425_v22  ;;  %v1434_v2 = vmul.f32 -1.442695, %v434_v52 }
  0xde   :  { %v1761_v26 = vpop.eup %1760  ;;  %v874_v27 = vadd.f32 1.0, %v1759_v24  ;;  %1786 = vpow2.f32 %v1461_v20  ;;  %v1665_v28 = vpop.f32.mrf.mxu0  ;;  %v554_v62 = vadd.f32 %v2170_v34, %v553_v23  ;;  %v1466_v7 = vmul.f32 -1.442695, %v562_v56 }
  0xdf   :  { %v1763_v29 = vpop.eup %1762  ;;  %1788 = vrcp.f32 %v842_v25  ;;  %v840_v30 = vadd.f32 1.0, %v1761_v26  ;;  %v1697_v31 = vpop.f32.mrf.mxu1  ;;  %v437_v3 = vadd.f32 %v1665_v28, %v2170_v34  ;;  %v1432_v11 = vmul.f32 -1.442695, %v426_v59 }
  0xe0   :  { %v1765_v32 = vpop.eup %1764  ;;  %1790 = vrcp.f32 %v874_v27  ;;  %v872_v33 = vadd.f32 1.0, %v1763_v29  ;;  %v428_v39 = vpop.f32.mrf.mxu0  ;;  %v565_v8 = vadd.f32 %v1697_v31, %v2170_v34  ;;  %v1464_v15 = vmul.f32 -1.442695, %v554_v62 }
  0xe1   :  { %v1767_v35 = vpop.eup %1766  ;;  %1792 = vrcp.f32 %v840_v30  ;;  %v843_v36 = vadd.f32 1.0, %v1765_v32  ;;  %v556_v42 = vpop.f32.mrf.mxu1  ;;  %v429_v12 = vadd.f32 %v2170_v34, %v428_v39  ;;  %v1435_v20 = vmul.f32 -1.442695, %v437_v3 }
  0xe2   :  { %v1769_v37 = vpop.eup %1768  ;;  %1794 = vrcp.f32 %v872_v33  ;;  %v875_v38 = vadd.f32 1.0, %v1767_v35  ;;  %v1668_v49 = vpop.f32.mrf.mxu0  ;;  %v557_v16 = vadd.f32 %v2170_v34, %v556_v42  ;;  %v1467_v25 = vmul.f32 -1.442695, %v565_v8 }
  0xe3   :  { %v1771_v40 = vpop.eup %1770  ;;  %1796 = vrcp.f32 %v843_v36  ;;  %v841_v41 = vadd.f32 1.0, %v1769_v37  ;;  %v1700_v53 = vpop.f32.mrf.mxu1  ;;  %v450_v21 = vadd.f32 %v1668_v49, %v2170_v34  ;;  %v1433_v29 = vmul.f32 -1.442695, %v429_v12 }
  0xe4   :  { %v1773_v43 = vpop.eup %1772  ;;  %1798 = vrcp.f32 %v875_v38  ;;  %v873_v44 = vadd.f32 1.0, %v1771_v40  ;;  %v441_v63 = vpop.f32.mrf.mxu0  ;;  %v578_v26 = vadd.f32 %v1700_v53, %v2170_v34  ;;  %v1465_v33 = vmul.f32 -1.442695, %v557_v16 }
  0xe5   :  { %v1775_v45 = vpop.eup %1774  ;;  %1800 = vrcp.f32 %v841_v41  ;;  %v846_v46 = vadd.f32 1.0, %v1773_v43  ;;  %v569_v4 = vpop.f32.mrf.mxu1  ;;  %v442_v30 = vadd.f32 %v2170_v34, %v441_v63  ;;  %v1438_v39 = vmul.f32 -1.442695, %v450_v21 }
  0xe6   :  { %v1777_v47 = vpop.eup %1776  ;;  %1802 = vrcp.f32 %v873_v44  ;;  %v878_v48 = vadd.f32 1.0, %v1775_v45  ;;  %v1669_v17 = vpop.f32.mrf.mxu0  ;;  %v570_v35 = vadd.f32 %v2170_v34, %v569_v4  ;;  %v1470_v44 = vmul.f32 -1.442695, %v578_v26 }
  0xe7   :  { %v1779_v50 = vpop.eup %1778  ;;  %1804 = vrcp.f32 %v846_v46  ;;  %v844_v51 = vadd.f32 1.0, %v1777_v47  ;;  %v1701_v22 = vpop.f32.mrf.mxu1  ;;  %v453_v40 = vadd.f32 %v1669_v17, %v2170_v34 }
  0xe8   :  { %v1781_v54 = vpop.eup %1780  ;;  %1806 = vrcp.f32 %v878_v48  ;;  %v876_v55 = vadd.f32 1.0, %v1779_v50  ;;  %v444_v36 = vpop.f32.mrf.mxu0  ;;  %v581_v45 = vadd.f32 %v1701_v22, %v2170_v34  ;;  %v1436_v48 = vmul.f32 -1.442695, %v442_v30 }
  0xe9   :  { %v1783_v57 = vpop.eup %1782  ;;  %1808 = vrcp.f32 %v844_v51  ;;  %v847_v58 = vadd.f32 1.0, %v1781_v54  ;;  %v572_v41 = vpop.f32.mrf.mxu1  ;;  %v445_v49 = vadd.f32 %v2170_v34, %v444_v36  ;;  %v1468_v52 = vmul.f32 -1.442695, %v570_v35 }
  0xea   :  { %v1785_v60 = vpop.eup %1784  ;;  %1810 = vrcp.f32 %v876_v55  ;;  %v879_v61 = vadd.f32 1.0, %v1783_v57  ;;  %v573_v53 = vadd.f32 %v2170_v34, %v572_v41  ;;  %v2236_v54 = vpop.f32.mrf.mxu0  ;;  %v1439_v57 = vmul.f32 -1.442695, %v453_v40 }
  0xeb   :  { %v1787_v0 = vpop.eup %1786  ;;  %1812 = vrcp.f32 %v847_v58  ;;  %v845_v1 = vadd.f32 1.0, %v1785_v60  ;;  %v2242_v58 = vpop.f32.mrf.mxu1 }
  0xec   :  { %v1789_v5 = vpop.eup %1788  ;;  %1814 = vrcp.f32 %v879_v61  ;;  %v877_v6 = vadd.f32 1.0, %v1787_v0  ;;  %v1471_v61 = vmul.f32 -1.442695, %v581_v45  ;;  %v1437_v0 = vmul.f32 -1.442695, %v445_v49  ;;  %v457_v4 = vpop.f32.mrf.mxu0 }
  0xed   :  { %v1791_v9 = vpop.eup %1790  ;;  %v1554_v10 = vpack.c.bf16 %v1789_v5, %v1789_v5  ;;  %1816 = vrcp.f32 %v845_v1  ;;  %v1469_v3 = vmul.f32 -1.442695, %v573_v53  ;;  %v458_v45 = vadd.f32 %v2170_v34, %v457_v4 }
  0xee   :  { %v1793_v13 = vpop.eup %1792  ;;  %v1586_v14 = vpack.c.bf16 %v1791_v9, %v1791_v9  ;;  %1818 = vrcp.f32 %v877_v6 }
  0xef   :  { %v1795_v18 = vpop.eup %1794  ;;  %1291 = vst.msk [vmem:[%s2509_s3 + $0x8] sm:$0xf] %vm1288_vm1, %v1554_v10  ;;  %v1552_v19 = vpack.c.bf16 %v1793_v13, %v1793_v13  ;;  %1820 = vpow2.f32 %v1434_v2 }
  0xf0   :  { %v1797_v23 = vpop.eup %1796  ;;  %1323 = vst.msk [vmem:[%s2509_s3 + $0x88] sm:$0xf] %vm1288_vm1, %v1586_v14  ;;  %v1584_v24 = vpack.c.bf16 %v1795_v18, %v1795_v18  ;;  %1822 = vpow2.f32 %v1466_v7  ;;  %v585_v7 = vpop.f32.mrf.mxu1 }
  0xf1   :  { %v1799_v27 = vpop.eup %1798  ;;  %1289 = vst.msk [vmem:[%s2509_s3] sm:$0xf] %vm1288_vm1, %v1552_v19  ;;  %v1555_v28 = vpack.c.bf16 %v1797_v23, %v1797_v23  ;;  %1824 = vpow2.f32 %v1432_v11  ;;  %v1673_v14 = vpop.f32.mrf.mxu0 }
  0xf2   :  { %v1801_v31 = vpop.eup %1800  ;;  %1321 = vst.msk [vmem:[%s2509_s3 + $0x80] sm:$0xf] %vm1288_vm1, %v1584_v24  ;;  %v1587_v32 = vpack.c.bf16 %v1799_v27, %v1799_v27  ;;  %1826 = vpow2.f32 %v1464_v15  ;;  %v1705_v17 = vpop.f32.mrf.mxu1  ;;  %v469_v53 = vadd.f32 %v1673_v14, %v2170_v34 }
  0xf3   :  { %v1803_v37 = vpop.eup %1802  ;;  %1292 = vst.msk [vmem:[%s2509_s3 + $0xc] sm:$0xf] %vm1288_vm1, %v1555_v28  ;;  %v1553_v38 = vpack.c.bf16 %v1801_v31, %v1801_v31  ;;  %1828 = vpow2.f32 %v1435_v20  ;;  %v460_v24 = vpop.f32.mrf.mxu0 }
  0xf4   :  { %v1805_v42 = vpop.eup %1804  ;;  %1324 = vst.msk [vmem:[%s2509_s3 + $0x8c] sm:$0xf] %vm1288_vm1, %v1587_v32  ;;  %v1585_v43 = vpack.c.bf16 %v1803_v37, %v1803_v37  ;;  %1830 = vpow2.f32 %v1467_v25  ;;  %v588_v27 = vpop.f32.mrf.mxu1 }
  0xf5   :  { %v1807_v46 = vpop.eup %1806  ;;  %1290 = vst.msk [vmem:[%s2509_s3 + $0x4] sm:$0xf] %vm1288_vm1, %v1553_v38  ;;  %v1558_v47 = vpack.c.bf16 %v1805_v42, %v1805_v42  ;;  %1832 = vpow2.f32 %v1433_v29  ;;  %v1676_v35 = vpop.f32.mrf.mxu0  ;;  %v466_v38 = vadd.f32 %v2236_v54, %v2170_v34  ;;  %v594_v42 = vadd.f32 %v2242_v58, %v2170_v34 }
  0xf6   :  { %v1809_v50 = vpop.eup %1808  ;;  %1322 = vst.msk [vmem:[%s2509_s3 + $0x84] sm:$0xf] %vm1288_vm1, %v1585_v43  ;;  %v1590_v51 = vpack.c.bf16 %v1807_v46, %v1807_v46  ;;  %1834 = vpow2.f32 %v1465_v33  ;;  %v597_v58 = vadd.f32 %v1705_v17, %v2170_v34 }
  0xf7   :  { %v1811_v55 = vpop.eup %1810  ;;  %1295 = vst.msk [vmem:[%s2509_s3 + $0x18] sm:$0xf] %vm1288_vm1, %v1558_v47  ;;  %v1556_v56 = vpack.c.bf16 %v1809_v50, %v1809_v50  ;;  %1836 = vpow2.f32 %v1438_v39  ;;  %v1708_v39 = vpop.f32.mrf.mxu1 }
  0xf8   :  { %v1813_v59 = vpop.eup %1812  ;;  %1327 = vst.msk [vmem:[%s2509_s3 + $0x98] sm:$0xf] %vm1288_vm1, %v1590_v51  ;;  %v1588_v60 = vpack.c.bf16 %v1811_v55, %v1811_v55  ;;  %1838 = vpow2.f32 %v1470_v44  ;;  %v473_v49 = vpop.f32.mrf.mxu0 }
  0xf9   :  { %v1815_v62 = vpop.eup %1814  ;;  %1293 = vst.msk [vmem:[%s2509_s3 + $0x10] sm:$0xf] %vm1288_vm1, %v1556_v56  ;;  %v1559_v63 = vpack.c.bf16 %v1813_v59, %v1813_v59  ;;  %1840 = vpow2.f32 %v1436_v48  ;;  %v586_v48 = vadd.f32 %v2170_v34, %v585_v7  ;;  %v601_v54 = vpop.f32.mrf.mxu1  ;;  %v482_v7 = vadd.f32 %v1676_v35, %v2170_v34 }
  0xfa   :  { %v1817_v1 = vpop.eup %1816  ;;  %1325 = vst.msk [vmem:[%s2509_s3 + $0x90] sm:$0xf] %vm1288_vm1, %v1588_v60  ;;  %v1591_v2 = vpack.c.bf16 %v1815_v62, %v1815_v62  ;;  %1842 = vpow2.f32 %v1468_v52  ;;  %v1442_v52 = vmul.f32 -1.442695, %v466_v38  ;;  %v461_v62 = vadd.f32 %v2170_v34, %v460_v24 }
  0xfb   :  { %v1819_v5 = vpop.eup %1818  ;;  %1296 = vst.msk [vmem:[%s2509_s3 + $0x1c] sm:$0xf] %vm1288_vm1, %v1559_v63  ;;  %v1557_v6 = vpack.c.bf16 %v1817_v1, %v1817_v1  ;;  %1844 = vpow2.f32 %v1439_v57  ;;  %v1474_v57 = vmul.f32 -1.442695, %v594_v42  ;;  %v1472_v1 = vmul.f32 -1.442695, %v586_v48 }
  0xfc   :  { %v1821_v8 = vpop.eup %1820  ;;  %1328 = vst.msk [vmem:[%s2509_s3 + $0x9c] sm:$0xf] %vm1288_vm1, %v1591_v2  ;;  %v1589_v9 = vpack.c.bf16 %v1819_v5, %v1819_v5  ;;  %1846 = vpow2.f32 %v1471_v61  ;;  %v1440_v61 = vmul.f32 -1.442695, %v458_v45  ;;  %v589_v2 = vadd.f32 %v2170_v34, %v588_v27 }
  0xfd   :  { %v1823_v10 = vpop.eup %1822  ;;  %1294 = vst.msk [vmem:[%s2509_s3 + $0x14] sm:$0xf] %vm1288_vm1, %v1557_v6  ;;  %v850_v11 = vadd.f32 1.0, %v1821_v8  ;;  %1848 = vpow2.f32 %v1437_v0  ;;  %v1443_v6 = vmul.f32 -1.442695, %v469_v53  ;;  %v1709_v8 = vpop.f32.mrf.mxu1 }
  0xfe   :  { %v1825_v12 = vpop.eup %1824  ;;  %1326 = vst.msk [vmem:[%s2509_s3 + $0x94] sm:$0xf] %vm1288_vm1, %v1589_v9  ;;  %v882_v13 = vadd.f32 1.0, %v1823_v10  ;;  %1850 = vpow2.f32 %v1469_v3  ;;  %v1677_v3 = vpop.f32.mrf.mxu0  ;;  %v1446_v24 = vmul.f32 -1.442695, %v482_v7 }
  0xff   :  { %v1827_v15 = vpop.eup %1826  ;;  %1852 = vrcp.f32 %v850_v11  ;;  %v848_v16 = vadd.f32 1.0, %v1825_v12  ;;  %v1475_v11 = vmul.f32 -1.442695, %v597_v58  ;;  %v610_v12 = vadd.f32 %v1708_v39, %v2170_v34 }
 0x100   :  { %v1829_v18 = vpop.eup %1828  ;;  %1854 = vrcp.f32 %v882_v13  ;;  %v880_v19 = vadd.f32 1.0, %v1827_v15  ;;  %v1441_v15 = vmul.f32 -1.442695, %v461_v62 }
 0x101   :  { %v1831_v20 = vpop.eup %1830  ;;  %1856 = vrcp.f32 %v848_v16  ;;  %v851_v21 = vadd.f32 1.0, %v1829_v18  ;;  %v474_v16 = vadd.f32 %v2170_v34, %v473_v49 }
 0x102   :  { %v1833_v22 = vpop.eup %1832  ;;  %1858 = vrcp.f32 %v880_v19  ;;  %v883_v23 = vadd.f32 1.0, %v1831_v20  ;;  %v1473_v19 = vmul.f32 -1.442695, %v589_v2  ;;  %v602_v20 = vadd.f32 %v2170_v34, %v601_v54 }
 0x103   :  { %v1835_v25 = vpop.eup %1834  ;;  %1860 = vrcp.f32 %v851_v21  ;;  %v849_v26 = vadd.f32 1.0, %v1833_v22  ;;  %v476_v21 = vpop.f32.mrf.mxu0 }
 0x104   :  { %v1837_v28 = vpop.eup %1836  ;;  %1862 = vrcp.f32 %v883_v23  ;;  %v881_v29 = vadd.f32 1.0, %v1835_v25  ;;  %v485_v25 = vadd.f32 %v1677_v3, %v2170_v34  ;;  %v477_v35 = vadd.f32 %v2170_v34, %v476_v21 }
 0x105   :  { %v1839_v30 = vpop.eup %1838  ;;  %1864 = vrcp.f32 %v849_v26  ;;  %v854_v31 = vadd.f32 1.0, %v1837_v28  ;;  %v604_v26 = vpop.f32.mrf.mxu1  ;;  %v1476_v38 = vmul.f32 -1.442695, %v602_v20 }
 0x106   :  { %v1841_v32 = vpop.eup %1840  ;;  %1866 = vrcp.f32 %v881_v29  ;;  %v886_v33 = vadd.f32 1.0, %v1839_v30  ;;  %v1478_v29 = vmul.f32 -1.442695, %v610_v12  ;;  %v613_v30 = vadd.f32 %v1709_v8, %v2170_v34 }
 0x107   :  { %v1843_v36 = vpop.eup %1842  ;;  %1868 = vrcp.f32 %v854_v31  ;;  %v852_v37 = vadd.f32 1.0, %v1841_v32  ;;  %v605_v39 = vadd.f32 %v2170_v34, %v604_v26 }
 0x108   :  { %v1845_v40 = vpop.eup %1844  ;;  %1870 = vrcp.f32 %v886_v33  ;;  %v884_v41 = vadd.f32 1.0, %v1843_v36  ;;  %v1444_v33 = vmul.f32 -1.442695, %v474_v16 }
 0x109   :  { %v1847_v43 = vpop.eup %1846  ;;  %1872 = vrcp.f32 %v852_v37  ;;  %v855_v44 = vadd.f32 1.0, %v1845_v40  ;;  %v2322_v40 = vpop.f32.mrf.mxu0  ;;  %v1477_v53 = vmul.f32 -1.442695, %v605_v39 }
 0x10a   :  { %v1849_v46 = vpop.eup %1848  ;;  %1874 = vrcp.f32 %v884_v41  ;;  %v887_v47 = vadd.f32 1.0, %v1847_v43  ;;  %v1447_v43 = vmul.f32 -1.442695, %v485_v25 }
 0x10b   :  { %v1851_v50 = vpop.eup %1850  ;;  %1876 = vrcp.f32 %v855_v44  ;;  %v853_v51 = vadd.f32 1.0, %v1849_v46  ;;  %v2328_v44 = vpop.f32.mrf.mxu1 }
 0x10c   :  { %v1853_v55 = vpop.eup %1852  ;;  %1878 = vrcp.f32 %v887_v47  ;;  %v885_v56 = vadd.f32 1.0, %v1851_v50  ;;  %v1479_v47 = vmul.f32 -1.442695, %v613_v30  ;;  %v1445_v50 = vmul.f32 -1.442695, %v477_v35  ;;  %v489_v54 = vpop.f32.mrf.mxu0 }
 0x10d   :  { %v1855_v59 = vpop.eup %1854  ;;  %v1562_v60 = vpack.c.bf16 %v1853_v55, %v1853_v55  ;;  %1880 = vrcp.f32 %v853_v51  ;;  %v490_v30 = vadd.f32 %v2170_v34, %v489_v54 }
 0x10e   :  { %v1857_v63 = vpop.eup %1856  ;;  %v1594_v0 = vpack.c.bf16 %v1855_v59, %v1855_v59  ;;  %1882 = vrcp.f32 %v885_v56 }
 0x10f   :  { %v1859_v4 = vpop.eup %1858  ;;  %1299 = vst.msk [vmem:[%s2509_s3 + $0x28] sm:$0xf] %vm1288_vm1, %v1562_v60  ;;  %v1560_v5 = vpack.c.bf16 %v1857_v63, %v1857_v63  ;;  %1884 = vpow2.f32 %v1442_v52 }
 0x110   :  { %v1861_v9 = vpop.eup %1860  ;;  %1331 = vst.msk [vmem:[%s2509_s3 + $0xa8] sm:$0xf] %vm1288_vm1, %v1594_v0  ;;  %v1592_v10 = vpack.c.bf16 %v1859_v4, %v1859_v4  ;;  %1886 = vpow2.f32 %v1474_v57  ;;  %v617_v57 = vpop.f32.mrf.mxu1 }
 0x111   :  { %v1863_v13 = vpop.eup %1862  ;;  %1297 = vst.msk [vmem:[%s2509_s3 + $0x20] sm:$0xf] %vm1288_vm1, %v1560_v5  ;;  %v1563_v14 = vpack.c.bf16 %v1861_v9, %v1861_v9  ;;  %1888 = vpow2.f32 %v1440_v61  ;;  %v1681_v0 = vpop.f32.mrf.mxu0 }
 0x112   :  { %v1865_v17 = vpop.eup %1864  ;;  %1329 = vst.msk [vmem:[%s2509_s3 + $0xa0] sm:$0xf] %vm1288_vm1, %v1592_v10  ;;  %v1595_v18 = vpack.c.bf16 %v1863_v13, %v1863_v13  ;;  %1890 = vpow2.f32 %v1472_v1  ;;  %v1713_v3 = vpop.f32.mrf.mxu1  ;;  %v501_v39 = vadd.f32 %v1681_v0, %v2170_v34 }
 0x113   :  { %v1867_v22 = vpop.eup %1866  ;;  %1300 = vst.msk [vmem:[%s2509_s3 + $0x2c] sm:$0xf] %vm1288_vm1, %v1563_v14  ;;  %v1561_v23 = vpack.c.bf16 %v1865_v17, %v1865_v17  ;;  %1892 = vpow2.f32 %v1443_v6  ;;  %v492_v10 = vpop.f32.mrf.mxu0 }
 0x114   :  { %v1869_v27 = vpop.eup %1868  ;;  %1332 = vst.msk [vmem:[%s2509_s3 + $0xac] sm:$0xf] %vm1288_vm1, %v1595_v18  ;;  %v1593_v28 = vpack.c.bf16 %v1867_v22, %v1867_v22  ;;  %1894 = vpow2.f32 %v1475_v11  ;;  %v620_v13 = vpop.f32.mrf.mxu1 }
 0x115   :  { %v1871_v31 = vpop.eup %1870  ;;  %1298 = vst.msk [vmem:[%s2509_s3 + $0x24] sm:$0xf] %vm1288_vm1, %v1561_v23  ;;  %v1566_v32 = vpack.c.bf16 %v1869_v27, %v1869_v27  ;;  %1896 = vpow2.f32 %v1441_v15  ;;  %v1684_v20 = vpop.f32.mrf.mxu0  ;;  %v498_v23 = vadd.f32 %v2322_v40, %v2170_v34  ;;  %v626_v27 = vadd.f32 %v2328_v44, %v2170_v34 }
 0x116   :  { %v1873_v36 = vpop.eup %1872  ;;  %1330 = vst.msk [vmem:[%s2509_s3 + $0xa4] sm:$0xf] %vm1288_vm1, %v1593_v28  ;;  %v1598_v37 = vpack.c.bf16 %v1871_v31, %v1871_v31  ;;  %1898 = vpow2.f32 %v1473_v19  ;;  %v629_v44 = vadd.f32 %v1713_v3, %v2170_v34 }
 0x117   :  { %v1875_v41 = vpop.eup %1874  ;;  %1303 = vst.msk [vmem:[%s2509_s3 + $0x38] sm:$0xf] %vm1288_vm1, %v1566_v32  ;;  %v1564_v42 = vpack.c.bf16 %v1873_v36, %v1873_v36  ;;  %1900 = vpow2.f32 %v1446_v24  ;;  %v1716_v24 = vpop.f32.mrf.mxu1 }
 0x118   :  { %v1877_v45 = vpop.eup %1876  ;;  %1335 = vst.msk [vmem:[%s2509_s3 + $0xb8] sm:$0xf] %vm1288_vm1, %v1598_v37  ;;  %v1596_v46 = vpack.c.bf16 %v1875_v41, %v1875_v41  ;;  %1902 = vpow2.f32 %v1478_v29  ;;  %v505_v35 = vpop.f32.mrf.mxu0 }
 0x119   :  { %v1879_v48 = vpop.eup %1878  ;;  %1301 = vst.msk [vmem:[%s2509_s3 + $0x30] sm:$0xf] %vm1288_vm1, %v1564_v42  ;;  %v1567_v49 = vpack.c.bf16 %v1877_v45, %v1877_v45  ;;  %1904 = vpow2.f32 %v1444_v33  ;;  %v618_v33 = vadd.f32 %v2170_v34, %v617_v57  ;;  %v633_v40 = vpop.f32.mrf.mxu1  ;;  %v514_v57 = vadd.f32 %v1684_v20, %v2170_v34 }
 0x11a   :  { %v1881_v51 = vpop.eup %1880  ;;  %1333 = vst.msk [vmem:[%s2509_s3 + $0xb0] sm:$0xf] %vm1288_vm1, %v1596_v46  ;;  %v1599_v52 = vpack.c.bf16 %v1879_v48, %v1879_v48  ;;  %1906 = vpow2.f32 %v1476_v38  ;;  %v1450_v38 = vmul.f32 -1.442695, %v498_v23  ;;  %v493_v48 = vadd.f32 %v2170_v34, %v492_v10 }
 0x11b   :  { %v1883_v55 = vpop.eup %1882  ;;  %1304 = vst.msk [vmem:[%s2509_s3 + $0x3c] sm:$0xf] %vm1288_vm1, %v1567_v49  ;;  %v1565_v56 = vpack.c.bf16 %v1881_v51, %v1881_v51  ;;  %1908 = vpow2.f32 %v1447_v43  ;;  %v1482_v43 = vmul.f32 -1.442695, %v626_v27  ;;  %v1480_v51 = vmul.f32 -1.442695, %v618_v33 }
 0x11c   :  { %v1885_v58 = vpop.eup %1884  ;;  %1336 = vst.msk [vmem:[%s2509_s3 + $0xbc] sm:$0xf] %vm1288_vm1, %v1599_v52  ;;  %v1597_v59 = vpack.c.bf16 %v1883_v55, %v1883_v55  ;;  %1910 = vpow2.f32 %v1479_v47  ;;  %v1448_v47 = vmul.f32 -1.442695, %v490_v30  ;;  %v621_v52 = vadd.f32 %v2170_v34, %v620_v13 }
 0x11d   :  { %v1887_v60 = vpop.eup %1886  ;;  %1302 = vst.msk [vmem:[%s2509_s3 + $0x34] sm:$0xf] %vm1288_vm1, %v1565_v56  ;;  %v858_v61 = vadd.f32 1.0, %v1885_v58  ;;  %1912 = vpow2.f32 %v1445_v50  ;;  %v1451_v56 = vmul.f32 -1.442695, %v501_v39  ;;  %v1717_v58 = vpop.f32.mrf.mxu1 }
 0x11e   :  { %v1889_v62 = vpop.eup %1888  ;;  %1334 = vst.msk [vmem:[%s2509_s3 + $0xb4] sm:$0xf] %vm1288_vm1, %v1597_v59  ;;  %v890_v63 = vadd.f32 1.0, %v1887_v60  ;;  %1914 = vpow2.f32 %v1477_v53  ;;  %v1685_v53 = vpop.f32.mrf.mxu0  ;;  %v1454_v10 = vmul.f32 -1.442695, %v514_v57 }
 0x11f   :  { %v1891_v1 = vpop.eup %1890  ;;  %1916 = vrcp.f32 %v858_v61  ;;  %v856_v2 = vadd.f32 1.0, %v1889_v62  ;;  %v1483_v61 = vmul.f32 -1.442695, %v629_v44  ;;  %v642_v62 = vadd.f32 %v1716_v24, %v2170_v34  ;;  %v2012_v24 = vld [vmem:[%s2508_s2] ss:$0 sm:$0xff] }
 0x120   :  { %v1893_v4 = vpop.eup %1892  ;;  %1918 = vrcp.f32 %v890_v63  ;;  %v888_v5 = vadd.f32 1.0, %v1891_v1  ;;  %v1449_v1 = vmul.f32 -1.442695, %v493_v48 }
 0x121   :  { %v1895_v6 = vpop.eup %1894  ;;  %1920 = vrcp.f32 %v856_v2  ;;  %v859_v7 = vadd.f32 1.0, %v1893_v4  ;;  %v506_v2 = vadd.f32 %v2170_v34, %v505_v35 }
 0x122   :  { %v1897_v8 = vpop.eup %1896  ;;  %1922 = vrcp.f32 %v888_v5  ;;  %v891_v9 = vadd.f32 1.0, %v1895_v6  ;;  %v1481_v5 = vmul.f32 -1.442695, %v621_v52  ;;  %v634_v6 = vadd.f32 %v2170_v34, %v633_v40 }
 0x123   :  { %v1899_v11 = vpop.eup %1898  ;;  %1924 = vrcp.f32 %v859_v7  ;;  %v857_v12 = vadd.f32 1.0, %v1897_v8  ;;  %v508_v7 = vpop.f32.mrf.mxu0 }
 0x124   :  { %v1901_v14 = vpop.eup %1900  ;;  %1926 = vrcp.f32 %v891_v9  ;;  %v889_v15 = vadd.f32 1.0, %v1899_v11  ;;  %v517_v11 = vadd.f32 %v1685_v53, %v2170_v34  ;;  %v509_v20 = vadd.f32 %v2170_v34, %v508_v7 }
 0x125   :  { %v1903_v16 = vpop.eup %1902  ;;  %1928 = vrcp.f32 %v857_v12  ;;  %v862_v17 = vadd.f32 1.0, %v1901_v14  ;;  %v636_v12 = vpop.f32.mrf.mxu1  ;;  %v1484_v23 = vmul.f32 -1.442695, %v634_v6 }
 0x126   :  { %v1905_v18 = vpop.eup %1904  ;;  %1930 = vrcp.f32 %v889_v15  ;;  %v894_v19 = vadd.f32 1.0, %v1903_v16  ;;  %v1486_v15 = vmul.f32 -1.442695, %v642_v62  ;;  %v645_v16 = vadd.f32 %v1717_v58, %v2170_v34 }
 0x127   :  { %v1907_v21 = vpop.eup %1906  ;;  %1932 = vrcp.f32 %v862_v17  ;;  %v860_v22 = vadd.f32 1.0, %v1905_v18  ;;  %v1455_v27 = vmul.f32 -1.442695, %v517_v11  ;;  %v1453_v33 = vmul.f32 -1.442695, %v509_v20 }
 0x128   :  { %v1909_v25 = vpop.eup %1908  ;;  %1934 = vrcp.f32 %v894_v19  ;;  %v892_v26 = vadd.f32 1.0, %v1907_v21  ;;  %v1452_v19 = vmul.f32 -1.442695, %v506_v2  ;;  %v1487_v30 = vmul.f32 -1.442695, %v645_v16 }
 0x129   :  { %v1911_v28 = vpop.eup %1910  ;;  %1936 = vrcp.f32 %v860_v22  ;;  %v863_v29 = vadd.f32 1.0, %v1909_v25  ;;  %v637_v25 = vadd.f32 %v2012_v24, %v636_v12 }
 0x12a   :  { %v1913_v31 = vpop.eup %1912  ;;  %1938 = vrcp.f32 %v892_v26  ;;  %v895_v32 = vadd.f32 1.0, %v1911_v28 }
 0x12b   :  { %v1915_v36 = vpop.eup %1914  ;;  %1940 = vrcp.f32 %v863_v29  ;;  %v861_v37 = vadd.f32 1.0, %v1913_v31 }
 0x12c   :  { %v1917_v41 = vpop.eup %1916  ;;  %1942 = vrcp.f32 %v895_v32  ;;  %v893_v42 = vadd.f32 1.0, %v1915_v36 }
 0x12d   :  { %v1919_v45 = vpop.eup %1918  ;;  %v1570_v46 = vpack.c.bf16 %v1917_v41, %v1917_v41  ;;  %1944 = vrcp.f32 %v861_v37  ;;  %v1485_v37 = vmul.f32 -1.442695, %v637_v25 }
 0x12e   :  { %v1921_v49 = vpop.eup %1920  ;;  %v1602_v50 = vpack.c.bf16 %v1919_v45, %v1919_v45  ;;  %1946 = vrcp.f32 %v893_v42 }
 0x12f   :  { %v1923_v54 = vpop.eup %1922  ;;  %1307 = vst.msk [vmem:[%s2509_s3 + $0x48] sm:$0xf] %vm1288_vm1, %v1570_v46  ;;  %v1568_v55 = vpack.c.bf16 %v1921_v49, %v1921_v49  ;;  %1948 = vpow2.f32 %v1450_v38 }
 0x130   :  { %v1925_v59 = vpop.eup %1924  ;;  %1339 = vst.msk [vmem:[%s2509_s3 + $0xc8] sm:$0xf] %vm1288_vm1, %v1602_v50  ;;  %v1600_v60 = vpack.c.bf16 %v1923_v54, %v1923_v54  ;;  %1950 = vpow2.f32 %v1482_v43 }
 0x131   :  { %v1927_v63 = vpop.eup %1926  ;;  %1305 = vst.msk [vmem:[%s2509_s3 + $0x40] sm:$0xf] %vm1288_vm1, %v1568_v55  ;;  %v1571_v0 = vpack.c.bf16 %v1925_v59, %v1925_v59  ;;  %1952 = vpow2.f32 %v1448_v47 }
 0x132   :  { %v1929_v3 = vpop.eup %1928  ;;  %1337 = vst.msk [vmem:[%s2509_s3 + $0xc0] sm:$0xf] %vm1288_vm1, %v1600_v60  ;;  %v1603_v4 = vpack.c.bf16 %v1927_v63, %v1927_v63  ;;  %1954 = vpow2.f32 %v1480_v51 }
 0x133   :  { %v1931_v8 = vpop.eup %1930  ;;  %1308 = vst.msk [vmem:[%s2509_s3 + $0x4c] sm:$0xf] %vm1288_vm1, %v1571_v0  ;;  %v1569_v9 = vpack.c.bf16 %v1929_v3, %v1929_v3  ;;  %1956 = vpow2.f32 %v1451_v56 }
 0x134   :  { %v1933_v13 = vpop.eup %1932  ;;  %1340 = vst.msk [vmem:[%s2509_s3 + $0xcc] sm:$0xf] %vm1288_vm1, %v1603_v4  ;;  %v1601_v14 = vpack.c.bf16 %v1931_v8, %v1931_v8  ;;  %1958 = vpow2.f32 %v1483_v61 }
 0x135   :  { %v1935_v17 = vpop.eup %1934  ;;  %1306 = vst.msk [vmem:[%s2509_s3 + $0x44] sm:$0xf] %vm1288_vm1, %v1569_v9  ;;  %v1574_v18 = vpack.c.bf16 %v1933_v13, %v1933_v13  ;;  %1960 = vpow2.f32 %v1449_v1 }
 0x136   :  { %v1937_v21 = vpop.eup %1936  ;;  %1338 = vst.msk [vmem:[%s2509_s3 + $0xc4] sm:$0xf] %vm1288_vm1, %v1601_v14  ;;  %v1606_v22 = vpack.c.bf16 %v1935_v17, %v1935_v17  ;;  %1962 = vpow2.f32 %v1481_v5 }
 0x137   :  { %v1939_v26 = vpop.eup %1938  ;;  %1311 = vst.msk [vmem:[%s2509_s3 + $0x58] sm:$0xf] %vm1288_vm1, %v1574_v18  ;;  %v1572_v34 = vpack.c.bf16 %v1937_v21, %v1937_v21  ;;  %1964 = vpow2.f32 %v1454_v10 }
 0x138   :  { %v1941_v28 = vpop.eup %1940  ;;  %1343 = vst.msk [vmem:[%s2509_s3 + $0xd8] sm:$0xf] %vm1288_vm1, %v1606_v22  ;;  %v1604_v29 = vpack.c.bf16 %v1939_v26, %v1939_v26  ;;  %1966 = vpow2.f32 %v1486_v15 }
 0x139   :  { %v1943_v31 = vpop.eup %1942  ;;  %1309 = vst.msk [vmem:[%s2509_s3 + $0x50] sm:$0xf] %vm1288_vm1, %v1572_v34  ;;  %v1575_v32 = vpack.c.bf16 %v1941_v28, %v1941_v28  ;;  %1968 = vpow2.f32 %v1452_v19 }
 0x13a   :  { %v1945_v35 = vpop.eup %1944  ;;  %1341 = vst.msk [vmem:[%s2509_s3 + $0xd0] sm:$0xf] %vm1288_vm1, %v1604_v29  ;;  %v1607_v36 = vpack.c.bf16 %v1943_v31, %v1943_v31  ;;  %1970 = vpow2.f32 %v1484_v23 }
 0x13b   :  { %v1947_v38 = vpop.eup %1946  ;;  %1312 = vst.msk [vmem:[%s2509_s3 + $0x5c] sm:$0xf] %vm1288_vm1, %v1575_v32  ;;  %v1573_v39 = vpack.c.bf16 %v1945_v35, %v1945_v35  ;;  %1972 = vpow2.f32 %v1455_v27 }
 0x13c   :  { %v1949_v40 = vpop.eup %1948  ;;  %1344 = vst.msk [vmem:[%s2509_s3 + $0xdc] sm:$0xf] %vm1288_vm1, %v1607_v36  ;;  %v1605_v41 = vpack.c.bf16 %v1947_v38, %v1947_v38  ;;  %1974 = vpow2.f32 %v1487_v30 }
 0x13d   :  { %v1951_v42 = vpop.eup %1950  ;;  %1310 = vst.msk [vmem:[%s2509_s3 + $0x54] sm:$0xf] %vm1288_vm1, %v1573_v39  ;;  %v866_v43 = vadd.f32 1.0, %v1949_v40  ;;  %1976 = vpow2.f32 %v1453_v33 }
 0x13e   :  { %v1953_v44 = vpop.eup %1952  ;;  %1342 = vst.msk [vmem:[%s2509_s3 + $0xd4] sm:$0xf] %vm1288_vm1, %v1605_v41  ;;  %v898_v45 = vadd.f32 1.0, %v1951_v42  ;;  %1978 = vpow2.f32 %v1485_v37 }
 0x13f   :  { %v1955_v46 = vpop.eup %1954  ;;  %1980 = vrcp.f32 %v866_v43  ;;  %v864_v47 = vadd.f32 1.0, %v1953_v44 }
 0x140   :  { %v1957_v48 = vpop.eup %1956  ;;  %1982 = vrcp.f32 %v898_v45  ;;  %v896_v49 = vadd.f32 1.0, %v1955_v46 }
 0x141   :  { %v1959_v50 = vpop.eup %1958  ;;  %1984 = vrcp.f32 %v864_v47  ;;  %v867_v51 = vadd.f32 1.0, %v1957_v48 }
 0x142   :  { %v1961_v52 = vpop.eup %1960  ;;  %1986 = vrcp.f32 %v896_v49  ;;  %v899_v53 = vadd.f32 1.0, %v1959_v50 }
 0x143   :  { %v1963_v54 = vpop.eup %1962  ;;  %1988 = vrcp.f32 %v867_v51  ;;  %v865_v55 = vadd.f32 1.0, %v1961_v52 }
 0x144   :  { %v1965_v56 = vpop.eup %1964  ;;  %1990 = vrcp.f32 %v899_v53  ;;  %v897_v57 = vadd.f32 1.0, %v1963_v54 }
 0x145   :  { %v1967_v58 = vpop.eup %1966  ;;  %1992 = vrcp.f32 %v865_v55  ;;  %v870_v59 = vadd.f32 1.0, %v1965_v56 }
 0x146   :  { %v1969_v60 = vpop.eup %1968  ;;  %1994 = vrcp.f32 %v897_v57  ;;  %v902_v61 = vadd.f32 1.0, %v1967_v58 }
 0x147   :  { %v1971_v62 = vpop.eup %1970  ;;  %1996 = vrcp.f32 %v870_v59  ;;  %v868_v63 = vadd.f32 1.0, %v1969_v60 }
 0x148   :  { %v1973_v0 = vpop.eup %1972  ;;  %1998 = vrcp.f32 %v902_v61  ;;  %v900_v1 = vadd.f32 1.0, %v1971_v62 }
 0x149   :  { %v1975_v2 = vpop.eup %1974  ;;  %2000 = vrcp.f32 %v868_v63  ;;  %v871_v3 = vadd.f32 1.0, %v1973_v0 }
 0x14a   :  { %v1977_v4 = vpop.eup %1976  ;;  %2002 = vrcp.f32 %v900_v1  ;;  %v903_v5 = vadd.f32 1.0, %v1975_v2 }
 0x14b   :  { %v1979_v6 = vpop.eup %1978  ;;  %2004 = vrcp.f32 %v871_v3  ;;  %v869_v7 = vadd.f32 1.0, %v1977_v4 }
 0x14c   :  { %v1981_v8 = vpop.eup %1980  ;;  %2006 = vrcp.f32 %v903_v5  ;;  %v901_v9 = vadd.f32 1.0, %v1979_v6 }
 0x14d   :  { %v1983_v10 = vpop.eup %1982  ;;  %v1578_v11 = vpack.c.bf16 %v1981_v8, %v1981_v8  ;;  %2008 = vrcp.f32 %v869_v7 }
 0x14e   :  { %v1985_v12 = vpop.eup %1984  ;;  %v1610_v13 = vpack.c.bf16 %v1983_v10, %v1983_v10  ;;  %2010 = vrcp.f32 %v901_v9 }
 0x14f   :  { %v1987_v14 = vpop.eup %1986  ;;  %1315 = vst.msk [vmem:[%s2509_s3 + $0x68] sm:$0xf] %vm1288_vm1, %v1578_v11  ;;  %v1576_v15 = vpack.c.bf16 %v1985_v12, %v1985_v12 }
 0x150   :  { %v1989_v16 = vpop.eup %1988  ;;  %1347 = vst.msk [vmem:[%s2509_s3 + $0xe8] sm:$0xf] %vm1288_vm1, %v1610_v13  ;;  %v1608_v17 = vpack.c.bf16 %v1987_v14, %v1987_v14 }
 0x151   :  { %v1991_v18 = vpop.eup %1990  ;;  %1313 = vst.msk [vmem:[%s2509_s3 + $0x60] sm:$0xf] %vm1288_vm1, %v1576_v15  ;;  %v1579_v19 = vpack.c.bf16 %v1989_v16, %v1989_v16 }
 0x152   :  { %v1993_v20 = vpop.eup %1992  ;;  %1345 = vst.msk [vmem:[%s2509_s3 + $0xe0] sm:$0xf] %vm1288_vm1, %v1608_v17  ;;  %v1611_v21 = vpack.c.bf16 %v1991_v18, %v1991_v18 }
 0x153   :  { %v1995_v22 = vpop.eup %1994  ;;  %1316 = vst.msk [vmem:[%s2509_s3 + $0x6c] sm:$0xf] %vm1288_vm1, %v1579_v19  ;;  %v1577_v23 = vpack.c.bf16 %v1993_v20, %v1993_v20 }
 0x154   :  { %v1997_v24 = vpop.eup %1996  ;;  %1348 = vst.msk [vmem:[%s2509_s3 + $0xec] sm:$0xf] %vm1288_vm1, %v1611_v21  ;;  %v1609_v25 = vpack.c.bf16 %v1995_v22, %v1995_v22 }
 0x155   :  { %v1999_v26 = vpop.eup %1998  ;;  %1314 = vst.msk [vmem:[%s2509_s3 + $0x64] sm:$0xf] %vm1288_vm1, %v1577_v23  ;;  %v1582_v34 = vpack.c.bf16 %v1997_v24, %v1997_v24 }
 0x156   :  { %v2001_v27 = vpop.eup %2000  ;;  %1346 = vst.msk [vmem:[%s2509_s3 + $0xe4] sm:$0xf] %vm1288_vm1, %v1609_v25  ;;  %v1614_v28 = vpack.c.bf16 %v1999_v26, %v1999_v26 }
 0x157   :  { %v2003_v29 = vpop.eup %2002  ;;  %1319 = vst.msk [vmem:[%s2509_s3 + $0x78] sm:$0xf] %vm1288_vm1, %v1582_v34  ;;  %v1580_v30 = vpack.c.bf16 %v2001_v27, %v2001_v27 }
 0x158   :  { %v2005_v31 = vpop.eup %2004  ;;  %1351 = vst.msk [vmem:[%s2509_s3 + $0xf8] sm:$0xf] %vm1288_vm1, %v1614_v28  ;;  %v1612_v32 = vpack.c.bf16 %v2003_v29, %v2003_v29 }
 0x159   :  { %v2007_v33 = vpop.eup %2006  ;;  %1317 = vst.msk [vmem:[%s2509_s3 + $0x70] sm:$0xf] %vm1288_vm1, %v1580_v30  ;;  %v1583_v35 = vpack.c.bf16 %v2005_v31, %v2005_v31 }
 0x15a   :  { %v2009_v36 = vpop.eup %2008  ;;  %1349 = vst.msk [vmem:[%s2509_s3 + $0xf0] sm:$0xf] %vm1288_vm1, %v1612_v32  ;;  %v1615_v37 = vpack.c.bf16 %v2007_v33, %v2007_v33 }
 0x15b   :  { %v2011_v38 = vpop.eup %2010  ;;  %1320 = vst.msk [vmem:[%s2509_s3 + $0x7c] sm:$0xf] %vm1288_vm1, %v1583_v35  ;;  %v1581_v39 = vpack.c.bf16 %v2009_v36, %v2009_v36 }
 0x15c   :  { %1352 = vst.msk [vmem:[%s2509_s3 + $0xfc] sm:$0xf] %vm1288_vm1, %v1615_v37  ;;  %v1613_v40 = vpack.c.bf16 %v2011_v38, %v2011_v38 }
 0x15d   :  { %1318 = vst.msk [vmem:[%s2509_s3 + $0x74] sm:$0xf] %vm1288_vm1, %v1581_v39 }
 0x15e   :  { %1350 = vst.msk [vmem:[%s2509_s3 + $0xf4] sm:$0xf] %vm1288_vm1, %v1613_v40 }

// kernel: cmptrans512_forward.23
= control target key start
LH: loop header
LB: loop body
LE: loop exit
PB: predicated region body
PF: predicated region fallthrough
CT: control target
= control target key end

     0   :  { %vm262_vm0 = vcmask 261120   ;;  %s1594_s1 = inlined_call_operand.vmem [shape: bf16[32,32], index: 1, kind: input, shape index: {}]   ;;  %s1595_s0 = inlined_call_operand.vmem [shape: bf16[512,32], index: 0, kind: input, shape index: {}]   ;;  %s1596_s2 = inlined_call_operand.vmem [shape: f32[1,32], index: 2, kind: input, shape index: {}]   ;;  %s1597_s3 = inlined_call_operand.vmem [shape: f32[512,32], index: 3, kind: output, shape index: {}]  }
   0x1   :  { %v1081_v0 = vld [vmem:[%s1594_s1 + $0x8] sm:$0xff]   ;;  %v1082_v1 = vld [vmem:[%s1594_s1] sm:$0xff]   ;;  %v1087_v6 = vld [vmem:[%s1595_s0 + $0x10] sm:$0xff]  }
   0x2   :  { %1009 = vmatprep.subr.bf16.mxu0 %v1081_v0  ;;  %1077 = vmatprep.subr.bf16.mxu1 %v1081_v0  ;;  %v1083_v2 = vld [vmem:[%s1595_s0] sm:$0xff]   ;;  %v1085_v4 = vld [vmem:[%s1595_s0 + $0x8] sm:$0xff]   ;;  %v1088_v7 = vld [vmem:[%s1595_s0 + $0x90] sm:$0xff]  }
   0x3   :  { %1010 = vmatpush3.bf16.msra.mxu0 %v1081_v0  ;;  %1079 = vmatpush3.bf16.msra.mxu1 %v1081_v0  ;;  %v1084_v3 = vld [vmem:[%s1595_s0 + $0x80] sm:$0xff]   ;;  %v1086_v5 = vld [vmem:[%s1595_s0 + $0x88] sm:$0xff]   ;;  %v1089_v8 = vld [vmem:[%s1595_s0 + $0x18] sm:$0xff]  }
   0x4   :  { %1011 = vmatprep.subr.bf16.mxu0 %v1082_v1  ;;  %1078 = vmatprep.subr.bf16.mxu1 %v1082_v1  ;;  %v1090_v9 = vld [vmem:[%s1595_s0 + $0x98] sm:$0xff]   ;;  %v1091_v10 = vld [vmem:[%s1595_s0 + $0x20] sm:$0xff]   ;;  %v1093_v12 = vld [vmem:[%s1595_s0 + $0x28] sm:$0xff]  }
   0x5   :  { %1013 = vmatprep.mubr.msk.bf16.mxu0 %vm262_vm0, %v1083_v2  ;;  %1045 = vmatprep.mubr.msk.bf16.mxu1 %vm262_vm0, %v1084_v3  ;;  %v1092_v11 = vld [vmem:[%s1595_s0 + $0xa0] sm:$0xff]   ;;  %v1094_v13 = vld [vmem:[%s1595_s0 + $0xa8] sm:$0xff]   ;;  %v1095_v14 = vld [vmem:[%s1595_s0 + $0x30] sm:$0xff]  }
   0x6   :  { %v1096_v15 = vld [vmem:[%s1595_s0 + $0xb0] sm:$0xff]   ;;  %v1097_v16 = vld [vmem:[%s1595_s0 + $0x38] sm:$0xff]   ;;  %v1099_v18 = vld [vmem:[%s1595_s0 + $0x40] sm:$0xff]  }
   0x7   :  { %1012 = vmatpush3.bf16.msra.mxu0 %v1082_v1  ;;  %1080 = vmatpush3.bf16.msra.mxu1 %v1082_v1  ;;  %v1098_v17 = vld [vmem:[%s1595_s0 + $0xb8] sm:$0xff]   ;;  %v1100_v19 = vld [vmem:[%s1595_s0 + $0xc0] sm:$0xff]   ;;  %v1101_v20 = vld [vmem:[%s1595_s0 + $0x48] sm:$0xff]  }
   0x8   :  { %v1102_v21 = vld [vmem:[%s1595_s0 + $0xc8] sm:$0xff]   ;;  %v1103_v22 = vld [vmem:[%s1595_s0 + $0x50] sm:$0xff]   ;;  %v1105_v24 = vld [vmem:[%s1595_s0 + $0x58] sm:$0xff]  }
   0x9   :  { %v1104_v23 = vld [vmem:[%s1595_s0 + $0xd0] sm:$0xff]   ;;  %v1106_v25 = vld [vmem:[%s1595_s0 + $0xd8] sm:$0xff]   ;;  %v1107_v26 = vld [vmem:[%s1595_s0 + $0x60] sm:$0xff]  }
   0xa   :  { %1014 = vmatmul.mubr.msk.bf16.vlgmr.msra.gmra.mxu0 %vm262_vm0, %v1085_v4  ;;  %1046 = vmatmul.mubr.msk.bf16.vlgmr.msra.gmra.mxu1 %vm262_vm0, %v1086_v5  ;;  %v1108_v27 = vld [vmem:[%s1595_s0 + $0xe0] sm:$0xff]   ;;  %v1109_v28 = vld [vmem:[%s1595_s0 + $0x68] sm:$0xff]   ;;  %v1111_v30 = vld [vmem:[%s1595_s0 + $0x70] sm:$0xff]  }
   0xb   :  { %1017 = vmatprep.mubr.msk.bf16.mxu0 %vm262_vm0, %v1087_v6  ;;  %1049 = vmatprep.mubr.msk.bf16.mxu1 %vm262_vm0, %v1088_v7  ;;  %v1110_v29 = vld [vmem:[%s1595_s0 + $0xe8] sm:$0xff]   ;;  %v1112_v31 = vld [vmem:[%s1595_s0 + $0xf0] sm:$0xff]   ;;  %v1113_v32 = vld [vmem:[%s1595_s0 + $0x78] sm:$0xff]  }
   0xc   :  { %v1114_v33 = vld [vmem:[%s1595_s0 + $0xf8] sm:$0xff]   ;;  %v1272_v34 = vld [vmem:[%s1596_s2] ss:$0 sm:$0xff] }
  0x12   :  { %1018 = vmatmul.mubr.msk.bf16.gmra.mxu0 %vm262_vm0, %v1089_v8  ;;  %1050 = vmatmul.mubr.msk.bf16.gmra.mxu1 %vm262_vm0, %v1090_v9 }
  0x13   :  { %1021 = vmatprep.mubr.msk.bf16.mxu0 %vm262_vm0, %v1091_v10  ;;  %1053 = vmatprep.mubr.msk.bf16.mxu1 %vm262_vm0, %v1092_v11 }
  0x1a   :  { %1022 = vmatmul.mubr.msk.bf16.gmra.mxu0 %vm262_vm0, %v1093_v12  ;;  %1054 = vmatmul.mubr.msk.bf16.gmra.mxu1 %vm262_vm0, %v1094_v13 }
  0x1b   :  { %1025 = vmatprep.mubr.msk.bf16.mxu0 %vm262_vm0, %v1095_v14  ;;  %1057 = vmatprep.mubr.msk.bf16.mxu1 %vm262_vm0, %v1096_v15 }
  0x22   :  { %1026 = vmatmul.mubr.msk.bf16.gmra.mxu0 %vm262_vm0, %v1097_v16  ;;  %1058 = vmatmul.mubr.msk.bf16.gmra.mxu1 %vm262_vm0, %v1098_v17 }
  0x23   :  { %1029 = vmatprep.mubr.msk.bf16.mxu0 %vm262_vm0, %v1099_v18  ;;  %1061 = vmatprep.mubr.msk.bf16.mxu1 %vm262_vm0, %v1100_v19 }
  0x2a   :  { %1030 = vmatmul.mubr.msk.bf16.gmra.mxu0 %vm262_vm0, %v1101_v20  ;;  %1062 = vmatmul.mubr.msk.bf16.gmra.mxu1 %vm262_vm0, %v1102_v21 }
  0x2b   :  { %1033 = vmatprep.mubr.msk.bf16.mxu0 %vm262_vm0, %v1103_v22  ;;  %1065 = vmatprep.mubr.msk.bf16.mxu1 %vm262_vm0, %v1104_v23 }
  0x32   :  { %1034 = vmatmul.mubr.msk.bf16.gmra.mxu0 %vm262_vm0, %v1105_v24  ;;  %1066 = vmatmul.mubr.msk.bf16.gmra.mxu1 %vm262_vm0, %v1106_v25 }
  0x33   :  { %1037 = vmatprep.mubr.msk.bf16.mxu0 %vm262_vm0, %v1107_v26  ;;  %1069 = vmatprep.mubr.msk.bf16.mxu1 %vm262_vm0, %v1108_v27 }
  0x3a   :  { %1038 = vmatmul.mubr.msk.bf16.gmra.mxu0 %vm262_vm0, %v1109_v28  ;;  %1070 = vmatmul.mubr.msk.bf16.gmra.mxu1 %vm262_vm0, %v1110_v29 }
  0x3b   :  { %1041 = vmatprep.mubr.msk.bf16.mxu0 %vm262_vm0, %v1111_v30  ;;  %1073 = vmatprep.mubr.msk.bf16.mxu1 %vm262_vm0, %v1112_v31 }
  0x42   :  { %1042 = vmatmul.mubr.msk.bf16.gmra.mxu0 %vm262_vm0, %v1113_v32  ;;  %1074 = vmatmul.mubr.msk.bf16.gmra.mxu1 %vm262_vm0, %v1114_v33 }
  0xca   :  { %v1015_v35 = vpop.f32.mrf.mxu0  ;;  %v1047_v36 = vpop.f32.mrf.mxu1 }
  0xcb   :  { %v402_v37 = vadd.f32 %v1015_v35, %v1272_v34  ;;  %v530_v38 = vadd.f32 %v1047_v36, %v1272_v34 }
  0xcc   :  { %v393_v39 = vpop.f32.mrf.mxu0  ;;  %v521_v40 = vpop.f32.mrf.mxu1 }
  0xcd   :  { %vm650_vm1 = vcmp.ge.f32.partialorder %v402_v37, 0.0  ;;  %v714_v41 = vmul.f32 0.01, %v402_v37  ;;  %vm682_vm2 = vcmp.ge.f32.partialorder %v530_v38, 0.0  ;;  %v746_v42 = vmul.f32 0.01, %v530_v38 }
  0xce   :  { %v394_v43 = vadd.f32 %v1272_v34, %v393_v39  ;;  %v522_v44 = vadd.f32 %v1272_v34, %v521_v40  ;;  %v1016_v45 = vpop.f32.mrf.mxu0  ;;  %v1048_v46 = vpop.f32.mrf.mxu1 }
  0xcf   :  { %v778_v47 = vsel %vm650_vm1, %v402_v37, %v714_v41  ;;  %v810_v48 = vsel %vm682_vm2, %v530_v38, %v746_v42  ;;  %v405_v49 = vadd.f32 %v1016_v45, %v1272_v34  ;;  %v533_v50 = vadd.f32 %v1048_v46, %v1272_v34 }
  0xd0   :  { %842 = vst.msk [vmem:[%s1597_s3 + $0x10] sm:$0xff] %vm262_vm0, %v778_v47  ;;  %874 = vst.msk [vmem:[%s1597_s3 + $0x110] sm:$0xff] %vm262_vm0, %v810_v48  ;;  %vm648_vm3 = vcmp.ge.f32.partialorder %v394_v43, 0.0  ;;  %v712_v51 = vmul.f32 0.01, %v394_v43  ;;  %vm680_vm4 = vcmp.ge.f32.partialorder %v522_v44, 0.0  ;;  %v396_v53 = vpop.f32.mrf.mxu0  ;;  %v524_v54 = vpop.f32.mrf.mxu1 }
  0xd1   :  { %v744_v52 = vmul.f32 0.01, %v522_v44  ;;  %vm651_vm5 = vcmp.ge.f32.partialorder %v405_v49, 0.0  ;;  %v715_v55 = vmul.f32 0.01, %v405_v49  ;;  %vm683_vm6 = vcmp.ge.f32.partialorder %v533_v50, 0.0 }
  0xd2   :  { %v747_v56 = vmul.f32 0.01, %v533_v50  ;;  %v776_v57 = vsel %vm648_vm3, %v394_v43, %v712_v51  ;;  %v397_v59 = vadd.f32 %v1272_v34, %v396_v53  ;;  %v525_v60 = vadd.f32 %v1272_v34, %v524_v54  ;;  %v1019_v61 = vpop.f32.mrf.mxu0  ;;  %v1051_v62 = vpop.f32.mrf.mxu1 }
  0xd3   :  { %v808_v58 = vsel %vm680_vm4, %v522_v44, %v744_v52  ;;  %840 = vst.msk [vmem:[%s1597_s3] sm:$0xff] %vm262_vm0, %v776_v57  ;;  %v779_v63 = vsel %vm651_vm5, %v405_v49, %v715_v55  ;;  %v418_v1 = vadd.f32 %v1019_v61, %v1272_v34  ;;  %v546_v2 = vadd.f32 %v1051_v62, %v1272_v34 }
  0xd4   :  { %872 = vst.msk [vmem:[%s1597_s3 + $0x100] sm:$0xff] %vm262_vm0, %v808_v58  ;;  %v811_v0 = vsel %vm683_vm6, %v533_v50, %v747_v56  ;;  %843 = vst.msk [vmem:[%s1597_s3 + $0x18] sm:$0xff] %vm262_vm0, %v779_v63  ;;  %vm649_vm7 = vcmp.ge.f32.partialorder %v397_v59, 0.0  ;;  %v713_v3 = vmul.f32 0.01, %v397_v59  ;;  %vm681_vm8 = vcmp.ge.f32.partialorder %v525_v60, 0.0  ;;  %v409_v5 = vpop.f32.mrf.mxu0  ;;  %v537_v6 = vpop.f32.mrf.mxu1 }
  0xd5   :  { %875 = vst.msk [vmem:[%s1597_s3 + $0x118] sm:$0xff] %vm262_vm0, %v811_v0  ;;  %v745_v4 = vmul.f32 0.01, %v525_v60  ;;  %vm654_vm9 = vcmp.ge.f32.partialorder %v418_v1, 0.0  ;;  %v718_v7 = vmul.f32 0.01, %v418_v1  ;;  %v410_v11 = vadd.f32 %v1272_v34, %v409_v5 }
  0xd6   :  { %vm686_vm10 = vcmp.ge.f32.partialorder %v546_v2, 0.0  ;;  %v750_v8 = vmul.f32 0.01, %v546_v2  ;;  %v777_v9 = vsel %vm649_vm7, %v397_v59, %v713_v3  ;;  %v538_v12 = vadd.f32 %v1272_v34, %v537_v6  ;;  %v1020_v13 = vpop.f32.mrf.mxu0  ;;  %v1052_v14 = vpop.f32.mrf.mxu1 }
  0xd7   :  { %v809_v10 = vsel %vm681_vm8, %v525_v60, %v745_v4  ;;  %841 = vst.msk [vmem:[%s1597_s3 + $0x8] sm:$0xff] %vm262_vm0, %v777_v9  ;;  %v782_v15 = vsel %vm654_vm9, %v418_v1, %v718_v7  ;;  %v421_v17 = vadd.f32 %v1020_v13, %v1272_v34  ;;  %v549_v18 = vadd.f32 %v1052_v14, %v1272_v34 }
  0xd8   :  { %873 = vst.msk [vmem:[%s1597_s3 + $0x108] sm:$0xff] %vm262_vm0, %v809_v10  ;;  %v814_v16 = vsel %vm686_vm10, %v546_v2, %v750_v8  ;;  %846 = vst.msk [vmem:[%s1597_s3 + $0x30] sm:$0xff] %vm262_vm0, %v782_v15  ;;  %vm652_vm11 = vcmp.ge.f32.partialorder %v410_v11, 0.0  ;;  %v716_v19 = vmul.f32 0.01, %v410_v11  ;;  %vm684_vm12 = vcmp.ge.f32.partialorder %v538_v12, 0.0  ;;  %v412_v21 = vpop.f32.mrf.mxu0  ;;  %v540_v22 = vpop.f32.mrf.mxu1 }
  0xd9   :  { %878 = vst.msk [vmem:[%s1597_s3 + $0x130] sm:$0xff] %vm262_vm0, %v814_v16  ;;  %v748_v20 = vmul.f32 0.01, %v538_v12  ;;  %vm655_vm13 = vcmp.ge.f32.partialorder %v421_v17, 0.0  ;;  %v719_v23 = vmul.f32 0.01, %v421_v17  ;;  %v413_v27 = vadd.f32 %v1272_v34, %v412_v21 }
  0xda   :  { %vm687_vm14 = vcmp.ge.f32.partialorder %v549_v18, 0.0  ;;  %v751_v24 = vmul.f32 0.01, %v549_v18  ;;  %v780_v25 = vsel %vm652_vm11, %v410_v11, %v716_v19  ;;  %v541_v28 = vadd.f32 %v1272_v34, %v540_v22  ;;  %v1023_v29 = vpop.f32.mrf.mxu0  ;;  %v1055_v30 = vpop.f32.mrf.mxu1 }
  0xdb   :  { %v812_v26 = vsel %vm684_vm12, %v538_v12, %v748_v20  ;;  %844 = vst.msk [vmem:[%s1597_s3 + $0x20] sm:$0xff] %vm262_vm0, %v780_v25  ;;  %v783_v31 = vsel %vm655_vm13, %v421_v17, %v719_v23  ;;  %v434_v33 = vadd.f32 %v1023_v29, %v1272_v34  ;;  %v562_v35 = vadd.f32 %v1055_v30, %v1272_v34 }
  0xdc   :  { %876 = vst.msk [vmem:[%s1597_s3 + $0x120] sm:$0xff] %vm262_vm0, %v812_v26  ;;  %v815_v32 = vsel %vm687_vm14, %v549_v18, %v751_v24  ;;  %847 = vst.msk [vmem:[%s1597_s3 + $0x38] sm:$0xff] %vm262_vm0, %v783_v31  ;;  %vm653_vm15 = vcmp.ge.f32.partialorder %v413_v27, 0.0  ;;  %v717_v36 = vmul.f32 0.01, %v413_v27  ;;  %vm685_vm1 = vcmp.ge.f32.partialorder %v541_v28, 0.0  ;;  %v425_v38 = vpop.f32.mrf.mxu0  ;;  %v553_v39 = vpop.f32.mrf.mxu1 }
  0xdd   :  { %879 = vst.msk [vmem:[%s1597_s3 + $0x138] sm:$0xff] %vm262_vm0, %v815_v32  ;;  %v749_v37 = vmul.f32 0.01, %v541_v28  ;;  %vm658_vm2 = vcmp.ge.f32.partialorder %v434_v33, 0.0  ;;  %v722_v40 = vmul.f32 0.01, %v434_v33  ;;  %v426_v44 = vadd.f32 %v1272_v34, %v425_v38 }
  0xde   :  { %vm690_vm3 = vcmp.ge.f32.partialorder %v562_v35, 0.0  ;;  %v754_v41 = vmul.f32 0.01, %v562_v35  ;;  %v781_v42 = vsel %vm653_vm15, %v413_v27, %v717_v36  ;;  %v554_v45 = vadd.f32 %v1272_v34, %v553_v39  ;;  %v1024_v46 = vpop.f32.mrf.mxu0  ;;  %v1056_v47 = vpop.f32.mrf.mxu1 }
  0xdf   :  { %v813_v43 = vsel %vm685_vm1, %v541_v28, %v749_v37  ;;  %845 = vst.msk [vmem:[%s1597_s3 + $0x28] sm:$0xff] %vm262_vm0, %v781_v42  ;;  %v786_v48 = vsel %vm658_vm2, %v434_v33, %v722_v40  ;;  %v437_v50 = vadd.f32 %v1024_v46, %v1272_v34  ;;  %v565_v51 = vadd.f32 %v1056_v47, %v1272_v34 }
  0xe0   :  { %877 = vst.msk [vmem:[%s1597_s3 + $0x128] sm:$0xff] %vm262_vm0, %v813_v43  ;;  %v818_v49 = vsel %vm690_vm3, %v562_v35, %v754_v41  ;;  %850 = vst.msk [vmem:[%s1597_s3 + $0x50] sm:$0xff] %vm262_vm0, %v786_v48  ;;  %vm656_vm4 = vcmp.ge.f32.partialorder %v426_v44, 0.0  ;;  %v720_v52 = vmul.f32 0.01, %v426_v44  ;;  %vm688_vm5 = vcmp.ge.f32.partialorder %v554_v45, 0.0  ;;  %v428_v54 = vpop.f32.mrf.mxu0  ;;  %v556_v55 = vpop.f32.mrf.mxu1 }
  0xe1   :  { %882 = vst.msk [vmem:[%s1597_s3 + $0x150] sm:$0xff] %vm262_vm0, %v818_v49  ;;  %v752_v53 = vmul.f32 0.01, %v554_v45  ;;  %vm659_vm6 = vcmp.ge.f32.partialorder %v437_v50, 0.0  ;;  %v723_v56 = vmul.f32 0.01, %v437_v50  ;;  %v429_v60 = vadd.f32 %v1272_v34, %v428_v54 }
  0xe2   :  { %vm691_vm7 = vcmp.ge.f32.partialorder %v565_v51, 0.0  ;;  %v755_v57 = vmul.f32 0.01, %v565_v51  ;;  %v784_v58 = vsel %vm656_vm4, %v426_v44, %v720_v52  ;;  %v557_v61 = vadd.f32 %v1272_v34, %v556_v55  ;;  %v1027_v62 = vpop.f32.mrf.mxu0  ;;  %v1059_v63 = vpop.f32.mrf.mxu1 }
  0xe3   :  { %v816_v59 = vsel %vm688_vm5, %v554_v45, %v752_v53  ;;  %848 = vst.msk [vmem:[%s1597_s3 + $0x40] sm:$0xff] %vm262_vm0, %v784_v58  ;;  %v787_v0 = vsel %vm659_vm6, %v437_v50, %v723_v56  ;;  %v450_v2 = vadd.f32 %v1027_v62, %v1272_v34  ;;  %v578_v3 = vadd.f32 %v1059_v63, %v1272_v34 }
  0xe4   :  { %880 = vst.msk [vmem:[%s1597_s3 + $0x140] sm:$0xff] %vm262_vm0, %v816_v59  ;;  %v819_v1 = vsel %vm691_vm7, %v565_v51, %v755_v57  ;;  %851 = vst.msk [vmem:[%s1597_s3 + $0x58] sm:$0xff] %vm262_vm0, %v787_v0  ;;  %vm657_vm8 = vcmp.ge.f32.partialorder %v429_v60, 0.0  ;;  %v721_v4 = vmul.f32 0.01, %v429_v60  ;;  %vm689_vm9 = vcmp.ge.f32.partialorder %v557_v61, 0.0  ;;  %v441_v6 = vpop.f32.mrf.mxu0  ;;  %v569_v7 = vpop.f32.mrf.mxu1 }
  0xe5   :  { %883 = vst.msk [vmem:[%s1597_s3 + $0x158] sm:$0xff] %vm262_vm0, %v819_v1  ;;  %v753_v5 = vmul.f32 0.01, %v557_v61  ;;  %vm662_vm10 = vcmp.ge.f32.partialorder %v450_v2, 0.0  ;;  %v726_v8 = vmul.f32 0.01, %v450_v2  ;;  %v442_v12 = vadd.f32 %v1272_v34, %v441_v6 }
  0xe6   :  { %vm694_vm11 = vcmp.ge.f32.partialorder %v578_v3, 0.0  ;;  %v758_v9 = vmul.f32 0.01, %v578_v3  ;;  %v785_v10 = vsel %vm657_vm8, %v429_v60, %v721_v4  ;;  %v570_v13 = vadd.f32 %v1272_v34, %v569_v7  ;;  %v1028_v14 = vpop.f32.mrf.mxu0  ;;  %v1060_v15 = vpop.f32.mrf.mxu1 }
  0xe7   :  { %v817_v11 = vsel %vm689_vm9, %v557_v61, %v753_v5  ;;  %849 = vst.msk [vmem:[%s1597_s3 + $0x48] sm:$0xff] %vm262_vm0, %v785_v10  ;;  %v790_v16 = vsel %vm662_vm10, %v450_v2, %v726_v8  ;;  %v453_v18 = vadd.f32 %v1028_v14, %v1272_v34  ;;  %v581_v19 = vadd.f32 %v1060_v15, %v1272_v34 }
  0xe8   :  { %881 = vst.msk [vmem:[%s1597_s3 + $0x148] sm:$0xff] %vm262_vm0, %v817_v11  ;;  %v822_v17 = vsel %vm694_vm11, %v578_v3, %v758_v9  ;;  %854 = vst.msk [vmem:[%s1597_s3 + $0x70] sm:$0xff] %vm262_vm0, %v790_v16  ;;  %vm660_vm12 = vcmp.ge.f32.partialorder %v442_v12, 0.0  ;;  %v724_v20 = vmul.f32 0.01, %v442_v12  ;;  %vm692_vm13 = vcmp.ge.f32.partialorder %v570_v13, 0.0  ;;  %v444_v22 = vpop.f32.mrf.mxu0  ;;  %v572_v23 = vpop.f32.mrf.mxu1 }
  0xe9   :  { %886 = vst.msk [vmem:[%s1597_s3 + $0x170] sm:$0xff] %vm262_vm0, %v822_v17  ;;  %v756_v21 = vmul.f32 0.01, %v570_v13  ;;  %vm663_vm14 = vcmp.ge.f32.partialorder %v453_v18, 0.0  ;;  %v727_v24 = vmul.f32 0.01, %v453_v18  ;;  %v445_v28 = vadd.f32 %v1272_v34, %v444_v22 }
  0xea   :  { %vm695_vm15 = vcmp.ge.f32.partialorder %v581_v19, 0.0  ;;  %v759_v25 = vmul.f32 0.01, %v581_v19  ;;  %v788_v26 = vsel %vm660_vm12, %v442_v12, %v724_v20  ;;  %v573_v29 = vadd.f32 %v1272_v34, %v572_v23  ;;  %v1031_v30 = vpop.f32.mrf.mxu0  ;;  %v1063_v31 = vpop.f32.mrf.mxu1 }
  0xeb   :  { %v820_v27 = vsel %vm692_vm13, %v570_v13, %v756_v21  ;;  %852 = vst.msk [vmem:[%s1597_s3 + $0x60] sm:$0xff] %vm262_vm0, %v788_v26  ;;  %v791_v32 = vsel %vm663_vm14, %v453_v18, %v727_v24  ;;  %v466_v35 = vadd.f32 %v1031_v30, %v1272_v34  ;;  %v594_v36 = vadd.f32 %v1063_v31, %v1272_v34 }
  0xec   :  { %884 = vst.msk [vmem:[%s1597_s3 + $0x160] sm:$0xff] %vm262_vm0, %v820_v27  ;;  %v823_v33 = vsel %vm695_vm15, %v581_v19, %v759_v25  ;;  %855 = vst.msk [vmem:[%s1597_s3 + $0x78] sm:$0xff] %vm262_vm0, %v791_v32  ;;  %vm661_vm1 = vcmp.ge.f32.partialorder %v445_v28, 0.0  ;;  %v725_v37 = vmul.f32 0.01, %v445_v28  ;;  %vm693_vm2 = vcmp.ge.f32.partialorder %v573_v29, 0.0  ;;  %v457_v39 = vpop.f32.mrf.mxu0  ;;  %v585_v40 = vpop.f32.mrf.mxu1 }
  0xed   :  { %887 = vst.msk [vmem:[%s1597_s3 + $0x178] sm:$0xff] %vm262_vm0, %v823_v33  ;;  %v757_v38 = vmul.f32 0.01, %v573_v29  ;;  %vm666_vm3 = vcmp.ge.f32.partialorder %v466_v35, 0.0  ;;  %v730_v41 = vmul.f32 0.01, %v466_v35  ;;  %v458_v45 = vadd.f32 %v1272_v34, %v457_v39 }
  0xee   :  { %vm698_vm4 = vcmp.ge.f32.partialorder %v594_v36, 0.0  ;;  %v762_v42 = vmul.f32 0.01, %v594_v36  ;;  %v789_v43 = vsel %vm661_vm1, %v445_v28, %v725_v37  ;;  %v586_v46 = vadd.f32 %v1272_v34, %v585_v40  ;;  %v1032_v47 = vpop.f32.mrf.mxu0  ;;  %v1064_v48 = vpop.f32.mrf.mxu1 }
  0xef   :  { %v821_v44 = vsel %vm693_vm2, %v573_v29, %v757_v38  ;;  %853 = vst.msk [vmem:[%s1597_s3 + $0x68] sm:$0xff] %vm262_vm0, %v789_v43  ;;  %v794_v49 = vsel %vm666_vm3, %v466_v35, %v730_v41  ;;  %v469_v51 = vadd.f32 %v1032_v47, %v1272_v34  ;;  %v597_v52 = vadd.f32 %v1064_v48, %v1272_v34 }
  0xf0   :  { %885 = vst.msk [vmem:[%s1597_s3 + $0x168] sm:$0xff] %vm262_vm0, %v821_v44  ;;  %v826_v50 = vsel %vm698_vm4, %v594_v36, %v762_v42  ;;  %858 = vst.msk [vmem:[%s1597_s3 + $0x90] sm:$0xff] %vm262_vm0, %v794_v49  ;;  %vm664_vm5 = vcmp.ge.f32.partialorder %v458_v45, 0.0  ;;  %v728_v53 = vmul.f32 0.01, %v458_v45  ;;  %vm696_vm6 = vcmp.ge.f32.partialorder %v586_v46, 0.0  ;;  %v460_v55 = vpop.f32.mrf.mxu0  ;;  %v588_v56 = vpop.f32.mrf.mxu1 }
  0xf1   :  { %890 = vst.msk [vmem:[%s1597_s3 + $0x190] sm:$0xff] %vm262_vm0, %v826_v50  ;;  %v760_v54 = vmul.f32 0.01, %v586_v46  ;;  %vm667_vm7 = vcmp.ge.f32.partialorder %v469_v51, 0.0  ;;  %v731_v57 = vmul.f32 0.01, %v469_v51  ;;  %v461_v61 = vadd.f32 %v1272_v34, %v460_v55 }
  0xf2   :  { %vm699_vm8 = vcmp.ge.f32.partialorder %v597_v52, 0.0  ;;  %v763_v58 = vmul.f32 0.01, %v597_v52  ;;  %v792_v59 = vsel %vm664_vm5, %v458_v45, %v728_v53  ;;  %v589_v62 = vadd.f32 %v1272_v34, %v588_v56  ;;  %v1035_v63 = vpop.f32.mrf.mxu0  ;;  %v1067_v0 = vpop.f32.mrf.mxu1 }
  0xf3   :  { %v824_v60 = vsel %vm696_vm6, %v586_v46, %v760_v54  ;;  %856 = vst.msk [vmem:[%s1597_s3 + $0x80] sm:$0xff] %vm262_vm0, %v792_v59  ;;  %v795_v1 = vsel %vm667_vm7, %v469_v51, %v731_v57  ;;  %v482_v3 = vadd.f32 %v1035_v63, %v1272_v34  ;;  %v610_v4 = vadd.f32 %v1067_v0, %v1272_v34 }
  0xf4   :  { %888 = vst.msk [vmem:[%s1597_s3 + $0x180] sm:$0xff] %vm262_vm0, %v824_v60  ;;  %v827_v2 = vsel %vm699_vm8, %v597_v52, %v763_v58  ;;  %859 = vst.msk [vmem:[%s1597_s3 + $0x98] sm:$0xff] %vm262_vm0, %v795_v1  ;;  %vm665_vm9 = vcmp.ge.f32.partialorder %v461_v61, 0.0  ;;  %v729_v5 = vmul.f32 0.01, %v461_v61  ;;  %vm697_vm10 = vcmp.ge.f32.partialorder %v589_v62, 0.0  ;;  %v473_v7 = vpop.f32.mrf.mxu0  ;;  %v601_v8 = vpop.f32.mrf.mxu1 }
  0xf5   :  { %891 = vst.msk [vmem:[%s1597_s3 + $0x198] sm:$0xff] %vm262_vm0, %v827_v2  ;;  %v761_v6 = vmul.f32 0.01, %v589_v62  ;;  %vm670_vm11 = vcmp.ge.f32.partialorder %v482_v3, 0.0  ;;  %v734_v9 = vmul.f32 0.01, %v482_v3  ;;  %v474_v13 = vadd.f32 %v1272_v34, %v473_v7 }
  0xf6   :  { %vm702_vm12 = vcmp.ge.f32.partialorder %v610_v4, 0.0  ;;  %v766_v10 = vmul.f32 0.01, %v610_v4  ;;  %v793_v11 = vsel %vm665_vm9, %v461_v61, %v729_v5  ;;  %v602_v14 = vadd.f32 %v1272_v34, %v601_v8  ;;  %v1036_v15 = vpop.f32.mrf.mxu0  ;;  %v1068_v16 = vpop.f32.mrf.mxu1 }
  0xf7   :  { %v825_v12 = vsel %vm697_vm10, %v589_v62, %v761_v6  ;;  %857 = vst.msk [vmem:[%s1597_s3 + $0x88] sm:$0xff] %vm262_vm0, %v793_v11  ;;  %v798_v17 = vsel %vm670_vm11, %v482_v3, %v734_v9  ;;  %v485_v19 = vadd.f32 %v1036_v15, %v1272_v34  ;;  %v613_v20 = vadd.f32 %v1068_v16, %v1272_v34 }
  0xf8   :  { %889 = vst.msk [vmem:[%s1597_s3 + $0x188] sm:$0xff] %vm262_vm0, %v825_v12  ;;  %v830_v18 = vsel %vm702_vm12, %v610_v4, %v766_v10  ;;  %862 = vst.msk [vmem:[%s1597_s3 + $0xb0] sm:$0xff] %vm262_vm0, %v798_v17  ;;  %vm668_vm13 = vcmp.ge.f32.partialorder %v474_v13, 0.0  ;;  %v732_v21 = vmul.f32 0.01, %v474_v13  ;;  %vm700_vm14 = vcmp.ge.f32.partialorder %v602_v14, 0.0  ;;  %v476_v23 = vpop.f32.mrf.mxu0  ;;  %v604_v24 = vpop.f32.mrf.mxu1 }
  0xf9   :  { %894 = vst.msk [vmem:[%s1597_s3 + $0x1b0] sm:$0xff] %vm262_vm0, %v830_v18  ;;  %v764_v22 = vmul.f32 0.01, %v602_v14  ;;  %vm671_vm15 = vcmp.ge.f32.partialorder %v485_v19, 0.0  ;;  %v735_v25 = vmul.f32 0.01, %v485_v19  ;;  %v477_v29 = vadd.f32 %v1272_v34, %v476_v23 }
  0xfa   :  { %vm703_vm1 = vcmp.ge.f32.partialorder %v613_v20, 0.0  ;;  %v767_v26 = vmul.f32 0.01, %v613_v20  ;;  %v796_v27 = vsel %vm668_vm13, %v474_v13, %v732_v21  ;;  %v605_v30 = vadd.f32 %v1272_v34, %v604_v24  ;;  %v1039_v31 = vpop.f32.mrf.mxu0  ;;  %v1071_v32 = vpop.f32.mrf.mxu1 }
  0xfb   :  { %v828_v28 = vsel %vm700_vm14, %v602_v14, %v764_v22  ;;  %860 = vst.msk [vmem:[%s1597_s3 + $0xa0] sm:$0xff] %vm262_vm0, %v796_v27  ;;  %v799_v33 = vsel %vm671_vm15, %v485_v19, %v735_v25  ;;  %v498_v36 = vadd.f32 %v1039_v31, %v1272_v34  ;;  %v626_v37 = vadd.f32 %v1071_v32, %v1272_v34 }
  0xfc   :  { %892 = vst.msk [vmem:[%s1597_s3 + $0x1a0] sm:$0xff] %vm262_vm0, %v828_v28  ;;  %v831_v35 = vsel %vm703_vm1, %v613_v20, %v767_v26  ;;  %863 = vst.msk [vmem:[%s1597_s3 + $0xb8] sm:$0xff] %vm262_vm0, %v799_v33  ;;  %vm669_vm2 = vcmp.ge.f32.partialorder %v477_v29, 0.0  ;;  %v733_v38 = vmul.f32 0.01, %v477_v29  ;;  %vm701_vm3 = vcmp.ge.f32.partialorder %v605_v30, 0.0  ;;  %v489_v40 = vpop.f32.mrf.mxu0  ;;  %v617_v41 = vpop.f32.mrf.mxu1 }
  0xfd   :  { %895 = vst.msk [vmem:[%s1597_s3 + $0x1b8] sm:$0xff] %vm262_vm0, %v831_v35  ;;  %v765_v39 = vmul.f32 0.01, %v605_v30  ;;  %vm674_vm4 = vcmp.ge.f32.partialorder %v498_v36, 0.0  ;;  %v738_v42 = vmul.f32 0.01, %v498_v36  ;;  %v490_v46 = vadd.f32 %v1272_v34, %v489_v40 }
  0xfe   :  { %vm706_vm5 = vcmp.ge.f32.partialorder %v626_v37, 0.0  ;;  %v770_v43 = vmul.f32 0.01, %v626_v37  ;;  %v797_v44 = vsel %vm669_vm2, %v477_v29, %v733_v38  ;;  %v618_v47 = vadd.f32 %v1272_v34, %v617_v41  ;;  %v1040_v48 = vpop.f32.mrf.mxu0  ;;  %v1072_v49 = vpop.f32.mrf.mxu1 }
  0xff   :  { %v829_v45 = vsel %vm701_vm3, %v605_v30, %v765_v39  ;;  %861 = vst.msk [vmem:[%s1597_s3 + $0xa8] sm:$0xff] %vm262_vm0, %v797_v44  ;;  %v802_v50 = vsel %vm674_vm4, %v498_v36, %v738_v42  ;;  %v501_v52 = vadd.f32 %v1040_v48, %v1272_v34  ;;  %v629_v53 = vadd.f32 %v1072_v49, %v1272_v34 }
 0x100   :  { %893 = vst.msk [vmem:[%s1597_s3 + $0x1a8] sm:$0xff] %vm262_vm0, %v829_v45  ;;  %v834_v51 = vsel %vm706_vm5, %v626_v37, %v770_v43  ;;  %866 = vst.msk [vmem:[%s1597_s3 + $0xd0] sm:$0xff] %vm262_vm0, %v802_v50  ;;  %vm672_vm6 = vcmp.ge.f32.partialorder %v490_v46, 0.0  ;;  %v736_v54 = vmul.f32 0.01, %v490_v46  ;;  %vm704_vm7 = vcmp.ge.f32.partialorder %v618_v47, 0.0  ;;  %v492_v56 = vpop.f32.mrf.mxu0  ;;  %v620_v57 = vpop.f32.mrf.mxu1 }
 0x101   :  { %898 = vst.msk [vmem:[%s1597_s3 + $0x1d0] sm:$0xff] %vm262_vm0, %v834_v51  ;;  %v768_v55 = vmul.f32 0.01, %v618_v47  ;;  %vm675_vm8 = vcmp.ge.f32.partialorder %v501_v52, 0.0  ;;  %v739_v58 = vmul.f32 0.01, %v501_v52  ;;  %v493_v62 = vadd.f32 %v1272_v34, %v492_v56 }
 0x102   :  { %vm707_vm9 = vcmp.ge.f32.partialorder %v629_v53, 0.0  ;;  %v771_v59 = vmul.f32 0.01, %v629_v53  ;;  %v800_v60 = vsel %vm672_vm6, %v490_v46, %v736_v54  ;;  %v621_v63 = vadd.f32 %v1272_v34, %v620_v57  ;;  %v1043_v0 = vpop.f32.mrf.mxu0  ;;  %v1075_v1 = vpop.f32.mrf.mxu1 }
 0x103   :  { %v832_v61 = vsel %vm704_vm7, %v618_v47, %v768_v55  ;;  %864 = vst.msk [vmem:[%s1597_s3 + $0xc0] sm:$0xff] %vm262_vm0, %v800_v60  ;;  %v803_v2 = vsel %vm675_vm8, %v501_v52, %v739_v58  ;;  %v514_v4 = vadd.f32 %v1043_v0, %v1272_v34  ;;  %v642_v5 = vadd.f32 %v1075_v1, %v1272_v34 }
 0x104   :  { %896 = vst.msk [vmem:[%s1597_s3 + $0x1c0] sm:$0xff] %vm262_vm0, %v832_v61  ;;  %v835_v3 = vsel %vm707_vm9, %v629_v53, %v771_v59  ;;  %867 = vst.msk [vmem:[%s1597_s3 + $0xd8] sm:$0xff] %vm262_vm0, %v803_v2  ;;  %vm673_vm10 = vcmp.ge.f32.partialorder %v493_v62, 0.0  ;;  %v737_v6 = vmul.f32 0.01, %v493_v62  ;;  %vm705_vm11 = vcmp.ge.f32.partialorder %v621_v63, 0.0  ;;  %v505_v8 = vpop.f32.mrf.mxu0  ;;  %v633_v9 = vpop.f32.mrf.mxu1 }
 0x105   :  { %899 = vst.msk [vmem:[%s1597_s3 + $0x1d8] sm:$0xff] %vm262_vm0, %v835_v3  ;;  %v769_v7 = vmul.f32 0.01, %v621_v63  ;;  %vm678_vm12 = vcmp.ge.f32.partialorder %v514_v4, 0.0  ;;  %v742_v10 = vmul.f32 0.01, %v514_v4  ;;  %v506_v14 = vadd.f32 %v1272_v34, %v505_v8 }
 0x106   :  { %vm710_vm13 = vcmp.ge.f32.partialorder %v642_v5, 0.0  ;;  %v774_v11 = vmul.f32 0.01, %v642_v5  ;;  %v801_v12 = vsel %vm673_vm10, %v493_v62, %v737_v6  ;;  %v634_v15 = vadd.f32 %v1272_v34, %v633_v9  ;;  %v1044_v16 = vpop.f32.mrf.mxu0  ;;  %v1076_v17 = vpop.f32.mrf.mxu1 }
 0x107   :  { %v833_v13 = vsel %vm705_vm11, %v621_v63, %v769_v7  ;;  %865 = vst.msk [vmem:[%s1597_s3 + $0xc8] sm:$0xff] %vm262_vm0, %v801_v12  ;;  %v806_v18 = vsel %vm678_vm12, %v514_v4, %v742_v10  ;;  %v517_v20 = vadd.f32 %v1044_v16, %v1272_v34  ;;  %v645_v21 = vadd.f32 %v1076_v17, %v1272_v34 }
 0x108   :  { %897 = vst.msk [vmem:[%s1597_s3 + $0x1c8] sm:$0xff] %vm262_vm0, %v833_v13  ;;  %v838_v19 = vsel %vm710_vm13, %v642_v5, %v774_v11  ;;  %870 = vst.msk [vmem:[%s1597_s3 + $0xf0] sm:$0xff] %vm262_vm0, %v806_v18  ;;  %vm676_vm14 = vcmp.ge.f32.partialorder %v506_v14, 0.0  ;;  %v740_v22 = vmul.f32 0.01, %v506_v14  ;;  %vm708_vm15 = vcmp.ge.f32.partialorder %v634_v15, 0.0  ;;  %v508_v24 = vpop.f32.mrf.mxu0  ;;  %v636_v25 = vpop.f32.mrf.mxu1 }
 0x109   :  { %902 = vst.msk [vmem:[%s1597_s3 + $0x1f0] sm:$0xff] %vm262_vm0, %v838_v19  ;;  %v772_v23 = vmul.f32 0.01, %v634_v15  ;;  %vm679_vm1 = vcmp.ge.f32.partialorder %v517_v20, 0.0  ;;  %v743_v26 = vmul.f32 0.01, %v517_v20  ;;  %v509_v30 = vadd.f32 %v1272_v34, %v508_v24 }
 0x10a   :  { %vm711_vm2 = vcmp.ge.f32.partialorder %v645_v21, 0.0  ;;  %v775_v27 = vmul.f32 0.01, %v645_v21  ;;  %v804_v28 = vsel %vm676_vm14, %v506_v14, %v740_v22  ;;  %v637_v31 = vadd.f32 %v1272_v34, %v636_v25 }
 0x10b   :  { %v836_v29 = vsel %vm708_vm15, %v634_v15, %v772_v23  ;;  %868 = vst.msk [vmem:[%s1597_s3 + $0xe0] sm:$0xff] %vm262_vm0, %v804_v28  ;;  %v807_v32 = vsel %vm679_vm1, %v517_v20, %v743_v26  ;;  %vm677_vm3 = vcmp.ge.f32.partialorder %v509_v30, 0.0  ;;  %v741_v34 = vmul.f32 0.01, %v509_v30 }
 0x10c   :  { %900 = vst.msk [vmem:[%s1597_s3 + $0x1e0] sm:$0xff] %vm262_vm0, %v836_v29  ;;  %v839_v33 = vsel %vm711_vm2, %v645_v21, %v775_v27  ;;  %871 = vst.msk [vmem:[%s1597_s3 + $0xf8] sm:$0xff] %vm262_vm0, %v807_v32  ;;  %vm709_vm4 = vcmp.ge.f32.partialorder %v637_v31, 0.0  ;;  %v773_v35 = vmul.f32 0.01, %v637_v31 }
 0x10d   :  { %903 = vst.msk [vmem:[%s1597_s3 + $0x1f8] sm:$0xff] %vm262_vm0, %v839_v33  ;;  %v805_v36 = vsel %vm677_vm3, %v509_v30, %v741_v34 }
 0x10e   :  { %v837_v37 = vsel %vm709_vm4, %v637_v31, %v773_v35  ;;  %869 = vst.msk [vmem:[%s1597_s3 + $0xe8] sm:$0xff] %vm262_vm0, %v805_v36 }
 0x10f   :  { %901 = vst.msk [vmem:[%s1597_s3 + $0x1e8] sm:$0xff] %vm262_vm0, %v837_v37 }

</bundles_post_ra>
